<compile_context>
chip_gen: v5e
topology: v5e:2x2
jax: 0.10.0
libtpu: 0.0.40
codegen_flags: <defaults>
</compile_context>

<pallas_src>
import jax
import jax.numpy as jnp
from jax.experimental import pallas as pl
from jax.experimental.pallas import tpu as pltpu

# ----------------------- config (small, self-consistent) ---------------------
B        = 2                      # batch
IMG_C    = 1                      # raw fov channels (torch squeezes dim 3 -> must be 1)
H = W    = 16                     # fov spatial size
NUM_EMB  = 16                     # ENCODE_NUM_EMBEEDING
EMB_DIM  = 8                      # ENCODE_EMBEEDING_DIM == img_in_channels
KS       = 4                      # img_kernel_size == stride
E        = 32                     # config.embedding
P        = 16                     # config.qk_projection
HEADS    = 4                      # config.multi_heads
L1       = 64                     # config.transformer_block_layer1
N_BLOCKS = 2                      # config.transformer_blocks
T        = (H // KS) * (W // KS)  # config.img_tokens = 16
TRUNK    = 32                     # config.trunk_features
N_ACT    = 5                      # len(config.possible_actions)
EPS      = 1e-5                   # nn.LayerNorm default eps

DQK   = P // HEADS                # per-head qk dim
DV    = E // HEADS                # per-head v dim
CKK   = EMB_DIM * KS * KS         # flattened conv patch features = 128
KK_NE = KS * KS * NUM_EMB         # one-hot patch features        = 256

_VMEM = pl.BlockSpec(memory_space=pltpu.MemorySpace.VMEM)


def _layernorm(x, g, b):
    """nn.LayerNorm semantics: biased variance over the last dim."""
    m = jnp.mean(x, axis=-1, keepdims=True)
    v = jnp.mean(jnp.square(x - m), axis=-1, keepdims=True)
    return (x - m) * jax.lax.rsqrt(v + EPS) * g + b


# --------------------------- fused Pallas kernel ------------------------------
def _fused_forward_kernel(*refs):
    """Entire TransformerPolicy forward. refs = (inputs..., out, scratch...)."""
    *ins, o_ref, x_scr, flat_scr = refs
    onehot_ref, cur_ref, tgt_ref = ins[0], ins[1], ins[2]
    emb_bd_ref, conv_w_ref, conv_b_ref = ins[3], ins[4], ins[5]
    idx = 6
    blocks = []
    for _ in range(N_BLOCKS):
        blocks.append(ins[idx:idx + 13])
        idx += 13
    img_g, img_b = ins[idx:idx + 2]; idx += 2
    t1w, t1b, tl1g, tl1b, t2w, t2b, tl2g, tl2b = ins[idx:idx + 8]; idx += 8
    hw_cur, hw_tgt, hw_feat, hb1, hlng, hlnb, h2w, h2b = ins[idx:idx + 8]

    f32 = jnp.float32

    # --- token embedding (one_hot @ block-diag table) + conv patch embed -----
    # HIGHEST precision on this one tiny dot keeps the "gather" exact in f32;
    # every other matmul runs at default (bf16-pass) MXU precision.
    patches = jnp.dot(onehot_ref[...], emb_bd_ref[...],
                      precision=jax.lax.Precision.HIGHEST,
                      preferred_element_type=f32)                      # (B*T, CKK)
    x = jnp.dot(patches, conv_w_ref[...],
                preferred_element_type=f32) + conv_b_ref[...]          # (B*T, E)

    scale = 1.0 / (float(T) ** 0.5)            # torch divides scores by sqrt(T)

    # --------------------------- transformer blocks ---------------------------
    for bp in blocks:
        (ln0g, ln0b, wqkv, mlng, mlnb, w1, b1, l1g, l1b, w2, b2, l2g, l2b) = bp
        # attention runs on the LayerNorm'd input, residual uses the original
        xn = _layernorm(x, ln0g[...], ln0b[...])
        qkv = jnp.dot(xn, wqkv[...], preferred_element_type=f32)       # (B*T, 2P+E)
        q3 = qkv[:, :P].reshape(B, T, P)
        k3 = qkv[:, P:2 * P].reshape(B, T, P)
        v3 = qkv[:, 2 * P:].reshape(B, T, E)
        head_outs = []
        for h in range(HEADS):                 # static unroll, batched over B
            qh = q3[..., h * DQK:(h + 1) * DQK]
            kh = k3[..., h * DQK:(h + 1) * DQK]
            vh = v3[..., h * DV:(h + 1) * DV]
            att = jnp.einsum('bqd,bkd->bqk', qh, kh,
                             preferred_element_type=f32) * scale
            att = att - jnp.max(att, axis=-1, keepdims=True)
            pr = jnp.exp(att)
            pr = pr * pl.reciprocal(jnp.sum(pr, axis=-1, keepdims=True),
                                    approx=True)
            head_outs.append(
                jnp.einsum('bqk,bkd->bqd', pr, vh,
                           preferred_element_type=f32).reshape(B * T, DV))
        vatt = jnp.concatenate(head_outs, axis=-1)                     # (B*T, E)
        feat = x + vatt                                                # residual 1
        # mlp = [LN, Linear(E->L1), LN, ReLU, Linear(L1->E), LN]
        h1 = jnp.dot(_layernorm(feat, mlng[...], mlnb[...]), w1[...],
                     preferred_element_type=f32) + b1[...]
        h1 = jnp.maximum(_layernorm(h1, l1g[...], l1b[...]), 0.0)
        h2 = jnp.dot(h1, w2[...], preferred_element_type=f32) + b2[...]
        x = feat + _layernorm(h2, l2g[...], l2b[...])                  # residual 2

    # ----- flatten tokens (B*T, E) -> (B, T*E): relayout via VMEM scratch -----
    x_scr[...] = x
    for b in range(B):
        for t in range(T):
            flat_scr[b:b + 1, t * E:(t + 1) * E] = \
                x_scr[b * T + t:b * T + t + 1, :]
    flat = flat_scr[...]                                               # (B, T*E)

    # ------------------------------- trunk MLP --------------------------------
    z = _layernorm(flat, img_g[...], img_b[...])
    z = jnp.dot(z, t1w[...], preferred_element_type=f32) + t1b[...]
    z = jnp.maximum(_layernorm(z, tl1g[...], tl1b[...]), 0.0)
    z = jnp.dot(z, t2w[...], preferred_element_type=f32) + t2b[...]
    z = jnp.maximum(_layernorm(z, tl2g[...], tl2b[...]), 0.0)          # (B, TRUNK)

    # --------------------------------- head -----------------------------------
    # concat([cur, tgt, z], -1) @ W  ==  z @ W_feat + VPU broadcast-FMAs for the
    # 4 position columns (a K=2 matmul would waste a full MXU push/drain).
    cur = cur_ref[...]
    tgt = tgt_ref[...]
    hwc = hw_cur[...]
    hwt = hw_tgt[...]
    y = jnp.dot(z, hw_feat[...], preferred_element_type=f32) + hb1[...]
    y = y + cur[:, 0:1] * hwc[0:1, :] + cur[:, 1:2] * hwc[1:2, :]
    y = y + tgt[:, 0:1] * hwt[0:1, :] + tgt[:, 1:2] * hwt[1:2, :]
    y = jnp.maximum(_layernorm(y, hlng[...], hlnb[...]), 0.0)
    o_ref[...] = jnp.dot(y, h2w[...], preferred_element_type=f32) + h2b[...]


# ------------------------ host-side weight re-layout --------------------------
def pack_kernel_params(params):
    """Re-layout canonical params into MXU-friendly kernel operands (host, once)."""
    # block-diagonal embedding table: one_hot(pixel tokens) @ emb_bd = patches
    emb_bd = jnp.kron(jnp.eye(KS * KS, dtype=jnp.float32), params['emb_w'])  # (256,128)
    # conv weight permuted so flattened patch features are (pixel, channel)
    conv_w_pm = jnp.transpose(params['conv_w'], (2, 3, 1, 0)).reshape(CKK, E)
    flat = [emb_bd, conv_w_pm, params['conv_b'].reshape(1, E)]
    for bp in params['blocks']:
        (ln0g, ln0b, wq, wk, wv, mlng, mlnb, w1, b1, l1g, l1b, w2, b2, l2g, l2b) = bp
        wqkv = jnp.concatenate([wq, wk, wv], axis=1)                   # (E, 2P+E)
        flat.extend((ln0g, ln0b, wqkv, mlng, mlnb, w1, b1, l1g, l1b,
                     w2, b2, l2g, l2b))
    flat.extend(params['img_ln'])
    flat.extend(params['trunk'])
    flat.extend(params['head'])
    return flat


def transformer_policy_forward(kernel_params, fov, cur, tgt):
    # TODO(synk): the int-token -> one-hot expansion stays as tiny host-side
    # glue; inside the kernel the nn.Embedding lookup is a one_hot @ table
    # matmul so no gather / f32 transposes are needed.
    tok = fov.astype(jnp.int32)[:, 0]                                  # (B, H, W)
    hp, wp = H // KS, W // KS
    tok = tok.reshape(B, hp, KS, wp, KS).transpose(0, 1, 3, 2, 4)      # (B,hp,wp,k,k)
    tok = tok.reshape(B * T, KS * KS)
    onehot = jax.nn.one_hot(tok, NUM_EMB, dtype=jnp.float32).reshape(B * T, KK_NE)

    args = [onehot, cur, tgt] + list(kernel_params)
    return pl.pallas_call(
        _fused_forward_kernel,
        out_shape=jax.ShapeDtypeStruct((B, N_ACT), jnp.float32),
        in_specs=[_VMEM] * len(args),
        out_specs=_VMEM,
        scratch_shapes=[pltpu.VMEM((B * T, E), jnp.float32),
                        pltpu.VMEM((B, T * E), jnp.float32)],
    )(*args)


# ------------------------- plain-JAX reference --------------------------------
def _block_ref(x, bp):
    ln0g, ln0b, wq, wk, wv, mlng, mlnb, w1, b1, ln1g, ln1b, w2, b2, ln2g, ln2b = bp
    xn = _layernorm(x, ln0g, ln0b)
    q, k, v = xn @ wq, xn @ wk, xn @ wv
    Bq, Tq, _ = q.shape
    qh = q.reshape(Bq, Tq, HEADS, -1).transpose(0, 2, 1, 3)
    kh = k.reshape(Bq, Tq, HEADS, -1).transpose(0, 2, 3, 1)
    att = jax.nn.softmax((qh @ kh) / jnp.sqrt(jnp.float32(Tq)), axis=-1)
    vh = v.reshape(Bq, Tq, HEADS, -1).transpose(0, 2, 1, 3)
    vatt = (att @ vh).transpose(0, 2, 1, 3).reshape(Bq, Tq, -1)
    feat = x + vatt
    h = _layernorm(feat, mlng, mlnb) @ w1 + b1
    h = jnp.maximum(_layernorm(h, ln1g, ln1b), 0.0) @ w2 + b2
    return feat + _layernorm(h, ln2g, ln2b)


def reference_forward(params, fov, cur, tgt):
    tok = jnp.transpose(fov, (0, 2, 3, 1)).astype(jnp.int32)
    emb = jnp.squeeze(params['emb_w'][tok], axis=3)
    emb = jnp.transpose(emb, (0, 3, 1, 2))
    conv = jax.lax.conv_general_dilated(emb, params['conv_w'], (KS, KS), 'VALID',
                                        dimension_numbers=('NCHW', 'OIHW', 'NCHW'))
    conv = conv + params['conv_b'][None, :, None, None]
    x = jnp.transpose(conv.reshape(B, E, -1), (0, 2, 1))
    for bp in params['blocks']:
        x = _block_ref(x, bp)
    feat = x.reshape(B, T * E)
    img_g, img_b = params['img_ln']
    feat = _layernorm(feat, img_g, img_b)
    t1w, t1b, ln1g, ln1b, t2w, t2b, ln2g, ln2b = params['trunk']
    feat = jnp.maximum(_layernorm(feat @ t1w + t1b, ln1g, ln1b), 0.0)
    feat = jnp.maximum(_layernorm(feat @ t2w + t2b, ln2g, ln2b), 0.0)
    hw_cur, hw_tgt, hw_feat, hb1, hlng, hlnb, h2w, h2b = params['head']
    h1w = jnp.concatenate([hw_cur, hw_tgt, hw_feat], axis=0)
    z = jnp.concatenate([cur, tgt, feat], axis=-1) @ h1w + hb1
    z = jnp.maximum(_layernorm(z, hlng, hlnb), 0.0)
    return z @ h2w + h2b


# ------------------------- deterministic parameters ----------------------------
def init_params(key):
    keys = iter(jax.random.split(key, 64))
    nk = lambda: next(keys)

    def kaiming(in_out):                     # stored (in, out) for x @ W
        bound = (6.0 / in_out[0]) ** 0.5
        return jax.random.uniform(nk(), in_out, jnp.float32, -bound, bound)

    def bias(fan_in, dim):
        bound = 1.0 / (fan_in ** 0.5)
        return jax.random.uniform(nk(), (1, dim), jnp.float32, -bound, bound)

    ones = lambda d: jnp.ones((1, d), jnp.float32)
    zeros = lambda d: jnp.zeros((1, d), jnp.float32)

    # nn.Embedding(max_norm=1.0): renorm rows to ||row|| <= 1 (lookup-equivalent)
    emb_w = jax.random.normal(nk(), (NUM_EMB, EMB_DIM), jnp.float32)
    norms = jnp.linalg.norm(emb_w, axis=-1, keepdims=True)
    emb_w = emb_w * jnp.minimum(1.0, 1.0 / (norms + 1e-7))

    cdk = EMB_DIM * KS * KS
    conv_w = jnp.transpose(kaiming((cdk, E))).reshape(E, EMB_DIM, KS, KS)   # OIHW
    conv_b = jax.random.uniform(nk(), (E,), jnp.float32,
                                -1.0 / cdk ** 0.5, 1.0 / cdk ** 0.5)

    blocks = []
    for _ in range(N_BLOCKS):
        wq = jax.random.uniform(nk(), (E, P), jnp.float32, 0.0, 1.0)
        wk = jax.random.uniform(nk(), (E, P), jnp.float32, 0.0, 1.0)
        wv = jax.random.uniform(nk(), (E, E), jnp.float32, 0.0, 1.0)
        w1, b1 = kaiming((E, L1)), bias(E, L1)
        w2, b2 = kaiming((L1, E)), bias(L1, E)
        blocks.append((ones(E), zeros(E), wq, wk, wv,
                       ones(E), zeros(E), w1, b1, ones(L1), zeros(L1),
                       w2, b2, ones(E), zeros(E)))

    img_ln = (ones(T * E), zeros(T * E))
    trunk = (kaiming((T * E, 2 * TRUNK)), bias(T * E, 2 * TRUNK),
             ones(2 * TRUNK), zeros(2 * TRUNK),
             kaiming((2 * TRUNK, TRUNK)), bias(2 * TRUNK, TRUNK),
             ones(TRUNK), zeros(TRUNK))
    h1w = kaiming((TRUNK + 4, TRUNK))
    head = (h1w[:2], h1w[2:4], h1w[4:], bias(TRUNK + 4, TRUNK),
            ones(TRUNK), zeros(TRUNK),
            kaiming((TRUNK, N_ACT)), bias(TRUNK, N_ACT))

    return {'emb_w': emb_w, 'conv_w': conv_w, 'conv_b': conv_b,
            'blocks': blocks, 'img_ln': img_ln, 'trunk': trunk, 'head': head}


# ------------------------------------ main -------------------------------------
if __name__ == "__main__":
    root = jax.random.PRNGKey(0)
    kp, kf, kc, kt = jax.random.split(root, 4)
    params = init_params(kp)
    kernel_params = pack_kernel_params(params)

    fov = jax.random.randint(kf, (B, IMG_C, H, W), 0, NUM_EMB).astype(jnp.float32)
    cur = jax.random.uniform(kc, (B, 2), jnp.float32)
    tgt = jax.random.uniform(kt, (B, 2), jnp.float32)

    fwd = jax.jit(transformer_policy_forward)
    logits = jax.block_until_ready(fwd(kernel_params, fov, cur, tgt))

    ref = reference_forward(params, fov, cur, tgt)
    assert logits.shape == (B, N_ACT)
    diff = float(jnp.max(jnp.abs(logits - ref)))
    # default (bf16-pass) MXU precision in both kernel and reference; rounding
    # structure matches, so the residual difference is small.
    assert diff < 2e-2, f"mismatch, max abs diff = {diff}"
    print("KERNEL_OK")
</pallas_src>

<mosaic_0001>
module attributes {stable_mosaic.version = 11 : i64} {
  func.func @_fused_forward_kernel(%arg0: memref<32x256xf32, #tpu.memory_space<vmem>>, %arg1: memref<2x2xf32, #tpu.memory_space<vmem>>, %arg2: memref<2x2xf32, #tpu.memory_space<vmem>>, %arg3: memref<256x128xf32, #tpu.memory_space<vmem>>, %arg4: memref<128x32xf32, #tpu.memory_space<vmem>>, %arg5: memref<1x32xf32, #tpu.memory_space<vmem>>, %arg6: memref<1x32xf32, #tpu.memory_space<vmem>>, %arg7: memref<1x32xf32, #tpu.memory_space<vmem>>, %arg8: memref<32x64xf32, #tpu.memory_space<vmem>>, %arg9: memref<1x32xf32, #tpu.memory_space<vmem>>, %arg10: memref<1x32xf32, #tpu.memory_space<vmem>>, %arg11: memref<32x64xf32, #tpu.memory_space<vmem>>, %arg12: memref<1x64xf32, #tpu.memory_space<vmem>>, %arg13: memref<1x64xf32, #tpu.memory_space<vmem>>, %arg14: memref<1x64xf32, #tpu.memory_space<vmem>>, %arg15: memref<64x32xf32, #tpu.memory_space<vmem>>, %arg16: memref<1x32xf32, #tpu.memory_space<vmem>>, %arg17: memref<1x32xf32, #tpu.memory_space<vmem>>, %arg18: memref<1x32xf32, #tpu.memory_space<vmem>>, %arg19: memref<1x32xf32, #tpu.memory_space<vmem>>, %arg20: memref<1x32xf32, #tpu.memory_space<vmem>>, %arg21: memref<32x64xf32, #tpu.memory_space<vmem>>, %arg22: memref<1x32xf32, #tpu.memory_space<vmem>>, %arg23: memref<1x32xf32, #tpu.memory_space<vmem>>, %arg24: memref<32x64xf32, #tpu.memory_space<vmem>>, %arg25: memref<1x64xf32, #tpu.memory_space<vmem>>, %arg26: memref<1x64xf32, #tpu.memory_space<vmem>>, %arg27: memref<1x64xf32, #tpu.memory_space<vmem>>, %arg28: memref<64x32xf32, #tpu.memory_space<vmem>>, %arg29: memref<1x32xf32, #tpu.memory_space<vmem>>, %arg30: memref<1x32xf32, #tpu.memory_space<vmem>>, %arg31: memref<1x32xf32, #tpu.memory_space<vmem>>, %arg32: memref<1x512xf32, #tpu.memory_space<vmem>>, %arg33: memref<1x512xf32, #tpu.memory_space<vmem>>, %arg34: memref<512x64xf32, #tpu.memory_space<vmem>>, %arg35: memref<1x64xf32, #tpu.memory_space<vmem>>, %arg36: memref<1x64xf32, #tpu.memory_space<vmem>>, %arg37: memref<1x64xf32, #tpu.memory_space<vmem>>, %arg38: memref<64x32xf32, #tpu.memory_space<vmem>>, %arg39: memref<1x32xf32, #tpu.memory_space<vmem>>, %arg40: memref<1x32xf32, #tpu.memory_space<vmem>>, %arg41: memref<1x32xf32, #tpu.memory_space<vmem>>, %arg42: memref<2x32xf32, #tpu.memory_space<vmem>>, %arg43: memref<2x32xf32, #tpu.memory_space<vmem>>, %arg44: memref<32x32xf32, #tpu.memory_space<vmem>>, %arg45: memref<1x32xf32, #tpu.memory_space<vmem>>, %arg46: memref<1x32xf32, #tpu.memory_space<vmem>>, %arg47: memref<1x32xf32, #tpu.memory_space<vmem>>, %arg48: memref<32x5xf32, #tpu.memory_space<vmem>>, %arg49: memref<1x5xf32, #tpu.memory_space<vmem>>, %arg50: memref<2x5xf32, #tpu.memory_space<vmem>>, %arg51: memref<32x32xf32, #tpu.memory_space<vmem>>, %arg52: memref<2x512xf32, #tpu.memory_space<vmem>>) attributes {dimension_semantics = [], scalar_prefetch = 0 : i64, scratch_operands = 2 : i64, tpu.core_type = #tpu.core_type<tc>} {
    %c0 = arith.constant 0 : index
    %c0_0 = arith.constant 0 : index
    %0 = vector.load %arg0[%c0, %c0_0] : memref<32x256xf32, #tpu.memory_space<vmem>>, vector<32x256xf32>
    %c0_1 = arith.constant 0 : index
    %c0_2 = arith.constant 0 : index
    %1 = vector.load %arg3[%c0_1, %c0_2] : memref<256x128xf32, #tpu.memory_space<vmem>>, vector<256x128xf32>
    %cst = arith.constant dense<0.000000e+00> : vector<32x128xf32>
    %2 = tpu.matmul %0, %1, %cst {dimension_numbers = #tpu.dot_dimension_numbers<[1], [0], [0], [1], [0, 0, 1, 1], [], []>, precision = #tpu.contract_precision<fp32>} : vector<32x256xf32>, vector<256x128xf32>, vector<32x128xf32> -> vector<32x128xf32>
    %c0_3 = arith.constant 0 : index
    %c0_4 = arith.constant 0 : index
    %3 = vector.load %arg4[%c0_3, %c0_4] : memref<128x32xf32, #tpu.memory_space<vmem>>, vector<128x32xf32>
    %cst_5 = arith.constant dense<0.000000e+00> : vector<32x32xf32>
    %4 = tpu.matmul %2, %3, %cst_5 {dimension_numbers = #tpu.dot_dimension_numbers<[1], [0], [0], [1], [0, 0, 1, 1], [], []>} : vector<32x128xf32>, vector<128x32xf32>, vector<32x32xf32> -> vector<32x32xf32>
    %c0_6 = arith.constant 0 : index
    %c0_7 = arith.constant 0 : index
    %5 = vector.load %arg5[%c0_6, %c0_7] : memref<1x32xf32, #tpu.memory_space<vmem>>, vector<1x32xf32>
    %6 = vector.broadcast %5 : vector<1x32xf32> to vector<32x32xf32>
    %7 = arith.addf %4, %6 : vector<32x32xf32>
    %c0_8 = arith.constant 0 : index
    %c0_9 = arith.constant 0 : index
    %8 = vector.load %arg6[%c0_8, %c0_9] : memref<1x32xf32, #tpu.memory_space<vmem>>, vector<1x32xf32>
    %c0_10 = arith.constant 0 : index
    %c0_11 = arith.constant 0 : index
    %9 = vector.load %arg7[%c0_10, %c0_11] : memref<1x32xf32, #tpu.memory_space<vmem>>, vector<1x32xf32>
    %cst_12 = arith.constant dense<0.000000e+00> : vector<32xf32>
    %10 = vector.multi_reduction <add>, %7, %cst_12 [1] : vector<32x32xf32> to vector<32xf32>
    %11 = vector.shape_cast %10 : vector<32xf32> to vector<32x1xf32>
    %cst_13 = arith.constant 3.200000e+01 : f32
    %12 = vector.broadcast %cst_13 : f32 to vector<32x1xf32>
    %13 = arith.divf %11, %12 : vector<32x1xf32>
    %14 = vector.broadcast %13 : vector<32x1xf32> to vector<32x32xf32>
    %15 = arith.subf %7, %14 : vector<32x32xf32>
    %16 = arith.mulf %15, %15 : vector<32x32xf32>
    %cst_14 = arith.constant dense<0.000000e+00> : vector<32xf32>
    %17 = vector.multi_reduction <add>, %16, %cst_14 [1] : vector<32x32xf32> to vector<32xf32>
    %18 = vector.shape_cast %17 : vector<32xf32> to vector<32x1xf32>
    %cst_15 = arith.constant 3.200000e+01 : f32
    %19 = vector.broadcast %cst_15 : f32 to vector<32x1xf32>
    %20 = arith.divf %18, %19 : vector<32x1xf32>
    %21 = vector.broadcast %13 : vector<32x1xf32> to vector<32x32xf32>
    %22 = arith.subf %7, %21 : vector<32x32xf32>
    %cst_16 = arith.constant 9.99999974E-6 : f32
    %23 = vector.broadcast %cst_16 : f32 to vector<32x1xf32>
    %24 = arith.addf %20, %23 : vector<32x1xf32>
    %25 = math.rsqrt %24 : vector<32x1xf32>
    %26 = vector.broadcast %25 : vector<32x1xf32> to vector<32x32xf32>
    %27 = arith.mulf %22, %26 : vector<32x32xf32>
    %28 = vector.broadcast %8 : vector<1x32xf32> to vector<32x32xf32>
    %29 = arith.mulf %27, %28 : vector<32x32xf32>
    %30 = vector.broadcast %9 : vector<1x32xf32> to vector<32x32xf32>
    %31 = arith.addf %29, %30 : vector<32x32xf32>
    %c0_17 = arith.constant 0 : index
    %c0_18 = arith.constant 0 : index
    %32 = vector.load %arg8[%c0_17, %c0_18] : memref<32x64xf32, #tpu.memory_space<vmem>>, vector<32x64xf32>
    %cst_19 = arith.constant dense<0.000000e+00> : vector<32x64xf32>
    %33 = tpu.matmul %31, %32, %cst_19 {dimension_numbers = #tpu.dot_dimension_numbers<[1], [0], [0], [1], [0, 0, 1, 1], [], []>} : vector<32x32xf32>, vector<32x64xf32>, vector<32x64xf32> -> vector<32x64xf32>
    %34 = vector.extract_strided_slice %33 {offsets = [0, 0], sizes = [32, 16], strides = [1, 1]} : vector<32x64xf32> to vector<32x16xf32>
    %35 = vector.shape_cast %34 : vector<32x16xf32> to vector<2x16x16xf32>
    %36 = vector.extract_strided_slice %33 {offsets = [0, 16], sizes = [32, 16], strides = [1, 1]} : vector<32x64xf32> to vector<32x16xf32>
    %37 = vector.shape_cast %36 : vector<32x16xf32> to vector<2x16x16xf32>
    %38 = vector.extract_strided_slice %33 {offsets = [0, 32], sizes = [32, 32], strides = [1, 1]} : vector<32x64xf32> to vector<32x32xf32>
    %39 = vector.shape_cast %38 : vector<32x32xf32> to vector<2x16x32xf32>
    %40 = vector.extract_strided_slice %35 {offsets = [0, 0, 0], sizes = [2, 16, 4], strides = [1, 1, 1]} : vector<2x16x16xf32> to vector<2x16x4xf32>
    %41 = vector.extract_strided_slice %37 {offsets = [0, 0, 0], sizes = [2, 16, 4], strides = [1, 1, 1]} : vector<2x16x16xf32> to vector<2x16x4xf32>
    %42 = vector.extract_strided_slice %39 {offsets = [0, 0, 0], sizes = [2, 16, 8], strides = [1, 1, 1]} : vector<2x16x32xf32> to vector<2x16x8xf32>
    "tpu.trace_start"() <{level = 10 : i32, message = "bqd,bkd->bqk"}> : () -> ()
    %cst_20 = arith.constant dense<0.000000e+00> : vector<2x16x16xf32>
    %43 = tpu.matmul %40, %41, %cst_20 {dimension_numbers = #tpu.dot_dimension_numbers<[2], [2], [1], [1], [0, 0, 0, 1, 1, 1], [0], [0]>} : vector<2x16x4xf32>, vector<2x16x4xf32>, vector<2x16x16xf32> -> vector<2x16x16xf32>
    "tpu.trace_stop"() : () -> ()
    %cst_21 = arith.constant 2.500000e-01 : f32
    %44 = vector.broadcast %cst_21 : f32 to vector<2x16x16xf32>
    %45 = arith.mulf %43, %44 : vector<2x16x16xf32>
    %cst_22 = arith.constant dense<0xFF800000> : vector<2x16xf32>
    %46 = vector.multi_reduction <maximumf>, %45, %cst_22 [2] : vector<2x16x16xf32> to vector<2x16xf32>
    %47 = vector.shape_cast %46 : vector<2x16xf32> to vector<2x16x1xf32>
    %48 = vector.broadcast %47 : vector<2x16x1xf32> to vector<2x16x16xf32>
    %49 = arith.subf %45, %48 : vector<2x16x16xf32>
    %50 = math.exp %49 : vector<2x16x16xf32>
    %cst_23 = arith.constant dense<0.000000e+00> : vector<2x16xf32>
    %51 = vector.multi_reduction <add>, %50, %cst_23 [2] : vector<2x16x16xf32> to vector<2x16xf32>
    %52 = vector.shape_cast %51 : vector<2x16xf32> to vector<2x16x1xf32>
    %53 = tpu.reciprocal %52 {approx = true} : vector<2x16x1xf32> -> vector<2x16x1xf32>
    %54 = vector.broadcast %53 : vector<2x16x1xf32> to vector<2x16x16xf32>
    %55 = arith.mulf %50, %54 : vector<2x16x16xf32>
    "tpu.trace_start"() <{level = 10 : i32, message = "bqk,bkd->bqd"}> : () -> ()
    %cst_24 = arith.constant dense<0.000000e+00> : vector<2x16x8xf32>
    %56 = tpu.matmul %55, %42, %cst_24 {dimension_numbers = #tpu.dot_dimension_numbers<[2], [1], [1], [2], [0, 0, 0, 1, 1, 2], [0], [0]>} : vector<2x16x16xf32>, vector<2x16x8xf32>, vector<2x16x8xf32> -> vector<2x16x8xf32>
    "tpu.trace_stop"() : () -> ()
    %57 = vector.shape_cast %56 : vector<2x16x8xf32> to vector<32x8xf32>
    %58 = vector.extract_strided_slice %35 {offsets = [0, 0, 4], sizes = [2, 16, 4], strides = [1, 1, 1]} : vector<2x16x16xf32> to vector<2x16x4xf32>
    %59 = vector.extract_strided_slice %37 {offsets = [0, 0, 4], sizes = [2, 16, 4], strides = [1, 1, 1]} : vector<2x16x16xf32> to vector<2x16x4xf32>
    %60 = vector.extract_strided_slice %39 {offsets = [0, 0, 8], sizes = [2, 16, 8], strides = [1, 1, 1]} : vector<2x16x32xf32> to vector<2x16x8xf32>
    "tpu.trace_start"() <{level = 10 : i32, message = "bqd,bkd->bqk"}> : () -> ()
    %cst_25 = arith.constant dense<0.000000e+00> : vector<2x16x16xf32>
    %61 = tpu.matmul %58, %59, %cst_25 {dimension_numbers = #tpu.dot_dimension_numbers<[2], [2], [1], [1], [0, 0, 0, 1, 1, 1], [0], [0]>} : vector<2x16x4xf32>, vector<2x16x4xf32>, vector<2x16x16xf32> -> vector<2x16x16xf32>
    "tpu.trace_stop"() : () -> ()
    %cst_26 = arith.constant 2.500000e-01 : f32
    %62 = vector.broadcast %cst_26 : f32 to vector<2x16x16xf32>
    %63 = arith.mulf %61, %62 : vector<2x16x16xf32>
    %cst_27 = arith.constant dense<0xFF800000> : vector<2x16xf32>
    %64 = vector.multi_reduction <maximumf>, %63, %cst_27 [2] : vector<2x16x16xf32> to vector<2x16xf32>
    %65 = vector.shape_cast %64 : vector<2x16xf32> to vector<2x16x1xf32>
    %66 = vector.broadcast %65 : vector<2x16x1xf32> to vector<2x16x16xf32>
    %67 = arith.subf %63, %66 : vector<2x16x16xf32>
    %68 = math.exp %67 : vector<2x16x16xf32>
    %cst_28 = arith.constant dense<0.000000e+00> : vector<2x16xf32>
    %69 = vector.multi_reduction <add>, %68, %cst_28 [2] : vector<2x16x16xf32> to vector<2x16xf32>
    %70 = vector.shape_cast %69 : vector<2x16xf32> to vector<2x16x1xf32>
    %71 = tpu.reciprocal %70 {approx = true} : vector<2x16x1xf32> -> vector<2x16x1xf32>
    %72 = vector.broadcast %71 : vector<2x16x1xf32> to vector<2x16x16xf32>
    %73 = arith.mulf %68, %72 : vector<2x16x16xf32>
    "tpu.trace_start"() <{level = 10 : i32, message = "bqk,bkd->bqd"}> : () -> ()
    %cst_29 = arith.constant dense<0.000000e+00> : vector<2x16x8xf32>
    %74 = tpu.matmul %73, %60, %cst_29 {dimension_numbers = #tpu.dot_dimension_numbers<[2], [1], [1], [2], [0, 0, 0, 1, 1, 2], [0], [0]>} : vector<2x16x16xf32>, vector<2x16x8xf32>, vector<2x16x8xf32> -> vector<2x16x8xf32>
    "tpu.trace_stop"() : () -> ()
    %75 = vector.shape_cast %74 : vector<2x16x8xf32> to vector<32x8xf32>
    %76 = vector.extract_strided_slice %35 {offsets = [0, 0, 8], sizes = [2, 16, 4], strides = [1, 1, 1]} : vector<2x16x16xf32> to vector<2x16x4xf32>
    %77 = vector.extract_strided_slice %37 {offsets = [0, 0, 8], sizes = [2, 16, 4], strides = [1, 1, 1]} : vector<2x16x16xf32> to vector<2x16x4xf32>
    %78 = vector.extract_strided_slice %39 {offsets = [0, 0, 16], sizes = [2, 16, 8], strides = [1, 1, 1]} : vector<2x16x32xf32> to vector<2x16x8xf32>
    "tpu.trace_start"() <{level = 10 : i32, message = "bqd,bkd->bqk"}> : () -> ()
    %cst_30 = arith.constant dense<0.000000e+00> : vector<2x16x16xf32>
    %79 = tpu.matmul %76, %77, %cst_30 {dimension_numbers = #tpu.dot_dimension_numbers<[2], [2], [1], [1], [0, 0, 0, 1, 1, 1], [0], [0]>} : vector<2x16x4xf32>, vector<2x16x4xf32>, vector<2x16x16xf32> -> vector<2x16x16xf32>
    "tpu.trace_stop"() : () -> ()
    %cst_31 = arith.constant 2.500000e-01 : f32
    %80 = vector.broadcast %cst_31 : f32 to vector<2x16x16xf32>
    %81 = arith.mulf %79, %80 : vector<2x16x16xf32>
    %cst_32 = arith.constant dense<0xFF800000> : vector<2x16xf32>
    %82 = vector.multi_reduction <maximumf>, %81, %cst_32 [2] : vector<2x16x16xf32> to vector<2x16xf32>
    %83 = vector.shape_cast %82 : vector<2x16xf32> to vector<2x16x1xf32>
    %84 = vector.broadcast %83 : vector<2x16x1xf32> to vector<2x16x16xf32>
    %85 = arith.subf %81, %84 : vector<2x16x16xf32>
    %86 = math.exp %85 : vector<2x16x16xf32>
    %cst_33 = arith.constant dense<0.000000e+00> : vector<2x16xf32>
    %87 = vector.multi_reduction <add>, %86, %cst_33 [2] : vector<2x16x16xf32> to vector<2x16xf32>
    %88 = vector.shape_cast %87 : vector<2x16xf32> to vector<2x16x1xf32>
    %89 = tpu.reciprocal %88 {approx = true} : vector<2x16x1xf32> -> vector<2x16x1xf32>
    %90 = vector.broadcast %89 : vector<2x16x1xf32> to vector<2x16x16xf32>
    %91 = arith.mulf %86, %90 : vector<2x16x16xf32>
    "tpu.trace_start"() <{level = 10 : i32, message = "bqk,bkd->bqd"}> : () -> ()
    %cst_34 = arith.constant dense<0.000000e+00> : vector<2x16x8xf32>
    %92 = tpu.matmul %91, %78, %cst_34 {dimension_numbers = #tpu.dot_dimension_numbers<[2], [1], [1], [2], [0, 0, 0, 1, 1, 2], [0], [0]>} : vector<2x16x16xf32>, vector<2x16x8xf32>, vector<2x16x8xf32> -> vector<2x16x8xf32>
    "tpu.trace_stop"() : () -> ()
    %93 = vector.shape_cast %92 : vector<2x16x8xf32> to vector<32x8xf32>
    %94 = vector.extract_strided_slice %35 {offsets = [0, 0, 12], sizes = [2, 16, 4], strides = [1, 1, 1]} : vector<2x16x16xf32> to vector<2x16x4xf32>
    %95 = vector.extract_strided_slice %37 {offsets = [0, 0, 12], sizes = [2, 16, 4], strides = [1, 1, 1]} : vector<2x16x16xf32> to vector<2x16x4xf32>
    %96 = vector.extract_strided_slice %39 {offsets = [0, 0, 24], sizes = [2, 16, 8], strides = [1, 1, 1]} : vector<2x16x32xf32> to vector<2x16x8xf32>
    "tpu.trace_start"() <{level = 10 : i32, message = "bqd,bkd->bqk"}> : () -> ()
    %cst_35 = arith.constant dense<0.000000e+00> : vector<2x16x16xf32>
    %97 = tpu.matmul %94, %95, %cst_35 {dimension_numbers = #tpu.dot_dimension_numbers<[2], [2], [1], [1], [0, 0, 0, 1, 1, 1], [0], [0]>} : vector<2x16x4xf32>, vector<2x16x4xf32>, vector<2x16x16xf32> -> vector<2x16x16xf32>
    "tpu.trace_stop"() : () -> ()
    %cst_36 = arith.constant 2.500000e-01 : f32
    %98 = vector.broadcast %cst_36 : f32 to vector<2x16x16xf32>
    %99 = arith.mulf %97, %98 : vector<2x16x16xf32>
    %cst_37 = arith.constant dense<0xFF800000> : vector<2x16xf32>
    %100 = vector.multi_reduction <maximumf>, %99, %cst_37 [2] : vector<2x16x16xf32> to vector<2x16xf32>
    %101 = vector.shape_cast %100 : vector<2x16xf32> to vector<2x16x1xf32>
    %102 = vector.broadcast %101 : vector<2x16x1xf32> to vector<2x16x16xf32>
    %103 = arith.subf %99, %102 : vector<2x16x16xf32>
    %104 = math.exp %103 : vector<2x16x16xf32>
    %cst_38 = arith.constant dense<0.000000e+00> : vector<2x16xf32>
    %105 = vector.multi_reduction <add>, %104, %cst_38 [2] : vector<2x16x16xf32> to vector<2x16xf32>
    %106 = vector.shape_cast %105 : vector<2x16xf32> to vector<2x16x1xf32>
    %107 = tpu.reciprocal %106 {approx = true} : vector<2x16x1xf32> -> vector<2x16x1xf32>
    %108 = vector.broadcast %107 : vector<2x16x1xf32> to vector<2x16x16xf32>
    %109 = arith.mulf %104, %108 : vector<2x16x16xf32>
    "tpu.trace_start"() <{level = 10 : i32, message = "bqk,bkd->bqd"}> : () -> ()
    %cst_39 = arith.constant dense<0.000000e+00> : vector<2x16x8xf32>
    %110 = tpu.matmul %109, %96, %cst_39 {dimension_numbers = #tpu.dot_dimension_numbers<[2], [1], [1], [2], [0, 0, 0, 1, 1, 2], [0], [0]>} : vector<2x16x16xf32>, vector<2x16x8xf32>, vector<2x16x8xf32> -> vector<2x16x8xf32>
    "tpu.trace_stop"() : () -> ()
    %111 = vector.shape_cast %110 : vector<2x16x8xf32> to vector<32x8xf32>
    %112 = tpu.concatenate %57, %75, %93, %111 in 1 : vector<32x8xf32>, vector<32x8xf32>, vector<32x8xf32>, vector<32x8xf32> -> vector<32x32xf32>
    %113 = arith.addf %7, %112 : vector<32x32xf32>
    %c0_40 = arith.constant 0 : index
    %c0_41 = arith.constant 0 : index
    %114 = vector.load %arg9[%c0_40, %c0_41] : memref<1x32xf32, #tpu.memory_space<vmem>>, vector<1x32xf32>
    %c0_42 = arith.constant 0 : index
    %c0_43 = arith.constant 0 : index
    %115 = vector.load %arg10[%c0_42, %c0_43] : memref<1x32xf32, #tpu.memory_space<vmem>>, vector<1x32xf32>
    %cst_44 = arith.constant dense<0.000000e+00> : vector<32xf32>
    %116 = vector.multi_reduction <add>, %113, %cst_44 [1] : vector<32x32xf32> to vector<32xf32>
    %117 = vector.shape_cast %116 : vector<32xf32> to vector<32x1xf32>
    %cst_45 = arith.constant 3.200000e+01 : f32
    %118 = vector.broadcast %cst_45 : f32 to vector<32x1xf32>
    %119 = arith.divf %117, %118 : vector<32x1xf32>
    %120 = vector.broadcast %119 : vector<32x1xf32> to vector<32x32xf32>
    %121 = arith.subf %113, %120 : vector<32x32xf32>
    %122 = arith.mulf %121, %121 : vector<32x32xf32>
    %cst_46 = arith.constant dense<0.000000e+00> : vector<32xf32>
    %123 = vector.multi_reduction <add>, %122, %cst_46 [1] : vector<32x32xf32> to vector<32xf32>
    %124 = vector.shape_cast %123 : vector<32xf32> to vector<32x1xf32>
    %cst_47 = arith.constant 3.200000e+01 : f32
    %125 = vector.broadcast %cst_47 : f32 to vector<32x1xf32>
    %126 = arith.divf %124, %125 : vector<32x1xf32>
    %127 = vector.broadcast %119 : vector<32x1xf32> to vector<32x32xf32>
    %128 = arith.subf %113, %127 : vector<32x32xf32>
    %cst_48 = arith.constant 9.99999974E-6 : f32
    %129 = vector.broadcast %cst_48 : f32 to vector<32x1xf32>
    %130 = arith.addf %126, %129 : vector<32x1xf32>
    %131 = math.rsqrt %130 : vector<32x1xf32>
    %132 = vector.broadcast %131 : vector<32x1xf32> to vector<32x32xf32>
    %133 = arith.mulf %128, %132 : vector<32x32xf32>
    %134 = vector.broadcast %114 : vector<1x32xf32> to vector<32x32xf32>
    %135 = arith.mulf %133, %134 : vector<32x32xf32>
    %136 = vector.broadcast %115 : vector<1x32xf32> to vector<32x32xf32>
    %137 = arith.addf %135, %136 : vector<32x32xf32>
    %c0_49 = arith.constant 0 : index
    %c0_50 = arith.constant 0 : index
    %138 = vector.load %arg11[%c0_49, %c0_50] : memref<32x64xf32, #tpu.memory_space<vmem>>, vector<32x64xf32>
    %cst_51 = arith.constant dense<0.000000e+00> : vector<32x64xf32>
    %139 = tpu.matmul %137, %138, %cst_51 {dimension_numbers = #tpu.dot_dimension_numbers<[1], [0], [0], [1], [0, 0, 1, 1], [], []>} : vector<32x32xf32>, vector<32x64xf32>, vector<32x64xf32> -> vector<32x64xf32>
    %c0_52 = arith.constant 0 : index
    %c0_53 = arith.constant 0 : index
    %140 = vector.load %arg12[%c0_52, %c0_53] : memref<1x64xf32, #tpu.memory_space<vmem>>, vector<1x64xf32>
    %141 = vector.broadcast %140 : vector<1x64xf32> to vector<32x64xf32>
    %142 = arith.addf %139, %141 : vector<32x64xf32>
    %c0_54 = arith.constant 0 : index
    %c0_55 = arith.constant 0 : index
    %143 = vector.load %arg13[%c0_54, %c0_55] : memref<1x64xf32, #tpu.memory_space<vmem>>, vector<1x64xf32>
    %c0_56 = arith.constant 0 : index
    %c0_57 = arith.constant 0 : index
    %144 = vector.load %arg14[%c0_56, %c0_57] : memref<1x64xf32, #tpu.memory_space<vmem>>, vector<1x64xf32>
    %cst_58 = arith.constant dense<0.000000e+00> : vector<32xf32>
    %145 = vector.multi_reduction <add>, %142, %cst_58 [1] : vector<32x64xf32> to vector<32xf32>
    %146 = vector.shape_cast %145 : vector<32xf32> to vector<32x1xf32>
    %cst_59 = arith.constant 6.400000e+01 : f32
    %147 = vector.broadcast %cst_59 : f32 to vector<32x1xf32>
    %148 = arith.divf %146, %147 : vector<32x1xf32>
    %149 = vector.broadcast %148 : vector<32x1xf32> to vector<32x64xf32>
    %150 = arith.subf %142, %149 : vector<32x64xf32>
    %151 = arith.mulf %150, %150 : vector<32x64xf32>
    %cst_60 = arith.constant dense<0.000000e+00> : vector<32xf32>
    %152 = vector.multi_reduction <add>, %151, %cst_60 [1] : vector<32x64xf32> to vector<32xf32>
    %153 = vector.shape_cast %152 : vector<32xf32> to vector<32x1xf32>
    %cst_61 = arith.constant 6.400000e+01 : f32
    %154 = vector.broadcast %cst_61 : f32 to vector<32x1xf32>
    %155 = arith.divf %153, %154 : vector<32x1xf32>
    %156 = vector.broadcast %148 : vector<32x1xf32> to vector<32x64xf32>
    %157 = arith.subf %142, %156 : vector<32x64xf32>
    %cst_62 = arith.constant 9.99999974E-6 : f32
    %158 = vector.broadcast %cst_62 : f32 to vector<32x1xf32>
    %159 = arith.addf %155, %158 : vector<32x1xf32>
    %160 = math.rsqrt %159 : vector<32x1xf32>
    %161 = vector.broadcast %160 : vector<32x1xf32> to vector<32x64xf32>
    %162 = arith.mulf %157, %161 : vector<32x64xf32>
    %163 = vector.broadcast %143 : vector<1x64xf32> to vector<32x64xf32>
    %164 = arith.mulf %162, %163 : vector<32x64xf32>
    %165 = vector.broadcast %144 : vector<1x64xf32> to vector<32x64xf32>
    %166 = arith.addf %164, %165 : vector<32x64xf32>
    %cst_63 = arith.constant 0.000000e+00 : f32
    %167 = vector.broadcast %cst_63 : f32 to vector<32x64xf32>
    %168 = arith.maximumf %166, %167 : vector<32x64xf32>
    %c0_64 = arith.constant 0 : index
    %c0_65 = arith.constant 0 : index
    %169 = vector.load %arg15[%c0_64, %c0_65] : memref<64x32xf32, #tpu.memory_space<vmem>>, vector<64x32xf32>
    %cst_66 = arith.constant dense<0.000000e+00> : vector<32x32xf32>
    %170 = tpu.matmul %168, %169, %cst_66 {dimension_numbers = #tpu.dot_dimension_numbers<[1], [0], [0], [1], [0, 0, 1, 1], [], []>} : vector<32x64xf32>, vector<64x32xf32>, vector<32x32xf32> -> vector<32x32xf32>
    %c0_67 = arith.constant 0 : index
    %c0_68 = arith.constant 0 : index
    %171 = vector.load %arg16[%c0_67, %c0_68] : memref<1x32xf32, #tpu.memory_space<vmem>>, vector<1x32xf32>
    %172 = vector.broadcast %171 : vector<1x32xf32> to vector<32x32xf32>
    %173 = arith.addf %170, %172 : vector<32x32xf32>
    %c0_69 = arith.constant 0 : index
    %c0_70 = arith.constant 0 : index
    %174 = vector.load %arg17[%c0_69, %c0_70] : memref<1x32xf32, #tpu.memory_space<vmem>>, vector<1x32xf32>
    %c0_71 = arith.constant 0 : index
    %c0_72 = arith.constant 0 : index
    %175 = vector.load %arg18[%c0_71, %c0_72] : memref<1x32xf32, #tpu.memory_space<vmem>>, vector<1x32xf32>
    %cst_73 = arith.constant dense<0.000000e+00> : vector<32xf32>
    %176 = vector.multi_reduction <add>, %173, %cst_73 [1] : vector<32x32xf32> to vector<32xf32>
    %177 = vector.shape_cast %176 : vector<32xf32> to vector<32x1xf32>
    %cst_74 = arith.constant 3.200000e+01 : f32
    %178 = vector.broadcast %cst_74 : f32 to vector<32x1xf32>
    %179 = arith.divf %177, %178 : vector<32x1xf32>
    %180 = vector.broadcast %179 : vector<32x1xf32> to vector<32x32xf32>
    %181 = arith.subf %173, %180 : vector<32x32xf32>
    %182 = arith.mulf %181, %181 : vector<32x32xf32>
    %cst_75 = arith.constant dense<0.000000e+00> : vector<32xf32>
    %183 = vector.multi_reduction <add>, %182, %cst_75 [1] : vector<32x32xf32> to vector<32xf32>
    %184 = vector.shape_cast %183 : vector<32xf32> to vector<32x1xf32>
    %cst_76 = arith.constant 3.200000e+01 : f32
    %185 = vector.broadcast %cst_76 : f32 to vector<32x1xf32>
    %186 = arith.divf %184, %185 : vector<32x1xf32>
    %187 = vector.broadcast %179 : vector<32x1xf32> to vector<32x32xf32>
    %188 = arith.subf %173, %187 : vector<32x32xf32>
    %cst_77 = arith.constant 9.99999974E-6 : f32
    %189 = vector.broadcast %cst_77 : f32 to vector<32x1xf32>
    %190 = arith.addf %186, %189 : vector<32x1xf32>
    %191 = math.rsqrt %190 : vector<32x1xf32>
    %192 = vector.broadcast %191 : vector<32x1xf32> to vector<32x32xf32>
    %193 = arith.mulf %188, %192 : vector<32x32xf32>
    %194 = vector.broadcast %174 : vector<1x32xf32> to vector<32x32xf32>
    %195 = arith.mulf %193, %194 : vector<32x32xf32>
    %196 = vector.broadcast %175 : vector<1x32xf32> to vector<32x32xf32>
    %197 = arith.addf %195, %196 : vector<32x32xf32>
    %198 = arith.addf %113, %197 : vector<32x32xf32>
    %c0_78 = arith.constant 0 : index
    %c0_79 = arith.constant 0 : index
    %199 = vector.load %arg19[%c0_78, %c0_79] : memref<1x32xf32, #tpu.memory_space<vmem>>, vector<1x32xf32>
    %c0_80 = arith.constant 0 : index
    %c0_81 = arith.constant 0 : index
    %200 = vector.load %arg20[%c0_80, %c0_81] : memref<1x32xf32, #tpu.memory_space<vmem>>, vector<1x32xf32>
    %cst_82 = arith.constant dense<0.000000e+00> : vector<32xf32>
    %201 = vector.multi_reduction <add>, %198, %cst_82 [1] : vector<32x32xf32> to vector<32xf32>
    %202 = vector.shape_cast %201 : vector<32xf32> to vector<32x1xf32>
    %cst_83 = arith.constant 3.200000e+01 : f32
    %203 = vector.broadcast %cst_83 : f32 to vector<32x1xf32>
    %204 = arith.divf %202, %203 : vector<32x1xf32>
    %205 = vector.broadcast %204 : vector<32x1xf32> to vector<32x32xf32>
    %206 = arith.subf %198, %205 : vector<32x32xf32>
    %207 = arith.mulf %206, %206 : vector<32x32xf32>
    %cst_84 = arith.constant dense<0.000000e+00> : vector<32xf32>
    %208 = vector.multi_reduction <add>, %207, %cst_84 [1] : vector<32x32xf32> to vector<32xf32>
    %209 = vector.shape_cast %208 : vector<32xf32> to vector<32x1xf32>
    %cst_85 = arith.constant 3.200000e+01 : f32
    %210 = vector.broadcast %cst_85 : f32 to vector<32x1xf32>
    %211 = arith.divf %209, %210 : vector<32x1xf32>
    %212 = vector.broadcast %204 : vector<32x1xf32> to vector<32x32xf32>
    %213 = arith.subf %198, %212 : vector<32x32xf32>
    %cst_86 = arith.constant 9.99999974E-6 : f32
    %214 = vector.broadcast %cst_86 : f32 to vector<32x1xf32>
    %215 = arith.addf %211, %214 : vector<32x1xf32>
    %216 = math.rsqrt %215 : vector<32x1xf32>
    %217 = vector.broadcast %216 : vector<32x1xf32> to vector<32x32xf32>
    %218 = arith.mulf %213, %217 : vector<32x32xf32>
    %219 = vector.broadcast %199 : vector<1x32xf32> to vector<32x32xf32>
    %220 = arith.mulf %218, %219 : vector<32x32xf32>
    %221 = vector.broadcast %200 : vector<1x32xf32> to vector<32x32xf32>
    %222 = arith.addf %220, %221 : vector<32x32xf32>
    %c0_87 = arith.constant 0 : index
    %c0_88 = arith.constant 0 : index
    %223 = vector.load %arg21[%c0_87, %c0_88] : memref<32x64xf32, #tpu.memory_space<vmem>>, vector<32x64xf32>
    %cst_89 = arith.constant dense<0.000000e+00> : vector<32x64xf32>
    %224 = tpu.matmul %222, %223, %cst_89 {dimension_numbers = #tpu.dot_dimension_numbers<[1], [0], [0], [1], [0, 0, 1, 1], [], []>} : vector<32x32xf32>, vector<32x64xf32>, vector<32x64xf32> -> vector<32x64xf32>
    %225 = vector.extract_strided_slice %224 {offsets = [0, 0], sizes = [32, 16], strides = [1, 1]} : vector<32x64xf32> to vector<32x16xf32>
    %226 = vector.shape_cast %225 : vector<32x16xf32> to vector<2x16x16xf32>
    %227 = vector.extract_strided_slice %224 {offsets = [0, 16], sizes = [32, 16], strides = [1, 1]} : vector<32x64xf32> to vector<32x16xf32>
    %228 = vector.shape_cast %227 : vector<32x16xf32> to vector<2x16x16xf32>
    %229 = vector.extract_strided_slice %224 {offsets = [0, 32], sizes = [32, 32], strides = [1, 1]} : vector<32x64xf32> to vector<32x32xf32>
    %230 = vector.shape_cast %229 : vector<32x32xf32> to vector<2x16x32xf32>
    %231 = vector.extract_strided_slice %226 {offsets = [0, 0, 0], sizes = [2, 16, 4], strides = [1, 1, 1]} : vector<2x16x16xf32> to vector<2x16x4xf32>
    %232 = vector.extract_strided_slice %228 {offsets = [0, 0, 0], sizes = [2, 16, 4], strides = [1, 1, 1]} : vector<2x16x16xf32> to vector<2x16x4xf32>
    %233 = vector.extract_strided_slice %230 {offsets = [0, 0, 0], sizes = [2, 16, 8], strides = [1, 1, 1]} : vector<2x16x32xf32> to vector<2x16x8xf32>
    "tpu.trace_start"() <{level = 10 : i32, message = "bqd,bkd->bqk"}> : () -> ()
    %cst_90 = arith.constant dense<0.000000e+00> : vector<2x16x16xf32>
    %234 = tpu.matmul %231, %232, %cst_90 {dimension_numbers = #tpu.dot_dimension_numbers<[2], [2], [1], [1], [0, 0, 0, 1, 1, 1], [0], [0]>} : vector<2x16x4xf32>, vector<2x16x4xf32>, vector<2x16x16xf32> -> vector<2x16x16xf32>
    "tpu.trace_stop"() : () -> ()
    %cst_91 = arith.constant 2.500000e-01 : f32
    %235 = vector.broadcast %cst_91 : f32 to vector<2x16x16xf32>
    %236 = arith.mulf %234, %235 : vector<2x16x16xf32>
    %cst_92 = arith.constant dense<0xFF800000> : vector<2x16xf32>
    %237 = vector.multi_reduction <maximumf>, %236, %cst_92 [2] : vector<2x16x16xf32> to vector<2x16xf32>
    %238 = vector.shape_cast %237 : vector<2x16xf32> to vector<2x16x1xf32>
    %239 = vector.broadcast %238 : vector<2x16x1xf32> to vector<2x16x16xf32>
    %240 = arith.subf %236, %239 : vector<2x16x16xf32>
    %241 = math.exp %240 : vector<2x16x16xf32>
    %cst_93 = arith.constant dense<0.000000e+00> : vector<2x16xf32>
    %242 = vector.multi_reduction <add>, %241, %cst_93 [2] : vector<2x16x16xf32> to vector<2x16xf32>
    %243 = vector.shape_cast %242 : vector<2x16xf32> to vector<2x16x1xf32>
    %244 = tpu.reciprocal %243 {approx = true} : vector<2x16x1xf32> -> vector<2x16x1xf32>
    %245 = vector.broadcast %244 : vector<2x16x1xf32> to vector<2x16x16xf32>
    %246 = arith.mulf %241, %245 : vector<2x16x16xf32>
    "tpu.trace_start"() <{level = 10 : i32, message = "bqk,bkd->bqd"}> : () -> ()
    %cst_94 = arith.constant dense<0.000000e+00> : vector<2x16x8xf32>
    %247 = tpu.matmul %246, %233, %cst_94 {dimension_numbers = #tpu.dot_dimension_numbers<[2], [1], [1], [2], [0, 0, 0, 1, 1, 2], [0], [0]>} : vector<2x16x16xf32>, vector<2x16x8xf32>, vector<2x16x8xf32> -> vector<2x16x8xf32>
    "tpu.trace_stop"() : () -> ()
    %248 = vector.shape_cast %247 : vector<2x16x8xf32> to vector<32x8xf32>
    %249 = vector.extract_strided_slice %226 {offsets = [0, 0, 4], sizes = [2, 16, 4], strides = [1, 1, 1]} : vector<2x16x16xf32> to vector<2x16x4xf32>
    %250 = vector.extract_strided_slice %228 {offsets = [0, 0, 4], sizes = [2, 16, 4], strides = [1, 1, 1]} : vector<2x16x16xf32> to vector<2x16x4xf32>
    %251 = vector.extract_strided_slice %230 {offsets = [0, 0, 8], sizes = [2, 16, 8], strides = [1, 1, 1]} : vector<2x16x32xf32> to vector<2x16x8xf32>
    "tpu.trace_start"() <{level = 10 : i32, message = "bqd,bkd->bqk"}> : () -> ()
    %cst_95 = arith.constant dense<0.000000e+00> : vector<2x16x16xf32>
    %252 = tpu.matmul %249, %250, %cst_95 {dimension_numbers = #tpu.dot_dimension_numbers<[2], [2], [1], [1], [0, 0, 0, 1, 1, 1], [0], [0]>} : vector<2x16x4xf32>, vector<2x16x4xf32>, vector<2x16x16xf32> -> vector<2x16x16xf32>
    "tpu.trace_stop"() : () -> ()
    %cst_96 = arith.constant 2.500000e-01 : f32
    %253 = vector.broadcast %cst_96 : f32 to vector<2x16x16xf32>
    %254 = arith.mulf %252, %253 : vector<2x16x16xf32>
    %cst_97 = arith.constant dense<0xFF800000> : vector<2x16xf32>
    %255 = vector.multi_reduction <maximumf>, %254, %cst_97 [2] : vector<2x16x16xf32> to vector<2x16xf32>
    %256 = vector.shape_cast %255 : vector<2x16xf32> to vector<2x16x1xf32>
    %257 = vector.broadcast %256 : vector<2x16x1xf32> to vector<2x16x16xf32>
    %258 = arith.subf %254, %257 : vector<2x16x16xf32>
    %259 = math.exp %258 : vector<2x16x16xf32>
    %cst_98 = arith.constant dense<0.000000e+00> : vector<2x16xf32>
    %260 = vector.multi_reduction <add>, %259, %cst_98 [2] : vector<2x16x16xf32> to vector<2x16xf32>
    %261 = vector.shape_cast %260 : vector<2x16xf32> to vector<2x16x1xf32>
    %262 = tpu.reciprocal %261 {approx = true} : vector<2x16x1xf32> -> vector<2x16x1xf32>
    %263 = vector.broadcast %262 : vector<2x16x1xf32> to vector<2x16x16xf32>
    %264 = arith.mulf %259, %263 : vector<2x16x16xf32>
    "tpu.trace_start"() <{level = 10 : i32, message = "bqk,bkd->bqd"}> : () -> ()
    %cst_99 = arith.constant dense<0.000000e+00> : vector<2x16x8xf32>
    %265 = tpu.matmul %264, %251, %cst_99 {dimension_numbers = #tpu.dot_dimension_numbers<[2], [1], [1], [2], [0, 0, 0, 1, 1, 2], [0], [0]>} : vector<2x16x16xf32>, vector<2x16x8xf32>, vector<2x16x8xf32> -> vector<2x16x8xf32>
    "tpu.trace_stop"() : () -> ()
    %266 = vector.shape_cast %265 : vector<2x16x8xf32> to vector<32x8xf32>
    %267 = vector.extract_strided_slice %226 {offsets = [0, 0, 8], sizes = [2, 16, 4], strides = [1, 1, 1]} : vector<2x16x16xf32> to vector<2x16x4xf32>
    %268 = vector.extract_strided_slice %228 {offsets = [0, 0, 8], sizes = [2, 16, 4], strides = [1, 1, 1]} : vector<2x16x16xf32> to vector<2x16x4xf32>
    %269 = vector.extract_strided_slice %230 {offsets = [0, 0, 16], sizes = [2, 16, 8], strides = [1, 1, 1]} : vector<2x16x32xf32> to vector<2x16x8xf32>
    "tpu.trace_start"() <{level = 10 : i32, message = "bqd,bkd->bqk"}> : () -> ()
    %cst_100 = arith.constant dense<0.000000e+00> : vector<2x16x16xf32>
    %270 = tpu.matmul %267, %268, %cst_100 {dimension_numbers = #tpu.dot_dimension_numbers<[2], [2], [1], [1], [0, 0, 0, 1, 1, 1], [0], [0]>} : vector<2x16x4xf32>, vector<2x16x4xf32>, vector<2x16x16xf32> -> vector<2x16x16xf32>
    "tpu.trace_stop"() : () -> ()
    %cst_101 = arith.constant 2.500000e-01 : f32
    %271 = vector.broadcast %cst_101 : f32 to vector<2x16x16xf32>
    %272 = arith.mulf %270, %271 : vector<2x16x16xf32>
    %cst_102 = arith.constant dense<0xFF800000> : vector<2x16xf32>
    %273 = vector.multi_reduction <maximumf>, %272, %cst_102 [2] : vector<2x16x16xf32> to vector<2x16xf32>
    %274 = vector.shape_cast %273 : vector<2x16xf32> to vector<2x16x1xf32>
    %275 = vector.broadcast %274 : vector<2x16x1xf32> to vector<2x16x16xf32>
    %276 = arith.subf %272, %275 : vector<2x16x16xf32>
    %277 = math.exp %276 : vector<2x16x16xf32>
    %cst_103 = arith.constant dense<0.000000e+00> : vector<2x16xf32>
    %278 = vector.multi_reduction <add>, %277, %cst_103 [2] : vector<2x16x16xf32> to vector<2x16xf32>
    %279 = vector.shape_cast %278 : vector<2x16xf32> to vector<2x16x1xf32>
    %280 = tpu.reciprocal %279 {approx = true} : vector<2x16x1xf32> -> vector<2x16x1xf32>
    %281 = vector.broadcast %280 : vector<2x16x1xf32> to vector<2x16x16xf32>
    %282 = arith.mulf %277, %281 : vector<2x16x16xf32>
    "tpu.trace_start"() <{level = 10 : i32, message = "bqk,bkd->bqd"}> : () -> ()
    %cst_104 = arith.constant dense<0.000000e+00> : vector<2x16x8xf32>
    %283 = tpu.matmul %282, %269, %cst_104 {dimension_numbers = #tpu.dot_dimension_numbers<[2], [1], [1], [2], [0, 0, 0, 1, 1, 2], [0], [0]>} : vector<2x16x16xf32>, vector<2x16x8xf32>, vector<2x16x8xf32> -> vector<2x16x8xf32>
    "tpu.trace_stop"() : () -> ()
    %284 = vector.shape_cast %283 : vector<2x16x8xf32> to vector<32x8xf32>
    %285 = vector.extract_strided_slice %226 {offsets = [0, 0, 12], sizes = [2, 16, 4], strides = [1, 1, 1]} : vector<2x16x16xf32> to vector<2x16x4xf32>
    %286 = vector.extract_strided_slice %228 {offsets = [0, 0, 12], sizes = [2, 16, 4], strides = [1, 1, 1]} : vector<2x16x16xf32> to vector<2x16x4xf32>
    %287 = vector.extract_strided_slice %230 {offsets = [0, 0, 24], sizes = [2, 16, 8], strides = [1, 1, 1]} : vector<2x16x32xf32> to vector<2x16x8xf32>
    "tpu.trace_start"() <{level = 10 : i32, message = "bqd,bkd->bqk"}> : () -> ()
    %cst_105 = arith.constant dense<0.000000e+00> : vector<2x16x16xf32>
    %288 = tpu.matmul %285, %286, %cst_105 {dimension_numbers = #tpu.dot_dimension_numbers<[2], [2], [1], [1], [0, 0, 0, 1, 1, 1], [0], [0]>} : vector<2x16x4xf32>, vector<2x16x4xf32>, vector<2x16x16xf32> -> vector<2x16x16xf32>
    "tpu.trace_stop"() : () -> ()
    %cst_106 = arith.constant 2.500000e-01 : f32
    %289 = vector.broadcast %cst_106 : f32 to vector<2x16x16xf32>
    %290 = arith.mulf %288, %289 : vector<2x16x16xf32>
    %cst_107 = arith.constant dense<0xFF800000> : vector<2x16xf32>
    %291 = vector.multi_reduction <maximumf>, %290, %cst_107 [2] : vector<2x16x16xf32> to vector<2x16xf32>
    %292 = vector.shape_cast %291 : vector<2x16xf32> to vector<2x16x1xf32>
    %293 = vector.broadcast %292 : vector<2x16x1xf32> to vector<2x16x16xf32>
    %294 = arith.subf %290, %293 : vector<2x16x16xf32>
    %295 = math.exp %294 : vector<2x16x16xf32>
    %cst_108 = arith.constant dense<0.000000e+00> : vector<2x16xf32>
    %296 = vector.multi_reduction <add>, %295, %cst_108 [2] : vector<2x16x16xf32> to vector<2x16xf32>
    %297 = vector.shape_cast %296 : vector<2x16xf32> to vector<2x16x1xf32>
    %298 = tpu.reciprocal %297 {approx = true} : vector<2x16x1xf32> -> vector<2x16x1xf32>
    %299 = vector.broadcast %298 : vector<2x16x1xf32> to vector<2x16x16xf32>
    %300 = arith.mulf %295, %299 : vector<2x16x16xf32>
    "tpu.trace_start"() <{level = 10 : i32, message = "bqk,bkd->bqd"}> : () -> ()
    %cst_109 = arith.constant dense<0.000000e+00> : vector<2x16x8xf32>
    %301 = tpu.matmul %300, %287, %cst_109 {dimension_numbers = #tpu.dot_dimension_numbers<[2], [1], [1], [2], [0, 0, 0, 1, 1, 2], [0], [0]>} : vector<2x16x16xf32>, vector<2x16x8xf32>, vector<2x16x8xf32> -> vector<2x16x8xf32>
    "tpu.trace_stop"() : () -> ()
    %302 = vector.shape_cast %301 : vector<2x16x8xf32> to vector<32x8xf32>
    %303 = tpu.concatenate %248, %266, %284, %302 in 1 : vector<32x8xf32>, vector<32x8xf32>, vector<32x8xf32>, vector<32x8xf32> -> vector<32x32xf32>
    %304 = arith.addf %198, %303 : vector<32x32xf32>
    %c0_110 = arith.constant 0 : index
    %c0_111 = arith.constant 0 : index
    %305 = vector.load %arg22[%c0_110, %c0_111] : memref<1x32xf32, #tpu.memory_space<vmem>>, vector<1x32xf32>
    %c0_112 = arith.constant 0 : index
    %c0_113 = arith.constant 0 : index
    %306 = vector.load %arg23[%c0_112, %c0_113] : memref<1x32xf32, #tpu.memory_space<vmem>>, vector<1x32xf32>
    %cst_114 = arith.constant dense<0.000000e+00> : vector<32xf32>
    %307 = vector.multi_reduction <add>, %304, %cst_114 [1] : vector<32x32xf32> to vector<32xf32>
    %308 = vector.shape_cast %307 : vector<32xf32> to vector<32x1xf32>
    %cst_115 = arith.constant 3.200000e+01 : f32
    %309 = vector.broadcast %cst_115 : f32 to vector<32x1xf32>
    %310 = arith.divf %308, %309 : vector<32x1xf32>
    %311 = vector.broadcast %310 : vector<32x1xf32> to vector<32x32xf32>
    %312 = arith.subf %304, %311 : vector<32x32xf32>
    %313 = arith.mulf %312, %312 : vector<32x32xf32>
    %cst_116 = arith.constant dense<0.000000e+00> : vector<32xf32>
    %314 = vector.multi_reduction <add>, %313, %cst_116 [1] : vector<32x32xf32> to vector<32xf32>
    %315 = vector.shape_cast %314 : vector<32xf32> to vector<32x1xf32>
    %cst_117 = arith.constant 3.200000e+01 : f32
    %316 = vector.broadcast %cst_117 : f32 to vector<32x1xf32>
    %317 = arith.divf %315, %316 : vector<32x1xf32>
    %318 = vector.broadcast %310 : vector<32x1xf32> to vector<32x32xf32>
    %319 = arith.subf %304, %318 : vector<32x32xf32>
    %cst_118 = arith.constant 9.99999974E-6 : f32
    %320 = vector.broadcast %cst_118 : f32 to vector<32x1xf32>
    %321 = arith.addf %317, %320 : vector<32x1xf32>
    %322 = math.rsqrt %321 : vector<32x1xf32>
    %323 = vector.broadcast %322 : vector<32x1xf32> to vector<32x32xf32>
    %324 = arith.mulf %319, %323 : vector<32x32xf32>
    %325 = vector.broadcast %305 : vector<1x32xf32> to vector<32x32xf32>
    %326 = arith.mulf %324, %325 : vector<32x32xf32>
    %327 = vector.broadcast %306 : vector<1x32xf32> to vector<32x32xf32>
    %328 = arith.addf %326, %327 : vector<32x32xf32>
    %c0_119 = arith.constant 0 : index
    %c0_120 = arith.constant 0 : index
    %329 = vector.load %arg24[%c0_119, %c0_120] : memref<32x64xf32, #tpu.memory_space<vmem>>, vector<32x64xf32>
    %cst_121 = arith.constant dense<0.000000e+00> : vector<32x64xf32>
    %330 = tpu.matmul %328, %329, %cst_121 {dimension_numbers = #tpu.dot_dimension_numbers<[1], [0], [0], [1], [0, 0, 1, 1], [], []>} : vector<32x32xf32>, vector<32x64xf32>, vector<32x64xf32> -> vector<32x64xf32>
    %c0_122 = arith.constant 0 : index
    %c0_123 = arith.constant 0 : index
    %331 = vector.load %arg25[%c0_122, %c0_123] : memref<1x64xf32, #tpu.memory_space<vmem>>, vector<1x64xf32>
    %332 = vector.broadcast %331 : vector<1x64xf32> to vector<32x64xf32>
    %333 = arith.addf %330, %332 : vector<32x64xf32>
    %c0_124 = arith.constant 0 : index
    %c0_125 = arith.constant 0 : index
    %334 = vector.load %arg26[%c0_124, %c0_125] : memref<1x64xf32, #tpu.memory_space<vmem>>, vector<1x64xf32>
    %c0_126 = arith.constant 0 : index
    %c0_127 = arith.constant 0 : index
    %335 = vector.load %arg27[%c0_126, %c0_127] : memref<1x64xf32, #tpu.memory_space<vmem>>, vector<1x64xf32>
    %cst_128 = arith.constant dense<0.000000e+00> : vector<32xf32>
    %336 = vector.multi_reduction <add>, %333, %cst_128 [1] : vector<32x64xf32> to vector<32xf32>
    %337 = vector.shape_cast %336 : vector<32xf32> to vector<32x1xf32>
    %cst_129 = arith.constant 6.400000e+01 : f32
    %338 = vector.broadcast %cst_129 : f32 to vector<32x1xf32>
    %339 = arith.divf %337, %338 : vector<32x1xf32>
    %340 = vector.broadcast %339 : vector<32x1xf32> to vector<32x64xf32>
    %341 = arith.subf %333, %340 : vector<32x64xf32>
    %342 = arith.mulf %341, %341 : vector<32x64xf32>
    %cst_130 = arith.constant dense<0.000000e+00> : vector<32xf32>
    %343 = vector.multi_reduction <add>, %342, %cst_130 [1] : vector<32x64xf32> to vector<32xf32>
    %344 = vector.shape_cast %343 : vector<32xf32> to vector<32x1xf32>
    %cst_131 = arith.constant 6.400000e+01 : f32
    %345 = vector.broadcast %cst_131 : f32 to vector<32x1xf32>
    %346 = arith.divf %344, %345 : vector<32x1xf32>
    %347 = vector.broadcast %339 : vector<32x1xf32> to vector<32x64xf32>
    %348 = arith.subf %333, %347 : vector<32x64xf32>
    %cst_132 = arith.constant 9.99999974E-6 : f32
    %349 = vector.broadcast %cst_132 : f32 to vector<32x1xf32>
    %350 = arith.addf %346, %349 : vector<32x1xf32>
    %351 = math.rsqrt %350 : vector<32x1xf32>
    %352 = vector.broadcast %351 : vector<32x1xf32> to vector<32x64xf32>
    %353 = arith.mulf %348, %352 : vector<32x64xf32>
    %354 = vector.broadcast %334 : vector<1x64xf32> to vector<32x64xf32>
    %355 = arith.mulf %353, %354 : vector<32x64xf32>
    %356 = vector.broadcast %335 : vector<1x64xf32> to vector<32x64xf32>
    %357 = arith.addf %355, %356 : vector<32x64xf32>
    %cst_133 = arith.constant 0.000000e+00 : f32
    %358 = vector.broadcast %cst_133 : f32 to vector<32x64xf32>
    %359 = arith.maximumf %357, %358 : vector<32x64xf32>
    %c0_134 = arith.constant 0 : index
    %c0_135 = arith.constant 0 : index
    %360 = vector.load %arg28[%c0_134, %c0_135] : memref<64x32xf32, #tpu.memory_space<vmem>>, vector<64x32xf32>
    %cst_136 = arith.constant dense<0.000000e+00> : vector<32x32xf32>
    %361 = tpu.matmul %359, %360, %cst_136 {dimension_numbers = #tpu.dot_dimension_numbers<[1], [0], [0], [1], [0, 0, 1, 1], [], []>} : vector<32x64xf32>, vector<64x32xf32>, vector<32x32xf32> -> vector<32x32xf32>
    %c0_137 = arith.constant 0 : index
    %c0_138 = arith.constant 0 : index
    %362 = vector.load %arg29[%c0_137, %c0_138] : memref<1x32xf32, #tpu.memory_space<vmem>>, vector<1x32xf32>
    %363 = vector.broadcast %362 : vector<1x32xf32> to vector<32x32xf32>
    %364 = arith.addf %361, %363 : vector<32x32xf32>
    %c0_139 = arith.constant 0 : index
    %c0_140 = arith.constant 0 : index
    %365 = vector.load %arg30[%c0_139, %c0_140] : memref<1x32xf32, #tpu.memory_space<vmem>>, vector<1x32xf32>
    %c0_141 = arith.constant 0 : index
    %c0_142 = arith.constant 0 : index
    %366 = vector.load %arg31[%c0_141, %c0_142] : memref<1x32xf32, #tpu.memory_space<vmem>>, vector<1x32xf32>
    %cst_143 = arith.constant dense<0.000000e+00> : vector<32xf32>
    %367 = vector.multi_reduction <add>, %364, %cst_143 [1] : vector<32x32xf32> to vector<32xf32>
    %368 = vector.shape_cast %367 : vector<32xf32> to vector<32x1xf32>
    %cst_144 = arith.constant 3.200000e+01 : f32
    %369 = vector.broadcast %cst_144 : f32 to vector<32x1xf32>
    %370 = arith.divf %368, %369 : vector<32x1xf32>
    %371 = vector.broadcast %370 : vector<32x1xf32> to vector<32x32xf32>
    %372 = arith.subf %364, %371 : vector<32x32xf32>
    %373 = arith.mulf %372, %372 : vector<32x32xf32>
    %cst_145 = arith.constant dense<0.000000e+00> : vector<32xf32>
    %374 = vector.multi_reduction <add>, %373, %cst_145 [1] : vector<32x32xf32> to vector<32xf32>
    %375 = vector.shape_cast %374 : vector<32xf32> to vector<32x1xf32>
    %cst_146 = arith.constant 3.200000e+01 : f32
    %376 = vector.broadcast %cst_146 : f32 to vector<32x1xf32>
    %377 = arith.divf %375, %376 : vector<32x1xf32>
    %378 = vector.broadcast %370 : vector<32x1xf32> to vector<32x32xf32>
    %379 = arith.subf %364, %378 : vector<32x32xf32>
    %cst_147 = arith.constant 9.99999974E-6 : f32
    %380 = vector.broadcast %cst_147 : f32 to vector<32x1xf32>
    %381 = arith.addf %377, %380 : vector<32x1xf32>
    %382 = math.rsqrt %381 : vector<32x1xf32>
    %383 = vector.broadcast %382 : vector<32x1xf32> to vector<32x32xf32>
    %384 = arith.mulf %379, %383 : vector<32x32xf32>
    %385 = vector.broadcast %365 : vector<1x32xf32> to vector<32x32xf32>
    %386 = arith.mulf %384, %385 : vector<32x32xf32>
    %387 = vector.broadcast %366 : vector<1x32xf32> to vector<32x32xf32>
    %388 = arith.addf %386, %387 : vector<32x32xf32>
    %389 = arith.addf %304, %388 : vector<32x32xf32>
    %c0_148 = arith.constant 0 : index
    %c0_149 = arith.constant 0 : index
    %390 = vector.load %arg51[%c0_148, %c0_149] : memref<32x32xf32, #tpu.memory_space<vmem>>, vector<32x32xf32>
    tpu.vector_store %arg51[%c0_148, %c0_149], %389 {strides = array<i32>} : memref<32x32xf32, #tpu.memory_space<vmem>>, vector<32x32xf32>,
    %c0_150 = arith.constant 0 : index
    %c0_151 = arith.constant 0 : index
    %391 = vector.load %arg51[%c0_150, %c0_151] : memref<32x32xf32, #tpu.memory_space<vmem>>, vector<1x32xf32>
    %c0_152 = arith.constant 0 : index
    %c0_153 = arith.constant 0 : index
    %392 = vector.load %arg52[%c0_152, %c0_153] : memref<2x512xf32, #tpu.memory_space<vmem>>, vector<1x32xf32>
    tpu.vector_store %arg52[%c0_152, %c0_153], %391 {strides = array<i32>} : memref<2x512xf32, #tpu.memory_space<vmem>>, vector<1x32xf32>,
    %c1 = arith.constant 1 : index
    %c0_154 = arith.constant 0 : index
    %393 = vector.load %arg51[%c1, %c0_154] : memref<32x32xf32, #tpu.memory_space<vmem>>, vector<1x32xf32>
    %c0_155 = arith.constant 0 : index
    %c32 = arith.constant 32 : index
    %394 = vector.load %arg52[%c0_155, %c32] : memref<2x512xf32, #tpu.memory_space<vmem>>, vector<1x32xf32>
    tpu.vector_store %arg52[%c0_155, %c32], %393 {strides = array<i32>} : memref<2x512xf32, #tpu.memory_space<vmem>>, vector<1x32xf32>,
    %c2 = arith.constant 2 : index
    %c0_156 = arith.constant 0 : index
    %395 = vector.load %arg51[%c2, %c0_156] : memref<32x32xf32, #tpu.memory_space<vmem>>, vector<1x32xf32>
    %c0_157 = arith.constant 0 : index
    %c64 = arith.constant 64 : index
    %396 = vector.load %arg52[%c0_157, %c64] : memref<2x512xf32, #tpu.memory_space<vmem>>, vector<1x32xf32>
    tpu.vector_store %arg52[%c0_157, %c64], %395 {strides = array<i32>} : memref<2x512xf32, #tpu.memory_space<vmem>>, vector<1x32xf32>,
    %c3 = arith.constant 3 : index
    %c0_158 = arith.constant 0 : index
    %397 = vector.load %arg51[%c3, %c0_158] : memref<32x32xf32, #tpu.memory_space<vmem>>, vector<1x32xf32>
    %c0_159 = arith.constant 0 : index
    %c96 = arith.constant 96 : index
    %398 = vector.load %arg52[%c0_159, %c96] : memref<2x512xf32, #tpu.memory_space<vmem>>, vector<1x32xf32>
    tpu.vector_store %arg52[%c0_159, %c96], %397 {strides = array<i32>} : memref<2x512xf32, #tpu.memory_space<vmem>>, vector<1x32xf32>,
    %c4 = arith.constant 4 : index
    %c0_160 = arith.constant 0 : index
    %399 = vector.load %arg51[%c4, %c0_160] : memref<32x32xf32, #tpu.memory_space<vmem>>, vector<1x32xf32>
    %c0_161 = arith.constant 0 : index
    %c128 = arith.constant 128 : index
    %400 = vector.load %arg52[%c0_161, %c128] : memref<2x512xf32, #tpu.memory_space<vmem>>, vector<1x32xf32>
    tpu.vector_store %arg52[%c0_161, %c128], %399 {strides = array<i32>} : memref<2x512xf32, #tpu.memory_space<vmem>>, vector<1x32xf32>,
    %c5 = arith.constant 5 : index
    %c0_162 = arith.constant 0 : index
    %401 = vector.load %arg51[%c5, %c0_162] : memref<32x32xf32, #tpu.memory_space<vmem>>, vector<1x32xf32>
    %c0_163 = arith.constant 0 : index
    %c160 = arith.constant 160 : index
    %402 = vector.load %arg52[%c0_163, %c160] : memref<2x512xf32, #tpu.memory_space<vmem>>, vector<1x32xf32>
    tpu.vector_store %arg52[%c0_163, %c160], %401 {strides = array<i32>} : memref<2x512xf32, #tpu.memory_space<vmem>>, vector<1x32xf32>,
    %c6 = arith.constant 6 : index
    %c0_164 = arith.constant 0 : index
    %403 = vector.load %arg51[%c6, %c0_164] : memref<32x32xf32, #tpu.memory_space<vmem>>, vector<1x32xf32>
    %c0_165 = arith.constant 0 : index
    %c192 = arith.constant 192 : index
    %404 = vector.load %arg52[%c0_165, %c192] : memref<2x512xf32, #tpu.memory_space<vmem>>, vector<1x32xf32>
    tpu.vector_store %arg52[%c0_165, %c192], %403 {strides = array<i32>} : memref<2x512xf32, #tpu.memory_space<vmem>>, vector<1x32xf32>,
    %c7 = arith.constant 7 : index
    %c0_166 = arith.constant 0 : index
    %405 = vector.load %arg51[%c7, %c0_166] : memref<32x32xf32, #tpu.memory_space<vmem>>, vector<1x32xf32>
    %c0_167 = arith.constant 0 : index
    %c224 = arith.constant 224 : index
    %406 = vector.load %arg52[%c0_167, %c224] : memref<2x512xf32, #tpu.memory_space<vmem>>, vector<1x32xf32>
    tpu.vector_store %arg52[%c0_167, %c224], %405 {strides = array<i32>} : memref<2x512xf32, #tpu.memory_space<vmem>>, vector<1x32xf32>,
    %c8 = arith.constant 8 : index
    %c0_168 = arith.constant 0 : index
    %407 = vector.load %arg51[%c8, %c0_168] : memref<32x32xf32, #tpu.memory_space<vmem>>, vector<1x32xf32>
    %c0_169 = arith.constant 0 : index
    %c256 = arith.constant 256 : index
    %408 = vector.load %arg52[%c0_169, %c256] : memref<2x512xf32, #tpu.memory_space<vmem>>, vector<1x32xf32>
    tpu.vector_store %arg52[%c0_169, %c256], %407 {strides = array<i32>} : memref<2x512xf32, #tpu.memory_space<vmem>>, vector<1x32xf32>,
    %c9 = arith.constant 9 : index
    %c0_170 = arith.constant 0 : index
    %409 = vector.load %arg51[%c9, %c0_170] : memref<32x32xf32, #tpu.memory_space<vmem>>, vector<1x32xf32>
    %c0_171 = arith.constant 0 : index
    %c288 = arith.constant 288 : index
    %410 = vector.load %arg52[%c0_171, %c288] : memref<2x512xf32, #tpu.memory_space<vmem>>, vector<1x32xf32>
    tpu.vector_store %arg52[%c0_171, %c288], %409 {strides = array<i32>} : memref<2x512xf32, #tpu.memory_space<vmem>>, vector<1x32xf32>,
    %c10 = arith.constant 10 : index
    %c0_172 = arith.constant 0 : index
    %411 = vector.load %arg51[%c10, %c0_172] : memref<32x32xf32, #tpu.memory_space<vmem>>, vector<1x32xf32>
    %c0_173 = arith.constant 0 : index
    %c320 = arith.constant 320 : index
    %412 = vector.load %arg52[%c0_173, %c320] : memref<2x512xf32, #tpu.memory_space<vmem>>, vector<1x32xf32>
    tpu.vector_store %arg52[%c0_173, %c320], %411 {strides = array<i32>} : memref<2x512xf32, #tpu.memory_space<vmem>>, vector<1x32xf32>,
    %c11 = arith.constant 11 : index
    %c0_174 = arith.constant 0 : index
    %413 = vector.load %arg51[%c11, %c0_174] : memref<32x32xf32, #tpu.memory_space<vmem>>, vector<1x32xf32>
    %c0_175 = arith.constant 0 : index
    %c352 = arith.constant 352 : index
    %414 = vector.load %arg52[%c0_175, %c352] : memref<2x512xf32, #tpu.memory_space<vmem>>, vector<1x32xf32>
    tpu.vector_store %arg52[%c0_175, %c352], %413 {strides = array<i32>} : memref<2x512xf32, #tpu.memory_space<vmem>>, vector<1x32xf32>,
    %c12 = arith.constant 12 : index
    %c0_176 = arith.constant 0 : index
    %415 = vector.load %arg51[%c12, %c0_176] : memref<32x32xf32, #tpu.memory_space<vmem>>, vector<1x32xf32>
    %c0_177 = arith.constant 0 : index
    %c384 = arith.constant 384 : index
    %416 = vector.load %arg52[%c0_177, %c384] : memref<2x512xf32, #tpu.memory_space<vmem>>, vector<1x32xf32>
    tpu.vector_store %arg52[%c0_177, %c384], %415 {strides = array<i32>} : memref<2x512xf32, #tpu.memory_space<vmem>>, vector<1x32xf32>,
    %c13 = arith.constant 13 : index
    %c0_178 = arith.constant 0 : index
    %417 = vector.load %arg51[%c13, %c0_178] : memref<32x32xf32, #tpu.memory_space<vmem>>, vector<1x32xf32>
    %c0_179 = arith.constant 0 : index
    %c416 = arith.constant 416 : index
    %418 = vector.load %arg52[%c0_179, %c416] : memref<2x512xf32, #tpu.memory_space<vmem>>, vector<1x32xf32>
    tpu.vector_store %arg52[%c0_179, %c416], %417 {strides = array<i32>} : memref<2x512xf32, #tpu.memory_space<vmem>>, vector<1x32xf32>,
    %c14 = arith.constant 14 : index
    %c0_180 = arith.constant 0 : index
    %419 = vector.load %arg51[%c14, %c0_180] : memref<32x32xf32, #tpu.memory_space<vmem>>, vector<1x32xf32>
    %c0_181 = arith.constant 0 : index
    %c448 = arith.constant 448 : index
    %420 = vector.load %arg52[%c0_181, %c448] : memref<2x512xf32, #tpu.memory_space<vmem>>, vector<1x32xf32>
    tpu.vector_store %arg52[%c0_181, %c448], %419 {strides = array<i32>} : memref<2x512xf32, #tpu.memory_space<vmem>>, vector<1x32xf32>,
    %c15 = arith.constant 15 : index
    %c0_182 = arith.constant 0 : index
    %421 = vector.load %arg51[%c15, %c0_182] : memref<32x32xf32, #tpu.memory_space<vmem>>, vector<1x32xf32>
    %c0_183 = arith.constant 0 : index
    %c480 = arith.constant 480 : index
    %422 = vector.load %arg52[%c0_183, %c480] : memref<2x512xf32, #tpu.memory_space<vmem>>, vector<1x32xf32>
    tpu.vector_store %arg52[%c0_183, %c480], %421 {strides = array<i32>} : memref<2x512xf32, #tpu.memory_space<vmem>>, vector<1x32xf32>,
    %c16 = arith.constant 16 : index
    %c0_184 = arith.constant 0 : index
    %423 = vector.load %arg51[%c16, %c0_184] : memref<32x32xf32, #tpu.memory_space<vmem>>, vector<1x32xf32>
    %c1_185 = arith.constant 1 : index
    %c0_186 = arith.constant 0 : index
    %424 = vector.load %arg52[%c1_185, %c0_186] : memref<2x512xf32, #tpu.memory_space<vmem>>, vector<1x32xf32>
    tpu.vector_store %arg52[%c1_185, %c0_186], %423 {strides = array<i32>} : memref<2x512xf32, #tpu.memory_space<vmem>>, vector<1x32xf32>,
    %c17 = arith.constant 17 : index
    %c0_187 = arith.constant 0 : index
    %425 = vector.load %arg51[%c17, %c0_187] : memref<32x32xf32, #tpu.memory_space<vmem>>, vector<1x32xf32>
    %c1_188 = arith.constant 1 : index
    %c32_189 = arith.constant 32 : index
    %426 = vector.load %arg52[%c1_188, %c32_189] : memref<2x512xf32, #tpu.memory_space<vmem>>, vector<1x32xf32>
    tpu.vector_store %arg52[%c1_188, %c32_189], %425 {strides = array<i32>} : memref<2x512xf32, #tpu.memory_space<vmem>>, vector<1x32xf32>,
    %c18 = arith.constant 18 : index
    %c0_190 = arith.constant 0 : index
    %427 = vector.load %arg51[%c18, %c0_190] : memref<32x32xf32, #tpu.memory_space<vmem>>, vector<1x32xf32>
    %c1_191 = arith.constant 1 : index
    %c64_192 = arith.constant 64 : index
    %428 = vector.load %arg52[%c1_191, %c64_192] : memref<2x512xf32, #tpu.memory_space<vmem>>, vector<1x32xf32>
    tpu.vector_store %arg52[%c1_191, %c64_192], %427 {strides = array<i32>} : memref<2x512xf32, #tpu.memory_space<vmem>>, vector<1x32xf32>,
    %c19 = arith.constant 19 : index
    %c0_193 = arith.constant 0 : index
    %429 = vector.load %arg51[%c19, %c0_193] : memref<32x32xf32, #tpu.memory_space<vmem>>, vector<1x32xf32>
    %c1_194 = arith.constant 1 : index
    %c96_195 = arith.constant 96 : index
    %430 = vector.load %arg52[%c1_194, %c96_195] : memref<2x512xf32, #tpu.memory_space<vmem>>, vector<1x32xf32>
    tpu.vector_store %arg52[%c1_194, %c96_195], %429 {strides = array<i32>} : memref<2x512xf32, #tpu.memory_space<vmem>>, vector<1x32xf32>,
    %c20 = arith.constant 20 : index
    %c0_196 = arith.constant 0 : index
    %431 = vector.load %arg51[%c20, %c0_196] : memref<32x32xf32, #tpu.memory_space<vmem>>, vector<1x32xf32>
    %c1_197 = arith.constant 1 : index
    %c128_198 = arith.constant 128 : index
    %432 = vector.load %arg52[%c1_197, %c128_198] : memref<2x512xf32, #tpu.memory_space<vmem>>, vector<1x32xf32>
    tpu.vector_store %arg52[%c1_197, %c128_198], %431 {strides = array<i32>} : memref<2x512xf32, #tpu.memory_space<vmem>>, vector<1x32xf32>,
    %c21 = arith.constant 21 : index
    %c0_199 = arith.constant 0 : index
    %433 = vector.load %arg51[%c21, %c0_199] : memref<32x32xf32, #tpu.memory_space<vmem>>, vector<1x32xf32>
    %c1_200 = arith.constant 1 : index
    %c160_201 = arith.constant 160 : index
    %434 = vector.load %arg52[%c1_200, %c160_201] : memref<2x512xf32, #tpu.memory_space<vmem>>, vector<1x32xf32>
    tpu.vector_store %arg52[%c1_200, %c160_201], %433 {strides = array<i32>} : memref<2x512xf32, #tpu.memory_space<vmem>>, vector<1x32xf32>,
    %c22 = arith.constant 22 : index
    %c0_202 = arith.constant 0 : index
    %435 = vector.load %arg51[%c22, %c0_202] : memref<32x32xf32, #tpu.memory_space<vmem>>, vector<1x32xf32>
    %c1_203 = arith.constant 1 : index
    %c192_204 = arith.constant 192 : index
    %436 = vector.load %arg52[%c1_203, %c192_204] : memref<2x512xf32, #tpu.memory_space<vmem>>, vector<1x32xf32>
    tpu.vector_store %arg52[%c1_203, %c192_204], %435 {strides = array<i32>} : memref<2x512xf32, #tpu.memory_space<vmem>>, vector<1x32xf32>,
    %c23 = arith.constant 23 : index
    %c0_205 = arith.constant 0 : index
    %437 = vector.load %arg51[%c23, %c0_205] : memref<32x32xf32, #tpu.memory_space<vmem>>, vector<1x32xf32>
    %c1_206 = arith.constant 1 : index
    %c224_207 = arith.constant 224 : index
    %438 = vector.load %arg52[%c1_206, %c224_207] : memref<2x512xf32, #tpu.memory_space<vmem>>, vector<1x32xf32>
    tpu.vector_store %arg52[%c1_206, %c224_207], %437 {strides = array<i32>} : memref<2x512xf32, #tpu.memory_space<vmem>>, vector<1x32xf32>,
    %c24 = arith.constant 24 : index
    %c0_208 = arith.constant 0 : index
    %439 = vector.load %arg51[%c24, %c0_208] : memref<32x32xf32, #tpu.memory_space<vmem>>, vector<1x32xf32>
    %c1_209 = arith.constant 1 : index
    %c256_210 = arith.constant 256 : index
    %440 = vector.load %arg52[%c1_209, %c256_210] : memref<2x512xf32, #tpu.memory_space<vmem>>, vector<1x32xf32>
    tpu.vector_store %arg52[%c1_209, %c256_210], %439 {strides = array<i32>} : memref<2x512xf32, #tpu.memory_space<vmem>>, vector<1x32xf32>,
    %c25 = arith.constant 25 : index
    %c0_211 = arith.constant 0 : index
    %441 = vector.load %arg51[%c25, %c0_211] : memref<32x32xf32, #tpu.memory_space<vmem>>, vector<1x32xf32>
    %c1_212 = arith.constant 1 : index
    %c288_213 = arith.constant 288 : index
    %442 = vector.load %arg52[%c1_212, %c288_213] : memref<2x512xf32, #tpu.memory_space<vmem>>, vector<1x32xf32>
    tpu.vector_store %arg52[%c1_212, %c288_213], %441 {strides = array<i32>} : memref<2x512xf32, #tpu.memory_space<vmem>>, vector<1x32xf32>,
    %c26 = arith.constant 26 : index
    %c0_214 = arith.constant 0 : index
    %443 = vector.load %arg51[%c26, %c0_214] : memref<32x32xf32, #tpu.memory_space<vmem>>, vector<1x32xf32>
    %c1_215 = arith.constant 1 : index
    %c320_216 = arith.constant 320 : index
    %444 = vector.load %arg52[%c1_215, %c320_216] : memref<2x512xf32, #tpu.memory_space<vmem>>, vector<1x32xf32>
    tpu.vector_store %arg52[%c1_215, %c320_216], %443 {strides = array<i32>} : memref<2x512xf32, #tpu.memory_space<vmem>>, vector<1x32xf32>,
    %c27 = arith.constant 27 : index
    %c0_217 = arith.constant 0 : index
    %445 = vector.load %arg51[%c27, %c0_217] : memref<32x32xf32, #tpu.memory_space<vmem>>, vector<1x32xf32>
    %c1_218 = arith.constant 1 : index
    %c352_219 = arith.constant 352 : index
    %446 = vector.load %arg52[%c1_218, %c352_219] : memref<2x512xf32, #tpu.memory_space<vmem>>, vector<1x32xf32>
    tpu.vector_store %arg52[%c1_218, %c352_219], %445 {strides = array<i32>} : memref<2x512xf32, #tpu.memory_space<vmem>>, vector<1x32xf32>,
    %c28 = arith.constant 28 : index
    %c0_220 = arith.constant 0 : index
    %447 = vector.load %arg51[%c28, %c0_220] : memref<32x32xf32, #tpu.memory_space<vmem>>, vector<1x32xf32>
    %c1_221 = arith.constant 1 : index
    %c384_222 = arith.constant 384 : index
    %448 = vector.load %arg52[%c1_221, %c384_222] : memref<2x512xf32, #tpu.memory_space<vmem>>, vector<1x32xf32>
    tpu.vector_store %arg52[%c1_221, %c384_222], %447 {strides = array<i32>} : memref<2x512xf32, #tpu.memory_space<vmem>>, vector<1x32xf32>,
    %c29 = arith.constant 29 : index
    %c0_223 = arith.constant 0 : index
    %449 = vector.load %arg51[%c29, %c0_223] : memref<32x32xf32, #tpu.memory_space<vmem>>, vector<1x32xf32>
    %c1_224 = arith.constant 1 : index
    %c416_225 = arith.constant 416 : index
    %450 = vector.load %arg52[%c1_224, %c416_225] : memref<2x512xf32, #tpu.memory_space<vmem>>, vector<1x32xf32>
    tpu.vector_store %arg52[%c1_224, %c416_225], %449 {strides = array<i32>} : memref<2x512xf32, #tpu.memory_space<vmem>>, vector<1x32xf32>,
    %c30 = arith.constant 30 : index
    %c0_226 = arith.constant 0 : index
    %451 = vector.load %arg51[%c30, %c0_226] : memref<32x32xf32, #tpu.memory_space<vmem>>, vector<1x32xf32>
    %c1_227 = arith.constant 1 : index
    %c448_228 = arith.constant 448 : index
    %452 = vector.load %arg52[%c1_227, %c448_228] : memref<2x512xf32, #tpu.memory_space<vmem>>, vector<1x32xf32>
    tpu.vector_store %arg52[%c1_227, %c448_228], %451 {strides = array<i32>} : memref<2x512xf32, #tpu.memory_space<vmem>>, vector<1x32xf32>,
    %c31 = arith.constant 31 : index
    %c0_229 = arith.constant 0 : index
    %453 = vector.load %arg51[%c31, %c0_229] : memref<32x32xf32, #tpu.memory_space<vmem>>, vector<1x32xf32>
    %c1_230 = arith.constant 1 : index
    %c480_231 = arith.constant 480 : index
    %454 = vector.load %arg52[%c1_230, %c480_231] : memref<2x512xf32, #tpu.memory_space<vmem>>, vector<1x32xf32>
    tpu.vector_store %arg52[%c1_230, %c480_231], %453 {strides = array<i32>} : memref<2x512xf32, #tpu.memory_space<vmem>>, vector<1x32xf32>,
    %c0_232 = arith.constant 0 : index
    %c0_233 = arith.constant 0 : index
    %455 = vector.load %arg52[%c0_232, %c0_233] : memref<2x512xf32, #tpu.memory_space<vmem>>, vector<2x512xf32>
    %c0_234 = arith.constant 0 : index
    %c0_235 = arith.constant 0 : index
    %456 = vector.load %arg32[%c0_234, %c0_235] : memref<1x512xf32, #tpu.memory_space<vmem>>, vector<1x512xf32>
    %c0_236 = arith.constant 0 : index
    %c0_237 = arith.constant 0 : index
    %457 = vector.load %arg33[%c0_236, %c0_237] : memref<1x512xf32, #tpu.memory_space<vmem>>, vector<1x512xf32>
    %cst_238 = arith.constant dense<0.000000e+00> : vector<2xf32>
    %458 = vector.multi_reduction <add>, %455, %cst_238 [1] : vector<2x512xf32> to vector<2xf32>
    %459 = vector.shape_cast %458 : vector<2xf32> to vector<2x1xf32>
    %cst_239 = arith.constant 5.120000e+02 : f32
    %460 = vector.broadcast %cst_239 : f32 to vector<2x1xf32>
    %461 = arith.divf %459, %460 : vector<2x1xf32>
    %462 = vector.broadcast %461 : vector<2x1xf32> to vector<2x512xf32>
    %463 = arith.subf %455, %462 : vector<2x512xf32>
    %464 = arith.mulf %463, %463 : vector<2x512xf32>
    %cst_240 = arith.constant dense<0.000000e+00> : vector<2xf32>
    %465 = vector.multi_reduction <add>, %464, %cst_240 [1] : vector<2x512xf32> to vector<2xf32>
    %466 = vector.shape_cast %465 : vector<2xf32> to vector<2x1xf32>
    %cst_241 = arith.constant 5.120000e+02 : f32
    %467 = vector.broadcast %cst_241 : f32 to vector<2x1xf32>
    %468 = arith.divf %466, %467 : vector<2x1xf32>
    %469 = vector.broadcast %461 : vector<2x1xf32> to vector<2x512xf32>
    %470 = arith.subf %455, %469 : vector<2x512xf32>
    %cst_242 = arith.constant 9.99999974E-6 : f32
    %471 = vector.broadcast %cst_242 : f32 to vector<2x1xf32>
    %472 = arith.addf %468, %471 : vector<2x1xf32>
    %473 = math.rsqrt %472 : vector<2x1xf32>
    %474 = vector.broadcast %473 : vector<2x1xf32> to vector<2x512xf32>
    %475 = arith.mulf %470, %474 : vector<2x512xf32>
    %476 = vector.broadcast %456 : vector<1x512xf32> to vector<2x512xf32>
    %477 = arith.mulf %475, %476 : vector<2x512xf32>
    %478 = vector.broadcast %457 : vector<1x512xf32> to vector<2x512xf32>
    %479 = arith.addf %477, %478 : vector<2x512xf32>
    %c0_243 = arith.constant 0 : index
    %c0_244 = arith.constant 0 : index
    %480 = vector.load %arg34[%c0_243, %c0_244] : memref<512x64xf32, #tpu.memory_space<vmem>>, vector<512x64xf32>
    %cst_245 = arith.constant dense<0.000000e+00> : vector<2x64xf32>
    %481 = tpu.matmul %479, %480, %cst_245 {dimension_numbers = #tpu.dot_dimension_numbers<[1], [0], [0], [1], [0, 0, 1, 1], [], []>} : vector<2x512xf32>, vector<512x64xf32>, vector<2x64xf32> -> vector<2x64xf32>
    %c0_246 = arith.constant 0 : index
    %c0_247 = arith.constant 0 : index
    %482 = vector.load %arg35[%c0_246, %c0_247] : memref<1x64xf32, #tpu.memory_space<vmem>>, vector<1x64xf32>
    %483 = vector.broadcast %482 : vector<1x64xf32> to vector<2x64xf32>
    %484 = arith.addf %481, %483 : vector<2x64xf32>
    %c0_248 = arith.constant 0 : index
    %c0_249 = arith.constant 0 : index
    %485 = vector.load %arg36[%c0_248, %c0_249] : memref<1x64xf32, #tpu.memory_space<vmem>>, vector<1x64xf32>
    %c0_250 = arith.constant 0 : index
    %c0_251 = arith.constant 0 : index
    %486 = vector.load %arg37[%c0_250, %c0_251] : memref<1x64xf32, #tpu.memory_space<vmem>>, vector<1x64xf32>
    %cst_252 = arith.constant dense<0.000000e+00> : vector<2xf32>
    %487 = vector.multi_reduction <add>, %484, %cst_252 [1] : vector<2x64xf32> to vector<2xf32>
    %488 = vector.shape_cast %487 : vector<2xf32> to vector<2x1xf32>
    %cst_253 = arith.constant 6.400000e+01 : f32
    %489 = vector.broadcast %cst_253 : f32 to vector<2x1xf32>
    %490 = arith.divf %488, %489 : vector<2x1xf32>
    %491 = vector.broadcast %490 : vector<2x1xf32> to vector<2x64xf32>
    %492 = arith.subf %484, %491 : vector<2x64xf32>
    %493 = arith.mulf %492, %492 : vector<2x64xf32>
    %cst_254 = arith.constant dense<0.000000e+00> : vector<2xf32>
    %494 = vector.multi_reduction <add>, %493, %cst_254 [1] : vector<2x64xf32> to vector<2xf32>
    %495 = vector.shape_cast %494 : vector<2xf32> to vector<2x1xf32>
    %cst_255 = arith.constant 6.400000e+01 : f32
    %496 = vector.broadcast %cst_255 : f32 to vector<2x1xf32>
    %497 = arith.divf %495, %496 : vector<2x1xf32>
    %498 = vector.broadcast %490 : vector<2x1xf32> to vector<2x64xf32>
    %499 = arith.subf %484, %498 : vector<2x64xf32>
    %cst_256 = arith.constant 9.99999974E-6 : f32
    %500 = vector.broadcast %cst_256 : f32 to vector<2x1xf32>
    %501 = arith.addf %497, %500 : vector<2x1xf32>
    %502 = math.rsqrt %501 : vector<2x1xf32>
    %503 = vector.broadcast %502 : vector<2x1xf32> to vector<2x64xf32>
    %504 = arith.mulf %499, %503 : vector<2x64xf32>
    %505 = vector.broadcast %485 : vector<1x64xf32> to vector<2x64xf32>
    %506 = arith.mulf %504, %505 : vector<2x64xf32>
    %507 = vector.broadcast %486 : vector<1x64xf32> to vector<2x64xf32>
    %508 = arith.addf %506, %507 : vector<2x64xf32>
    %cst_257 = arith.constant 0.000000e+00 : f32
    %509 = vector.broadcast %cst_257 : f32 to vector<2x64xf32>
    %510 = arith.maximumf %508, %509 : vector<2x64xf32>
    %c0_258 = arith.constant 0 : index
    %c0_259 = arith.constant 0 : index
    %511 = vector.load %arg38[%c0_258, %c0_259] : memref<64x32xf32, #tpu.memory_space<vmem>>, vector<64x32xf32>
    %cst_260 = arith.constant dense<0.000000e+00> : vector<2x32xf32>
    %512 = tpu.matmul %510, %511, %cst_260 {dimension_numbers = #tpu.dot_dimension_numbers<[1], [0], [0], [1], [0, 0, 1, 1], [], []>} : vector<2x64xf32>, vector<64x32xf32>, vector<2x32xf32> -> vector<2x32xf32>
    %c0_261 = arith.constant 0 : index
    %c0_262 = arith.constant 0 : index
    %513 = vector.load %arg39[%c0_261, %c0_262] : memref<1x32xf32, #tpu.memory_space<vmem>>, vector<1x32xf32>
    %514 = vector.broadcast %513 : vector<1x32xf32> to vector<2x32xf32>
    %515 = arith.addf %512, %514 : vector<2x32xf32>
    %c0_263 = arith.constant 0 : index
    %c0_264 = arith.constant 0 : index
    %516 = vector.load %arg40[%c0_263, %c0_264] : memref<1x32xf32, #tpu.memory_space<vmem>>, vector<1x32xf32>
    %c0_265 = arith.constant 0 : index
    %c0_266 = arith.constant 0 : index
    %517 = vector.load %arg41[%c0_265, %c0_266] : memref<1x32xf32, #tpu.memory_space<vmem>>, vector<1x32xf32>
    %cst_267 = arith.constant dense<0.000000e+00> : vector<2xf32>
    %518 = vector.multi_reduction <add>, %515, %cst_267 [1] : vector<2x32xf32> to vector<2xf32>
    %519 = vector.shape_cast %518 : vector<2xf32> to vector<2x1xf32>
    %cst_268 = arith.constant 3.200000e+01 : f32
    %520 = vector.broadcast %cst_268 : f32 to vector<2x1xf32>
    %521 = arith.divf %519, %520 : vector<2x1xf32>
    %522 = vector.broadcast %521 : vector<2x1xf32> to vector<2x32xf32>
    %523 = arith.subf %515, %522 : vector<2x32xf32>
    %524 = arith.mulf %523, %523 : vector<2x32xf32>
    %cst_269 = arith.constant dense<0.000000e+00> : vector<2xf32>
    %525 = vector.multi_reduction <add>, %524, %cst_269 [1] : vector<2x32xf32> to vector<2xf32>
    %526 = vector.shape_cast %525 : vector<2xf32> to vector<2x1xf32>
    %cst_270 = arith.constant 3.200000e+01 : f32
    %527 = vector.broadcast %cst_270 : f32 to vector<2x1xf32>
    %528 = arith.divf %526, %527 : vector<2x1xf32>
    %529 = vector.broadcast %521 : vector<2x1xf32> to vector<2x32xf32>
    %530 = arith.subf %515, %529 : vector<2x32xf32>
    %cst_271 = arith.constant 9.99999974E-6 : f32
    %531 = vector.broadcast %cst_271 : f32 to vector<2x1xf32>
    %532 = arith.addf %528, %531 : vector<2x1xf32>
    %533 = math.rsqrt %532 : vector<2x1xf32>
    %534 = vector.broadcast %533 : vector<2x1xf32> to vector<2x32xf32>
    %535 = arith.mulf %530, %534 : vector<2x32xf32>
    %536 = vector.broadcast %516 : vector<1x32xf32> to vector<2x32xf32>
    %537 = arith.mulf %535, %536 : vector<2x32xf32>
    %538 = vector.broadcast %517 : vector<1x32xf32> to vector<2x32xf32>
    %539 = arith.addf %537, %538 : vector<2x32xf32>
    %cst_272 = arith.constant 0.000000e+00 : f32
    %540 = vector.broadcast %cst_272 : f32 to vector<2x32xf32>
    %541 = arith.maximumf %539, %540 : vector<2x32xf32>
    %c0_273 = arith.constant 0 : index
    %c0_274 = arith.constant 0 : index
    %542 = vector.load %arg1[%c0_273, %c0_274] : memref<2x2xf32, #tpu.memory_space<vmem>>, vector<2x2xf32>
    %c0_275 = arith.constant 0 : index
    %c0_276 = arith.constant 0 : index
    %543 = vector.load %arg2[%c0_275, %c0_276] : memref<2x2xf32, #tpu.memory_space<vmem>>, vector<2x2xf32>
    %c0_277 = arith.constant 0 : index
    %c0_278 = arith.constant 0 : index
    %544 = vector.load %arg42[%c0_277, %c0_278] : memref<2x32xf32, #tpu.memory_space<vmem>>, vector<2x32xf32>
    %c0_279 = arith.constant 0 : index
    %c0_280 = arith.constant 0 : index
    %545 = vector.load %arg43[%c0_279, %c0_280] : memref<2x32xf32, #tpu.memory_space<vmem>>, vector<2x32xf32>
    %c0_281 = arith.constant 0 : index
    %c0_282 = arith.constant 0 : index
    %546 = vector.load %arg44[%c0_281, %c0_282] : memref<32x32xf32, #tpu.memory_space<vmem>>, vector<32x32xf32>
    %cst_283 = arith.constant dense<0.000000e+00> : vector<2x32xf32>
    %547 = tpu.matmul %541, %546, %cst_283 {dimension_numbers = #tpu.dot_dimension_numbers<[1], [0], [0], [1], [0, 0, 1, 1], [], []>} : vector<2x32xf32>, vector<32x32xf32>, vector<2x32xf32> -> vector<2x32xf32>
    %c0_284 = arith.constant 0 : index
    %c0_285 = arith.constant 0 : index
    %548 = vector.load %arg45[%c0_284, %c0_285] : memref<1x32xf32, #tpu.memory_space<vmem>>, vector<1x32xf32>
    %549 = vector.broadcast %548 : vector<1x32xf32> to vector<2x32xf32>
    %550 = arith.addf %547, %549 : vector<2x32xf32>
    %551 = vector.extract_strided_slice %542 {offsets = [0, 0], sizes = [2, 1], strides = [1, 1]} : vector<2x2xf32> to vector<2x1xf32>
    %552 = vector.extract_strided_slice %544 {offsets = [0, 0], sizes = [1, 32], strides = [1, 1]} : vector<2x32xf32> to vector<1x32xf32>
    %553 = vector.broadcast %551 : vector<2x1xf32> to vector<2x32xf32>
    %554 = vector.broadcast %552 : vector<1x32xf32> to vector<2x32xf32>
    %555 = arith.mulf %553, %554 : vector<2x32xf32>
    %556 = arith.addf %550, %555 : vector<2x32xf32>
    %557 = vector.extract_strided_slice %542 {offsets = [0, 1], sizes = [2, 1], strides = [1, 1]} : vector<2x2xf32> to vector<2x1xf32>
    %558 = vector.extract_strided_slice %544 {offsets = [1, 0], sizes = [1, 32], strides = [1, 1]} : vector<2x32xf32> to vector<1x32xf32>
    %559 = vector.broadcast %557 : vector<2x1xf32> to vector<2x32xf32>
    %560 = vector.broadcast %558 : vector<1x32xf32> to vector<2x32xf32>
    %561 = arith.mulf %559, %560 : vector<2x32xf32>
    %562 = arith.addf %556, %561 : vector<2x32xf32>
    %563 = vector.extract_strided_slice %543 {offsets = [0, 0], sizes = [2, 1], strides = [1, 1]} : vector<2x2xf32> to vector<2x1xf32>
    %564 = vector.extract_strided_slice %545 {offsets = [0, 0], sizes = [1, 32], strides = [1, 1]} : vector<2x32xf32> to vector<1x32xf32>
    %565 = vector.broadcast %563 : vector<2x1xf32> to vector<2x32xf32>
    %566 = vector.broadcast %564 : vector<1x32xf32> to vector<2x32xf32>
    %567 = arith.mulf %565, %566 : vector<2x32xf32>
    %568 = arith.addf %562, %567 : vector<2x32xf32>
    %569 = vector.extract_strided_slice %543 {offsets = [0, 1], sizes = [2, 1], strides = [1, 1]} : vector<2x2xf32> to vector<2x1xf32>
    %570 = vector.extract_strided_slice %545 {offsets = [1, 0], sizes = [1, 32], strides = [1, 1]} : vector<2x32xf32> to vector<1x32xf32>
    %571 = vector.broadcast %569 : vector<2x1xf32> to vector<2x32xf32>
    %572 = vector.broadcast %570 : vector<1x32xf32> to vector<2x32xf32>
    %573 = arith.mulf %571, %572 : vector<2x32xf32>
    %574 = arith.addf %568, %573 : vector<2x32xf32>
    %c0_286 = arith.constant 0 : index
    %c0_287 = arith.constant 0 : index
    %575 = vector.load %arg46[%c0_286, %c0_287] : memref<1x32xf32, #tpu.memory_space<vmem>>, vector<1x32xf32>
    %c0_288 = arith.constant 0 : index
    %c0_289 = arith.constant 0 : index
    %576 = vector.load %arg47[%c0_288, %c0_289] : memref<1x32xf32, #tpu.memory_space<vmem>>, vector<1x32xf32>
    %cst_290 = arith.constant dense<0.000000e+00> : vector<2xf32>
    %577 = vector.multi_reduction <add>, %574, %cst_290 [1] : vector<2x32xf32> to vector<2xf32>
    %578 = vector.shape_cast %577 : vector<2xf32> to vector<2x1xf32>
    %cst_291 = arith.constant 3.200000e+01 : f32
    %579 = vector.broadcast %cst_291 : f32 to vector<2x1xf32>
    %580 = arith.divf %578, %579 : vector<2x1xf32>
    %581 = vector.broadcast %580 : vector<2x1xf32> to vector<2x32xf32>
    %582 = arith.subf %574, %581 : vector<2x32xf32>
    %583 = arith.mulf %582, %582 : vector<2x32xf32>
    %cst_292 = arith.constant dense<0.000000e+00> : vector<2xf32>
    %584 = vector.multi_reduction <add>, %583, %cst_292 [1] : vector<2x32xf32> to vector<2xf32>
    %585 = vector.shape_cast %584 : vector<2xf32> to vector<2x1xf32>
    %cst_293 = arith.constant 3.200000e+01 : f32
    %586 = vector.broadcast %cst_293 : f32 to vector<2x1xf32>
    %587 = arith.divf %585, %586 : vector<2x1xf32>
    %588 = vector.broadcast %580 : vector<2x1xf32> to vector<2x32xf32>
    %589 = arith.subf %574, %588 : vector<2x32xf32>
    %cst_294 = arith.constant 9.99999974E-6 : f32
    %590 = vector.broadcast %cst_294 : f32 to vector<2x1xf32>
    %591 = arith.addf %587, %590 : vector<2x1xf32>
    %592 = math.rsqrt %591 : vector<2x1xf32>
    %593 = vector.broadcast %592 : vector<2x1xf32> to vector<2x32xf32>
    %594 = arith.mulf %589, %593 : vector<2x32xf32>
    %595 = vector.broadcast %575 : vector<1x32xf32> to vector<2x32xf32>
    %596 = arith.mulf %594, %595 : vector<2x32xf32>
    %597 = vector.broadcast %576 : vector<1x32xf32> to vector<2x32xf32>
    %598 = arith.addf %596, %597 : vector<2x32xf32>
    %cst_295 = arith.constant 0.000000e+00 : f32
    %599 = vector.broadcast %cst_295 : f32 to vector<2x32xf32>
    %600 = arith.maximumf %598, %599 : vector<2x32xf32>
    %c0_296 = arith.constant 0 : index
    %c0_297 = arith.constant 0 : index
    %601 = vector.load %arg48[%c0_296, %c0_297] : memref<32x5xf32, #tpu.memory_space<vmem>>, vector<32x5xf32>
    %cst_298 = arith.constant dense<0.000000e+00> : vector<2x5xf32>
    %602 = tpu.matmul %600, %601, %cst_298 {dimension_numbers = #tpu.dot_dimension_numbers<[1], [0], [0], [1], [0, 0, 1, 1], [], []>} : vector<2x32xf32>, vector<32x5xf32>, vector<2x5xf32> -> vector<2x5xf32>
    %c0_299 = arith.constant 0 : index
    %c0_300 = arith.constant 0 : index
    %603 = vector.load %arg49[%c0_299, %c0_300] : memref<1x5xf32, #tpu.memory_space<vmem>>, vector<1x5xf32>
    %604 = vector.broadcast %603 : vector<1x5xf32> to vector<2x5xf32>
    %605 = arith.addf %602, %604 : vector<2x5xf32>
    %c0_301 = arith.constant 0 : index
    %c0_302 = arith.constant 0 : index
    %606 = vector.load %arg50[%c0_301, %c0_302] : memref<2x5xf32, #tpu.memory_space<vmem>>, vector<2x5xf32>
    tpu.vector_store %arg50[%c0_301, %c0_302], %605 {strides = array<i32>} : memref<2x5xf32, #tpu.memory_space<vmem>>, vector<2x5xf32>,
    return
  }
}

</mosaic_0001>

<bundles_post_ra>
// kernel: squeeze.1
= control target key start
LH: loop header
LB: loop body
LE: loop exit
PB: predicated region body
PF: predicated region fallthrough
CT: control target
= control target key end

     0   :  { %s370_s10 = smov 124   ;;  %s371_s11 = smov 120   ;;  %vm3_vm0 = vcmask 31744   ;;  %s523_s0 = inlined_call_operand.vmem [shape: s32[2,1,16,16], index: 0, kind: input, shape index: {}]   ;;  %s524_s1 = inlined_call_operand.vmem [shape: s32[2,4,4,4,4], index: 1, kind: output, shape index: {}]  }
   0x1   :  { %v328_v0 = vld [vmem:[%s523_s0 + $0x10] sm:$0xff]   ;;  %v27_v1 = vld [vmem:[%s523_s0] sm:$0xff]   ;;  %v329_v2 = vld [vmem:[%s523_s0 + $0x18] sm:$0xff]  }
   0x2   :  { %46 = vrot.lane.b32.xlu1 %v328_v0, %s370_s10  ;;  %28 = vrot.lane.b32.xlu0 %v27_v1, %s370_s10  ;;  %v327_v3 = vld [vmem:[%s523_s0 + $0x8] sm:$0xff]   ;;  %s372_s0 = smov 116   ;;  %4 = vst.msk [vmem:[#allocation0] ss:$8 sm:$0xf] %vm3_vm0, %v27_v1  }
   0x3   :  { %63 = vrot.lane.b32.xlu2 %v27_v1, %s371_s11  ;;  %5 = vst.msk [vmem:[#allocation0] ss:$8 sm:$0xf0] %vm3_vm0, %v27_v1  }
   0x4   :  { %24 = vst.msk [vmem:[#allocation0 + $0xc0] ss:$8 sm:$0xf] %vm3_vm0, %v329_v2  }
   0x5   :  { %26 = vst.msk [vmem:[#allocation0 + $0xc0] ss:$8 sm:$0xf0] %vm3_vm0, %v329_v2  }
   0x6   :  { %17 = vst.msk [vmem:[#allocation0 + $0x80] ss:$8 sm:$0xf] %vm3_vm0, %v328_v0  }
   0x7   :  { %19 = vst.msk [vmem:[#allocation0 + $0x80] ss:$8 sm:$0xf0] %vm3_vm0, %v328_v0  }
   0x8   :  { %10 = vst.msk [vmem:[#allocation0 + $0x40] ss:$8 sm:$0xf] %vm3_vm0, %v327_v3  }
   0x9   :  { %12 = vst.msk [vmem:[#allocation0 + $0x40] ss:$8 sm:$0xf0] %vm3_vm0, %v327_v3  }
   0xa   :  { %55 = vrot.lane.b32.xlu1 %v329_v2, %s370_s10  ;;  %37 = vrot.lane.b32.xlu0 %v327_v3, %s370_s10 }
   0xb   :  { %72 = vrot.lane.b32.xlu2 %v327_v3, %s371_s11 }
  0x12   :  { %90 = vrot.lane.b32.xlu1 %v329_v2, %s371_s11  ;;  %81 = vrot.lane.b32.xlu0 %v328_v0, %s371_s11 }
  0x13   :  { %98 = vrot.lane.b32.xlu2 %v27_v1, %s372_s0 }
  0x1a   :  { %116 = vrot.lane.b32.xlu1 %v328_v0, %s372_s0  ;;  %107 = vrot.lane.b32.xlu0 %v327_v3, %s372_s0 }
  0x1b   :  { %125 = vrot.lane.b32.xlu2 %v329_v2, %s372_s0 }
  0x5d   :  { %v64_v4 = vpop.permute.xlu2 %63  }
  0x5e   :  { %67 = vst.msk [vmem:[#allocation0 + $0x2] ss:$8 sm:$0xf] %vm3_vm0, %v64_v4  }
  0x5f   :  { %69 = vst.msk [vmem:[#allocation0 + $0x2] ss:$8 sm:$0xf0] %vm3_vm0, %v64_v4  }
  0x65   :  { %v73_v5 = vpop.permute.xlu2 %72  }
  0x66   :  { %76 = vst.msk [vmem:[#allocation0 + $0x42] ss:$8 sm:$0xf] %vm3_vm0, %v73_v5  }
  0x67   :  { %78 = vst.msk [vmem:[#allocation0 + $0x42] ss:$8 sm:$0xf0] %vm3_vm0, %v73_v5  }
  0x6d   :  { %v99_v6 = vpop.permute.xlu2 %98  }
  0x6e   :  { %102 = vst.msk [vmem:[#allocation0 + $0x3] ss:$8 sm:$0xf] %vm3_vm0, %v99_v6  }
  0x6f   :  { %104 = vst.msk [vmem:[#allocation0 + $0x3] ss:$8 sm:$0xf0] %vm3_vm0, %v99_v6  }
  0x74   :  { %v47_v7 = vpop.permute.xlu1 %46   ;;  %v29_v8 = vpop.permute.xlu0 %28  }
  0x75   :  { %50 = vst.msk [vmem:[#allocation0 + $0x81] ss:$8 sm:$0xf] %vm3_vm0, %v47_v7   ;;  %v126_v9 = vpop.permute.xlu2 %125  }
  0x76   :  { %52 = vst.msk [vmem:[#allocation0 + $0x81] ss:$8 sm:$0xf0] %vm3_vm0, %v47_v7  }
  0x77   :  { %32 = vst.msk [vmem:[#allocation0 + $0x1] ss:$8 sm:$0xf] %vm3_vm0, %v29_v8  }
  0x78   :  { %34 = vst.msk [vmem:[#allocation0 + $0x1] ss:$8 sm:$0xf0] %vm3_vm0, %v29_v8  }
  0x79   :  { %129 = vst.msk [vmem:[#allocation0 + $0xc3] ss:$8 sm:$0xf] %vm3_vm0, %v126_v9  }
  0x7a   :  { %131 = vst.msk [vmem:[#allocation0 + $0xc3] ss:$8 sm:$0xf0] %vm3_vm0, %v126_v9  }
  0x7c   :  { %v56_v10 = vpop.permute.xlu1 %55   ;;  %v38_v11 = vpop.permute.xlu0 %37  }
  0x7d   :  { %59 = vst.msk [vmem:[#allocation0 + $0xc1] ss:$8 sm:$0xf] %vm3_vm0, %v56_v10  }
  0x7e   :  { %v134_v12 = vld [vmem:[#allocation0] sm:$0xf]  ;;  %v139_v13 = vld [vmem:[#allocation0 + $0x8] sm:$0xf]  ;;  %v145_v14 = vld [vmem:[#allocation0 + $0x10] sm:$0xf] }
  0x7f   :  { %137 = vst [vmem:[%s524_s1] sm:$0xf] %v134_v12  ;;  %v151_v15 = vld [vmem:[#allocation0 + $0x18] sm:$0xf]  ;;  %v157_v16 = vld [vmem:[#allocation0 + $0x20] sm:$0xf] }
  0x80   :  { %61 = vst.msk [vmem:[#allocation0 + $0xc1] ss:$8 sm:$0xf0] %vm3_vm0, %v56_v10   ;;  %v163_v17 = vld [vmem:[#allocation0 + $0x28] sm:$0xf] }
  0x81   :  { %336 = vst [vmem:[%s524_s1 + $0x4] sm:$0xf] %v139_v13  ;;  %v169_v18 = vld [vmem:[#allocation0 + $0x30] sm:$0xf]  ;;  %v175_v21 = vld [vmem:[#allocation0 + $0x38] sm:$0xf] }
  0x82   :  { %337 = vst [vmem:[%s524_s1 + $0x8] sm:$0xf] %v145_v14 }
  0x83   :  { %338 = vst [vmem:[%s524_s1 + $0xc] sm:$0xf] %v151_v15 }
  0x84   :  { %v91_v19 = vpop.permute.xlu1 %90   ;;  %v82_v20 = vpop.permute.xlu0 %81   ;;  %339 = vst [vmem:[%s524_s1 + $0x10] sm:$0xf] %v157_v16 }
  0x85   :  { %340 = vst [vmem:[%s524_s1 + $0x14] sm:$0xf] %v163_v17 }
  0x86   :  { %341 = vst [vmem:[%s524_s1 + $0x18] sm:$0xf] %v169_v18 }
  0x87   :  { %342 = vst [vmem:[%s524_s1 + $0x1c] sm:$0xf] %v175_v21 }
  0x88   :  { %41 = vst.msk [vmem:[#allocation0 + $0x41] ss:$8 sm:$0xf] %vm3_vm0, %v38_v11  }
  0x89   :  { %43 = vst.msk [vmem:[#allocation0 + $0x41] ss:$8 sm:$0xf0] %vm3_vm0, %v38_v11  }
  0x8a   :  { %94 = vst.msk [vmem:[#allocation0 + $0xc2] ss:$8 sm:$0xf] %vm3_vm0, %v91_v19  }
  0x8b   :  { %96 = vst.msk [vmem:[#allocation0 + $0xc2] ss:$8 sm:$0xf0] %vm3_vm0, %v91_v19  }
  0x8c   :  { %v117_v22 = vpop.permute.xlu1 %116   ;;  %v108_v23 = vpop.permute.xlu0 %107   ;;  %85 = vst.msk [vmem:[#allocation0 + $0x82] ss:$8 sm:$0xf] %vm3_vm0, %v82_v20  }
  0x8d   :  { %87 = vst.msk [vmem:[#allocation0 + $0x82] ss:$8 sm:$0xf0] %vm3_vm0, %v82_v20  }
  0x8e   :  { %120 = vst.msk [vmem:[#allocation0 + $0x83] ss:$8 sm:$0xf] %vm3_vm0, %v117_v22  }
  0x8f   :  { %122 = vst.msk [vmem:[#allocation0 + $0x83] ss:$8 sm:$0xf0] %vm3_vm0, %v117_v22  }
  0x90   :  { %111 = vst.msk [vmem:[#allocation0 + $0x43] ss:$8 sm:$0xf] %vm3_vm0, %v108_v23  }
  0x91   :  { %v277_v24 = vld [vmem:[#allocation0 + $0xc0] sm:$0xf]  ;;  %v283_v25 = vld [vmem:[#allocation0 + $0xc8] sm:$0xf]  ;;  %v289_v26 = vld [vmem:[#allocation0 + $0xd0] sm:$0xf] }
  0x92   :  { %v295_v27 = vld [vmem:[#allocation0 + $0xd8] sm:$0xf]  ;;  %359 = vst [vmem:[%s524_s1 + $0x60] sm:$0xf] %v277_v24  ;;  %v301_v28 = vld [vmem:[#allocation0 + $0xe0] sm:$0xf] }
  0x93   :  { %360 = vst [vmem:[%s524_s1 + $0x64] sm:$0xf] %v283_v25  ;;  %v307_v29 = vld [vmem:[#allocation0 + $0xe8] sm:$0xf]  ;;  %v313_v30 = vld [vmem:[#allocation0 + $0xf0] sm:$0xf] }
  0x94   :  { %361 = vst [vmem:[%s524_s1 + $0x68] sm:$0xf] %v289_v26  ;;  %v319_v31 = vld [vmem:[#allocation0 + $0xf8] sm:$0xf] }
  0x95   :  { %362 = vst [vmem:[%s524_s1 + $0x6c] sm:$0xf] %v295_v27  ;;  %v229_v32 = vld [vmem:[#allocation0 + $0x80] sm:$0xf]  ;;  %v235_v33 = vld [vmem:[#allocation0 + $0x88] sm:$0xf] }
  0x96   :  { %363 = vst [vmem:[%s524_s1 + $0x70] sm:$0xf] %v301_v28  ;;  %v241_v34 = vld [vmem:[#allocation0 + $0x90] sm:$0xf]  ;;  %v247_v35 = vld [vmem:[#allocation0 + $0x98] sm:$0xf] }
  0x97   :  { %364 = vst [vmem:[%s524_s1 + $0x74] sm:$0xf] %v307_v29  ;;  %v253_v36 = vld [vmem:[#allocation0 + $0xa0] sm:$0xf]  ;;  %v259_v37 = vld [vmem:[#allocation0 + $0xa8] sm:$0xf] }
  0x98   :  { %365 = vst [vmem:[%s524_s1 + $0x78] sm:$0xf] %v313_v30  ;;  %v265_v38 = vld [vmem:[#allocation0 + $0xb0] sm:$0xf]  ;;  %v271_v39 = vld [vmem:[#allocation0 + $0xb8] sm:$0xf] }
  0x99   :  { %366 = vst [vmem:[%s524_s1 + $0x7c] sm:$0xf] %v319_v31  ;;  %v181_v40 = vld [vmem:[#allocation0 + $0x40] sm:$0xf]  ;;  %v187_v41 = vld [vmem:[#allocation0 + $0x48] sm:$0xf] }
  0x9a   :  { %351 = vst [vmem:[%s524_s1 + $0x40] sm:$0xf] %v229_v32  ;;  %v193_v42 = vld [vmem:[#allocation0 + $0x50] sm:$0xf]  ;;  %v199_v43 = vld [vmem:[#allocation0 + $0x58] sm:$0xf] }
  0x9b   :  { %352 = vst [vmem:[%s524_s1 + $0x44] sm:$0xf] %v235_v33 }
  0x9c   :  { %353 = vst [vmem:[%s524_s1 + $0x48] sm:$0xf] %v241_v34 }
  0x9d   :  { %354 = vst [vmem:[%s524_s1 + $0x4c] sm:$0xf] %v247_v35 }
  0x9e   :  { %355 = vst [vmem:[%s524_s1 + $0x50] sm:$0xf] %v253_v36 }
  0x9f   :  { %356 = vst [vmem:[%s524_s1 + $0x54] sm:$0xf] %v259_v37 }
  0xa0   :  { %357 = vst [vmem:[%s524_s1 + $0x58] sm:$0xf] %v265_v38 }
  0xa1   :  { %358 = vst [vmem:[%s524_s1 + $0x5c] sm:$0xf] %v271_v39 }
  0xa2   :  { %113 = vst.msk [vmem:[#allocation0 + $0x43] ss:$8 sm:$0xf0] %vm3_vm0, %v108_v23  }
  0xa3   :  { %343 = vst [vmem:[%s524_s1 + $0x20] sm:$0xf] %v181_v40 }
  0xa4   :  { %344 = vst [vmem:[%s524_s1 + $0x24] sm:$0xf] %v187_v41 }
  0xa5   :  { %345 = vst [vmem:[%s524_s1 + $0x28] sm:$0xf] %v193_v42 }
  0xa6   :  { %346 = vst [vmem:[%s524_s1 + $0x2c] sm:$0xf] %v199_v43 }
  0xa9   :  { %v205_v44 = vld [vmem:[#allocation0 + $0x60] sm:$0xf]  ;;  %v211_v45 = vld [vmem:[#allocation0 + $0x68] sm:$0xf]  ;;  %v217_v46 = vld [vmem:[#allocation0 + $0x70] sm:$0xf] }
  0xaa   :  { %347 = vst [vmem:[%s524_s1 + $0x30] sm:$0xf] %v205_v44  ;;  %v223_v47 = vld [vmem:[#allocation0 + $0x78] sm:$0xf] }
  0xab   :  { %348 = vst [vmem:[%s524_s1 + $0x34] sm:$0xf] %v211_v45 }
  0xac   :  { %349 = vst [vmem:[%s524_s1 + $0x38] sm:$0xf] %v217_v46 }
  0xad   :  { %350 = vst [vmem:[%s524_s1 + $0x3c] sm:$0xf] %v223_v47 }

// kernel: eq.1
= control target key start
LH: loop header
LB: loop body
LE: loop exit
PB: predicated region body
PF: predicated region fallthrough
CT: control target
= control target key end

     0   :  { %vm134_vm0 = vcmask 1043458   ;;  %vm138_vm1 = vcmask 1045508   ;;  %vm142_vm2 = vcmask 1047558   ;;  %s213_s26 = smov 3  ;;  %s216_s27 = smov 12  ;;  %vm144_vm3 = vcmask 31744   ;;  %s814_s0 = inlined_call_operand.vmem [shape: s32[2,4,4,4,4], index: 0, kind: input, shape index: {}]   ;;  %s815_s1 = inlined_call_operand.vmem [shape: s32[32,16], index: 1, kind: output, shape index: {}]  }
   0x1   :  { %v498_v0 = vld [vmem:[%s814_s0 + $0x3c] sm:$0xf]  ;;  %v500_v1 = vld [vmem:[%s814_s0 + $0x34] sm:$0xf]  ;;  %v502_v2 = vld [vmem:[%s814_s0 + $0x2c] sm:$0xf] }
   0x2   :  { %71 = vst [vmem:[#allocation0 + $0x78] sm:$0xf] %v498_v0  ;;  %v504_v3 = vld [vmem:[%s814_s0 + $0x24] sm:$0xf]  ;;  %v506_v4 = vld [vmem:[%s814_s0 + $0x1c] sm:$0xf] }
   0x3   :  { %79 = vst [vmem:[#allocation0 + $0x68] sm:$0xf] %v500_v1  ;;  %v508_v5 = vld [vmem:[%s814_s0 + $0x14] sm:$0xf]  ;;  %v510_v6 = vld [vmem:[%s814_s0 + $0xc] sm:$0xf] }
   0x4   :  { %87 = vst [vmem:[#allocation0 + $0x58] sm:$0xf] %v502_v2  ;;  %v512_v7 = vld [vmem:[%s814_s0 + $0x4] sm:$0xf]  ;;  %v482_v8 = vld [vmem:[%s814_s0 + $0x7c] sm:$0xf] }
   0x5   :  { %95 = vst [vmem:[#allocation0 + $0x48] sm:$0xf] %v504_v3  ;;  %v484_v9 = vld [vmem:[%s814_s0 + $0x74] sm:$0xf]  ;;  %v486_v10 = vld [vmem:[%s814_s0 + $0x6c] sm:$0xf] }
   0x6   :  { %103 = vst [vmem:[#allocation0 + $0x38] sm:$0xf] %v506_v4  ;;  %s221_s30 = smov 48  ;;  %s226_s2 = smov 192  ;;  %v488_v11 = vld [vmem:[%s814_s0 + $0x64] sm:$0xf] }
   0x7   :  { %111 = vst [vmem:[#allocation0 + $0x28] sm:$0xf] %v508_v5  ;;  %s168_s5 = smov 3  ;;  %v490_v12 = vld [vmem:[%s814_s0 + $0x5c] sm:$0xf]  ;;  %s171_s8 = smov 12 }
   0x8   :  { %119 = vst [vmem:[#allocation0 + $0x18] sm:$0xf] %v510_v6  ;;  %s176_s9 = smov 48  ;;  %v492_v13 = vld [vmem:[%s814_s0 + $0x54] sm:$0xf]  ;;  %s181_s12 = smov 192 }
   0x9   :  { %127 = vst [vmem:[#allocation0 + $0x8] sm:$0xf] %v512_v7  ;;  %v494_v14 = vld [vmem:[%s814_s0 + $0x4c] sm:$0xf]  ;;  %v496_v15 = vld [vmem:[%s814_s0 + $0x44] sm:$0xf] }
   0xa   :  { %7 = vst [vmem:[#allocation0 + $0xf8] sm:$0xf] %v482_v8  ;;  %s593_s17 = smov 3  ;;  %s595_s18 = smov 12  ;;  %v499_v16 = vld [vmem:[%s814_s0 + $0x38] sm:$0xf] }
   0xb   :  { %15 = vst [vmem:[#allocation0 + $0xe8] sm:$0xf] %v484_v9  ;;  %s597_s19 = smov 48  ;;  %s599_s20 = smov 192  ;;  %v501_v20 = vld [vmem:[%s814_s0 + $0x30] sm:$0xf] }
   0xc   :  { %23 = vst [vmem:[#allocation0 + $0xd8] sm:$0xf] %v486_v10  ;;  %s612_s25 = smov 3  ;;  %v503_v31 = vld [vmem:[%s814_s0 + $0x28] sm:$0xf]  ;;  %s528_s29 = smov 24  }
   0xd   :  { %31 = vst [vmem:[#allocation0 + $0xc8] sm:$0xf] %v488_v11  ;;  %s529_s3 = smov 28   ;;  %s626_s4 = smov 3  ;;  %v505_v33 = vld [vmem:[%s814_s0 + $0x20] sm:$0xf] }
   0xe   :  { %39 = vst [vmem:[#allocation0 + $0xb8] sm:$0xf] %v490_v12  ;;  %s303_s7 = smov 3  ;;  %v507_v34 = vld [vmem:[%s814_s0 + $0x18] sm:$0xf]  ;;  %s328_s11 = smov 12 }
   0xf   :  { %47 = vst [vmem:[#allocation0 + $0xa8] sm:$0xf] %v492_v13  ;;  %s634_s13 = smov 192  ;;  %s311_s14 = smov 48  ;;  %v509_v37 = vld [vmem:[%s814_s0 + $0x10] sm:$0xf] }
  0x10   :  { %v214_v17 = vld [vmem:[#allocation0 + $0xa] ss:$16 sm:%s213_s26]   ;;  %v169_v23 = vld [vmem:[#allocation0 + $0xb] ss:$16 sm:%s168_s5]   ;;  %55 = vst [vmem:[#allocation0 + $0x98] sm:$0xf] %v494_v14 }
  0x11   :  { %v217_v18 = vld [vmem:[#allocation0 + $0xa] ss:$16 sm:%s216_s27]   ;;  %v172_v24 = vld [vmem:[#allocation0 + $0xb] ss:$16 sm:%s171_s8]   ;;  %63 = vst [vmem:[#allocation0 + $0x88] sm:$0xf] %v496_v15 }
  0x12   :  { %v222_v19 = vld [vmem:[#allocation0 + $0xa] ss:$16 sm:%s221_s30]   ;;  %v219_v21 = vsel %vm134_vm0, %v217_v18, %v214_v17  ;;  %v174_v26 = vsel %vm134_vm0, %v172_v24, %v169_v23  ;;  %v177_v27 = vld [vmem:[#allocation0 + $0xb] ss:$16 sm:%s176_s9]   ;;  %s614_s26 = smov 12  ;;  %s621_s30 = smov 48 }
  0x13   :  { %v227_v22 = vld [vmem:[#allocation0 + $0xa] ss:$16 sm:%s226_s2]   ;;  %v224_v25 = vsel %vm138_vm1, %v222_v19, %v219_v21  ;;  %v182_v28 = vld [vmem:[#allocation0 + $0xb] ss:$16 sm:%s181_s12]   ;;  %v179_v30 = vsel %vm138_vm1, %v177_v27, %v174_v26  ;;  %s623_s2 = smov 192  ;;  %s306_s8 = smov 12 }
  0x14   :  { %v229_v29 = vsel %vm142_vm2, %v227_v22, %v224_v25  ;;  %v184_v32 = vsel %vm142_vm2, %v182_v28, %v179_v30  ;;  %75 = vst [vmem:[#allocation0 + $0x70] sm:$0xf] %v499_v16  ;;  %s333_s12 = smov 48  ;;  %v304_v35 = vld [vmem:[#allocation0 + $0x8] ss:$16 sm:%s303_s7]   ;;  %s636_s15 = smov 192 }
  0x15   :  { %230 = vrot.lane.b32.xlu1 %v229_v29, %s528_s29  ;;  %185 = vrot.lane.b32.xlu0 %v184_v32, %s529_s3  ;;  %83 = vst [vmem:[#allocation0 + $0x60] sm:$0xf] %v501_v20  ;;  %v307_v36 = vld [vmem:[#allocation0 + $0x8] ss:$16 sm:%s306_s8]   ;;  %s641_s22 = smov 3  ;;  %s667_s23 = smov 12 }
  0x16   :  { %91 = vst [vmem:[#allocation0 + $0x50] sm:$0xf] %v503_v31  ;;  %v511_v41 = vld [vmem:[%s814_s0 + $0x8] sm:$0xf]  ;;  %v128_v56 = vld [vmem:[%s814_s0] sm:$0xf]  ;;  %v309_v59 = vsel %vm134_vm0, %v307_v36, %v304_v35 }
  0x17   :  { %99 = vst [vmem:[#allocation0 + $0x40] sm:$0xf] %v505_v33  ;;  %v312_v51 = vld [vmem:[#allocation0 + $0x8] ss:$16 sm:%s311_s14]   ;;  %s669_s24 = smov 48  ;;  %s696_s9 = smov 3 }
  0x18   :  { %107 = vst [vmem:[#allocation0 + $0x30] sm:$0xf] %v507_v34  ;;  %v236_v38 = vld [vmem:[#allocation0 + $0x8a] ss:$16 sm:%s593_s17]   ;;  %v191_v44 = vld [vmem:[#allocation0 + $0x8b] ss:$16 sm:%s612_s25]   ;;  %v314_v2 = vsel %vm138_vm1, %v312_v51, %v309_v59 }
  0x19   :  { %v239_v39 = vld [vmem:[#allocation0 + $0x8a] ss:$16 sm:%s595_s18]   ;;  %v194_v45 = vld [vmem:[#allocation0 + $0x8b] ss:$16 sm:%s614_s26]   ;;  %v326_v50 = vld [vmem:[#allocation0 + $0x88] ss:$16 sm:%s626_s4]  }
  0x1a   :  { %v244_v40 = vld [vmem:[#allocation0 + $0x8a] ss:$16 sm:%s597_s19]   ;;  %v241_v42 = vsel %vm134_vm0, %v239_v39, %v236_v38  ;;  %v196_v47 = vsel %vm134_vm0, %v194_v45, %v191_v44  ;;  %v199_v48 = vld [vmem:[#allocation0 + $0x8b] ss:$16 sm:%s621_s30]   ;;  %v329_v54 = vld [vmem:[#allocation0 + $0x88] ss:$16 sm:%s328_s11]  }
  0x1b   :  { %v249_v43 = vld [vmem:[#allocation0 + $0x8a] ss:$16 sm:%s599_s20]   ;;  %v246_v46 = vsel %vm138_vm1, %v244_v40, %v241_v42  ;;  %v204_v49 = vld [vmem:[#allocation0 + $0x8b] ss:$16 sm:%s623_s2]   ;;  %v201_v53 = vsel %vm138_vm1, %v199_v48, %v196_v47  ;;  %v334_v55 = vld [vmem:[#allocation0 + $0x88] ss:$16 sm:%s333_s12]   ;;  %v331_v58 = vsel %vm134_vm0, %v329_v54, %v326_v50 }
  0x1c   :  { %v251_v52 = vsel %vm142_vm2, %v249_v43, %v246_v46  ;;  %v206_v57 = vsel %vm142_vm2, %v204_v49, %v201_v53  ;;  %115 = vst [vmem:[#allocation0 + $0x20] sm:$0xf] %v509_v37  ;;  %v483_v60 = vld [vmem:[%s814_s0 + $0x78] sm:$0xf]  ;;  %v485_v63 = vld [vmem:[%s814_s0 + $0x70] sm:$0xf]  ;;  %v336_v0 = vsel %vm138_vm1, %v334_v55, %v331_v58 }
  0x1d   :  { %252 = vrot.lane.b32.xlu1 %v251_v52, %s528_s29  ;;  %207 = vrot.lane.b32.xlu0 %v206_v57, %s529_s3  ;;  %v339_v61 = vld [vmem:[#allocation0 + $0x88] ss:$16 sm:%s634_s13]   ;;  %123 = vst [vmem:[#allocation0 + $0x10] sm:$0xf] %v511_v41  ;;  %s681_s29 = smov 192  ;;  %s702_s12 = smov 12 }
  0x1e   :  { %v317_v62 = vld [vmem:[#allocation0 + $0x8] ss:$16 sm:%s636_s15]   ;;  %129 = vst [vmem:[#allocation0] sm:$0xf] %v128_v56  ;;  %v489_v3 = vld [vmem:[%s814_s0 + $0x60] sm:$0xf]  ;;  %v341_v6 = vsel %vm142_vm2, %v339_v61, %v336_v0 }
  0x1f   :  { %v487_v1 = vld [vmem:[%s814_s0 + $0x68] sm:$0xf]  ;;  %11 = vst [vmem:[#allocation0 + $0xf0] sm:$0xf] %v483_v60  ;;  %v491_v4 = vld [vmem:[%s814_s0 + $0x58] sm:$0xf]  ;;  %v319_v8 = vsel %vm142_vm2, %v317_v62, %v314_v2 }
  0x20   :  { %19 = vst [vmem:[#allocation0 + $0xe0] sm:$0xf] %v485_v63  ;;  %v493_v5 = vld [vmem:[%s814_s0 + $0x50] sm:$0xf]  ;;  %v495_v7 = vld [vmem:[%s814_s0 + $0x48] sm:$0xf] }
  0x21   :  { %27 = vst [vmem:[#allocation0 + $0xd0] sm:$0xf] %v487_v1  ;;  %s704_s13 = smov 48  ;;  %v497_v9 = vld [vmem:[%s814_s0 + $0x40] sm:$0xf]  ;;  %s710_s0 = smov 192 }
  0x22   :  { %35 = vst [vmem:[#allocation0 + $0xc0] sm:$0xf] %v489_v3  ;;  %s258_s16 = smov 3  ;;  %s261_s21 = smov 12  ;;  %vm187_vm4 = vcmask 261344   ;;  %vm232_vm5 = vcmask 228544  }
  0x23   :  { %43 = vst [vmem:[#allocation0 + $0xb0] sm:$0xf] %v491_v4  ;;  %v259_v10 = vld [vmem:[#allocation0 + $0x9] ss:$16 sm:%s258_s16]   ;;  %s266_s17 = smov 48  ;;  %s530_s18 = smov 16  }
  0x24   :  { %51 = vst [vmem:[#allocation0 + $0xa0] sm:$0xf] %v493_v5  ;;  %v262_v11 = vld [vmem:[#allocation0 + $0x9] ss:$16 sm:%s261_s21]   ;;  %s720_s19 = smov 3  ;;  %s463_s20 = smov 12 }
  0x25   :  { %342 = vrot.lane.b32.xlu1 %v341_v6, %s530_s18  ;;  %v267_v12 = vld [vmem:[#allocation0 + $0x9] ss:$16 sm:%s266_s17]   ;;  %320 = vrot.lane.b32.xlu0 %v319_v8, %s530_s18  ;;  %v394_v13 = vld [vmem:[#allocation0 + $0x2] ss:$16 sm:%s641_s22]   ;;  %v264_v16 = vsel %vm134_vm0, %v262_v11, %v259_v10  ;;  %59 = vst [vmem:[#allocation0 + $0x90] sm:$0xf] %v495_v7 }
  0x26   :  { %v397_v14 = vld [vmem:[#allocation0 + $0x2] ss:$16 sm:%s667_s23]   ;;  %v269_v19 = vsel %vm138_vm1, %v267_v12, %v264_v16  ;;  %s271_s22 = smov 192  ;;  %67 = vst [vmem:[#allocation0 + $0x80] sm:$0xf] %v497_v9  ;;  %s723_s23 = smov 48 }
  0x27   :  { %v402_v15 = vld [vmem:[#allocation0 + $0x2] ss:$16 sm:%s669_s24]   ;;  %v399_v17 = vsel %vm134_vm0, %v397_v14, %v394_v13  ;;  %v272_v21 = vld [vmem:[#allocation0 + $0x9] ss:$16 sm:%s271_s22]   ;;  %s531_s24 = smov 20   ;;  %s473_s25 = smov 192 }
  0x28   :  { %v407_v18 = vld [vmem:[#allocation0 + $0x2] ss:$16 sm:%s681_s29]   ;;  %v404_v20 = vsel %vm138_vm1, %v402_v15, %v399_v17  ;;  %v274_v22 = vsel %vm142_vm2, %v272_v21, %v269_v19  ;;  %s438_s26 = smov 3  ;;  %s441_s27 = smov 12  ;;  %vm277_vm6 = vcmask 195744   ;;  %vm322_vm7 = vcmask 162944  }
  0x29   :  { %v409_v23 = vsel %vm142_vm2, %v407_v18, %v404_v20  ;;  %275 = vrot.lane.b32.xlu2 %v274_v22, %s531_s24  ;;  %s727_s28 = smov 48  ;;  %s729_s29 = smov 192  ;;  %v439_v24 = vld [vmem:[#allocation0 + $0x1] ss:$16 sm:%s438_s26]   ;;  %vm367_vm8 = vcmask 130144   ;;  %vm412_vm9 = vcmask 97344  }
  0x2a   :  { %s280_s30 = smov 3  ;;  %s532_s2 = smov 8   ;;  %v442_v25 = vld [vmem:[#allocation0 + $0x1] ss:$16 sm:%s441_s27]   ;;  %vm457_vm10 = vcmask 64544  }
  0x2b   :  { %v281_v26 = vld [vmem:[#allocation0 + $0x89] ss:$16 sm:%s280_s30]   ;;  %s283_s3 = smov 12  ;;  %s288_s4 = smov 48  ;;  %v444_v45 = vsel %vm134_vm0, %v442_v25, %v439_v24  ;;  %v447_v46 = vld [vmem:[#allocation0 + $0x1] ss:$16 sm:%s727_s28]  }
  0x2c   :  { %v284_v27 = vld [vmem:[#allocation0 + $0x89] ss:$16 sm:%s283_s3]   ;;  %s293_s5 = smov 192  ;;  %s348_s6 = smov 3  ;;  %v449_v53 = vsel %vm138_vm1, %v447_v46, %v444_v45  ;;  %v452_v54 = vld [vmem:[#allocation0 + $0x1] ss:$16 sm:%s729_s29]  }
  0x2d   :  { %410 = vrot.lane.b32.xlu1 %v409_v23, %s532_s2  ;;  %v289_v28 = vld [vmem:[#allocation0 + $0x89] ss:$16 sm:%s288_s4]   ;;  %v371_v29 = vld [vmem:[#allocation0 + $0x83] ss:$16 sm:%s696_s9]   ;;  %v286_v32 = vsel %vm134_vm0, %v284_v27, %v281_v26  ;;  %v461_v35 = vld [vmem:[#allocation0 + $0x81] ss:$16 sm:%s720_s19]   ;;  %v454_v59 = vsel %vm142_vm2, %v452_v54, %v449_v53 }
  0x2e   :  { %v374_v30 = vld [vmem:[#allocation0 + $0x83] ss:$16 sm:%s702_s12]   ;;  %v464_v36 = vld [vmem:[#allocation0 + $0x81] ss:$16 sm:%s463_s20]   ;;  %v291_v37 = vsel %vm138_vm1, %v289_v28, %v286_v32  ;;  %v294_v42 = vld [vmem:[#allocation0 + $0x89] ss:$16 sm:%s293_s5]  }
  0x2f   :  { %v379_v31 = vld [vmem:[#allocation0 + $0x83] ss:$16 sm:%s704_s13]   ;;  %v376_v33 = vsel %vm134_vm0, %v374_v30, %v371_v29  ;;  %v466_v39 = vsel %vm134_vm0, %v464_v36, %v461_v35  ;;  %v469_v40 = vld [vmem:[#allocation0 + $0x81] ss:$16 sm:%s723_s23]   ;;  %v296_v47 = vsel %vm142_vm2, %v294_v42, %v291_v37  ;;  %s351_s7 = smov 12  ;;  %s356_s8 = smov 48 }
  0x30   :  { %v384_v34 = vld [vmem:[#allocation0 + $0x83] ss:$16 sm:%s710_s0]   ;;  %v381_v38 = vsel %vm138_vm1, %v379_v31, %v376_v33  ;;  %v474_v41 = vld [vmem:[#allocation0 + $0x81] ss:$16 sm:%s473_s25]   ;;  %v471_v44 = vsel %vm138_vm1, %v469_v40, %v466_v39  ;;  %s533_s9 = smov 12   ;;  %s361_s10 = smov 192 }
  0x31   :  { %v386_v43 = vsel %vm142_vm2, %v384_v34, %v381_v38  ;;  %v349_v48 = vld [vmem:[#allocation0 + $0x3] ss:$16 sm:%s348_s6]   ;;  %v476_v49 = vsel %vm142_vm2, %v474_v41, %v471_v44  ;;  %297 = vrot.lane.b32.xlu2 %v296_v47, %s531_s24  ;;  %s415_s11 = smov 3  ;;  %s418_s12 = smov 12 }
  0x32   :  { %387 = vrot.lane.b32.xlu0 %v386_v43, %s533_s9  ;;  %v352_v50 = vld [vmem:[#allocation0 + $0x3] ss:$16 sm:%s351_s7]   ;;  %s534_s13 = smov 4   ;;  %v416_v57 = vld [vmem:[#allocation0 + $0x82] ss:$16 sm:%s415_s11]   ;;  %s423_s14 = smov 48 }
  0x33   :  { %v357_v51 = vld [vmem:[#allocation0 + $0x3] ss:$16 sm:%s356_s8]   ;;  %v354_v52 = vsel %vm134_vm0, %v352_v50, %v349_v48  ;;  %v419_v58 = vld [vmem:[#allocation0 + $0x82] ss:$16 sm:%s418_s12]   ;;  %s428_s15 = smov 192  ;;  %s130_s0 = smov 3 }
  0x34   :  { %v359_v55 = vsel %vm138_vm1, %v357_v51, %v354_v52  ;;  %v362_v56 = vld [vmem:[#allocation0 + $0x3] ss:$16 sm:%s361_s10]   ;;  %v421_v61 = vsel %vm134_vm0, %v419_v58, %v416_v57  ;;  %v424_v62 = vld [vmem:[#allocation0 + $0x82] ss:$16 sm:%s423_s14]   ;;  %s132_s16 = smov 12  ;;  %s136_s21 = smov 48 }
  0x35   :  { %477 = vrot.lane.b32.xlu1 %v476_v49, %s534_s13  ;;  %v364_v60 = vsel %vm142_vm2, %v362_v56, %v359_v55  ;;  %v426_v63 = vsel %vm138_vm1, %v424_v62, %v421_v61  ;;  %v429_v0 = vld [vmem:[#allocation0 + $0x82] ss:$16 sm:%s428_s15]   ;;  %s140_s17 = smov 192  ;;  %v131_v2 = vld [vmem:[#allocation0] ss:$16 sm:%s130_s0]   ;;  %s147_s19 = smov 3 }
  0x36   :  { %v431_v1 = vsel %vm142_vm2, %v429_v0, %v426_v63  ;;  %v133_v3 = vld [vmem:[#allocation0] ss:$16 sm:%s132_s16]   ;;  %s150_s20 = smov 12  ;;  %s155_s23 = smov 48 }
  0x37   :  { %v137_v4 = vld [vmem:[#allocation0] ss:$16 sm:%s136_s21]   ;;  %v135_v5 = vsel %vm134_vm0, %v133_v3, %v131_v2  ;;  %s160_s24 = smov 192 }
  0x38   :  { %v141_v6 = vld [vmem:[#allocation0] ss:$16 sm:%s140_s17]   ;;  %v139_v7 = vsel %vm138_vm1, %v137_v4, %v135_v5 }
  0x39   :  { %365 = vrot.lane.b32.xlu2 %v364_v60, %s533_s9  ;;  %v143_v8 = vsel %vm142_vm2, %v141_v6, %v139_v7  ;;  %v148_v9 = vld [vmem:[#allocation0 + $0x80] ss:$16 sm:%s147_s19]  }
  0x3a   :  { %455 = vrot.lane.b32.xlu0 %v454_v59, %s534_s13  ;;  %145 = vst.msk [vmem:[%s815_s1] sm:$0xff] %vm144_vm3, %v143_v8   ;;  %v151_v10 = vld [vmem:[#allocation0 + $0x80] ss:$16 sm:%s150_s20]  }
  0x3b   :  { %v156_v11 = vld [vmem:[#allocation0 + $0x80] ss:$16 sm:%s155_s23]   ;;  %v153_v12 = vsel %vm134_vm0, %v151_v10, %v148_v9 }
  0x3c   :  { %v161_v13 = vld [vmem:[#allocation0 + $0x80] ss:$16 sm:%s160_s24]   ;;  %v158_v14 = vsel %vm138_vm1, %v156_v11, %v153_v12 }
  0x3d   :  { %v163_v15 = vsel %vm142_vm2, %v161_v13, %v158_v14 }
  0x3e   :  { %513 = vst.msk [vmem:[%s815_s1 + $0x8] sm:$0xff] %vm144_vm3, %v163_v15  }
  0x41   :  { %432 = vrot.lane.b32.xlu2 %v431_v1, %s532_s2 }
  0x83   :  { %v276_v16 = vpop.permute.xlu2 %275  }
  0x87   :  { %v231_v17 = vpop.permute.xlu1 %230   ;;  %v186_v18 = vpop.permute.xlu0 %185  }
  0x88   :  { %188 = vst.msk [vmem:[%s815_s1] sm:$0xff] %vm187_vm4, %v186_v18  }
  0x89   :  { %233 = vst.msk [vmem:[%s815_s1] sm:$0xff] %vm232_vm5, %v231_v17  }
  0x8a   :  { %278 = vst.msk [vmem:[%s815_s1] sm:$0xff] %vm277_vm6, %v276_v16  }
  0x8b   :  { %v298_v19 = vpop.permute.xlu2 %297  }
  0x8f   :  { %v253_v20 = vpop.permute.xlu1 %252   ;;  %v208_v21 = vpop.permute.xlu0 %207  }
  0x90   :  { %514 = vst.msk [vmem:[%s815_s1 + $0x8] sm:$0xff] %vm187_vm4, %v208_v21  }
  0x91   :  { %515 = vst.msk [vmem:[%s815_s1 + $0x8] sm:$0xff] %vm232_vm5, %v253_v20  }
  0x92   :  { %516 = vst.msk [vmem:[%s815_s1 + $0x8] sm:$0xff] %vm277_vm6, %v298_v19  }
  0x93   :  { %v366_v22 = vpop.permute.xlu2 %365  }
  0x97   :  { %v343_v23 = vpop.permute.xlu1 %342   ;;  %v321_v24 = vpop.permute.xlu0 %320  }
  0x98   :  { %517 = vst.msk [vmem:[%s815_s1 + $0x8] sm:$0xff] %vm322_vm7, %v343_v23  }
  0x99   :  { %323 = vst.msk [vmem:[%s815_s1] sm:$0xff] %vm322_vm7, %v321_v24  }
  0x9a   :  { %368 = vst.msk [vmem:[%s815_s1] sm:$0xff] %vm367_vm8, %v366_v22  }
  0x9b   :  { %v433_v25 = vpop.permute.xlu2 %432  }
  0x9f   :  { %v411_v26 = vpop.permute.xlu1 %410  }
  0xa0   :  { %413 = vst.msk [vmem:[%s815_s1] sm:$0xff] %vm412_vm9, %v411_v26  }
  0xa4   :  { %v388_v27 = vpop.permute.xlu0 %387  }
  0xa5   :  { %518 = vst.msk [vmem:[%s815_s1 + $0x8] sm:$0xff] %vm367_vm8, %v388_v27  }
  0xa6   :  { %519 = vst.msk [vmem:[%s815_s1 + $0x8] sm:$0xff] %vm412_vm9, %v433_v25  }
  0xa7   :  { %v478_v28 = vpop.permute.xlu1 %477  }
  0xa8   :  { %520 = vst.msk [vmem:[%s815_s1 + $0x8] sm:$0xff] %vm457_vm10, %v478_v28  }
  0xac   :  { %v456_v29 = vpop.permute.xlu0 %455  }
  0xad   :  { %458 = vst.msk [vmem:[%s815_s1] sm:$0xff] %vm457_vm10, %v456_v29  }

// kernel: transformer_policy_forward.1
= control target key start
LH: loop header
LB: loop body
LE: loop exit
PB: predicated region body
PF: predicated region fallthrough
CT: control target
= control target key end

     0   :  { %s5469_s6 = smov 1   ;;  %s5470_s10 = smov 2   ;;  %s7704_s0 = inlined_call_operand.smem [shape: u32[51], index: -1, kind: input, shape index: {}] }
   0x1   :  { %s5554_s5 = sld [smem:[%s7704_s0]]   ;;  %s5471_s14 = smov 3  }
   0x2   :  { %s5559_s9 = sld [smem:[%s7704_s0 + %s5469_s6]]   ;;  %s5472_s18 = smov 4  }
   0x3   :  { %s5564_s13 = sld [smem:[%s7704_s0 + %s5470_s10]]   ;;  %s5473_s22 = smov 5  }
   0x4   :  { %s5569_s17 = sld [smem:[%s7704_s0 + %s5471_s14]]   ;;  %s5474_s26 = smov 6  }
   0x5   :  { %s5574_s21 = sld [smem:[%s7704_s0 + %s5472_s18]]   ;;  %s5475_s30 = smov 7  }
   0x6   :  { %s5579_s25 = sld [smem:[%s7704_s0 + %s5473_s22]]   ;;  %s5476_s4 = smov 8  }
   0x7   :  { %s5584_s29 = sld [smem:[%s7704_s0 + %s5474_s26]]   ;;  %s5477_s10 = smov 9  }
   0x8   :  { %7736 = sst [smem:[#allocation17_spill]] %s5559_s9  ;;  %s5478_s15 = smov 10  }
   0x9   :  { %7737 = sst [smem:[#allocation18_spill]] %s5564_s13  ;;  %s5479_s20 = smov 11  }
   0xa   :  { %s5589_s3 = sld [smem:[%s7704_s0 + %s5475_s30]]   ;;  %s5480_s26 = smov 12  }
   0xb   :  { %s5594_s8 = sld [smem:[%s7704_s0 + %s5476_s4]]   ;;  %s5481_s1 = smov 13  }
   0xc   :  { %s5599_s14 = sld [smem:[%s7704_s0 + %s5477_s10]]   ;;  %s5482_s7 = smov 14  }
   0xd   :  { %s5604_s19 = sld [smem:[%s7704_s0 + %s5478_s15]]   ;;  %s5483_s15 = smov 15  }
   0xe   :  { %s5609_s24 = sld [smem:[%s7704_s0 + %s5479_s20]]   ;;  %s5484_s22 = smov 16  }
   0xf   :  { %s5614_s30 = sld [smem:[%s7704_s0 + %s5480_s26]]   ;;  %s5485_s28 = smov 17  }
  0x10   :  { %s5619_s6 = sld [smem:[%s7704_s0 + %s5481_s1]]   ;;  %s5515_s16 = smov 47  }
  0x11   :  { %s5624_s12 = sld [smem:[%s7704_s0 + %s5482_s7]]   ;;  %s5486_s7 = smov 18  }
  0x12   :  { %s5629_s20 = sld [smem:[%s7704_s0 + %s5483_s15]]   ;;  %s5487_s15 = smov 19  }
  0x13   :  { %s5634_s27 = sld [smem:[%s7704_s0 + %s5484_s22]]   ;;  %s5488_s22 = smov 20  }
  0x14   :  { %s5639_s4 = sld [smem:[%s7704_s0 + %s5485_s28]]   ;;  %s5489_s28 = smov 21  }
  0x15   :  { %s5644_s13 = sld [smem:[%s7704_s0 + %s5486_s7]]   ;;  %s5490_s7 = smov 22  }
  0x16   :  { %7738 = sst [smem:[#allocation19_spill]] %s5619_s6  ;;  %s5516_s23 = smov 48  }
  0x17   :  { %7739 = sst [smem:[#allocation20_spill]] %s5624_s12  ;;  %s5517_s1 = smov 49  }
  0x18   :  { %s5649_s9 = sld [smem:[%s7704_s0 + %s5487_s15]]   ;;  %s5491_s15 = smov 23  }
  0x19   :  { %7740 = sst [smem:[#allocation21_spill]] %s5634_s27  ;;  %s5518_s10 = smov 50  }
  0x1a   :  { %7741 = sst [smem:[#allocation22_spill]] %s5639_s4 }
  0x1b   :  { %7742 = sst [smem:[#allocation23_spill]] %s5644_s13 }
  0x1c   :  { %s5654_s27 = sld [smem:[%s7704_s0 + %s5488_s22]]   ;;  %s5492_s22 = smov 24  }
  0x1d   :  { %s5659_s4 = sld [smem:[%s7704_s0 + %s5489_s28]]   ;;  %s5493_s28 = smov 25  }
  0x1e   :  { %7743 = sst [smem:[#allocation24_spill]] %s5649_s9 }
  0x1f   :  { %s5664_s13 = sld [smem:[%s7704_s0 + %s5490_s7]]   ;;  %s5494_s7 = smov 26  }
  0x20   :  { %s5669_s9 = sld [smem:[%s7704_s0 + %s5491_s15]]   ;;  %s5495_s15 = smov 27  }
  0x21   :  { %s5797_s12 = sld [smem:[%s7704_s0 + %s5517_s1]]  }
  0x22   :  { %7744 = sst [smem:[#allocation25_spill]] %s5654_s27 }
  0x23   :  { %7745 = sst [smem:[#allocation26_spill]] %s5659_s4 }
  0x24   :  { %s5674_s27 = sld [smem:[%s7704_s0 + %s5492_s22]]   ;;  %s5496_s22 = smov 28  }
  0x25   :  { %7746 = sst [smem:[#allocation27_spill]] %s5664_s13 }
  0x26   :  { %7747 = sst [smem:[#allocation28_spill]] %s5669_s9 }
  0x27   :  { %s5679_s4 = sld [smem:[%s7704_s0 + %s5493_s28]]   ;;  %s5497_s28 = smov 29  }
  0x28   :  { %s5684_s13 = sld [smem:[%s7704_s0 + %s5494_s7]]   ;;  %s5498_s7 = smov 30  }
  0x29   :  { %s5689_s9 = sld [smem:[%s7704_s0 + %s5495_s15]]   ;;  %s5499_s15 = smov 31  }
  0x2a   :  { %7748 = sst [smem:[#allocation29_spill]] %s5674_s27 }
  0x2b   :  { %s5694_s27 = sld [smem:[%s7704_s0 + %s5496_s22]]   ;;  %s5500_s22 = smov 32  }
  0x2c   :  { %s5802_s6 = sld [smem:[%s7704_s0 + %s5518_s10]]  }
  0x2d   :  { %7749 = sst [smem:[#allocation30_spill]] %s5679_s4 }
  0x2e   :  { %7750 = sst [smem:[#allocation31_spill]] %s5684_s13 }
  0x2f   :  { %7751 = sst [smem:[#allocation32_spill]] %s5689_s9 }
  0x30   :  { %s5699_s4 = sld [smem:[%s7704_s0 + %s5497_s28]]   ;;  %s5501_s28 = smov 33  }
  0x31   :  { %7752 = sst [smem:[#allocation33_spill]] %s5694_s27 }
  0x32   :  { %s5704_s13 = sld [smem:[%s7704_s0 + %s5498_s7]]   ;;  %s5502_s7 = smov 34  }
  0x33   :  { %s5709_s9 = sld [smem:[%s7704_s0 + %s5499_s15]]   ;;  %s5503_s15 = smov 35  }
  0x34   :  { %s5714_s27 = sld [smem:[%s7704_s0 + %s5500_s22]]   ;;  %s5504_s22 = smov 36  }
  0x36   :  { %7753 = sst [smem:[#allocation34_spill]] %s5699_s4 }
  0x37   :  { %s5719_s4 = sld [smem:[%s7704_s0 + %s5501_s28]]   ;;  %s5505_s28 = smov 37  }
  0x38   :  { %7754 = sst [smem:[#allocation35_spill]] %s5704_s13 }
  0x39   :  { %7755 = sst [smem:[#allocation36_spill]] %s5709_s9 }
  0x3a   :  { %7756 = sst [smem:[#allocation37_spill]] %s5714_s27 }
  0x3b   :  { %s5724_s13 = sld [smem:[%s7704_s0 + %s5502_s7]]   ;;  %s5506_s7 = smov 38  }
  0x3c   :  { %s5729_s9 = sld [smem:[%s7704_s0 + %s5503_s15]]   ;;  %s5507_s15 = smov 39  }
  0x3d   :  { %7757 = sst [smem:[#allocation38_spill]] %s5719_s4 }
  0x3e   :  { %s5734_s27 = sld [smem:[%s7704_s0 + %s5504_s22]]   ;;  %s5508_s22 = smov 40  }
  0x3f   :  { %s5739_s4 = sld [smem:[%s7704_s0 + %s5505_s28]]   ;;  %s5509_s28 = smov 41  }
  0x41   :  { %7758 = sst [smem:[#allocation39_spill]] %s5724_s13 }
  0x42   :  { %7759 = sst [smem:[#allocation40_spill]] %s5729_s9 }
  0x43   :  { %s5744_s13 = sld [smem:[%s7704_s0 + %s5506_s7]]   ;;  %s5510_s7 = smov 42  }
  0x44   :  { %7760 = sst [smem:[#allocation41_spill]] %s5734_s27 }
  0x45   :  { %7761 = sst [smem:[#allocation42_spill]] %s5739_s4 }
  0x46   :  { %s5749_s9 = sld [smem:[%s7704_s0 + %s5507_s15]]   ;;  %s5511_s15 = smov 43  }
  0x47   :  { %s5754_s27 = sld [smem:[%s7704_s0 + %s5508_s22]]   ;;  %s5512_s22 = smov 44  }
  0x48   :  { %s5759_s4 = sld [smem:[%s7704_s0 + %s5509_s28]]   ;;  %s5513_s28 = smov 45  }
  0x49   :  { %7762 = sst [smem:[#allocation43_spill]] %s5744_s13 }
  0x4a   :  { %s5764_s13 = sld [smem:[%s7704_s0 + %s5510_s7]]   ;;  %s5514_s7 = smov 46  }
  0x4c   :  { %7763 = sst [smem:[#allocation44_spill]] %s5749_s9 }
  0x4d   :  { %7764 = sst [smem:[#allocation45_spill]] %s5754_s27 }
  0x4e   :  { %7765 = sst [smem:[#allocation46_spill]] %s5759_s4 }
  0x4f   :  { %s5769_s9 = sld [smem:[%s7704_s0 + %s5511_s15]]  }
  0x50   :  { %7766 = sst [smem:[#allocation47_spill]] %s5764_s13 }
  0x51   :  { %s5774_s27 = sld [smem:[%s7704_s0 + %s5512_s22]]  }
  0x52   :  { %s5779_s4 = sld [smem:[%s7704_s0 + %s5513_s28]]  }
  0x53   :  { %s4798_s13 = sld [smem:[%s7704_s0 + %s5514_s7]]  }
  0x55   :  { %7767 = sst [smem:[#allocation48_spill]] %s5769_s9 }
  0x56   :  { %s5787_s9 = sld [smem:[%s7704_s0 + %s5515_s16]]  }
  0x57   :  { %7768 = sst [smem:[#allocation49_spill]] %s5774_s27 }
  0x58   :  { %s5792_s27 = sld [smem:[%s7704_s0 + %s5516_s23]]  }
  0x59   :  { %106 = vsyncpa [#allocation5], 0 }
  0x5a   :  { %107 = vsyncpa [#allocation8], 0 }
  0x5b   :  { %108 = vsyncpa [#allocation11], 0  ;;  %s216_s16 = sshll.u32 %s4798_s13, 4  ;;  %s217_s16 = int_to_ptr.hbm [resolvable:$true] %s216_s16 }
  0x5c   :  { %109 = vsyncpa [#allocation6], 0  ;;  %s5519_s15 = smov [#allocation7]   ;;  %s205_s23 = sshll.u32 %s5779_s4, 4  ;;  %s206_s23 = int_to_ptr.hbm [resolvable:$true] %s205_s23 }
  0x5d   :  { %s218_s18 = sshll.u32 %s5519_s15, 4  ;;  %s5341_s22 = sshra.s32 %s217_s16, 4  ;;  %s219_s18 = int_to_ptr.vmem [resolvable:$true] %s218_s18  ;;  %s5342_s22 = int_to_ptr.hbm [resolvable:$true] %s5341_s22 }
  0x5e   :  { %s5343_s26 = scalar_lea.hbm %s5342_s22, 1  ;;  %s5345_s1 = scalar_lea.hbm %s4798_s13, 1 }
  0x5f   :  { %p5344_p0 = scmp.ne.s32.totalorder %s5342_s22, %s5343_s26  ;;  %p5346_p1 = scmp.lt.s32.totalorder %s5342_s22, %s4798_s13 }
  0x60   :  { %p5347_p2 = scmp.lt.s32.totalorder %s5345_s1, %s5343_s26 }
  0x62   :  { %p5348_p3 = por %p5347_p2, %p5346_p1 }
  0x64   :  { %p5349_p4 = pnand %p5348_p3, %p5344_p0 }
  0x66   :  { %5352 = shalt.err (!%p5349_p4)
}
  0x67   :  { %221 = dma.hbm_to_vmem [thread:$0]  %s217_s16, 16, %s219_s18, [#allocation8]  }
  0x68   :  { %s5520_s0 = smov [#allocation4]   ;;  %s227_s2 = sshll.u32 %s5787_s9, 4  ;;  %s228_s2 = int_to_ptr.hbm [resolvable:$true] %s227_s2 }
  0x69   :  { %s207_s28 = sshll.u32 %s5520_s0, 4  ;;  %s5365_s10 = sshra.s32 %s206_s23, 4  ;;  %s208_s28 = int_to_ptr.vmem [resolvable:$true] %s207_s28  ;;  %s5366_s10 = int_to_ptr.hbm [resolvable:$true] %s5365_s10 }
  0x6a   :  { %s5367_s7 = scalar_lea.hbm %s5366_s10, 1  ;;  %s5369_s11 = scalar_lea.hbm %s5779_s4, 1 }
  0x6b   :  { %p5368_p5 = scmp.ne.s32.totalorder %s5366_s10, %s5367_s7  ;;  %p5370_p6 = scmp.lt.s32.totalorder %s5366_s10, %s5779_s4 }
  0x6c   :  { %p5371_p7 = scmp.lt.s32.totalorder %s5369_s11, %s5367_s7 }
  0x6e   :  { %p5372_p8 = por %p5371_p7, %p5370_p6 }
  0x70   :  { %p5373_p9 = pnand %p5372_p8, %p5368_p5 }
  0x72   :  { %5376 = shalt.err (!%p5373_p9)
}
  0x73   :  { %210 = dma.hbm_to_vmem [thread:$0]  %s206_s23, 16, %s208_s28, [#allocation5]  }
  0x74   :  { %s240_s13 = sshll.u32 %s5797_s12, 4  ;;  %s5521_s16 = smov [#allocation9]   ;;  %s241_s13 = int_to_ptr.hbm [resolvable:$true] %s240_s13 }
  0x75   :  { %s229_s15 = sshll.u32 %s5521_s16, 4  ;;  %s5389_s18 = sshra.s32 %s228_s2, 4  ;;  %s230_s15 = int_to_ptr.vmem [resolvable:$true] %s229_s15  ;;  %s5390_s18 = int_to_ptr.hbm [resolvable:$true] %s5389_s18 }
  0x76   :  { %s5391_s22 = scalar_lea.hbm %s5390_s18, 1  ;;  %s5393_s26 = scalar_lea.hbm %s5787_s9, 1 }
  0x77   :  { %p5392_p10 = scmp.ne.s32.totalorder %s5390_s18, %s5391_s22  ;;  %p5394_p11 = scmp.lt.s32.totalorder %s5390_s18, %s5787_s9 }
  0x78   :  { %p5395_p12 = scmp.lt.s32.totalorder %s5393_s26, %s5391_s22 }
  0x7a   :  { %p5396_p13 = por %p5395_p12, %p5394_p11 }
  0x7c   :  { %p5397_p0 = pnand %p5396_p13, %p5392_p10 }
  0x7e   :  { %5400 = shalt.err (!%p5397_p0)
}
  0x7f   :  { %232 = dma.hbm_to_vmem [thread:$0]  %s228_s2, 16, %s230_s15, [#allocation8]  }
  0x80   :  { %s5522_s4 = smov [#allocation10]   ;;  %s5413_s1 = sshra.s32 %s241_s13, 4  ;;  %s5414_s1 = int_to_ptr.hbm [resolvable:$true] %s5413_s1 }
  0x81   :  { %s242_s23 = sshll.u32 %s5522_s4, 4  ;;  %s5415_s0 = scalar_lea.hbm %s5414_s1, 1  ;;  %s243_s23 = int_to_ptr.vmem [resolvable:$true] %s242_s23 }
  0x82   :  { %p5416_p1 = scmp.ne.s32.totalorder %s5414_s1, %s5415_s0  ;;  %s5417_s28 = scalar_lea.hbm %s5797_s12, 1 }
  0x83   :  { %p5418_p2 = scmp.lt.s32.totalorder %s5414_s1, %s5797_s12  ;;  %p5419_p3 = scmp.lt.s32.totalorder %s5417_s28, %s5415_s0 }
  0x85   :  { %p5420_p4 = por %p5419_p3, %p5418_p2 }
  0x87   :  { %p5421_p5 = pnand %p5420_p4, %p5416_p1 }
  0x89   :  { %5424 = shalt.err (!%p5421_p5)
}
  0x8a   :  { %245 = dma.hbm_to_vmem [thread:$0]  %s241_s13, 16, %s243_s23, [#allocation11]  }
  0x8b   :  { %5461 = dma.done.wait [#allocation5], 16  }
  0x8c   :  { %5462 = vsyncadd [#allocation5], 4294967280 }
  0x8d   :  { %5463 = dma.done.wait [#allocation8], 32  }
  0x8e   :  { %5464 = vsyncadd [#allocation8], 4294967264 }
  0x8f   :  { %5465 = dma.done.wait [#allocation11], 16  }
  0x90   :  { %5466 = vsyncadd [#allocation11], 4294967280  ;;  %v285_v0 = vld [vmem:[%s5569_s17 + $0x78] sm:$0xff]  ;;  %v284_v1 = vld [vmem:[%s5569_s17 + $0x70] sm:$0xff]  ;;  %vm1221_vm0 = vcmask 261120   ;;  %s5525_s9 = smov 108  }
  0x91   :  { %v283_v2 = vld [vmem:[%s5569_s17 + $0x68] sm:$0xff]  ;;  %v5816_v3 = vand.u32 4294901760, %v285_v0  ;;  %v5818_v4 = vand.u32 4294901760, %v284_v1  ;;  %v282_v6 = vld [vmem:[%s5569_s17 + $0x60] sm:$0xff]  ;;  %v281_v7 = vld [vmem:[%s5569_s17 + $0x58] sm:$0xff]  ;;  %s5532_s12 = smov 80  }
  0x92   :  { %v5820_v5 = vand.u32 4294901760, %v283_v2  ;;  %v280_v8 = vld [vmem:[%s5569_s17 + $0x50] sm:$0xff]  ;;  %v5825_v9 = vand.u32 4294901760, %v282_v6  ;;  %v5827_v10 = vand.u32 4294901760, %v281_v7  ;;  %v279_v12 = vld [vmem:[%s5569_s17 + $0x48] sm:$0xff]  ;;  %v278_v13 = vld [vmem:[%s5569_s17 + $0x40] sm:$0xff] }
  0x93   :  { %v5829_v11 = vand.u32 4294901760, %v280_v8  ;;  %303 = vmatpush.msra.mxu0 %v5816_v3  ;;  %v5835_v14 = vsub.f32 %v285_v0, %v5816_v3  ;;  %v5838_v15 = vsub.f32 %v284_v1, %v5818_v4  ;;  %550 = vmatpush.msra.mxu3 %v5816_v3  ;;  %v5844_v17 = vand.u32 4294901760, %v279_v12  ;;  %v277_v18 = vld [vmem:[%s5569_s17 + $0x38] sm:$0xff]  ;;  %v276_v26 = vld [vmem:[%s5569_s17 + $0x30] sm:$0xff]  ;;  %v275_v34 = vld [vmem:[%s5569_s17 + $0x28] sm:$0xff]  ;;  %s5533_s2 = smov 88  }
  0x94   :  { %v5842_v16 = vsub.f32 %v283_v2, %v5820_v5  ;;  %v5848_v19 = vsub.f32 %v282_v6, %v5825_v9  ;;  %v5851_v20 = vsub.f32 %v281_v7, %v5827_v10  ;;  %v5861_v25 = vand.u32 4294901760, %v278_v13  ;;  %v274_v41 = vld [vmem:[%s5569_s17 + $0x20] sm:$0xff]  ;;  %v273_v49 = vld [vmem:[%s5569_s17 + $0x18] sm:$0xff]  ;;  %v272_v55 = vld [vmem:[%s5569_s17 + $0x10] sm:$0xff]  ;;  %s5534_s10 = smov 72   ;;  %s5535_s7 = smov 8  }
  0x95   :  { %v5854_v21 = vsub.f32 %v280_v8, %v5829_v11  ;;  %305 = vmatpush.msra.mxu0 %v5818_v4  ;;  %482 = vmatpush.msra.mxu2 %v5835_v14  ;;  %v369_v22 = vand.u32 4294901760, %v5835_v14  ;;  %v7725_v23 = vand.u32 4294901760, %v5838_v15  ;;  %v5866_v28 = vand.u32 4294901760, %v277_v18  ;;  %v262_v56 = vld [vmem:[%s5554_s5] sm:$0xff]  ;;  %v271_v62 = vld [vmem:[%s5569_s17 + $0x8] sm:$0xff]  ;;  %v301_v6 = vld [vmem:[%s5569_s17 + $0xf8] sm:$0xff] }
  0x96   :  { %v7723_v24 = vand.u32 4294901760, %v5842_v16  ;;  %552 = vmatpush.msra.mxu3 %v5818_v4  ;;  %v7721_v27 = vand.u32 4294901760, %v5848_v19  ;;  %v5869_v29 = vsub.f32 %v279_v12, %v5844_v17  ;;  %v7720_v33 = vand.u32 4294901760, %v5851_v20  ;;  %v270_v12 = vld [vmem:[%s5569_s17] sm:$0xff]  ;;  %s5536_s11 = smov 16   ;;  %s5537_s13 = smov 24  }
  0x97   :  { %307 = vmatpush.msra.mxu0 %v5820_v5  ;;  %485 = vmatpush.msra.mxu2 %v5838_v15  ;;  %v370_v30 = vsub.f32 %v5835_v14, %v369_v22  ;;  %v376_v31 = vsub.f32 %v5838_v15, %v7725_v23  ;;  %v5885_v35 = vand.u32 4294901760, %v276_v26  ;;  %v7718_v36 = vand.u32 4294901760, %v5854_v21  ;;  %v295_v23 = vld [vmem:[%s5569_s17 + $0xc8] sm:$0xff]  ;;  %s7818_s16 = sld [smem:[#allocation26_spill]] }
  0x98   :  { %v382_v32 = vsub.f32 %v5842_v16, %v7723_v24  ;;  %554 = vmatpush.msra.mxu3 %v5820_v5  ;;  %v388_v39 = vsub.f32 %v5848_v19, %v7721_v27  ;;  %v5894_v40 = vsub.f32 %v278_v13, %v5861_v25  ;;  %v7717_v42 = vand.u32 4294901760, %v5869_v29  ;;  %s7819_s15 = sld [smem:[#allocation24_spill]] }
  0x99   :  { %309 = vmatpush.msra.mxu0 %v5825_v9  ;;  %v371_v37 = vand.u32 4294901760, %v370_v30  ;;  %488 = vmatpush.msra.mxu2 %v5842_v16  ;;  %v377_v38 = vand.u32 4294901760, %v376_v31  ;;  %v5900_v43 = vsub.f32 %v277_v18, %v5866_v28  ;;  %v394_v45 = vsub.f32 %v5851_v20, %v7720_v33  ;;  %s7820_s18 = sld [smem:[#allocation25_spill]] }
  0x9a   :  { %556 = vmatpush.msra.mxu3 %v5825_v9  ;;  %v383_v44 = vand.u32 4294901760, %v382_v32  ;;  %v5906_v46 = vand.u32 4294901760, %v275_v34  ;;  %v400_v47 = vsub.f32 %v5854_v21, %v7718_v36  ;;  %v5913_v48 = vand.u32 4294901760, %v274_v41  ;;  %v266_v36 = vld [vmem:[%s5554_s5 + $0x20] sm:$0xff]  ;;  %s7821_s22 = sld [smem:[#allocation29_spill]] }
  0x9b   :  { %311 = vmatpush.msra.mxu0 %v5827_v10  ;;  %372 = vmatpush.msra.mxu1 %v371_v37  ;;  %v389_v50 = vand.u32 4294901760, %v388_v39  ;;  %v7715_v51 = vand.u32 4294901760, %v5894_v40  ;;  %v5919_v52 = vsub.f32 %v276_v26, %v5885_v35  ;;  %v406_v53 = vsub.f32 %v5869_v29, %v7717_v42  ;;  %v264_v37 = vld [vmem:[%s5554_s5 + $0x10] sm:$0xff]  ;;  %s7822_s26 = sld [smem:[#allocation27_spill]] }
  0x9c   :  { %491 = vmatpush.msra.mxu2 %v5848_v19  ;;  %558 = vmatpush.msra.mxu3 %v5827_v10  ;;  %v7714_v54 = vand.u32 4294901760, %v5900_v43  ;;  %v395_v57 = vand.u32 4294901760, %v394_v45  ;;  %v5930_v58 = vand.u32 4294901760, %v273_v49  ;;  %v5933_v59 = vsub.f32 %v275_v34, %v5906_v46  ;;  %v300_v34 = vld [vmem:[%s5569_s17 + $0xf0] sm:$0xff]  ;;  %s7823_s4 = sld [smem:[#allocation28_spill]] }
  0x9d   :  { %313 = vmatpush.msra.mxu0 %v5829_v11  ;;  %378 = vmatpush.msra.mxu1 %v377_v38  ;;  %v401_v60 = vand.u32 4294901760, %v400_v47  ;;  %v5938_v61 = vsub.f32 %v274_v41, %v5913_v48  ;;  %v412_v63 = vsub.f32 %v5894_v40, %v7715_v51  ;;  %v5945_v0 = vand.u32 4294901760, %v272_v55  ;;  %s7824_s23 = sld [smem:[#allocation30_spill]] }
  0x9e   :  { %494 = vmatpush.msra.mxu2 %v5851_v20  ;;  %560 = vmatpush.msra.mxu3 %v5829_v11  ;;  %v7713_v1 = vand.u32 4294901760, %v5919_v52  ;;  %v5948_v2 = vand.u32 4294901760, %v262_v56  ;;  %v407_v7 = vand.u32 4294901760, %v406_v53  ;;  %v418_v8 = vsub.f32 %v5900_v43, %v7714_v54  ;;  %s7825_s1 = sld [smem:[#allocation33_spill]] }
  0x9f   :  { %315 = vmatpush.msra.mxu0 %v5844_v17  ;;  %384 = vmatpush.msra.mxu1 %v383_v44  ;;  %v5958_v13 = vand.u32 4294901760, %v271_v62  ;;  %v7712_v18 = vand.u32 4294901760, %v5933_v59  ;;  %v5962_v26 = vsub.f32 %v273_v49, %v5930_v58  ;;  %v7711_v31 = vand.u32 4294901760, %v5938_v61  ;;  %s7826_s0 = sld [smem:[#allocation31_spill]] }
  0xa0   :  { %497 = vmatpush.msra.mxu2 %v5854_v21  ;;  %562 = vmatpush.msra.mxu3 %v5844_v17  ;;  %v5965_v30 = vsub.f32 %v262_v56, %v5948_v2  ;;  %v5970_v32 = vand.u32 4294901760, %v301_v6  ;;  %v413_v38 = vand.u32 4294901760, %v412_v63  ;;  %v424_v39 = vsub.f32 %v5919_v52, %v7713_v1  ;;  %v299_v56 = vld [vmem:[%s5569_s17 + $0xe8] sm:$0xff]  ;;  %s7827_s28 = sld [smem:[#allocation32_spill]] }
  0xa1   :  { %317 = vmatpush.msra.mxu0 %v5861_v25  ;;  %390 = vmatpush.msra.mxu1 %v389_v50  ;;  %v5978_v41 = vand.u32 4294901760, %v270_v12  ;;  %v5981_v44 = vsub.f32 %v272_v55, %v5945_v0  ;;  %v419_v45 = vand.u32 4294901760, %v418_v8  ;;  %v430_v49 = vsub.f32 %v5933_v59, %v7712_v18  ;;  %v298_v18 = vld [vmem:[%s5569_s17 + $0xe0] sm:$0xff] }
  0xa2   :  { %500 = vmatpush.msra.mxu2 %v5869_v29  ;;  %564 = vmatpush.msra.mxu3 %v5861_v25  ;;  %v7724_v47 = vand.u32 4294901760, %v5965_v30  ;;  %v7716_v50 = vand.u32 4294901760, %v5962_v26  ;;  %v5992_v53 = vsub.f32 %v271_v62, %v5958_v13  ;;  %v5994_v55 = vand.u32 4294901760, %v264_v37 }
  0xa3   :  { %319 = vmatpush.msra.mxu0 %v5866_v28  ;;  %396 = vmatpush.msra.mxu1 %v395_v57  ;;  %7769 = vst [vmem:[#allocation50_spill] sm:$0xff] %v5978_v41  ;;  %v436_v57 = vsub.f32 %v5938_v61, %v7711_v31  ;;  %v6005_v63 = vsub.f32 %v301_v6, %v5970_v32  ;;  %v425_v62 = vand.u32 4294901760, %v424_v39  ;;  %v6017_v6 = vand.u32 4294901760, %v299_v56 }
  0xa4   :  { %503 = vmatpush.msra.mxu2 %v5894_v40  ;;  %566 = vmatpush.msra.mxu3 %v5866_v28  ;;  %v6010_v8 = vsub.f32 %v270_v12, %v5978_v41  ;;  %v337_v31 = vsub.f32 %v5965_v30, %v7724_v47  ;;  %v442_v12 = vsub.f32 %v5962_v26, %v7716_v50  ;;  %v7722_v39 = vand.u32 4294901760, %v5992_v53 }
  0xa5   :  { %321 = vmatpush.msra.mxu0 %v5885_v35  ;;  %402 = vmatpush.msra.mxu1 %v401_v60  ;;  %v6002_v60 = vand.u32 4294901760, %v300_v34  ;;  %v6026_v1 = vsub.f32 %v264_v37, %v5994_v55  ;;  %v437_v54 = vand.u32 4294901760, %v436_v57  ;;  %v7726_v51 = vand.u32 4294901760, %v6005_v63 }
  0xa6   :  { %506 = vmatpush.msra.mxu2 %v5900_v43  ;;  %568 = vmatpush.msra.mxu3 %v5885_v35  ;;  %v7727_v50 = vand.u32 4294901760, %v6010_v8  ;;  %v6040_v42 = vand.u32 4294901760, %v298_v18  ;;  %v338_v57 = vand.u32 4294901760, %v337_v31  ;;  %v296_v31 = vld [vmem:[%s5569_s17 + $0xd0] sm:$0xff]  ;;  %v6069_v47 = vand.u32 4294901760, %v266_v36 }
  0xa7   :  { %323 = vmatpush.msra.mxu0 %v5906_v46  ;;  %408 = vmatpush.msra.mxu1 %v407_v7  ;;  %v7719_v7 = vand.u32 4294901760, %v5981_v44  ;;  %v7728_v33 = vand.u32 4294901760, %v6026_v1  ;;  %v6089_v14 = vand.u32 4294901760, %v295_v23  ;;  %vm1382_vm14 = vcmask 31744  }
  0xa8   :  { %509 = vmatpush.msra.mxu2 %v5919_v52  ;;  %570 = vmatpush.msra.mxu3 %v5906_v46  ;;  %7770 = vst [vmem:[#allocation51_spill] sm:$0xff] %v6040_v42  ;;  %v6067_v24 = vsub.f32 %v298_v18, %v6040_v42  ;;  %vm1455_vm15 = vcmask 130048  }
  0xa9   :  { %325 = vmatpush.msra.mxu0 %v5913_v48  ;;  %414 = vmatpush.msra.mxu1 %v413_v38  ;;  %v431_v38 = vand.u32 4294901760, %v430_v49  ;;  %v297_v49 = vld [vmem:[%s5569_s17 + $0xd8] sm:$0xff]  ;;  %v448_v37 = vsub.f32 %v5981_v44, %v7719_v7  ;;  %v454_v7 = vsub.f32 %v5992_v53, %v7722_v39  ;;  %v460_v39 = vsub.f32 %v6010_v8, %v7727_v50 }
  0xaa   :  { %512 = vmatpush.msra.mxu2 %v5933_v59  ;;  %572 = vmatpush.msra.mxu3 %v5913_v48  ;;  %v6053_v27 = vand.u32 4294901760, %v297_v49  ;;  %v345_v18 = vsub.f32 %v6026_v1, %v7728_v33 }
  0xab   :  { %327 = vmatpush.msra.mxu0 %v5930_v58  ;;  %420 = vmatpush.msra.mxu1 %v419_v45  ;;  %v6032_v45 = vsub.f32 %v300_v34, %v6002_v60  ;;  %v6045_v34 = vsub.f32 %v299_v56, %v6017_v6  ;;  %v804_v56 = vsub.f32 %v6005_v63, %v7726_v51  ;;  %v461_v33 = vand.u32 4294901760, %v460_v39 }
  0xac   :  { %515 = vmatpush.msra.mxu2 %v5938_v61  ;;  %574 = vmatpush.msra.mxu3 %v5930_v58  ;;  %v6096_v51 = vsub.f32 %v266_v36, %v6069_v47  ;;  %v346_v39 = vand.u32 4294901760, %v345_v18 }
  0xad   :  { %329 = vmatpush.msra.mxu0 %v5945_v0  ;;  %426 = vmatpush.msra.mxu1 %v425_v62  ;;  %v443_v62 = vand.u32 4294901760, %v442_v12  ;;  %v449_v12 = vand.u32 4294901760, %v448_v37  ;;  %v6082_v37 = vsub.f32 %v297_v49, %v6053_v27  ;;  %v7771_v50 = vand.u32 4294901760, %v6032_v45 }
  0xae   :  { %518 = vmatpush.msra.mxu2 %v5962_v26  ;;  %576 = vmatpush.msra.mxu3 %v5945_v0  ;;  %v7730_v49 = vand.u32 4294901760, %v6067_v24 }
  0xaf   :  { %331 = vmatpush.msra.mxu0 %v5958_v13  ;;  %432 = vmatpush.msra.mxu1 %v431_v38  ;;  %v6074_v38 = vand.u32 4294901760, %v296_v31 }
  0xb0   :  { %521 = vmatpush.msra.mxu2 %v5981_v44  ;;  %578 = vmatpush.msra.mxu3 %v5958_v13 }
  0xb1   :  { %333 = vmatpush.msra.mxu0 %v5978_v41  ;;  %438 = vmatpush.msra.mxu1 %v437_v54  ;;  %v455_v54 = vand.u32 4294901760, %v454_v7  ;;  %v7772_v7 = vand.u32 4294901760, %v5838_v15  ;;  %v293_v15 = vld [vmem:[%s5569_s17 + $0xb8] sm:$0xff] }
  0xb2   :  { %339 = vmatmul.f32.vlgmr.msra.gmra.mxu0 %v338_v57  ;;  %524 = vmatpush.msra.mxu2 %v5992_v53  ;;  %v805_v57 = vand.u32 4294901760, %v804_v56  ;;  %v7773_v56 = vand.u32 4294901760, %v5965_v30  ;;  %v6123_v36 = vand.u32 4294901760, %v293_v15 }
  0xb3   :  { %444 = vmatpush.msra.mxu1 %v443_v62  ;;  %609 = vmatpush.msrb.mxu0 %v369_v22  ;;  %v810_v62 = vsub.f32 %v6032_v45, %v7771_v50  ;;  %v294_v22 = vld [vmem:[%s5569_s17 + $0xc0] sm:$0xff]  ;;  %v7774_v50 = vand.u32 4294901760, %v6045_v34 }
  0xb4   :  { %527 = vmatpush.msra.mxu2 %v6010_v8  ;;  %580 = vmatpush.msra.mxu3 %v5978_v41 }
  0xb5   :  { %450 = vmatpush.msra.mxu1 %v449_v12  ;;  %613 = vmatpush.msrb.mxu0 %v7772_v7  ;;  %v816_v41 = vsub.f32 %v6045_v34, %v7774_v50  ;;  %v6105_v12 = vsub.f32 %v296_v31, %v6074_v38  ;;  %v6110_v7 = vand.u32 4294901760, %v294_v22  ;;  %v6115_v50 = vsub.f32 %v295_v23, %v6089_v14  ;;  %v268_v31 = vld [vmem:[%s5554_s5 + $0x30] sm:$0xff] }
  0xb6   :  { %530 = vmatmul.f32.vlgmr.msra.gmra.mxu2 %v5965_v30  ;;  %584 = vmatmul.f32.vlgmr.msra.gmra.mxu3 %v7773_v56  ;;  %v7775_v30 = vand.u32 4294901760, %v5842_v16  ;;  %v811_v56 = vand.u32 4294901760, %v810_v62  ;;  %v292_v16 = vld [vmem:[%s5569_s17 + $0xb0] sm:$0xff]  ;;  %v6137_v18 = vand.u32 4294901760, %v268_v31  ;;  %v6151_v62 = vsub.f32 %v293_v15, %v6123_v36 }
  0xb7   :  { %737 = vmatpush.msrb.mxu2 %v5970_v32  ;;  %456 = vmatpush.msra.mxu1 %v455_v54  ;;  %v822_v54 = vsub.f32 %v6067_v24, %v7730_v49  ;;  %v817_v23 = vand.u32 4294901760, %v816_v41  ;;  %v6135_v49 = vsub.f32 %v294_v22, %v6110_v7  ;;  %v7779_v22 = vand.u32 4294901760, %v6096_v51 }
  0xb8   :  { %617 = vmatpush.msrb.mxu0 %v7775_v30  ;;  %806 = vmatpush.msrb.mxu3 %v805_v57  ;;  %v7776_v57 = vand.u32 4294901760, %v5848_v19  ;;  %v291_v19 = vld [vmem:[%s5569_s17 + $0xa8] sm:$0xff]  ;;  %v6165_v15 = vsub.f32 %v268_v31, %v6137_v18  ;;  %v7733_v31 = vand.u32 4294901760, %v6151_v62 }
  0xb9   :  { %739 = vmatpush.msrb.mxu2 %v6002_v60  ;;  %462 = vmatpush.msra.mxu1 %v461_v33  ;;  %v7777_v33 = vand.u32 4294901760, %v6082_v37 }
  0xba   :  { %621 = vmatpush.msrb.mxu0 %v7776_v57  ;;  %464 = vmatmul.f32.vlgmr.msra.gmra.mxu1 %v5948_v2  ;;  %v6142_v57 = vand.u32 4294901760, %v292_v16 }
  0xbb   :  { %347 = vmatmul.f32.gmra.mxu0 %v346_v39  ;;  %688 = vmatpush.msrb.mxu1 %v5816_v3  ;;  %v828_v30 = vsub.f32 %v6082_v37, %v7777_v33  ;;  %v7778_v3 = vand.u32 4294901760, %v5851_v20  ;;  %v823_v39 = vand.u32 4294901760, %v822_v54  ;;  %v353_v33 = vsub.f32 %v6096_v51, %v7779_v22 }
  0xbc   :  { %741 = vmatpush.msrb.mxu2 %v6017_v6  ;;  %812 = vmatpush.msrb.mxu3 %v811_v56  ;;  %v7780_v56 = vand.u32 4294901760, %v6105_v12  ;;  %v6157_v20 = vand.u32 4294901760, %v291_v19 }
  0xbd   :  { %625 = vmatpush.msrb.mxu0 %v7778_v3  ;;  %690 = vmatpush.msrb.mxu1 %v5818_v4  ;;  %v290_v3 = vld [vmem:[%s5569_s17 + $0xa0] sm:$0xff]  ;;  %v7781_v4 = vand.u32 4294901760, %v5854_v21  ;;  %v829_v54 = vand.u32 4294901760, %v828_v30  ;;  %v289_v21 = vld [vmem:[%s5569_s17 + $0x98] sm:$0xff]  ;;  %v7783_v30 = vand.u32 4294901760, %v5869_v29  ;;  %v7785_v29 = vand.u32 4294901760, %v6135_v49 }
  0xbe   :  { %743 = vmatpush.msrb.mxu2 %v6040_v42  ;;  %818 = vmatpush.msrb.mxu3 %v817_v23  ;;  %v834_v41 = vsub.f32 %v6105_v12, %v7780_v56  ;;  %v7782_v23 = vand.u32 4294901760, %v6115_v50  ;;  %v6173_v42 = vsub.f32 %v292_v16, %v6142_v57  ;;  %v6179_v22 = vand.u32 4294901760, %v290_v3 }
  0xbf   :  { %629 = vmatpush.msrb.mxu0 %v7781_v4  ;;  %535 = vmatmul.f32.gmra.mxu2 %v6026_v1  ;;  %v354_v4 = vand.u32 4294901760, %v353_v33  ;;  %v6185_v16 = vsub.f32 %v291_v19, %v6157_v20  ;;  %v7734_v33 = vand.u32 4294901760, %v6165_v15  ;;  %v263_v19 = vld [vmem:[%s5554_s5 + $0x8] sm:$0xff] }
  0xc0   :  { %692 = vmatpush.msrb.mxu1 %v5820_v5  ;;  %745 = vmatpush.msrb.mxu2 %v6053_v27  ;;  %v840_v56 = vsub.f32 %v6115_v50, %v7782_v23  ;;  %v7784_v5 = vand.u32 4294901760, %v6026_v1  ;;  %v835_v23 = vand.u32 4294901760, %v834_v41  ;;  %v288_v1 = vld [vmem:[%s5569_s17 + $0x90] sm:$0xff]  ;;  %v852_v41 = vsub.f32 %v6151_v62, %v7733_v31  ;;  %v286_v31 = vld [vmem:[%s5569_s17 + $0x80] sm:$0xff] }
  0xc1   :  { %824 = vmatpush.msrb.mxu3 %v823_v39  ;;  %633 = vmatpush.msrb.mxu0 %v7783_v30  ;;  %v846_v39 = vsub.f32 %v6135_v49, %v7785_v29  ;;  %v6192_v30 = vand.u32 4294901760, %v289_v21  ;;  %v287_v29 = vld [vmem:[%s5569_s17 + $0x88] sm:$0xff]  ;;  %s5526_s17 = smov 124  }
  0xc2   :  { %590 = vmatmul.f32.gmra.mxu3 %v7784_v5  ;;  %694 = vmatpush.msrb.mxu1 %v5825_v9  ;;  %v7786_v5 = vand.u32 4294901760, %v5894_v40  ;;  %v841_v9 = vand.u32 4294901760, %v840_v56  ;;  %v7735_v40 = vand.u32 4294901760, %v6185_v16  ;;  %v6209_v56 = vand.u32 4294901760, %v288_v1 }
  0xc3   :  { %747 = vmatpush.msrb.mxu2 %v6074_v38  ;;  %830 = vmatpush.msrb.mxu3 %v829_v54  ;;  %v6204_v54 = vsub.f32 %v290_v3, %v6179_v22  ;;  %v6218_v3 = vsub.f32 %v289_v21, %v6192_v30  ;;  %v7791_v21 = vand.u32 4294901760, %v6096_v51 }
  0xc4   :  { %637 = vmatpush.msrb.mxu0 %v7786_v5  ;;  %468 = vmatmul.f32.gmra.mxu1 %v5994_v55  ;;  %v7787_v5 = vand.u32 4294901760, %v5900_v43 }
  0xc5   :  { %355 = vmatmul.f32.gmra.mxu0 %v354_v4  ;;  %696 = vmatpush.msrb.mxu1 %v5827_v10  ;;  %v847_v10 = vand.u32 4294901760, %v846_v39  ;;  %v361_v4 = vsub.f32 %v6165_v15, %v7734_v33  ;;  %v853_v39 = vand.u32 4294901760, %v852_v41  ;;  %v6240_v33 = vand.u32 4294901760, %v286_v31 }
  0xc6   :  { %749 = vmatpush.msrb.mxu2 %v6089_v14  ;;  %836 = vmatpush.msrb.mxu3 %v835_v23  ;;  %v7788_v23 = vand.u32 4294901760, %v6173_v42  ;;  %v7790_v41 = vand.u32 4294901760, %v5933_v59 }
  0xc7   :  { %641 = vmatpush.msrb.mxu0 %v7787_v5  ;;  %698 = vmatpush.msrb.mxu1 %v5829_v11  ;;  %v6226_v5 = vand.u32 4294901760, %v287_v29  ;;  %v7789_v11 = vand.u32 4294901760, %v5919_v52  ;;  %v6242_v52 = vand.u32 4294901760, %v263_v19 }
  0xc8   :  { %751 = vmatpush.msrb.mxu2 %v6110_v7  ;;  %842 = vmatpush.msrb.mxu3 %v841_v9  ;;  %v858_v43 = vsub.f32 %v6173_v42, %v7788_v23  ;;  %v864_v9 = vsub.f32 %v6185_v16, %v7735_v40  ;;  %v6238_v23 = vsub.f32 %v288_v1, %v6209_v56 }
  0xc9   :  { %645 = vmatpush.msrb.mxu0 %v7789_v11  ;;  %540 = vmatmul.f32.gmra.mxu2 %v6096_v51  ;;  %v362_v11 = vand.u32 4294901760, %v361_v4  ;;  %v6251_v1 = vsub.f32 %v287_v29, %v6226_v5  ;;  %v7793_v4 = vand.u32 4294901760, %v5938_v61  ;;  %v6265_v29 = vsub.f32 %v286_v31, %v6240_v33 }
  0xca   :  { %700 = vmatpush.msrb.mxu1 %v5844_v17  ;;  %753 = vmatpush.msrb.mxu2 %v6123_v36  ;;  %v875_v17 = vand.u32 4294901760, %v6218_v3  ;;  %v859_v40 = vand.u32 4294901760, %v858_v43  ;;  %v865_v51 = vand.u32 4294901760, %v864_v9  ;;  %v6262_v43 = vsub.f32 %v263_v19, %v6242_v52 }
  0xcb   :  { %848 = vmatpush.msrb.mxu3 %v847_v10  ;;  %649 = vmatpush.msrb.mxu0 %v7790_v41  ;;  %v7792_v10 = vand.u32 4294901760, %v6204_v54  ;;  %v887_v61 = vand.u32 4294901760, %v6251_v1  ;;  %v7794_v9 = vand.u32 4294901760, %v5962_v26  ;;  %v7795_v41 = vand.u32 4294901760, %v5981_v44 }
  0xcc   :  { %596 = vmatmul.f32.gmra.mxu3 %v7791_v21  ;;  %702 = vmatpush.msrb.mxu1 %v5861_v25  ;;  %v881_v25 = vand.u32 4294901760, %v6238_v23  ;;  %v265_v21 = vld [vmem:[%s5554_s5 + $0x18] sm:$0xff]  ;;  %v770_v19 = vand.u32 4294901760, %v6262_v43  ;;  %v7797_v44 = vand.u32 4294901760, %v6165_v15 }
  0xcd   :  { %755 = vmatpush.msrb.mxu2 %v6142_v57  ;;  %854 = vmatpush.msrb.mxu3 %v853_v39  ;;  %v870_v59 = vsub.f32 %v6204_v54, %v7792_v10  ;;  %v876_v39 = vsub.f32 %v6218_v3, %v875_v17  ;;  %v7796_v10 = vand.u32 4294901760, %v5992_v53 }
  0xce   :  { %653 = vmatpush.msrb.mxu0 %v7793_v4  ;;  %472 = vmatmul.f32.gmra.mxu1 %v6069_v47 }
  0xcf   :  { %363 = vmatmul.f32.gmra.mxu0 %v362_v11  ;;  %704 = vmatpush.msrb.mxu1 %v5866_v28  ;;  %v871_v31 = vand.u32 4294901760, %v870_v59  ;;  %v882_v28 = vsub.f32 %v6238_v23, %v881_v25  ;;  %v877_v26 = vand.u32 4294901760, %v876_v39  ;;  %v6286_v11 = vand.u32 4294901760, %v265_v21 }
  0xd0   :  { %757 = vmatpush.msrb.mxu2 %v6157_v20  ;;  %860 = vmatpush.msrb.mxu3 %v859_v40  ;;  %v893_v40 = vand.u32 4294901760, %v6265_v29 }
  0xd1   :  { %657 = vmatpush.msrb.mxu0 %v7794_v9  ;;  %706 = vmatpush.msrb.mxu1 %v5885_v35  ;;  %v888_v35 = vsub.f32 %v6251_v1, %v887_v61  ;;  %v883_v59 = vand.u32 4294901760, %v882_v28  ;;  %v6306_v53 = vsub.f32 %v265_v21, %v6286_v11  ;;  %v267_v9 = vld [vmem:[%s5554_s5 + $0x28] sm:$0xff]  ;;  %v7799_v21 = vand.u32 4294901760, %v6005_v63 }
  0xd2   :  { %759 = vmatpush.msrb.mxu2 %v6179_v22  ;;  %866 = vmatpush.msrb.mxu3 %v865_v51  ;;  %v894_v4 = vsub.f32 %v6265_v29, %v893_v40 }
  0xd3   :  { %661 = vmatpush.msrb.mxu0 %v7795_v41  ;;  %545 = vmatmul.f32.gmra.mxu2 %v6165_v15  ;;  %v7798_v15 = vand.u32 4294901760, %v6010_v8  ;;  %v778_v8 = vand.u32 4294901760, %v6306_v53  ;;  %v7802_v41 = vand.u32 4294901760, %v6045_v34 }
  0xd4   :  { %708 = vmatpush.msrb.mxu1 %v5906_v46  ;;  %761 = vmatpush.msrb.mxu2 %v6192_v30  ;;  %v771_v46 = vsub.f32 %v6262_v43, %v770_v19  ;;  %v895_v39 = vand.u32 4294901760, %v894_v4 }
  0xd5   :  { %872 = vmatpush.msrb.mxu3 %v871_v31  ;;  %665 = vmatpush.msrb.mxu0 %v7796_v10  ;;  %v7800_v31 = vld [vmem:[#allocation50_spill] sm:$0xff]  ;;  %v7807_v10 = vand.u32 4294901760, %v6115_v50 }
  0xd6   :  { %602 = vmatmul.f32.gmra.mxu3 %v7797_v44  ;;  %710 = vmatpush.msrb.mxu1 %v5913_v48  ;;  %v889_v48 = vand.u32 4294901760, %v888_v35  ;;  %v772_v51 = vand.u32 4294901760, %v771_v46  ;;  %v7803_v35 = vand.u32 4294901760, %v6067_v24  ;;  %v7808_v44 = vand.u32 4294901760, %v6135_v49 }
  0xd7   :  { %763 = vmatpush.msrb.mxu2 %v6209_v56  ;;  %878 = vmatpush.msrb.mxu3 %v877_v26 }
  0xd8   :  { %669 = vmatpush.msrb.mxu0 %v7798_v15  ;;  %476 = vmatmul.f32.gmra.mxu1 %v6137_v18  ;;  %v1174_v15 = vld [vmem:[%s5574_s21 + $0x20] sm:$0xff] }
  0xd9   :  { %671 = vmatmul.f32.vlgmr.msrb.gmra.mxu0 %v5948_v2  ;;  %712 = vmatpush.msrb.mxu1 %v5930_v58  ;;  %v6321_v58 = vand.u32 4294901760, %v267_v9 }
  0xda   :  { %765 = vmatpush.msrb.mxu2 %v6226_v5  ;;  %884 = vmatpush.msrb.mxu3 %v883_v59  ;;  %v1176_v59 = vld [vmem:[%s5574_s21 + $0x30] sm:$0xff] }
  0xdb   :  { %916 = vmatpush.msra.mxu0 %v6005_v63  ;;  %714 = vmatpush.msrb.mxu1 %v5945_v0  ;;  %v779_v0 = vsub.f32 %v6306_v53, %v778_v8  ;;  %v6335_v28 = vsub.f32 %v267_v9, %v6321_v58 }
  0xdc   :  { %767 = vmatpush.msrb.mxu2 %v6240_v33  ;;  %890 = vmatpush.msrb.mxu3 %v889_v48 }
  0xdd   :  { %919 = vmatpush.msra.mxu0 %v6032_v45  ;;  %716 = vmatpush.msrb.mxu1 %v5958_v13  ;;  %v7801_v13 = vand.u32 4294901760, %v6032_v45  ;;  %v780_v63 = vand.u32 4294901760, %v779_v0  ;;  %v269_v45 = vld [vmem:[%s5554_s5 + $0x38] sm:$0xff]  ;;  %v786_v26 = vand.u32 4294901760, %v6335_v28  ;;  %v1170_v0 = vld [vmem:[%s5574_s21] sm:$0xff]  ;;  %s5524_s5 = smov 112  }
  0xde   :  { %773 = vmatmul.f32.vlgmr.msrb.gmra.mxu2 %v772_v51  ;;  %896 = vmatpush.msrb.mxu3 %v895_v39  ;;  %v1173_v51 = vld [vmem:[%s5574_s21 + $0x18] sm:$0xff]  ;;  %v1172_v39 = vld [vmem:[%s5574_s21 + $0x10] sm:$0xff] }
  0xdf   :  { %1043 = vmatpush.msra.mxu2 %v7799_v21  ;;  %922 = vmatpush.msra.mxu0 %v6045_v34  ;;  %v7805_v34 = vld [vmem:[#allocation51_spill] sm:$0xff] }
  0xe0   :  { %718 = vmatpush.msrb.mxu1 %v7800_v31  ;;  %898 = vmatmul.f32.vlgmr.msrb.gmra.mxu3 %v6242_v52 }
  0xe1   :  { %1047 = vmatpush.msra.mxu2 %v7801_v13  ;;  %1122 = vmatpush.msra.mxu3 %v5970_v32 }
  0xe2   :  { %925 = vmatpush.msra.mxu0 %v6067_v24  ;;  %720 = vmatmul.f32.vlgmr.msrb.gmra.mxu1 %v5948_v2  ;;  %v6352_v2 = vand.u32 4294901760, %v269_v45  ;;  %v787_v24 = vsub.f32 %v6335_v28, %v786_v26 }
  0xe3   :  { %675 = vmatmul.f32.gmra.mxu0 %v5994_v55  ;;  %984 = vmatpush.msra.mxu1 %v5970_v32  ;;  %v7804_v32 = vand.u32 4294901760, %v6082_v37 }
  0xe4   :  { %1051 = vmatpush.msra.mxu2 %v7802_v41  ;;  %1124 = vmatpush.msra.mxu3 %v6002_v60 }
  0xe5   :  { %928 = vmatpush.msra.mxu0 %v6082_v37  ;;  %986 = vmatpush.msra.mxu1 %v6002_v60  ;;  %v7806_v60 = vand.u32 4294901760, %v6105_v12  ;;  %v788_v37 = vand.u32 4294901760, %v787_v24 }
  0xe6   :  { %1055 = vmatpush.msra.mxu2 %v7803_v35  ;;  %1126 = vmatpush.msra.mxu3 %v6017_v6 }
  0xe7   :  { %931 = vmatpush.msra.mxu0 %v6105_v12  ;;  %781 = vmatmul.f32.gmra.mxu2 %v780_v63 }
  0xe8   :  { %988 = vmatpush.msra.mxu1 %v6017_v6  ;;  %1059 = vmatpush.msra.mxu2 %v7804_v32  ;;  %v6368_v6 = vsub.f32 %v269_v45, %v6352_v2 }
  0xe9   :  { %1128 = vmatpush.msra.mxu3 %v7805_v34  ;;  %934 = vmatpush.msra.mxu0 %v6115_v50 }
  0xea   :  { %902 = vmatmul.f32.gmra.mxu3 %v6286_v11  ;;  %990 = vmatpush.msra.mxu1 %v7805_v34  ;;  %v794_v12 = vand.u32 4294901760, %v6368_v6 }
  0xeb   :  { %1063 = vmatpush.msra.mxu2 %v7806_v60  ;;  %1130 = vmatpush.msra.mxu3 %v6053_v27 }
  0xec   :  { %937 = vmatpush.msra.mxu0 %v6135_v49  ;;  %724 = vmatmul.f32.gmra.mxu1 %v5994_v55  ;;  %v795_v55 = vsub.f32 %v6368_v6, %v794_v12  ;;  %v7811_v49 = vand.u32 4294901760, %v6185_v16 }
  0xed   :  { %679 = vmatmul.f32.gmra.mxu0 %v6069_v47  ;;  %992 = vmatpush.msra.mxu1 %v6053_v27  ;;  %v7809_v27 = vand.u32 4294901760, %v6151_v62 }
  0xee   :  { %1067 = vmatpush.msra.mxu2 %v7807_v10  ;;  %1132 = vmatpush.msra.mxu3 %v6074_v38 }
  0xef   :  { %940 = vmatpush.msra.mxu0 %v6151_v62  ;;  %994 = vmatpush.msra.mxu1 %v6074_v38  ;;  %v7810_v38 = vand.u32 4294901760, %v6173_v42 }
  0xf0   :  { %1071 = vmatpush.msra.mxu2 %v7808_v44  ;;  %1134 = vmatpush.msra.mxu3 %v6089_v14 }
  0xf1   :  { %943 = vmatpush.msra.mxu0 %v6173_v42  ;;  %789 = vmatmul.f32.gmra.mxu2 %v788_v37  ;;  %v7812_v42 = vand.u32 4294901760, %v6204_v54 }
  0xf2   :  { %996 = vmatpush.msra.mxu1 %v6089_v14  ;;  %1075 = vmatpush.msra.mxu2 %v7809_v27  ;;  %v796_v14 = vand.u32 4294901760, %v795_v55 }
  0xf3   :  { %1136 = vmatpush.msra.mxu3 %v6110_v7  ;;  %946 = vmatpush.msra.mxu0 %v6185_v16 }
  0xf4   :  { %906 = vmatmul.f32.gmra.mxu3 %v6321_v58  ;;  %998 = vmatpush.msra.mxu1 %v6110_v7 }
  0xf5   :  { %1079 = vmatpush.msra.mxu2 %v7810_v38  ;;  %1138 = vmatpush.msra.mxu3 %v6123_v36 }
  0xf6   :  { %949 = vmatpush.msra.mxu0 %v6204_v54  ;;  %728 = vmatmul.f32.gmra.mxu1 %v6069_v47  ;;  %v1184_v54 = vld [vmem:[%s5574_s21 + $0x70] sm:$0xff] }
  0xf7   :  { %683 = vmatmul.f32.gmra.mxu0 %v6137_v18  ;;  %1000 = vmatpush.msra.mxu1 %v6123_v36 }
  0xf8   :  { %1083 = vmatpush.msra.mxu2 %v7811_v49  ;;  %1140 = vmatpush.msra.mxu3 %v6142_v57 }
  0xf9   :  { %952 = vmatpush.msra.mxu0 %v6218_v3  ;;  %1002 = vmatpush.msra.mxu1 %v6142_v57  ;;  %v1183_v3 = vld [vmem:[%s5574_s21 + $0x68] sm:$0xff] }
  0xfa   :  { %1087 = vmatpush.msra.mxu2 %v7812_v42  ;;  %1142 = vmatpush.msra.mxu3 %v6157_v20 }
  0xfb   :  { %955 = vmatpush.msra.mxu0 %v6238_v23  ;;  %797 = vmatmul.f32.gmra.mxu2 %v796_v14  ;;  %v1182_v23 = vld [vmem:[%s5574_s21 + $0x60] sm:$0xff] }
  0xfc   :  { %1004 = vmatpush.msra.mxu1 %v6157_v20  ;;  %1091 = vmatpush.msra.mxu2 %v875_v17  ;;  %v1181_v17 = vld [vmem:[%s5574_s21 + $0x58] sm:$0xff] }
  0xfd   :  { %1144 = vmatpush.msra.mxu3 %v6179_v22  ;;  %958 = vmatpush.msra.mxu0 %v6251_v1 }
  0xfe   :  { %910 = vmatmul.f32.gmra.mxu3 %v6352_v2  ;;  %1006 = vmatpush.msra.mxu1 %v6179_v22 }
  0xff   :  { %1095 = vmatpush.msra.mxu2 %v881_v25  ;;  %1146 = vmatpush.msra.mxu3 %v6192_v30  ;;  %v1180_v25 = vld [vmem:[%s5574_s21 + $0x50] sm:$0xff] }
 0x100   :  { %961 = vmatpush.msra.mxu0 %v6265_v29  ;;  %732 = vmatmul.f32.gmra.mxu1 %v6137_v18  ;;  %v1179_v29 = vld [vmem:[%s5574_s21 + $0x48] sm:$0xff] }
 0x101   :  { %964 = vmatmul.f32.vlgmr.msra.gmra.mxu0 %v6262_v43  ;;  %1008 = vmatpush.msra.mxu1 %v6192_v30 }
 0x102   :  { %1099 = vmatpush.msra.mxu2 %v887_v61  ;;  %1148 = vmatpush.msra.mxu3 %v6209_v56 }
 0x103   :  { %1010 = vmatpush.msra.mxu1 %v6209_v56 }
 0x104   :  { %1103 = vmatpush.msra.mxu2 %v893_v40  ;;  %1150 = vmatpush.msra.mxu3 %v6226_v5  ;;  %v1177_v40 = vld [vmem:[%s5574_s21 + $0x38] sm:$0xff] }
 0x105   :  { %1012 = vmatpush.msra.mxu1 %v6226_v5  ;;  %1105 = vmatmul.f32.vlgmr.msra.gmra.mxu2 %v6242_v52 }
 0x106   :  { %1152 = vmatpush.msra.mxu3 %v6240_v33 }
 0x107   :  { %1014 = vmatpush.msra.mxu1 %v6240_v33  ;;  %1154 = vmatmul.f32.vlgmr.msra.gmra.mxu3 %v6242_v52  ;;  %v1185_v33 = vld [vmem:[%s5574_s21 + $0x78] sm:$0xff] }
 0x108   :  { %1018 = vmatmul.f32.vlgmr.msra.gmra.mxu1 %v770_v19  ;;  %1190 = vmatpush.msrb.mxu0 %v1185_v33  ;;  %v1178_v19 = vld [vmem:[%s5574_s21 + $0x40] sm:$0xff] }
 0x109   :  { %969 = vmatmul.f32.gmra.mxu0 %v6306_v53  ;;  %4926 = vmatpush.msrb.mxu3 %v1185_v33  ;;  %v1175_v53 = vld [vmem:[%s5574_s21 + $0x28] sm:$0xff] }
 0x10a   :  { %1191 = vmatpush.msrb.mxu0 %v1184_v54 }
 0x10b   :  { %4927 = vmatpush.msrb.mxu3 %v1184_v54 }
 0x10c   :  { %1192 = vmatpush.msrb.mxu0 %v1183_v3 }
 0x10d   :  { %1109 = vmatmul.f32.gmra.mxu2 %v6286_v11  ;;  %4928 = vmatpush.msrb.mxu3 %v1183_v3 }
 0x10e   :  { %1193 = vmatpush.msrb.mxu0 %v1182_v23 }
 0x10f   :  { %1158 = vmatmul.f32.gmra.mxu3 %v6286_v11 }
 0x110   :  { %1024 = vmatmul.f32.gmra.mxu1 %v778_v8  ;;  %4929 = vmatpush.msrb.mxu3 %v1182_v23  ;;  %v1171_v8 = vld [vmem:[%s5574_s21 + $0x8] sm:$0xff]  ;;  %s5527_s21 = smov 120  }
 0x111   :  { %974 = vmatmul.f32.gmra.mxu0 %v6335_v28 }
 0x112   :  { %1194 = vmatpush.msrb.mxu0 %v1181_v17  ;;  %4930 = vmatpush.msrb.mxu3 %v1181_v17 }
 0x114   :  { %1195 = vmatpush.msrb.mxu0 %v1180_v25  ;;  %4931 = vmatpush.msrb.mxu3 %v1180_v25 }
 0x115   :  { %1113 = vmatmul.f32.gmra.mxu2 %v6321_v58 }
 0x116   :  { %1196 = vmatpush.msrb.mxu0 %v1179_v29  ;;  %4932 = vmatpush.msrb.mxu3 %v1179_v29 }
 0x117   :  { %1162 = vmatmul.f32.gmra.mxu3 %v6321_v58 }
 0x118   :  { %1030 = vmatmul.f32.gmra.mxu1 %v786_v26  ;;  %1197 = vmatpush.msrb.mxu0 %v1178_v19 }
 0x119   :  { %979 = vmatmul.f32.gmra.mxu0 %v6368_v6  ;;  %4933 = vmatpush.msrb.mxu3 %v1178_v19 }
 0x11a   :  { %1198 = vmatpush.msrb.mxu0 %v1177_v40 }
 0x11b   :  { %4934 = vmatpush.msrb.mxu3 %v1177_v40 }
 0x11c   :  { %1199 = vmatpush.msrb.mxu0 %v1176_v59 }
 0x11d   :  { %1117 = vmatmul.f32.gmra.mxu2 %v6352_v2  ;;  %4935 = vmatpush.msrb.mxu3 %v1176_v59 }
 0x11e   :  { %1200 = vmatpush.msrb.mxu0 %v1175_v53 }
 0x11f   :  { %1166 = vmatmul.f32.gmra.mxu3 %v6352_v2 }
 0x120   :  { %1036 = vmatmul.f32.gmra.mxu1 %v794_v12  ;;  %4936 = vmatpush.msrb.mxu3 %v1175_v53 }
 0x121   :  { %1201 = vmatpush.msrb.mxu0 %v1174_v15 }
 0x122   :  { %4937 = vmatpush.msrb.mxu3 %v1174_v15 }
 0x123   :  { %1202 = vmatpush.msrb.mxu0 %v1173_v51 }
 0x124   :  { %4938 = vmatpush.msrb.mxu3 %v1173_v51 }
 0x125   :  { %1203 = vmatpush.msrb.mxu0 %v1172_v39 }
 0x126   :  { %4939 = vmatpush.msrb.mxu3 %v1172_v39 }
 0x127   :  { %1204 = vmatpush.msrb.mxu0 %v1171_v8 }
 0x128   :  { %4940 = vmatpush.msrb.mxu3 %v1171_v8 }
 0x129   :  { %1205 = vmatpush.msrb.mxu0 %v1170_v0 }
 0x12a   :  { %4941 = vmatpush.msrb.mxu3 %v1170_v0 }
 0x12f   :  { %v6449_v47 = vpop.f32.mrf.mxu0 }
 0x137   :  { %v6451_v36 = vpop.f32.mrf.mxu1 }
 0x138   :  { %v6453_v7 = vpop.f32.mrf.mxu0  ;;  %v466_v13 = vadd.f32 %v6451_v36, %v6449_v47 }
 0x139   :  { %v6455_v50 = vpop.f32.mrf.mxu2  ;;  %v6457_v18 = vpop.f32.mrf.mxu3 }
 0x13a   :  { %v532_v28 = vadd.f32 %v6455_v50, %v466_v13 }
 0x13c   :  { %v586_v26 = vadd.f32 %v6457_v18, %v532_v28 }
 0x141   :  { %v6459_v62 = vpop.f32.mrf.mxu1 }
 0x142   :  { %v6461_v57 = vpop.f32.mrf.mxu0  ;;  %v6463_v20 = vpop.f32.mrf.mxu2  ;;  %v470_v35 = vadd.f32 %v6459_v62, %v6453_v7 }
 0x144   :  { %v537_v34 = vadd.f32 %v6463_v20, %v470_v35 }
 0x145   :  { %v6465_v22 = vpop.f32.mrf.mxu3 }
 0x146   :  { %v592_v6 = vadd.f32 %v6465_v22, %v537_v34 }
 0x14b   :  { %v6467_v16 = vpop.f32.mrf.mxu1 }
 0x14c   :  { %v6470_v30 = vpop.f32.mrf.mxu0  ;;  %v6473_v56 = vpop.f32.mrf.mxu2  ;;  %v474_v37 = vadd.f32 %v6467_v16, %v6461_v57 }
 0x14e   :  { %v542_v38 = vadd.f32 %v6473_v56, %v474_v37 }
 0x14f   :  { %v6476_v5 = vpop.f32.mrf.mxu3 }
 0x150   :  { %v598_v36 = vadd.f32 %v6476_v5, %v542_v38 }
 0x155   :  { %v6479_v52 = vpop.f32.mrf.mxu1 }
 0x156   :  { %v672_v1 = vpop.f32.mrf.mxu0  ;;  %v6483_v43 = vpop.f32.mrf.mxu2  ;;  %v478_v7 = vadd.f32 %v6479_v52, %v6470_v30 }
 0x157   :  { %v673_v32 = vadd.f32 %v672_v1, %v586_v26 }
 0x158   :  { %v547_v16 = vadd.f32 %v6483_v43, %v478_v7 }
 0x159   :  { %v6486_v61 = vpop.f32.mrf.mxu3 }
 0x15a   :  { %v604_v5 = vadd.f32 %v6486_v61, %v547_v16 }
 0x15f   :  { %v721_v11 = vpop.f32.mrf.mxu1 }
 0x160   :  { %v676_v46 = vpop.f32.mrf.mxu0  ;;  %v722_v24 = vadd.f32 %v721_v11, %v673_v32 }
 0x161   :  { %v774_v4 = vpop.f32.mrf.mxu2  ;;  %v677_v27 = vadd.f32 %v676_v46, %v592_v6 }
 0x162   :  { %v775_v10 = vadd.f32 %v774_v4, %v722_v24 }
 0x163   :  { %v899_v48 = vpop.f32.mrf.mxu3 }
 0x164   :  { %v900_v14 = vadd.f32 %v899_v48, %v775_v10 }
 0x169   :  { %v725_v9 = vpop.f32.mrf.mxu1 }
 0x16a   :  { %v680_v58 = vpop.f32.mrf.mxu0  ;;  %v782_v21 = vpop.f32.mrf.mxu2  ;;  %v726_v49 = vadd.f32 %v725_v9, %v677_v27 }
 0x16b   :  { %v681_v57 = vadd.f32 %v680_v58, %v598_v36 }
 0x16c   :  { %v783_v50 = vadd.f32 %v782_v21, %v726_v49 }
 0x16d   :  { %v903_v31 = vpop.f32.mrf.mxu3 }
 0x16e   :  { %v904_v33 = vadd.f32 %v903_v31, %v783_v50 }
 0x173   :  { %v729_v63 = vpop.f32.mrf.mxu1 }
 0x174   :  { %v684_v41 = vpop.f32.mrf.mxu0  ;;  %v790_v45 = vpop.f32.mrf.mxu2  ;;  %v730_v54 = vadd.f32 %v729_v63, %v681_v57 }
 0x175   :  { %v685_v52 = vadd.f32 %v684_v41, %v604_v5  ;;  %v5104_v41 = vld [vmem:[%s5579_s25] ss:$0 sm:$0xff]  ;;  %s5528_s25 = smov 104  }
 0x176   :  { %v791_v1 = vadd.f32 %v790_v45, %v730_v54 }
 0x177   :  { %v907_v2 = vpop.f32.mrf.mxu3 }
 0x178   :  { %v908_v40 = vadd.f32 %v907_v2, %v791_v1 }
 0x17d   :  { %v733_v60 = vpop.f32.mrf.mxu1 }
 0x17e   :  { %v965_v12 = vpop.f32.mrf.mxu0  ;;  %v798_v44 = vpop.f32.mrf.mxu2  ;;  %v734_v11 = vadd.f32 %v733_v60, %v685_v52  ;;  %v1334_v52 = vld [vmem:[%s5594_s8 + $0x18] sm:$0xff] }
 0x17f   :  { %v966_v42 = vadd.f32 %v965_v12, %v900_v14  ;;  %1359 = vmatpush.msrb.mxu1 %v1334_v52 }
 0x180   :  { %v799_v53 = vadd.f32 %v798_v44, %v734_v11  ;;  %v5523_v44 = vmov 32.0  }
 0x181   :  { %v911_v55 = vpop.f32.mrf.mxu3  ;;  %5135 = vrcp.f32 %v5523_v44 }
 0x182   :  { %v912_v61 = vadd.f32 %v911_v55, %v799_v53 }
 0x185   :  { %v1019_v47 = vpop.f32.mrf.mxu1 }
 0x186   :  { %v970_v18 = vpop.f32.mrf.mxu0  ;;  %v1020_v62 = vadd.f32 %v1019_v47, %v966_v42 }
 0x187   :  { %v971_v23 = vadd.f32 %v970_v18, %v904_v33  ;;  %v5136_v27 = vpop.eup %5135 }
 0x188   :  { %v1106_v20 = vpop.f32.mrf.mxu2  ;;  %v1235_v55 = vmul.f32 32.0, %v5136_v27  ;;  %vm1239_vm1 = vweird.f32 %v5136_v27 }
 0x189   :  { %v1107_v22 = vadd.f32 %v1106_v20, %v1020_v62 }
 0x18a   :  { %v1155_v56 = vpop.f32.mrf.mxu3  ;;  %v1236_v38 = vsub.f32 1.0, %v1235_v55 }
 0x18b   :  { %v1156_v3 = vadd.f32 %v1155_v56, %v1107_v22 }
 0x18c   :  { %v1237_v14 = vmul.f32 %v5136_v27, %v1236_v38 }
 0x18d   :  { %1206 = vmatmul.f32.vlgmr.msrb.gmra.mxu0 %v1156_v3  ;;  %v1025_v17 = vpop.f32.mrf.mxu1 }
 0x18e   :  { %v1026_v25 = vadd.f32 %v1025_v17, %v971_v23  ;;  %v975_v30 = vpop.f32.mrf.mxu0  ;;  %v1238_v49 = vadd.f32 %v5136_v27, %v1237_v14 }
 0x18f   :  { %v976_v43 = vadd.f32 %v975_v30, %v908_v40  ;;  %v1331_v40 = vld [vmem:[%s5594_s8] sm:$0xff] }
 0x190   :  { %v1110_v29 = vpop.f32.mrf.mxu2  ;;  %v6530_v42 = vsel %vm1239_vm1, %v5136_v27, %v1238_v49  ;;  %vm2206_vm1 = vcmask 64512  }
 0x191   :  { %v1111_v19 = vadd.f32 %v1110_v29, %v1026_v25  ;;  %v1333_v29 = vld [vmem:[%s5594_s8 + $0x10] sm:$0xff] }
 0x192   :  { %v1159_v59 = vpop.f32.mrf.mxu3  ;;  %1360 = vmatpush.msrb.mxu1 %v1333_v29 }
 0x193   :  { %v1160_v46 = vadd.f32 %v1159_v59, %v1111_v19  ;;  %v1332_v19 = vld [vmem:[%s5594_s8 + $0x8] sm:$0xff]  ;;  %s5531_s8 = smov 116  }
 0x194   :  { %1361 = vmatpush.msrb.mxu1 %v1332_v19 }
 0x195   :  { %1209 = vmatmul.f32.gmra.mxu0 %v1160_v46  ;;  %v1031_v4 = vpop.f32.mrf.mxu1 }
 0x196   :  { %v1032_v15 = vadd.f32 %v1031_v4, %v976_v43  ;;  %v980_v51 = vpop.f32.mrf.mxu0  ;;  %1362 = vmatpush.msrb.mxu1 %v1331_v40 }
 0x197   :  { %v981_v58 = vadd.f32 %v980_v51, %v912_v61 }
 0x198   :  { %v1114_v48 = vpop.f32.mrf.mxu2 }
 0x199   :  { %v1115_v39 = vadd.f32 %v1114_v48, %v1032_v15 }
 0x19a   :  { %v1163_v9 = vpop.f32.mrf.mxu3 }
 0x19b   :  { %v1164_v8 = vadd.f32 %v1163_v9, %v1115_v39 }
 0x19d   :  { %1212 = vmatmul.f32.gmra.mxu0 %v1164_v8  ;;  %v1037_v21 = vpop.f32.mrf.mxu1 }
 0x19e   :  { %v1038_v0 = vadd.f32 %v1037_v21, %v981_v58 }
 0x1a0   :  { %v1118_v31 = vpop.f32.mrf.mxu2 }
 0x1a1   :  { %v1119_v13 = vadd.f32 %v1118_v31, %v1038_v0 }
 0x1a2   :  { %v1167_v28 = vpop.f32.mrf.mxu3 }
 0x1a3   :  { %v1168_v63 = vadd.f32 %v1167_v28, %v1119_v13  ;;  %v5105_v13 = vld [vmem:[%s5584_s29] ss:$0 sm:$0xff]  ;;  %s5529_s29 = smov 100  }
 0x1a5   :  { %1215 = vmatmul.f32.vlgmr.msrb.gmra.mxu3 %v1168_v63 }
 0x20a   :  { %v1207_v45 = vpop.f32.mrf.mxu0 }
 0x20b   :  { %v6514_v26 = vadd.f32 %v5104_v41, %v1207_v45  ;;  %v5106_v45 = vld [vmem:[%s5589_s3] ss:$0 sm:$0xff]  ;;  %s5530_s3 = smov 96  }
 0x20d   :  { %v1222_v35 = vsel %vm1221_vm0, %v6514_v26, 0.0 }
 0x20e   :  { %1223 = vadd.xlane.f32.xlu0 %v1222_v35 }
 0x212   :  { %v1210_v2 = vpop.f32.mrf.mxu0 }
 0x213   :  { %v6518_v32 = vadd.f32 %v5104_v41, %v1210_v2 }
 0x215   :  { %v1225_v34 = vsel %vm1221_vm0, %v6518_v32, 0.0 }
 0x216   :  { %1226 = vadd.xlane.f32.xlu0 %v1225_v34 }
 0x21a   :  { %v1213_v24 = vpop.f32.mrf.mxu0 }
 0x21b   :  { %v6522_v60 = vadd.f32 %v5104_v41, %v1213_v24 }
 0x21d   :  { %v1228_v6 = vsel %vm1221_vm0, %v6522_v60, 0.0 }
 0x21e   :  { %1229 = vadd.xlane.f32.xlu1 %v1228_v6 }
 0x228   :  { %v1216_v37 = vpop.f32.mrf.mxu3 }
 0x229   :  { %v6526_v10 = vadd.f32 %v5104_v41, %v1216_v37 }
 0x22b   :  { %v1231_v12 = vsel %vm1221_vm0, %v6526_v10, 0.0 }
 0x22c   :  { %1232 = vadd.xlane.f32.xlu1 %v1231_v12 }
 0x281   :  { %v1224_v47 = vpop.xlane.xlu0 %1223 }
 0x282   :  { %v1241_v36 = vmul.f32 %v6530_v42, %v1224_v47 }
 0x284   :  { %v1245_v7 = vsub.f32 %v6514_v26, %v1241_v36 }
 0x286   :  { %v1249_v50 = vmul.f32 %v1245_v7, %v1245_v7 }
 0x288   :  { %v1253_v18 = vsel %vm1221_vm0, %v1249_v50, 0.0 }
 0x289   :  { %1254 = vadd.xlane.f32.xlu2 %v1253_v18  ;;  %v1227_v62 = vpop.xlane.xlu0 %1226 }
 0x28a   :  { %v1242_v57 = vmul.f32 %v6530_v42, %v1227_v62 }
 0x28c   :  { %v6537_v20 = vsub.f32 %v6518_v32, %v1242_v57 }
 0x28e   :  { %v1250_v22 = vmul.f32 %v6537_v20, %v6537_v20 }
 0x290   :  { %v1256_v16 = vsel %vm1221_vm0, %v1250_v22, 0.0 }
 0x291   :  { %v1230_v33 = vpop.xlane.xlu1 %1229  ;;  %1257 = vadd.xlane.f32.xlu2 %v1256_v16 }
 0x292   :  { %v1243_v54 = vmul.f32 %v6530_v42, %v1230_v33 }
 0x294   :  { %v6544_v56 = vsub.f32 %v6522_v60, %v1243_v54 }
 0x296   :  { %v1251_v3 = vmul.f32 %v6544_v56, %v6544_v56 }
 0x298   :  { %v1259_v23 = vsel %vm1221_vm0, %v1251_v3, 0.0 }
 0x299   :  { %1260 = vadd.xlane.f32.xlu0 %v1259_v23 }
 0x29f   :  { %v1233_v17 = vpop.xlane.xlu1 %1232 }
 0x2a0   :  { %v1244_v5 = vmul.f32 %v6530_v42, %v1233_v17 }
 0x2a2   :  { %v6551_v1 = vsub.f32 %v6526_v10, %v1244_v5 }
 0x2a4   :  { %v1252_v25 = vmul.f32 %v6551_v1, %v6551_v1 }
 0x2a6   :  { %v1262_v30 = vsel %vm1221_vm0, %v1252_v25, 0.0 }
 0x2a7   :  { %1263 = vadd.xlane.f32.xlu1 %v1262_v30 }
 0x2fc   :  { %v1255_v11 = vpop.xlane.xlu2 %1254 }
 0x2fd   :  { %v1265_v59 = vmul.f32 %v1255_v11, %v6530_v42 }
 0x2ff   :  { %v1269_v46 = vadd.f32 1e-05, %v1265_v59 }
 0x301   :  { %5137 = vrsqrt.f32 %v1269_v46  ;;  %vm1279_vm3 = vweird.f32 %v1269_v46 }
 0x304   :  { %v1258_v43 = vpop.xlane.xlu2 %1257 }
 0x305   :  { %v1266_v4 = vmul.f32 %v1258_v43, %v6530_v42 }
 0x307   :  { %v5138_v53 = vpop.eup %5137  ;;  %v1270_v15 = vadd.f32 1e-05, %v1266_v4 }
 0x308   :  { %v1274_v48 = vmul.f32 %v5138_v53, %v1269_v46  ;;  %vm1280_vm2 = vweird.f32 %v5138_v53 }
 0x309   :  { %5139 = vrsqrt.f32 %v1270_v15  ;;  %vm1281_vm4 = vmor %vm1279_vm3, %vm1280_vm2  ;;  %vm1289_vm6 = vweird.f32 %v1270_v15  ;;  %vm2215_vm2 = vcmask 195584  }
 0x30a   :  { %v1275_v51 = vmul.f32 %v5138_v53, %v1274_v48 }
 0x30c   :  { %v1276_v39 = vmul.f32 0.5, %v1275_v51  ;;  %v1261_v61 = vpop.xlane.xlu0 %1260 }
 0x30d   :  { %v1267_v9 = vmul.f32 %v1261_v61, %v6530_v42 }
 0x30e   :  { %v1277_v8 = vsub.f32 1.5, %v1276_v39 }
 0x30f   :  { %v5140_v58 = vpop.eup %5139  ;;  %v1271_v21 = vadd.f32 1e-05, %v1267_v9 }
 0x310   :  { %v1278_v0 = vmul.f32 %v5138_v53, %v1277_v8  ;;  %v1284_v31 = vmul.f32 %v5140_v58, %v1270_v15  ;;  %vm1290_vm5 = vweird.f32 %v5140_v58 }
 0x311   :  { %5141 = vrsqrt.f32 %v1271_v21  ;;  %vm1291_vm7 = vmor %vm1289_vm6, %vm1290_vm5  ;;  %vm1299_vm9 = vweird.f32 %v1271_v21 }
 0x312   :  { %v1282_v28 = vsel %vm1281_vm4, %v5138_v53, %v1278_v0  ;;  %v1285_v63 = vmul.f32 %v5140_v58, %v1284_v31 }
 0x313   :  { %v1313_v41 = vmul.f32 %v1282_v28, %v1245_v7 }
 0x314   :  { %v1286_v35 = vmul.f32 0.5, %v1285_v63 }
 0x315   :  { %v1320_v2 = vmul.f32 %v5105_v13, %v1313_v41 }
 0x316   :  { %v1287_v34 = vsub.f32 1.5, %v1286_v35 }
 0x317   :  { %v5142_v24 = vpop.eup %5141  ;;  %v1327_v6 = vadd.f32 %v5106_v45, %v1320_v2 }
 0x318   :  { %v1288_v37 = vmul.f32 %v5140_v58, %v1287_v34  ;;  %v1294_v12 = vmul.f32 %v5142_v24, %v1271_v21  ;;  %vm1300_vm8 = vweird.f32 %v5142_v24 }
 0x319   :  { %4803 = vmatmul.msk.f32.vlgmr.msrb.gmra.mxu1 %vm1221_vm0, %v1327_v6  ;;  %vm1301_vm10 = vmor %vm1299_vm9, %vm1300_vm8 }
 0x31a   :  { %v1295_v44 = vmul.f32 %v5142_v24, %v1294_v12  ;;  %v1264_v27 = vpop.xlane.xlu1 %1263  ;;  %v1292_v55 = vsel %vm1291_vm7, %v5140_v58, %v1288_v37 }
 0x31b   :  { %v1268_v38 = vmul.f32 %v1264_v27, %v6530_v42  ;;  %v1314_v14 = vmul.f32 %v1292_v55, %v6537_v20 }
 0x31c   :  { %v1296_v49 = vmul.f32 0.5, %v1295_v44 }
 0x31d   :  { %v1272_v47 = vadd.f32 1e-05, %v1268_v38  ;;  %v1321_v36 = vmul.f32 %v5105_v13, %v1314_v14 }
 0x31e   :  { %v1297_v7 = vsub.f32 1.5, %v1296_v49 }
 0x31f   :  { %5143 = vrsqrt.f32 %v1272_v47  ;;  %v1328_v50 = vadd.f32 %v5106_v45, %v1321_v36  ;;  %vm1309_vm12 = vweird.f32 %v1272_v47 }
 0x320   :  { %v1298_v18 = vmul.f32 %v5142_v24, %v1297_v7 }
 0x321   :  { %4804 = vmatmul.msk.f32.gmra.mxu1 %vm1221_vm0, %v1328_v50 }
 0x322   :  { %v1302_v62 = vsel %vm1301_vm10, %v5142_v24, %v1298_v18 }
 0x323   :  { %v1315_v57 = vmul.f32 %v1302_v62, %v6544_v56 }
 0x325   :  { %v5144_v22 = vpop.eup %5143  ;;  %v1322_v16 = vmul.f32 %v5105_v13, %v1315_v57 }
 0x326   :  { %v1304_v33 = vmul.f32 %v5144_v22, %v1272_v47  ;;  %vm1310_vm11 = vweird.f32 %v5144_v22 }
 0x327   :  { %v1329_v54 = vadd.f32 %v5106_v45, %v1322_v16  ;;  %vm1311_vm13 = vmor %vm1309_vm12, %vm1310_vm11 }
 0x328   :  { %v1305_v20 = vmul.f32 %v5144_v22, %v1304_v33 }
 0x329   :  { %4805 = vmatmul.msk.f32.gmra.mxu1 %vm1221_vm0, %v1329_v54 }
 0x32a   :  { %v1306_v3 = vmul.f32 0.5, %v1305_v20 }
 0x32c   :  { %v1307_v23 = vsub.f32 1.5, %v1306_v3 }
 0x32e   :  { %v1308_v17 = vmul.f32 %v5144_v22, %v1307_v23 }
 0x330   :  { %v1312_v5 = vsel %vm1311_vm13, %v5144_v22, %v1308_v17 }
 0x331   :  { %v1316_v25 = vmul.f32 %v1312_v5, %v6551_v1 }
 0x333   :  { %v1323_v30 = vmul.f32 %v5105_v13, %v1316_v25 }
 0x335   :  { %v1330_v52 = vadd.f32 %v5106_v45, %v1323_v30 }
 0x337   :  { %4806 = vmatmul.msk.f32.gmra.mxu1 %vm1221_vm0, %v1330_v52 }
 0x396   :  { %v1364_v56 = vpop.f32.mrf.mxu1 }
 0x397   :  { %1378 = vrot.lane.b32.xlu0 %v1364_v56, %s5524_s5 }
 0x39e   :  { %v1367_v29 = vpop.f32.mrf.mxu1 }
 0x39f   :  { %1576 = vrot.lane.b32.xlu0 %v1367_v29, %s5525_s9  ;;  %1380 = vrot.lane.b32.xlu2 %v1367_v29, %s5524_s5  ;;  %v6611_v40 = vpack.i.bf16 %v1364_v56, %v1367_v29 }
 0x3a6   :  { %v6576_v19 = vpop.f32.mrf.mxu1 }
 0x3a7   :  { %1572 = vrot.lane.b32.xlu0 %v1367_v29, %s5526_s17  ;;  %1416 = vrot.lane.b32.xlu2 %v6576_v19, %s5524_s5 }
 0x3af   :  { %1613 = vrot.lane.b32.xlu0 %v6576_v19, %s5525_s9  ;;  %1574 = vrot.lane.b32.xlu2 %v1364_v56, %s5525_s9 }
 0x3b4   :  { %v6584_v1 = vpop.f32.mrf.mxu1 }
 0x3b5   :  { %1418 = vrot.lane.b32.xlu1 %v6584_v1, %s5524_s5  ;;  %v6619_v11 = vpack.i.bf16 %v6576_v19, %v6584_v1 }
 0x3b7   :  { %1766 = vrot.lane.b32.xlu0 %v1364_v56, %s5527_s21  ;;  %1770 = vrot.lane.b32.xlu2 %v1364_v56, %s5528_s25 }
 0x3bd   :  { %1570 = vrot.lane.b32.xlu1 %v1364_v56, %s5526_s17 }
 0x3bf   :  { %1811 = vrot.lane.b32.xlu0 %v6584_v1, %s5528_s25  ;;  %1615 = vrot.lane.b32.xlu2 %v6584_v1, %s5525_s9 }
 0x3c5   :  { %1772 = vrot.lane.b32.xlu1 %v1367_v29, %s5528_s25 }
 0x3c7   :  { %1966 = vrot.lane.b32.xlu0 %v1364_v56, %s5529_s29  ;;  %1968 = vrot.lane.b32.xlu2 %v1367_v29, %s5529_s29 }
 0x3cd   :  { %1609 = vrot.lane.b32.xlu1 %v6576_v19, %s5526_s17 }
 0x3cf   :  { %1807 = vrot.lane.b32.xlu0 %v6584_v1, %s5527_s21  ;;  %1611 = vrot.lane.b32.xlu2 %v6584_v1, %s5526_s17 }
 0x3d5   :  { %1768 = vrot.lane.b32.xlu1 %v1367_v29, %s5527_s21 }
 0x3d7   :  { %2005 = vrot.lane.b32.xlu0 %v6576_v19, %s5529_s29  ;;  %1805 = vrot.lane.b32.xlu2 %v6576_v19, %s5527_s21 }
 0x3dd   :  { %1809 = vrot.lane.b32.xlu1 %v6576_v19, %s5528_s25 }
 0x3df   :  { %5020 = vrot.lane.b32.xlu0 %v6611_v40, %s5530_s3  ;;  %1964 = vrot.lane.b32.xlu2 %v1367_v29, %s5531_s8 }
 0x3e5   :  { %1962 = vrot.lane.b32.xlu1 %v1364_v56, %s5531_s8 }
 0x3e7   :  { %5035 = vrot.lane.b32.xlu0 %v6619_v11, %s5530_s3  ;;  %2001 = vrot.lane.b32.xlu2 %v6576_v19, %s5531_s8 }
 0x3ed   :  { %2007 = vrot.lane.b32.xlu1 %v6584_v1, %s5529_s29 }
 0x3ef   :  { %5030 = vrot.lane.b32.xlu2 %v6611_v40, %s5532_s12 }
 0x3f5   :  { %2003 = vrot.lane.b32.xlu1 %v6584_v1, %s5531_s8 }
 0x3f9   :  { %v1381_v59 = vpop.permute.xlu2 %1380 }
 0x3fa   :  { %4807 = vmatpush.xpose.msk.msrb.mxu2 %vm1382_vm14, %v1381_v59 }
 0x3fd   :  { %5025 = vrot.lane.b32.xlu1 %v6611_v40, %s5533_s2 }
 0x401   :  { %v1417_v46 = vpop.permute.xlu2 %1416 }
 0x405   :  { %5040 = vrot.lane.b32.xlu1 %v6619_v11, %s5533_s2 }
 0x409   :  { %v1575_v43 = vpop.permute.xlu2 %1574  ;;  %v1379_v4 = vpop.permute.xlu0 %1378 }
 0x40a   :  { %4808 = vmatpush.xpose.msk.msrb.mxu2 %vm1382_vm14, %v1379_v4 }
 0x40d   :  { %4809 = vmatmul.msk.f32.vlgmr.msrb.gmra.mxu2 %vm1382_vm14, %v1364_v56 }
 0x411   :  { %v1771_v53 = vpop.permute.xlu2 %1770  ;;  %v1577_v15 = vpop.permute.xlu0 %1576 }
 0x412   :  { %4819 = vmatpush.xpose.msk.msra.mxu0 %vm1382_vm14, %v1577_v15 }
 0x415   :  { %4810 = vmatmul.msk.f32.gmra.mxu2 %vm1382_vm14, %v1367_v29 }
 0x416   :  { %4820 = vmatpush.xpose.msk.msra.mxu0 %vm1382_vm14, %v1575_v43 }
 0x419   :  { %v1573_v48 = vpop.permute.xlu0 %1572  ;;  %v1616_v51 = vpop.permute.xlu2 %1615 }
 0x41a   :  { %4823 = vmatpush.xpose.msk.msra.mxu1 %vm1382_vm14, %v1616_v51 }
 0x421   :  { %v1614_v39 = vpop.permute.xlu0 %1613  ;;  %v1969_v31 = vpop.permute.xlu2 %1968 }
 0x422   :  { %4824 = vmatpush.xpose.msk.msra.mxu1 %vm1382_vm14, %v1614_v39 }
 0x427   :  { %v1419_v61 = vpop.permute.xlu1 %1418 }
 0x428   :  { %4811 = vmatpush.xpose.msk.msra.mxu3 %vm1382_vm14, %v1419_v61 }
 0x429   :  { %v1767_v9 = vpop.permute.xlu0 %1766  ;;  %v1612_v63 = vpop.permute.xlu2 %1611 }
 0x42c   :  { %4812 = vmatpush.xpose.msk.msra.mxu3 %vm1382_vm14, %v1417_v46 }
 0x42f   :  { %4813 = vmatmul.msk.f32.vlgmr.msra.gmra.mxu3 %vm1382_vm14, %v6576_v19  ;;  %v1571_v8 = vpop.permute.xlu1 %1570 }
 0x430   :  { %4821 = vmatmul.msk.f32.vlgmr.msra.gmra.mxu0 %vm1382_vm14, %v1571_v8 }
 0x431   :  { %v1812_v58 = vpop.permute.xlu0 %1811  ;;  %v1806_v34 = vpop.permute.xlu2 %1805 }
 0x432   :  { %4835 = vmatpush.xpose.msk.msrb.mxu1 %vm1382_vm14, %v1812_v58 }
 0x437   :  { %4814 = vmatmul.msk.f32.gmra.mxu3 %vm1382_vm14, %v6584_v1  ;;  %v1773_v21 = vpop.permute.xlu1 %1772 }
 0x438   :  { %4822 = vmatmul.msk.f32.gmra.mxu0 %vm1382_vm14, %v1573_v48 }
 0x439   :  { %4831 = vmatpush.xpose.msk.msrb.mxu0 %vm1382_vm14, %v1773_v21  ;;  %v1967_v0 = vpop.permute.xlu0 %1966  ;;  %v1965_v27 = vpop.permute.xlu2 %1964 }
 0x43d   :  { %4832 = vmatpush.xpose.msk.msrb.mxu0 %vm1382_vm14, %v1771_v53 }
 0x43f   :  { %v1610_v13 = vpop.permute.xlu1 %1609 }
 0x440   :  { %4825 = vmatmul.msk.f32.vlgmr.msra.gmra.mxu1 %vm1382_vm14, %v1610_v13  ;;  %4833 = vmatmul.msk.f32.vlgmr.msrb.gmra.mxu0 %vm1382_vm14, %v1767_v9 }
 0x441   :  { %4843 = vmatpush.xpose.msk.msra.mxu0 %vm1382_vm14, %v1969_v31  ;;  %v1808_v28 = vpop.permute.xlu0 %1807  ;;  %v2002_v14 = vpop.permute.xlu2 %2001 }
 0x445   :  { %4844 = vmatpush.xpose.msk.msra.mxu0 %vm1382_vm14, %v1967_v0 }
 0x447   :  { %v1769_v41 = vpop.permute.xlu1 %1768 }
 0x448   :  { %4826 = vmatmul.msk.f32.gmra.mxu1 %vm1382_vm14, %v1612_v63  ;;  %4834 = vmatmul.msk.f32.gmra.mxu0 %vm1382_vm14, %v1769_v41 }
 0x449   :  { %v2006_v45 = vpop.permute.xlu0 %2005 }
 0x44f   :  { %v1810_v35 = vpop.permute.xlu1 %1809 }
 0x450   :  { %4836 = vmatpush.xpose.msk.msrb.mxu1 %vm1382_vm14, %v1810_v35 }
 0x451   :  { %v5021_v2 = vpop.permute.xlu0 %5020 }
 0x452   :  { %v5022_v24 = vunpack.i.l.bf16 %v5021_v2  ;;  %v5023_v6 = vunpack.i.h.bf16 %v5021_v2 }
 0x453   :  { %4837 = vmatmul.msk.f32.vlgmr.msrb.gmra.mxu1 %vm1382_vm14, %v1806_v34 }
 0x454   :  { %1526 = vmatpush.msra.mxu2 %v5022_v24 }
 0x456   :  { %1527 = vmatpush.msra.mxu2 %v5023_v6 }
 0x457   :  { %v1963_v37 = vpop.permute.xlu1 %1962 }
 0x458   :  { %4845 = vmatmul.msk.f32.vlgmr.msra.gmra.mxu0 %vm1382_vm14, %v1963_v37 }
 0x459   :  { %v5036_v12 = vpop.permute.xlu0 %5035 }
 0x45a   :  { %v5037_v44 = vunpack.i.l.bf16 %v5036_v12  ;;  %v5038_v55 = vunpack.i.h.bf16 %v5036_v12 }
 0x45b   :  { %4838 = vmatmul.msk.f32.gmra.mxu1 %vm1382_vm14, %v1808_v28 }
 0x45c   :  { %1561 = vmatpush.msrb.mxu3 %v5037_v44 }
 0x45e   :  { %1562 = vmatpush.msrb.mxu3 %v5038_v55 }
 0x45f   :  { %v2008_v38 = vpop.permute.xlu1 %2007 }
 0x460   :  { %4846 = vmatmul.msk.f32.gmra.mxu0 %vm1382_vm14, %v1965_v27  ;;  %4847 = vmatpush.xpose.msk.msra.mxu1 %vm1382_vm14, %v2008_v38  ;;  %v6733_v38 = vpop.permute.xlu2 %5030 }
 0x464   :  { %4848 = vmatpush.xpose.msk.msra.mxu1 %vm1382_vm14, %v2006_v45 }
 0x467   :  { %4849 = vmatmul.msk.f32.vlgmr.msra.gmra.mxu1 %vm1382_vm14, %v2002_v14  ;;  %v2004_v49 = vpop.permute.xlu1 %2003 }
 0x46f   :  { %4850 = vmatmul.msk.f32.gmra.mxu1 %vm1382_vm14, %v2004_v49  ;;  %v5026_v47 = vpop.permute.xlu1 %5025 }
 0x470   :  { %v5027_v36 = vunpack.i.l.bf16 %v5026_v47  ;;  %v5028_v7 = vunpack.i.h.bf16 %v5026_v47 }
 0x472   :  { %1722 = vmatpush.msrb.mxu2 %v5027_v36 }
 0x474   :  { %1723 = vmatpush.msrb.mxu2 %v5028_v7 }
 0x477   :  { %v5041_v50 = vpop.permute.xlu1 %5040 }
 0x478   :  { %v5042_v18 = vunpack.i.l.bf16 %v5041_v50  ;;  %v5043_v62 = vunpack.i.h.bf16 %v5041_v50 }
 0x47a   :  { %1757 = vmatpush.msra.mxu3 %v5042_v18 }
 0x47c   :  { %1758 = vmatpush.msra.mxu3 %v5043_v62 }
 0x490   :  { %v1408_v57 = vpop.f32.mrf.mxu2 }
 0x491   :  { %v6677_v23 = vmul.f32 0.25, %v1408_v57 }
 0x493   :  { %v1456_v30 = vsel %vm1455_vm15, %v6677_v23, -inf }
 0x498   :  { %v1411_v22 = vpop.f32.mrf.mxu2 }
 0x499   :  { %v6669_v16 = vmul.f32 0.25, %v1411_v22 }
 0x49b   :  { %v1459_v33 = vsel %vm1455_vm15, %v6669_v16, -inf }
 0x49c   :  { %1460 = vmax.xlane.f32.xlu2 %v1459_v33 }
 0x4ad   :  { %v1603_v54 = vpop.f32.mrf.mxu0 }
 0x4ae   :  { %v6673_v20 = vmul.f32 0.25, %v1603_v54 }
 0x4b0   :  { %v1652_v3 = vsel %vm1455_vm15, %v6673_v20, -inf }
 0x4b1   :  { %1653 = vmax.xlane.f32.xlu0 %v1652_v3 }
 0x4b2   :  { %v1445_v25 = vpop.f32.mrf.mxu3 }
 0x4b3   :  { %v6685_v56 = vmul.f32 0.25, %v1445_v25 }
 0x4b5   :  { %v1606_v17 = vpop.f32.mrf.mxu0  ;;  %v1462_v46 = vsel %vm1455_vm15, %v6685_v56, -inf }
 0x4b6   :  { %v6679_v5 = vmul.f32 0.25, %v1606_v17 }
 0x4b8   :  { %v1655_v52 = vsel %vm1455_vm15, %v6679_v5, -inf }
 0x4b9   :  { %1457 = vmax.xlane.f32.xlu0 %v1456_v30  ;;  %1656 = vmax.xlane.f32.xlu1 %v1655_v52 }
 0x4ba   :  { %v1448_v53 = vpop.f32.mrf.mxu3 }
 0x4bb   :  { %v6697_v15 = vmul.f32 0.25, %v1448_v53 }
 0x4bd   :  { %v1642_v29 = vpop.f32.mrf.mxu1  ;;  %v1799_v19 = vpop.f32.mrf.mxu0  ;;  %v1465_v9 = vsel %vm1455_vm15, %v6697_v15, -inf }
 0x4be   :  { %v6687_v1 = vmul.f32 0.25, %v1642_v29  ;;  %v6689_v59 = vmul.f32 0.25, %v1799_v19 }
 0x4c0   :  { %v1848_v43 = vsel %vm1455_vm15, %v6689_v59, -inf  ;;  %v1658_v4 = vsel %vm1455_vm15, %v6687_v1, -inf }
 0x4c1   :  { %1463 = vmax.xlane.f32.xlu1 %v1462_v46  ;;  %1849 = vmax.xlane.f32.xlu2 %v1848_v43 }
 0x4c2   :  { %1659 = vmax.xlane.f32.xlu0 %v1658_v4 }
 0x4c5   :  { %v1645_v48 = vpop.f32.mrf.mxu1  ;;  %v1802_v51 = vpop.f32.mrf.mxu0 }
 0x4c6   :  { %v6699_v39 = vmul.f32 0.25, %v1645_v48  ;;  %v6701_v61 = vmul.f32 0.25, %v1802_v51 }
 0x4c8   :  { %v1661_v8 = vsel %vm1455_vm15, %v6699_v39, -inf  ;;  %v1851_v58 = vsel %vm1455_vm15, %v6701_v61, -inf }
 0x4c9   :  { %1466 = vmax.xlane.f32.xlu2 %v1465_v9  ;;  %1662 = vmax.xlane.f32.xlu1 %v1661_v8 }
 0x4ca   :  { %1852 = vmax.xlane.f32.xlu0 %v1851_v58 }
 0x4d0   :  { %v1838_v21 = vpop.f32.mrf.mxu1 }
 0x4d1   :  { %v6709_v0 = vmul.f32 0.25, %v1838_v21 }
 0x4d3   :  { %v1854_v31 = vsel %vm1455_vm15, %v6709_v0, -inf }
 0x4d4   :  { %1855 = vmax.xlane.f32.xlu2 %v1854_v31 }
 0x4d5   :  { %v1995_v13 = vpop.f32.mrf.mxu0 }
 0x4d6   :  { %v6713_v28 = vmul.f32 0.25, %v1995_v13 }
 0x4d8   :  { %v1841_v63 = vpop.f32.mrf.mxu1  ;;  %v2044_v41 = vsel %vm1455_vm15, %v6713_v28, -inf }
 0x4d9   :  { %v6717_v45 = vmul.f32 0.25, %v1841_v63  ;;  %2045 = vmax.xlane.f32.xlu1 %v2044_v41 }
 0x4db   :  { %v1857_v35 = vsel %vm1455_vm15, %v6717_v45, -inf }
 0x4dc   :  { %1858 = vmax.xlane.f32.xlu2 %v1857_v35 }
 0x4dd   :  { %v1998_v2 = vpop.f32.mrf.mxu0 }
 0x4de   :  { %v6721_v34 = vmul.f32 0.25, %v1998_v2 }
 0x4e0   :  { %v2047_v24 = vsel %vm1455_vm15, %v6721_v34, -inf }
 0x4e1   :  { %2048 = vmax.xlane.f32.xlu1 %v2047_v24 }
 0x4e4   :  { %v2034_v6 = vpop.f32.mrf.mxu1 }
 0x4e5   :  { %v6725_v37 = vmul.f32 0.25, %v2034_v6 }
 0x4e7   :  { %v2050_v12 = vsel %vm1455_vm15, %v6725_v37, -inf }
 0x4e9   :  { %2051 = vmax.xlane.f32.xlu1 %v2050_v12 }
 0x4ec   :  { %v2037_v44 = vpop.f32.mrf.mxu1 }
 0x4ed   :  { %v6729_v27 = vmul.f32 0.25, %v2037_v44 }
 0x4ef   :  { %v2053_v55 = vsel %vm1455_vm15, %v6729_v27, -inf }
 0x4f0   :  { %2054 = vmax.xlane.f32.xlu2 %v2053_v55 }
 0x50f   :  { %v1461_v14 = vpop.xlane.xlu2 %1460 }
 0x510   :  { %v1469_v49 = vsub.f32 %v6669_v16, %v1461_v14 }
 0x512   :  { %v1474_v47 = vmul.f32 1.442695, %v1469_v49 }
 0x514   :  { %5145 = vpow2.f32 %v1474_v47 }
 0x51a   :  { %v6736_v36 = vpop.eup %5145 }
 0x51b   :  { %v1483_v7 = vsel %vm1455_vm15, %v6736_v36, 0.0 }
 0x51c   :  { %1484 = vadd.xlane.f32.xlu2 %v1483_v7 }
 0x524   :  { %v1654_v50 = vpop.xlane.xlu0 %1653 }
 0x525   :  { %v1664_v18 = vsub.f32 %v6673_v20, %v1654_v50 }
 0x527   :  { %v1668_v62 = vmul.f32 1.442695, %v1664_v18 }
 0x529   :  { %5147 = vpow2.f32 %v1668_v62 }
 0x52c   :  { %v1458_v57 = vpop.xlane.xlu0 %1457  ;;  %v1657_v22 = vpop.xlane.xlu1 %1656 }
 0x52d   :  { %v1468_v33 = vsub.f32 %v6677_v23, %v1458_v57  ;;  %v1665_v3 = vsub.f32 %v6679_v5, %v1657_v22 }
 0x52f   :  { %v6742_v54 = vpop.eup %5147  ;;  %v1472_v16 = vmul.f32 1.442695, %v1468_v33  ;;  %v1670_v25 = vmul.f32 1.442695, %v1665_v3 }
 0x530   :  { %v1676_v17 = vsel %vm1455_vm15, %v6742_v54, 0.0 }
 0x531   :  { %5149 = vpow2.f32 %v1472_v16  ;;  %1677 = vadd.xlane.f32.xlu1 %v1676_v17 }
 0x532   :  { %5151 = vpow2.f32 %v1670_v25 }
 0x534   :  { %v1850_v30 = vpop.xlane.xlu2 %1849  ;;  %v1464_v52 = vpop.xlane.xlu1 %1463 }
 0x535   :  { %v1860_v20 = vsub.f32 %v6689_v59, %v1850_v30  ;;  %v1660_v29 = vpop.xlane.xlu0 %1659  ;;  %v1470_v59 = vsub.f32 %v6685_v56, %v1464_v52 }
 0x536   :  { %v1666_v46 = vsub.f32 %v6687_v1, %v1660_v29 }
 0x537   :  { %v6748_v19 = vpop.eup %5149  ;;  %v1864_v23 = vmul.f32 1.442695, %v1860_v20  ;;  %v1476_v58 = vmul.f32 1.442695, %v1470_v59 }
 0x538   :  { %v1480_v5 = vsel %vm1455_vm15, %v6748_v19, 0.0  ;;  %v1672_v43 = vmul.f32 1.442695, %v1666_v46  ;;  %v6753_v53 = vpop.eup %5151 }
 0x539   :  { %5153 = vpow2.f32 %v1864_v23  ;;  %1481 = vadd.xlane.f32.xlu0 %v1480_v5  ;;  %v1679_v8 = vsel %vm1455_vm15, %v6753_v53, 0.0 }
 0x53a   :  { %5155 = vpow2.f32 %v1672_v43 }
 0x53c   :  { %v1663_v4 = vpop.xlane.xlu1 %1662  ;;  %v1467_v21 = vpop.xlane.xlu2 %1466 }
 0x53d   :  { %v1667_v48 = vsub.f32 %v6699_v39, %v1663_v4  ;;  %v1471_v39 = vsub.f32 %v6697_v15, %v1467_v21  ;;  %v1853_v18 = vpop.xlane.xlu0 %1852 }
 0x53e   :  { %v1861_v62 = vsub.f32 %v6701_v61, %v1853_v18 }
 0x53f   :  { %v6756_v51 = vpop.eup %5153  ;;  %v1674_v9 = vmul.f32 1.442695, %v1667_v48  ;;  %v1478_v41 = vmul.f32 1.442695, %v1471_v39 }
 0x540   :  { %v1872_v1 = vsel %vm1455_vm15, %v6756_v51, 0.0  ;;  %v6763_v31 = vpop.eup %5155  ;;  %v1866_v57 = vmul.f32 1.442695, %v1861_v62 }
 0x541   :  { %1873 = vadd.xlane.f32.xlu2 %v1872_v1  ;;  %1680 = vadd.xlane.f32.xlu0 %v1679_v8  ;;  %5157 = vpow2.f32 %v1674_v9  ;;  %v1682_v56 = vsel %vm1455_vm15, %v6763_v31, 0.0  ;;  %v5032_v8 = vunpack.i.l.bf16 %v6733_v38 }
 0x542   :  { %5159 = vpow2.f32 %v1476_v58  ;;  %v5033_v58 = vunpack.i.h.bf16 %v6733_v38 }
 0x543   :  { %5161 = vpow2.f32 %v1478_v41 }
 0x547   :  { %v6768_v13 = vpop.eup %5157  ;;  %v1856_v35 = vpop.xlane.xlu2 %1855 }
 0x548   :  { %v1685_v63 = vsel %vm1455_vm15, %v6768_v13, 0.0  ;;  %v6772_v24 = vpop.eup %5159  ;;  %v1862_v6 = vsub.f32 %v6709_v0, %v1856_v35 }
 0x549   :  { %1683 = vadd.xlane.f32.xlu2 %v1682_v56  ;;  %1686 = vadd.xlane.f32.xlu1 %v1685_v63  ;;  %v1486_v15 = vsel %vm1455_vm15, %v6772_v24, 0.0  ;;  %v6777_v55 = vpop.eup %5161 }
 0x54a   :  { %v1868_v12 = vmul.f32 1.442695, %v1862_v6  ;;  %v1489_v49 = vsel %vm1455_vm15, %v6777_v55, 0.0 }
 0x54c   :  { %v2046_v2 = vpop.xlane.xlu1 %2045  ;;  %5163 = vpow2.f32 %v1868_v12 }
 0x54d   :  { %v2056_v22 = vsub.f32 %v6713_v28, %v2046_v2 }
 0x54f   :  { %v2060_v33 = vmul.f32 1.442695, %v2056_v22  ;;  %v1859_v3 = vpop.xlane.xlu2 %1858 }
 0x550   :  { %v1863_v25 = vsub.f32 %v6717_v45, %v1859_v3 }
 0x551   :  { %1487 = vadd.xlane.f32.xlu2 %v1486_v15 }
 0x552   :  { %v6784_v0 = vpop.eup %5163  ;;  %v1870_v61 = vmul.f32 1.442695, %v1863_v25 }
 0x553   :  { %v1878_v7 = vsel %vm1455_vm15, %v6784_v0, 0.0 }
 0x554   :  { %v2049_v44 = vpop.xlane.xlu1 %2048 }
 0x555   :  { %5045 = vrot.lane.b32.xlu0 %v6619_v11, %s5532_s12  ;;  %v2057_v14 = vsub.f32 %v6721_v34, %v2049_v44 }
 0x557   :  { %v2062_v47 = vmul.f32 1.442695, %v2057_v14 }
 0x559   :  { %1490 = vadd.xlane.f32.xlu2 %v1489_v49  ;;  %5165 = vpow2.f32 %v2062_v47 }
 0x55a   :  { %5167 = vpow2.f32 %v1866_v57 }
 0x55b   :  { %5169 = vpow2.f32 %v2060_v33 }
 0x55c   :  { %v2052_v16 = vpop.xlane.xlu1 %2051 }
 0x55f   :  { %v6790_v50 = vpop.eup %5165 }
 0x560   :  { %v2071_v34 = vsel %vm1455_vm15, %v6790_v50, 0.0  ;;  %v6796_v17 = vpop.eup %5167 }
 0x561   :  { %1879 = vadd.xlane.f32.xlu2 %v1878_v7  ;;  %v1875_v30 = vsel %vm1455_vm15, %v6796_v17, 0.0  ;;  %v6804_v20 = vpop.eup %5169 }
 0x562   :  { %5050 = vrot.lane.b32.xlu1 %v6611_v40, %s5534_s10  ;;  %v2058_v40 = vsub.f32 %v6725_v37, %v2052_v16  ;;  %v2068_v37 = vsel %vm1455_vm15, %v6804_v20, 0.0 }
 0x563   :  { %v2055_v28 = vpop.xlane.xlu2 %2054 }
 0x564   :  { %v2064_v52 = vmul.f32 1.442695, %v2058_v40  ;;  %v2059_v29 = vsub.f32 %v6729_v27, %v2055_v28 }
 0x566   :  { %5171 = vpow2.f32 %v2064_v52  ;;  %v2066_v45 = vmul.f32 1.442695, %v2059_v29 }
 0x567   :  { %5173 = vpow2.f32 %v1870_v61 }
 0x568   :  { %5175 = vpow2.f32 %v2066_v45 }
 0x569   :  { %2072 = vadd.xlane.f32.xlu2 %v2071_v34 }
 0x56c   :  { %v6809_v23 = vpop.eup %5171 }
 0x56d   :  { %v6811_v46 = vpop.eup %5173 }
 0x56e   :  { %v1881_v5 = vsel %vm1455_vm15, %v6811_v46, 0.0  ;;  %v6817_v43 = vpop.eup %5175 }
 0x56f   :  { %v2077_v27 = vsel %vm1455_vm15, %v6817_v43, 0.0 }
 0x57f   :  { %1876 = vadd.xlane.f32.xlu0 %v1875_v30 }
 0x581   :  { %5055 = vrot.lane.b32.xlu2 %v6619_v11, %s5534_s10  ;;  %v2074_v11 = vsel %vm1455_vm15, %v6809_v23, 0.0 }
 0x587   :  { %2069 = vadd.xlane.f32.xlu0 %v2068_v37 }
 0x58c   :  { %2075 = vadd.xlane.f32.xlu1 %v2074_v11 }
 0x58f   :  { %1882 = vadd.xlane.f32.xlu0 %v1881_v5  ;;  %v1485_v4 = vpop.xlane.xlu2 %1484 }
 0x597   :  { %2078 = vadd.xlane.f32.xlu0 %v2077_v27 }
 0x5a4   :  { %v1678_v21 = vpop.xlane.xlu1 %1677 }
 0x5ac   :  { %v1482_v48 = vpop.xlane.xlu0 %1481 }
 0x5ad   :  { %5177 = vrcp.f32 %v1482_v48 }
 0x5ae   :  { %5179 = vrcp.f32 %v1485_v4 }
 0x5af   :  { %5181 = vrcp.f32 %v1678_v21 }
 0x5b3   :  { %v5178_v59 = vpop.eup %5177 }
 0x5b4   :  { %v1496_v9 = vmul.f32 %v5178_v59, %v6748_v19  ;;  %v1874_v1 = vpop.xlane.xlu2 %1873  ;;  %v5180_v39 = vpop.eup %5179 }
 0x5b5   :  { %v1497_v63 = vmul.f32 %v5180_v39, %v6736_v36  ;;  %v1681_v41 = vpop.xlane.xlu0 %1680  ;;  %v5182_v35 = vpop.eup %5181 }
 0x5b6   :  { %4815 = vmatmul.msk.f32.vlgmr.msra.gmra.mxu2 %vm1455_vm15, %v1496_v9  ;;  %5183 = vrcp.f32 %v1681_v41  ;;  %v1692_v19 = vmul.f32 %v5182_v35, %v6742_v54 }
 0x5b7   :  { %1918 = vmatpush.msra.mxu2 %v5032_v8 }
 0x5b9   :  { %1919 = vmatpush.msra.mxu2 %v5033_v58 }
 0x5bc   :  { %v1684_v56 = vpop.xlane.xlu2 %1683  ;;  %v5184_v38 = vpop.eup %5183 }
 0x5bd   :  { %v1693_v36 = vmul.f32 %v5184_v38, %v6753_v53  ;;  %v1687_v49 = vpop.xlane.xlu1 %1686 }
 0x5be   :  { %4816 = vmatmul.msk.f32.gmra.mxu2 %vm1455_vm15, %v1497_v63 }
 0x5c4   :  { %v1488_v2 = vpop.xlane.xlu2 %1487 }
 0x5c5   :  { %5185 = vrcp.f32 %v1488_v2 }
 0x5c6   :  { %4827 = vmatmul.msk.f32.vlgmr.msrb.gmra.mxu2 %vm1455_vm15, %v1692_v19  ;;  %5187 = vrcp.f32 %v1874_v1 }
 0x5c7   :  { %v5046_v6 = vpop.permute.xlu0 %5045 }
 0x5c8   :  { %v5047_v14 = vunpack.i.l.bf16 %v5046_v6  ;;  %v5048_v54 = vunpack.i.h.bf16 %v5046_v6 }
 0x5cb   :  { %v5186_v15 = vpop.eup %5185 }
 0x5cc   :  { %v1498_v12 = vmul.f32 %v5186_v15, %v6772_v24  ;;  %v1491_v44 = vpop.xlane.xlu2 %1490  ;;  %v5188_v47 = vpop.eup %5187 }
 0x5cd   :  { %5189 = vrcp.f32 %v1491_v44  ;;  %v1888_v34 = vmul.f32 %v5188_v47, %v6756_v51 }
 0x5ce   :  { %4817 = vmatmul.msk.f32.vlgmr.msrb.gmra.mxu3 %vm1455_vm15, %v1498_v12  ;;  %4828 = vmatmul.msk.f32.gmra.mxu2 %vm1455_vm15, %v1693_v36  ;;  %5191 = vrcp.f32 %v1684_v56 }
 0x5cf   :  { %1953 = vmatpush.msrb.mxu3 %v5047_v14  ;;  %5193 = vrcp.f32 %v1687_v49 }
 0x5d1   :  { %1954 = vmatpush.msrb.mxu3 %v5048_v54 }
 0x5d3   :  { %v5190_v7 = vpop.eup %5189 }
 0x5d4   :  { %v1880_v18 = vpop.xlane.xlu2 %1879  ;;  %v1499_v24 = vmul.f32 %v5190_v7, %v6777_v55  ;;  %v5051_v62 = vpop.permute.xlu1 %5050 }
 0x5d5   :  { %v5052_v53 = vunpack.i.l.bf16 %v5051_v62  ;;  %v5192_v57 = vpop.eup %5191  ;;  %v5053_v22 = vunpack.i.h.bf16 %v5051_v62  ;;  %5195 = vrcp.f32 %v1880_v18 }
 0x5d6   :  { %4818 = vmatmul.msk.f32.gmra.mxu3 %vm1455_vm15, %v1499_v24  ;;  %4839 = vmatmul.msk.f32.vlgmr.msra.gmra.mxu2 %vm1455_vm15, %v1888_v34  ;;  %v1694_v33 = vmul.f32 %v5192_v57, %v6763_v31  ;;  %v5194_v51 = vpop.eup %5193 }
 0x5d7   :  { %2114 = vmatpush.msrb.mxu2 %v5052_v53  ;;  %v1695_v55 = vmul.f32 %v5194_v51, %v6768_v13 }
 0x5d9   :  { %2115 = vmatpush.msrb.mxu2 %v5053_v22 }
 0x5db   :  { %v5196_v30 = vpop.eup %5195 }
 0x5dc   :  { %v2073_v16 = vpop.xlane.xlu2 %2072  ;;  %v1890_v52 = vmul.f32 %v5196_v30, %v6784_v0 }
 0x5de   :  { %4829 = vmatmul.msk.f32.vlgmr.msra.gmra.mxu3 %vm1455_vm15, %v1694_v33 }
 0x5e4   :  { %v5056_v3 = vpop.permute.xlu2 %5055 }
 0x5e5   :  { %v5057_v40 = vunpack.i.l.bf16 %v5056_v3  ;;  %v5058_v25 = vunpack.i.h.bf16 %v5056_v3 }
 0x5e6   :  { %4830 = vmatmul.msk.f32.gmra.mxu3 %vm1455_vm15, %v1695_v55 }
 0x5e7   :  { %2149 = vmatpush.msra.mxu3 %v5057_v40 }
 0x5e9   :  { %2150 = vmatpush.msra.mxu3 %v5058_v25 }
 0x5ee   :  { %4841 = vmatmul.msk.f32.vlgmr.msrb.gmra.mxu3 %vm1455_vm15, %v1890_v52 }
 0x5f2   :  { %v1877_v31 = vpop.xlane.xlu0 %1876 }
 0x5f3   :  { %5197 = vrcp.f32 %v1877_v31 }
 0x5f9   :  { %v5198_v61 = vpop.eup %5197 }
 0x5fa   :  { %v2070_v28 = vpop.xlane.xlu0 %2069  ;;  %v1889_v29 = vmul.f32 %v5198_v61, %v6796_v17 }
 0x5fb   :  { %5199 = vrcp.f32 %v2070_v28 }
 0x5fc   :  { %4840 = vmatmul.msk.f32.gmra.mxu2 %vm1455_vm15, %v1889_v29  ;;  %5201 = vrcp.f32 %v2073_v16 }
 0x5ff   :  { %v2076_v0 = vpop.xlane.xlu1 %2075 }
 0x601   :  { %v5200_v13 = vpop.eup %5199 }
 0x602   :  { %v2084_v37 = vmul.f32 %v5200_v13, %v6804_v20  ;;  %v1883_v45 = vpop.xlane.xlu0 %1882  ;;  %v5202_v11 = vpop.eup %5201 }
 0x603   :  { %5203 = vrcp.f32 %v1883_v45  ;;  %v2085_v4 = vmul.f32 %v5202_v11, %v6790_v50 }
 0x604   :  { %4851 = vmatmul.msk.f32.vlgmr.msrb.gmra.mxu2 %vm1455_vm15, %v2084_v37  ;;  %5205 = vrcp.f32 %v2076_v0 }
 0x609   :  { %v5204_v5 = vpop.eup %5203 }
 0x60a   :  { %v1891_v27 = vmul.f32 %v5204_v5, %v6811_v46  ;;  %v2079_v17 = vpop.xlane.xlu0 %2078  ;;  %v5206_v48 = vpop.eup %5205 }
 0x60b   :  { %5207 = vrcp.f32 %v2079_v17  ;;  %v2086_v20 = vmul.f32 %v5206_v48, %v6809_v23 }
 0x60c   :  { %4842 = vmatmul.msk.f32.gmra.mxu3 %vm1455_vm15, %v1891_v27  ;;  %4852 = vmatmul.msk.f32.gmra.mxu2 %vm1455_vm15, %v2085_v4 }
 0x611   :  { %v5208_v59 = vpop.eup %5207 }
 0x612   :  { %v2087_v9 = vmul.f32 %v5208_v59, %v6817_v43 }
 0x614   :  { %4853 = vmatmul.msk.f32.vlgmr.msra.gmra.mxu3 %vm1455_vm15, %v2086_v20 }
 0x61c   :  { %4854 = vmatmul.msk.f32.gmra.mxu3 %vm1455_vm15, %v2087_v9 }
 0x639   :  { %v1529_v1 = vpop.f32.mrf.mxu2 }
 0x641   :  { %v1532_v46 = vpop.f32.mrf.mxu2 }
 0x649   :  { %v1725_v8 = vpop.f32.mrf.mxu2 }
 0x64a   :  { %2162 = vrot.lane.b32.xlu2 %v1725_v8, %s5535_s7 }
 0x651   :  { %v1564_v50 = vpop.f32.mrf.mxu3  ;;  %v1728_v58 = vpop.f32.mrf.mxu2 }
 0x652   :  { %2164 = vrot.lane.b32.xlu1 %v1728_v58, %s5535_s7 }
 0x659   :  { %v1567_v21 = vpop.f32.mrf.mxu3  ;;  %v1921_v39 = vpop.f32.mrf.mxu2 }
 0x65a   :  { %2178 = vrot.lane.b32.xlu0 %v1921_v39, %s5536_s11  ;;  %v2330_v39 = vld [vmem:[%s5609_s24 + $0x10] sm:$0xff] }
 0x661   :  { %v1760_v23 = vpop.f32.mrf.mxu3 }
 0x662   :  { %2166 = vrot.lane.b32.xlu0 %v1760_v23, %s5535_s7  ;;  %v2329_v23 = vld [vmem:[%s5609_s24 + $0x8] sm:$0xff] }
 0x669   :  { %v1763_v43 = vpop.f32.mrf.mxu3 }
 0x66a   :  { %2168 = vrot.lane.b32.xlu1 %v1763_v43, %s5535_s7  ;;  %v2328_v43 = vld [vmem:[%s5609_s24] sm:$0xff] }
 0x671   :  { %v1956_v63 = vpop.f32.mrf.mxu3 }
 0x67f   :  { %v1924_v56 = vpop.f32.mrf.mxu2 }
 0x680   :  { %2180 = vrot.lane.b32.xlu2 %v1924_v56, %s5536_s11 }
 0x687   :  { %v2117_v41 = vpop.f32.mrf.mxu2 }
 0x688   :  { %2194 = vrot.lane.b32.xlu2 %v2117_v41, %s5537_s13 }
 0x68f   :  { %v1959_v35 = vpop.f32.mrf.mxu3  ;;  %v2120_v19 = vpop.f32.mrf.mxu2 }
 0x690   :  { %2196 = vrot.lane.b32.xlu2 %v2120_v19, %s5537_s13 }
 0x697   :  { %v2152_v2 = vpop.f32.mrf.mxu3 }
 0x698   :  { %2198 = vrot.lane.b32.xlu0 %v2152_v2, %s5537_s13  ;;  %2182 = vrot.lane.b32.xlu2 %v1956_v63, %s5536_s11 }
 0x69f   :  { %v2155_v38 = vpop.f32.mrf.mxu3 }
 0x6a0   :  { %2200 = vrot.lane.b32.xlu0 %v2155_v38, %s5537_s13  ;;  %2184 = vrot.lane.b32.xlu2 %v1959_v35, %s5536_s11 }
 0x6a4   :  { %v2163_v6 = vpop.permute.xlu2 %2162 }
 0x6a5   :  { %v2207_v44 = vsel %vm2206_vm1, %v1529_v1, %v2163_v6 }
 0x6c4   :  { %v2165_v47 = vpop.permute.xlu1 %2164 }
 0x6c5   :  { %v2208_v34 = vsel %vm2206_vm1, %v1532_v46, %v2165_v47  ;;  %v5107_v47 = vld [vmem:[%s5599_s14] ss:$0 sm:$0xff]  ;;  %s7813_s14 = sld [smem:[#allocation19_spill]] }
 0x6cc   :  { %v2179_v12 = vpop.permute.xlu0 %2178 }
 0x6cd   :  { %v2211_v36 = vsel %vm1455_vm15, %v2207_v44, %v2179_v12 }
 0x6da   :  { %v2181_v15 = vpop.permute.xlu2 %2180 }
 0x6db   :  { %v2212_v18 = vsel %vm1455_vm15, %v2208_v34, %v2181_v15 }
 0x6dc   :  { %v2169_v40 = vpop.permute.xlu1 %2168 }
 0x6dd   :  { %v2210_v30 = vsel %vm2206_vm1, %v1567_v21, %v2169_v40  ;;  %v2331_v21 = vld [vmem:[%s5609_s24 + $0x18] sm:$0xff]  ;;  %s7815_s24 = sld [smem:[#allocation21_spill]] }
 0x6de   :  { %2360 = vmatpush.msrb.mxu0 %v2331_v21 }
 0x6e0   :  { %2361 = vmatpush.msrb.mxu0 %v2330_v39  ;;  %v5109_v39 = vld [vmem:[%s5614_s30] ss:$0 sm:$0xff]  ;;  %s7816_s30 = sld [smem:[#allocation22_spill]] }
 0x6e2   :  { %v2195_v14 = vpop.permute.xlu2 %2194  ;;  %2362 = vmatpush.msrb.mxu0 %v2329_v23 }
 0x6e3   :  { %v2216_v49 = vsel %vm2215_vm2, %v2211_v36, %v2195_v14 }
 0x6e4   :  { %v6871_v54 = vadd.f32 %v2216_v49, %v6514_v26  ;;  %v2167_v26 = vpop.permute.xlu0 %2166  ;;  %2363 = vmatpush.msrb.mxu0 %v2328_v43 }
 0x6e5   :  { %v2209_v33 = vsel %vm2206_vm1, %v1564_v50, %v2167_v26 }
 0x6e6   :  { %v2226_v7 = vsel %vm1221_vm0, %v6871_v54, 0.0 }
 0x6e7   :  { %2227 = vadd.xlane.f32.xlu1 %v2226_v7 }
 0x6ea   :  { %v2197_v24 = vpop.permute.xlu2 %2196 }
 0x6eb   :  { %v2217_v62 = vsel %vm2215_vm2, %v2212_v18, %v2197_v24  ;;  %v5108_v24 = vld [vmem:[%s5604_s19] ss:$0 sm:$0xff]  ;;  %s7814_s19 = sld [smem:[#allocation20_spill]] }
 0x6ec   :  { %v6879_v53 = vadd.f32 %v2217_v62, %v6518_v32 }
 0x6ee   :  { %v2229_v57 = vsel %vm1221_vm0, %v6879_v53, 0.0 }
 0x6ef   :  { %2230 = vadd.xlane.f32.xlu2 %v2229_v57 }
 0x6f2   :  { %v2183_v22 = vpop.permute.xlu2 %2182 }
 0x6f3   :  { %v2213_v16 = vsel %vm1455_vm15, %v2209_v33, %v2183_v22 }
 0x6fa   :  { %v2185_v25 = vpop.permute.xlu2 %2184 }
 0x6fb   :  { %v2214_v52 = vsel %vm1455_vm15, %v2210_v30, %v2185_v25 }
 0x70a   :  { %v2199_v51 = vpop.permute.xlu0 %2198 }
 0x70b   :  { %v2218_v3 = vsel %vm2215_vm2, %v2213_v16, %v2199_v51 }
 0x70c   :  { %v6887_v55 = vadd.f32 %v2218_v3, %v6522_v60 }
 0x70e   :  { %v2232_v32 = vsel %vm1221_vm0, %v6887_v55, 0.0 }
 0x70f   :  { %2233 = vadd.xlane.f32.xlu0 %v2232_v32 }
 0x712   :  { %v2201_v31 = vpop.permute.xlu0 %2200 }
 0x713   :  { %v2219_v61 = vsel %vm2215_vm2, %v2214_v52, %v2201_v31 }
 0x714   :  { %v6895_v28 = vadd.f32 %v2219_v61, %v6526_v10 }
 0x716   :  { %v2235_v60 = vsel %vm1221_vm0, %v6895_v28, 0.0 }
 0x717   :  { %2236 = vadd.xlane.f32.xlu2 %v2235_v60 }
 0x75a   :  { %v2228_v29 = vpop.xlane.xlu1 %2227 }
 0x75b   :  { %v2238_v13 = vmul.f32 %v2228_v29, %v6530_v42 }
 0x75d   :  { %v2242_v37 = vsub.f32 %v6871_v54, %v2238_v13 }
 0x75f   :  { %v2246_v45 = vmul.f32 %v2242_v37, %v2242_v37 }
 0x761   :  { %v2250_v0 = vsel %vm1221_vm0, %v2246_v45, 0.0 }
 0x762   :  { %2251 = vadd.xlane.f32.xlu1 %v2250_v0  ;;  %v2231_v11 = vpop.xlane.xlu2 %2230 }
 0x763   :  { %v2239_v5 = vmul.f32 %v2231_v11, %v6530_v42 }
 0x765   :  { %v2243_v27 = vsub.f32 %v6879_v53, %v2239_v5 }
 0x767   :  { %v2247_v10 = vmul.f32 %v2243_v27, %v2243_v27 }
 0x769   :  { %v2253_v4 = vsel %vm1221_vm0, %v2247_v10, 0.0 }
 0x76a   :  { %2254 = vadd.xlane.f32.xlu0 %v2253_v4 }
 0x782   :  { %v2234_v17 = vpop.xlane.xlu0 %2233 }
 0x783   :  { %v2240_v48 = vmul.f32 %v2234_v17, %v6530_v42 }
 0x785   :  { %v6907_v20 = vsub.f32 %v6887_v55, %v2240_v48 }
 0x787   :  { %v2248_v59 = vmul.f32 %v6907_v20, %v6907_v20 }
 0x789   :  { %v2256_v9 = vsel %vm1221_vm0, %v2248_v59, 0.0 }
 0x78a   :  { %2257 = vadd.xlane.f32.xlu2 %v2256_v9  ;;  %v2237_v1 = vpop.xlane.xlu2 %2236 }
 0x78b   :  { %v2241_v46 = vmul.f32 %v2237_v1, %v6530_v42 }
 0x78d   :  { %v6914_v8 = vsub.f32 %v6895_v28, %v2241_v46 }
 0x78f   :  { %v2249_v50 = vmul.f32 %v6914_v8, %v6914_v8 }
 0x791   :  { %v2259_v58 = vsel %vm1221_vm0, %v2249_v50, 0.0 }
 0x792   :  { %2260 = vadd.xlane.f32.xlu1 %v2259_v58 }
 0x7d5   :  { %v2252_v56 = vpop.xlane.xlu1 %2251 }
 0x7d6   :  { %v2262_v63 = vmul.f32 %v2252_v56, %v6530_v42 }
 0x7d8   :  { %v2266_v41 = vadd.f32 1e-05, %v2262_v63 }
 0x7da   :  { %5209 = vrsqrt.f32 %v2266_v41  ;;  %vm2276_vm4 = vweird.f32 %v2266_v41 }
 0x7dd   :  { %v2255_v35 = vpop.xlane.xlu0 %2254 }
 0x7de   :  { %v2263_v19 = vmul.f32 %v2255_v35, %v6530_v42 }
 0x7e0   :  { %v5210_v2 = vpop.eup %5209  ;;  %v2267_v38 = vadd.f32 1e-05, %v2263_v19 }
 0x7e1   :  { %v2271_v6 = vmul.f32 %v5210_v2, %v2266_v41  ;;  %vm2277_vm3 = vweird.f32 %v5210_v2 }
 0x7e2   :  { %5211 = vrsqrt.f32 %v2267_v38  ;;  %vm2278_vm5 = vmor %vm2276_vm4, %vm2277_vm3  ;;  %vm2286_vm7 = vweird.f32 %v2267_v38  ;;  %vm2379_vm4 = vcmask 523264  }
 0x7e3   :  { %v2272_v15 = vmul.f32 %v5210_v2, %v2271_v6 }
 0x7e5   :  { %v2273_v12 = vmul.f32 0.5, %v2272_v15  ;;  %v5538_v15 = vmov 64.0  }
 0x7e7   :  { %v2274_v44 = vsub.f32 1.5, %v2273_v12 }
 0x7e8   :  { %v5212_v36 = vpop.eup %5211 }
 0x7e9   :  { %v2275_v14 = vmul.f32 %v5210_v2, %v2274_v44  ;;  %v2281_v49 = vmul.f32 %v5212_v36, %v2267_v38  ;;  %vm2287_vm6 = vweird.f32 %v5212_v36 }
 0x7ea   :  { %vm2288_vm8 = vmor %vm2286_vm7, %vm2287_vm6 }
 0x7eb   :  { %v2279_v7 = vsel %vm2278_vm5, %v5210_v2, %v2275_v14  ;;  %v2282_v34 = vmul.f32 %v5212_v36, %v2281_v49 }
 0x7ec   :  { %v2310_v18 = vmul.f32 %v2279_v7, %v2242_v37 }
 0x7ed   :  { %v2283_v62 = vmul.f32 0.5, %v2282_v34 }
 0x7ee   :  { %v2317_v57 = vmul.f32 %v5107_v47, %v2310_v18 }
 0x7ef   :  { %v2284_v26 = vsub.f32 1.5, %v2283_v62 }
 0x7f0   :  { %v2324_v22 = vadd.f32 %v5108_v24, %v2317_v57 }
 0x7f1   :  { %v2285_v33 = vmul.f32 %v5212_v36, %v2284_v26 }
 0x7f2   :  { %4855 = vmatmul.msk.f32.vlgmr.msrb.gmra.mxu0 %vm1221_vm0, %v2324_v22 }
 0x7f3   :  { %v2289_v16 = vsel %vm2288_vm8, %v5212_v36, %v2285_v33 }
 0x7f4   :  { %v2311_v51 = vmul.f32 %v2289_v16, %v2243_v27 }
 0x7f6   :  { %v2318_v3 = vmul.f32 %v5107_v47, %v2311_v51 }
 0x7f8   :  { %v2325_v40 = vadd.f32 %v5108_v24, %v2318_v3 }
 0x7fa   :  { %4856 = vmatmul.msk.f32.gmra.mxu0 %vm1221_vm0, %v2325_v40 }
 0x7fd   :  { %v2258_v32 = vpop.xlane.xlu2 %2257 }
 0x7fe   :  { %v2264_v25 = vmul.f32 %v2258_v32, %v6530_v42 }
 0x800   :  { %v2268_v30 = vadd.f32 1e-05, %v2264_v25 }
 0x802   :  { %5213 = vrsqrt.f32 %v2268_v30  ;;  %vm2296_vm10 = vweird.f32 %v2268_v30 }
 0x805   :  { %v2261_v52 = vpop.xlane.xlu1 %2260 }
 0x806   :  { %v2265_v31 = vmul.f32 %v2261_v52, %v6530_v42 }
 0x808   :  { %v5214_v61 = vpop.eup %5213  ;;  %v2269_v60 = vadd.f32 1e-05, %v2265_v31 }
 0x809   :  { %v2291_v29 = vmul.f32 %v5214_v61, %v2268_v30  ;;  %vm2297_vm9 = vweird.f32 %v5214_v61 }
 0x80a   :  { %5215 = vrsqrt.f32 %v2269_v60  ;;  %vm2298_vm11 = vmor %vm2296_vm10, %vm2297_vm9  ;;  %vm2306_vm13 = vweird.f32 %v2269_v60 }
 0x80b   :  { %v2292_v13 = vmul.f32 %v5214_v61, %v2291_v29  ;;  %5217 = vrcp.f32 %v5538_v15  ;;  %v2500_v29 = vld [vmem:[%s5629_s20 + $0x38] sm:$0xff] }
 0x80c   :  { %2525 = vmatpush.msrb.mxu1 %v2500_v29 }
 0x80d   :  { %v2293_v37 = vmul.f32 0.5, %v2292_v13  ;;  %v2499_v13 = vld [vmem:[%s5629_s20 + $0x30] sm:$0xff] }
 0x80e   :  { %2526 = vmatpush.msrb.mxu1 %v2499_v13 }
 0x80f   :  { %v2294_v45 = vsub.f32 1.5, %v2293_v37  ;;  %v2498_v37 = vld [vmem:[%s5629_s20 + $0x28] sm:$0xff] }
 0x810   :  { %v5216_v0 = vpop.eup %5215  ;;  %2527 = vmatpush.msrb.mxu1 %v2498_v37 }
 0x811   :  { %v2295_v11 = vmul.f32 %v5214_v61, %v2294_v45  ;;  %v2301_v5 = vmul.f32 %v5216_v0, %v2269_v60  ;;  %vm2307_vm12 = vweird.f32 %v5216_v0  ;;  %v5218_v12 = vpop.eup %5217  ;;  %v2497_v45 = vld [vmem:[%s5629_s20 + $0x20] sm:$0xff] }
 0x812   :  { %vm2308_vm3 = vmor %vm2306_vm13, %vm2307_vm12  ;;  %v2393_v44 = vmul.f32 64.0, %v5218_v12  ;;  %vm2397_vm5 = vweird.f32 %v5218_v12  ;;  %2528 = vmatpush.msrb.mxu1 %v2497_v45 }
 0x813   :  { %v2302_v27 = vmul.f32 %v5216_v0, %v2301_v5  ;;  %v2299_v10 = vsel %vm2298_vm11, %v5214_v61, %v2295_v11  ;;  %v2495_v11 = vld [vmem:[%s5629_s20 + $0x10] sm:$0xff]  ;;  %v2494_v5 = vld [vmem:[%s5629_s20 + $0x8] sm:$0xff] }
 0x814   :  { %v2312_v4 = vmul.f32 %v2299_v10, %v6907_v20  ;;  %v2394_v36 = vsub.f32 1.0, %v2393_v44 }
 0x815   :  { %v2303_v17 = vmul.f32 0.5, %v2302_v27  ;;  %v2493_v27 = vld [vmem:[%s5629_s20] sm:$0xff] }
 0x816   :  { %v2319_v48 = vmul.f32 %v5107_v47, %v2312_v4  ;;  %v2395_v14 = vmul.f32 %v5218_v12, %v2394_v36 }
 0x817   :  { %v2304_v59 = vsub.f32 1.5, %v2303_v17 }
 0x818   :  { %v2326_v9 = vadd.f32 %v5108_v24, %v2319_v48  ;;  %v2396_v49 = vadd.f32 %v5218_v12, %v2395_v14 }
 0x819   :  { %v2305_v1 = vmul.f32 %v5216_v0, %v2304_v59 }
 0x81a   :  { %4857 = vmatmul.msk.f32.gmra.mxu0 %vm1221_vm0, %v2326_v9 }
 0x81b   :  { %v2309_v46 = vsel %vm2308_vm3, %v5216_v0, %v2305_v1  ;;  %v2496_v0 = vld [vmem:[%s5629_s20 + $0x18] sm:$0xff]  ;;  %s7817_s20 = sld [smem:[#allocation23_spill]] }
 0x81c   :  { %v2313_v50 = vmul.f32 %v2309_v46, %v6914_v8  ;;  %2529 = vmatpush.msrb.mxu1 %v2496_v0 }
 0x81e   :  { %v2320_v58 = vmul.f32 %v5107_v47, %v2313_v50  ;;  %v6940_v47 = vsel %vm2397_vm5, %v5218_v12, %v2396_v49  ;;  %2530 = vmatpush.msrb.mxu1 %v2495_v11 }
 0x820   :  { %v2327_v21 = vadd.f32 %v5108_v24, %v2320_v58  ;;  %2531 = vmatpush.msrb.mxu1 %v2494_v5 }
 0x822   :  { %4858 = vmatmul.msk.f32.gmra.mxu0 %vm1221_vm0, %v2327_v21  ;;  %2532 = vmatpush.msrb.mxu1 %v2493_v27 }
 0x86f   :  { %v2365_v23 = vpop.f32.mrf.mxu0 }
 0x870   :  { %v2366_v20 = vadd.f32 %v5109_v39, %v2365_v23 }
 0x872   :  { %v2380_v43 = vsel %vm2379_vm4, %v2366_v20, 0.0 }
 0x873   :  { %2381 = vadd.xlane.f32.xlu0 %v2380_v43  ;;  %v5110_v43 = vld [vmem:[%s7813_s14] ss:$0 sm:$0xff]  ;;  %s7840_s14 = sld [smem:[#allocation17_spill]] }
 0x877   :  { %v2368_v56 = vpop.f32.mrf.mxu0 }
 0x878   :  { %v2369_v63 = vadd.f32 %v5109_v39, %v2368_v56 }
 0x87a   :  { %v2383_v41 = vsel %vm2379_vm4, %v2369_v63, 0.0 }
 0x87b   :  { %2384 = vadd.xlane.f32.xlu2 %v2383_v41 }
 0x897   :  { %v2371_v35 = vpop.f32.mrf.mxu0 }
 0x898   :  { %v2372_v19 = vadd.f32 %v5109_v39, %v2371_v35  ;;  %v5111_v35 = vld [vmem:[%s7814_s19] ss:$0 sm:$0xff]  ;;  %s7841_s19 = sld [smem:[#allocation18_spill]] }
 0x89a   :  { %v2386_v8 = vsel %vm2379_vm4, %v2372_v19, 0.0 }
 0x89b   :  { %2387 = vadd.xlane.f32.xlu1 %v2386_v8 }
 0x89f   :  { %v2374_v2 = vpop.f32.mrf.mxu0 }
 0x8a0   :  { %v2375_v38 = vadd.f32 %v5109_v39, %v2374_v2 }
 0x8a2   :  { %v2389_v6 = vsel %vm2379_vm4, %v2375_v38, 0.0 }
 0x8a3   :  { %2390 = vadd.xlane.f32.xlu0 %v2389_v6 }
 0x8e6   :  { %v2382_v7 = vpop.xlane.xlu0 %2381 }
 0x8e7   :  { %v2399_v34 = vmul.f32 %v6940_v47, %v2382_v7 }
 0x8e9   :  { %v2403_v18 = vsub.f32 %v2366_v20, %v2399_v34 }
 0x8eb   :  { %v2407_v24 = vmul.f32 %v2403_v18, %v2403_v18 }
 0x8ed   :  { %v2411_v62 = vsel %vm2379_vm4, %v2407_v24, 0.0 }
 0x8ee   :  { %2412 = vadd.xlane.f32.xlu2 %v2411_v62  ;;  %v2385_v57 = vpop.xlane.xlu2 %2384 }
 0x8ef   :  { %v2400_v26 = vmul.f32 %v6940_v47, %v2385_v57 }
 0x8f1   :  { %v6945_v22 = vsub.f32 %v2369_v63, %v2400_v26 }
 0x8f3   :  { %v2408_v33 = vmul.f32 %v6945_v22, %v6945_v22 }
 0x8f5   :  { %v2414_v16 = vsel %vm2379_vm4, %v2408_v33, 0.0 }
 0x8f6   :  { %2415 = vadd.xlane.f32.xlu1 %v2414_v16 }
 0x90e   :  { %v2388_v51 = vpop.xlane.xlu1 %2387 }
 0x90f   :  { %v2401_v3 = vmul.f32 %v6940_v47, %v2388_v51 }
 0x911   :  { %v6951_v40 = vsub.f32 %v2372_v19, %v2401_v3 }
 0x913   :  { %v2409_v32 = vmul.f32 %v6951_v40, %v6951_v40 }
 0x915   :  { %v2417_v25 = vsel %vm2379_vm4, %v2409_v32, 0.0 }
 0x916   :  { %v2391_v30 = vpop.xlane.xlu0 %2390  ;;  %2418 = vadd.xlane.f32.xlu0 %v2417_v25 }
 0x917   :  { %v2402_v52 = vmul.f32 %v6940_v47, %v2391_v30 }
 0x919   :  { %v6957_v31 = vsub.f32 %v2375_v38, %v2402_v52 }
 0x91b   :  { %v2410_v61 = vmul.f32 %v6957_v31, %v6957_v31 }
 0x91d   :  { %v2420_v60 = vsel %vm2379_vm4, %v2410_v61, 0.0 }
 0x91e   :  { %2421 = vadd.xlane.f32.xlu2 %v2420_v60 }
 0x961   :  { %v2413_v10 = vpop.xlane.xlu2 %2412 }
 0x962   :  { %v2423_v4 = vmul.f32 %v2413_v10, %v6940_v47 }
 0x964   :  { %v2427_v17 = vadd.f32 1e-05, %v2423_v4 }
 0x966   :  { %5219 = vrsqrt.f32 %v2427_v17  ;;  %vm2437_vm7 = vweird.f32 %v2427_v17 }
 0x969   :  { %v2416_v48 = vpop.xlane.xlu1 %2415 }
 0x96a   :  { %v2424_v59 = vmul.f32 %v2416_v48, %v6940_v47 }
 0x96c   :  { %v5220_v9 = vpop.eup %5219  ;;  %v2428_v1 = vadd.f32 1e-05, %v2424_v59 }
 0x96d   :  { %v2432_v46 = vmul.f32 %v5220_v9, %v2427_v17  ;;  %vm2438_vm6 = vweird.f32 %v5220_v9 }
 0x96e   :  { %5221 = vrsqrt.f32 %v2428_v1  ;;  %vm2439_vm8 = vmor %vm2437_vm7, %vm2438_vm6  ;;  %vm2447_vm10 = vweird.f32 %v2428_v1 }
 0x96f   :  { %v2433_v50 = vmul.f32 %v5220_v9, %v2432_v46 }
 0x971   :  { %v2434_v58 = vmul.f32 0.5, %v2433_v50 }
 0x973   :  { %v2435_v21 = vsub.f32 1.5, %v2434_v58 }
 0x974   :  { %v5222_v39 = vpop.eup %5221 }
 0x975   :  { %v2436_v23 = vmul.f32 %v5220_v9, %v2435_v21  ;;  %v2442_v20 = vmul.f32 %v5222_v39, %v2428_v1  ;;  %vm2448_vm9 = vweird.f32 %v5222_v39 }
 0x976   :  { %vm2449_vm11 = vmor %vm2447_vm10, %vm2448_vm9 }
 0x977   :  { %v2440_v56 = vsel %vm2439_vm8, %v5220_v9, %v2436_v23  ;;  %v2443_v63 = vmul.f32 %v5222_v39, %v2442_v20 }
 0x978   :  { %v2471_v41 = vmul.f32 %v2440_v56, %v2403_v18 }
 0x979   :  { %v2444_v19 = vmul.f32 0.5, %v2443_v63 }
 0x97a   :  { %v2478_v8 = vmul.f32 %v5110_v43, %v2471_v41 }
 0x97b   :  { %v2445_v2 = vsub.f32 1.5, %v2444_v19 }
 0x97c   :  { %v2485_v38 = vadd.f32 %v5111_v35, %v2478_v8 }
 0x97d   :  { %v2446_v6 = vmul.f32 %v5222_v39, %v2445_v2 }
 0x97e   :  { %v2489_v15 = vmax.f32 %v2485_v38, 0.0 }
 0x97f   :  { %v2450_v12 = vsel %vm2449_vm11, %v5222_v39, %v2446_v6 }
 0x980   :  { %4859 = vmatmul.msk.f32.vlgmr.msrb.gmra.mxu1 %vm2379_vm4, %v2489_v15  ;;  %v2472_v44 = vmul.f32 %v2450_v12, %v6945_v22 }
 0x982   :  { %v2479_v36 = vmul.f32 %v5110_v43, %v2472_v44 }
 0x984   :  { %v2486_v14 = vadd.f32 %v5111_v35, %v2479_v36 }
 0x986   :  { %v2490_v49 = vmax.f32 %v2486_v14, 0.0 }
 0x988   :  { %4860 = vmatmul.msk.f32.gmra.mxu1 %vm2379_vm4, %v2490_v49 }
 0x989   :  { %v2419_v7 = vpop.xlane.xlu0 %2418 }
 0x98a   :  { %v2425_v34 = vmul.f32 %v2419_v7, %v6940_v47 }
 0x98c   :  { %v2429_v18 = vadd.f32 1e-05, %v2425_v34 }
 0x98e   :  { %5223 = vrsqrt.f32 %v2429_v18  ;;  %vm2457_vm13 = vweird.f32 %v2429_v18 }
 0x991   :  { %v2422_v24 = vpop.xlane.xlu2 %2421 }
 0x992   :  { %v2426_v62 = vmul.f32 %v2422_v24, %v6940_v47 }
 0x994   :  { %v5224_v57 = vpop.eup %5223  ;;  %v2430_v26 = vadd.f32 1e-05, %v2426_v62 }
 0x995   :  { %v2452_v33 = vmul.f32 %v5224_v57, %v2429_v18  ;;  %vm2458_vm12 = vweird.f32 %v5224_v57 }
 0x996   :  { %5225 = vrsqrt.f32 %v2430_v26  ;;  %vm2459_vm3 = vmor %vm2457_vm13, %vm2458_vm12  ;;  %vm2467_vm6 = vweird.f32 %v2430_v26 }
 0x997   :  { %v2453_v16 = vmul.f32 %v5224_v57, %v2452_v33 }
 0x999   :  { %v2454_v51 = vmul.f32 0.5, %v2453_v16 }
 0x99b   :  { %v2455_v22 = vsub.f32 1.5, %v2454_v51 }
 0x99c   :  { %v5226_v3 = vpop.eup %5225 }
 0x99d   :  { %v2456_v32 = vmul.f32 %v5224_v57, %v2455_v22  ;;  %v2462_v25 = vmul.f32 %v5226_v3, %v2430_v26  ;;  %vm2468_vm5 = vweird.f32 %v5226_v3 }
 0x99e   :  { %vm2469_vm7 = vmor %vm2467_vm6, %vm2468_vm5 }
 0x99f   :  { %v2460_v30 = vsel %vm2459_vm3, %v5224_v57, %v2456_v32  ;;  %v2463_v52 = vmul.f32 %v5226_v3, %v2462_v25 }
 0x9a0   :  { %v2473_v61 = vmul.f32 %v2460_v30, %v6951_v40  ;;  %v5112_v40 = vld [vmem:[%s7815_s24] ss:$0 sm:$0xff]  ;;  %s7842_s24 = sld [smem:[#allocation45_spill]] }
 0x9a1   :  { %v2464_v60 = vmul.f32 0.5, %v2463_v52 }
 0x9a2   :  { %v2480_v29 = vmul.f32 %v5110_v43, %v2473_v61 }
 0x9a3   :  { %v2465_v13 = vsub.f32 1.5, %v2464_v60  ;;  %v5113_v60 = vld [vmem:[%s7816_s30] ss:$0 sm:$0xff]  ;;  %s7843_s30 = sld [smem:[#allocation46_spill]] }
 0x9a4   :  { %v2487_v37 = vadd.f32 %v5111_v35, %v2480_v29 }
 0x9a5   :  { %v2466_v45 = vmul.f32 %v5226_v3, %v2465_v13 }
 0x9a6   :  { %v2491_v0 = vmax.f32 %v2487_v37, 0.0 }
 0x9a7   :  { %v2470_v11 = vsel %vm2469_vm7, %v5226_v3, %v2466_v45  ;;  %v5114_v45 = vld [vmem:[%s7817_s20] ss:$0 sm:$0xff]  ;;  %s7844_s20 = sld [smem:[#allocation47_spill]] }
 0x9a8   :  { %v2474_v5 = vmul.f32 %v2470_v11, %v6957_v31  ;;  %4861 = vmatmul.msk.f32.gmra.mxu1 %vm2379_vm4, %v2491_v0 }
 0x9aa   :  { %v2481_v27 = vmul.f32 %v5110_v43, %v2474_v5 }
 0x9ac   :  { %v2488_v10 = vadd.f32 %v5111_v35, %v2481_v27 }
 0x9ae   :  { %v2492_v4 = vmax.f32 %v2488_v10, 0.0 }
 0x9b0   :  { %4862 = vmatmul.msk.f32.gmra.mxu1 %vm2379_vm4, %v2492_v4 }
 0x9fd   :  { %v2534_v17 = vpop.f32.mrf.mxu1 }
 0x9fe   :  { %v2535_v48 = vadd.f32 %v5112_v40, %v2534_v17 }
 0xa00   :  { %v2548_v59 = vsel %vm1221_vm0, %v2535_v48, 0.0 }
 0xa01   :  { %2549 = vadd.xlane.f32.xlu1 %v2548_v59 }
 0xa05   :  { %v2537_v9 = vpop.f32.mrf.mxu1 }
 0xa06   :  { %v2538_v1 = vadd.f32 %v5112_v40, %v2537_v9 }
 0xa08   :  { %v2551_v46 = vsel %vm1221_vm0, %v2538_v1, 0.0 }
 0xa09   :  { %2552 = vadd.xlane.f32.xlu0 %v2551_v46 }
 0xa25   :  { %v2540_v50 = vpop.f32.mrf.mxu1 }
 0xa26   :  { %v2541_v31 = vadd.f32 %v5112_v40, %v2540_v50 }
 0xa28   :  { %v2554_v58 = vsel %vm1221_vm0, %v2541_v31, 0.0 }
 0xa29   :  { %2555 = vadd.xlane.f32.xlu2 %v2554_v58 }
 0xa2d   :  { %v2543_v21 = vpop.f32.mrf.mxu1 }
 0xa2e   :  { %v2544_v39 = vadd.f32 %v5112_v40, %v2543_v21 }
 0xa30   :  { %v2557_v23 = vsel %vm1221_vm0, %v2544_v39, 0.0 }
 0xa31   :  { %2558 = vadd.xlane.f32.xlu1 %v2557_v23 }
 0xa74   :  { %v2550_v20 = vpop.xlane.xlu1 %2549 }
 0xa75   :  { %v2560_v43 = vmul.f32 %v2550_v20, %v6530_v42 }
 0xa77   :  { %v2564_v56 = vsub.f32 %v2535_v48, %v2560_v43 }
 0xa79   :  { %v2568_v63 = vmul.f32 %v2564_v56, %v2564_v56 }
 0xa7b   :  { %v2572_v41 = vsel %vm1221_vm0, %v2568_v63, 0.0 }
 0xa7c   :  { %v2553_v35 = vpop.xlane.xlu0 %2552  ;;  %2573 = vadd.xlane.f32.xlu0 %v2572_v41 }
 0xa7d   :  { %v2561_v19 = vmul.f32 %v2553_v35, %v6530_v42 }
 0xa7f   :  { %v2565_v8 = vsub.f32 %v2538_v1, %v2561_v19 }
 0xa81   :  { %v2569_v2 = vmul.f32 %v2565_v8, %v2565_v8 }
 0xa83   :  { %v2575_v38 = vsel %vm1221_vm0, %v2569_v2, 0.0 }
 0xa84   :  { %2576 = vadd.xlane.f32.xlu2 %v2575_v38 }
 0xa9c   :  { %v2556_v6 = vpop.xlane.xlu2 %2555 }
 0xa9d   :  { %v2562_v15 = vmul.f32 %v2556_v6, %v6530_v42 }
 0xa9f   :  { %v6993_v12 = vsub.f32 %v2541_v31, %v2562_v15 }
 0xaa1   :  { %v2570_v44 = vmul.f32 %v6993_v12, %v6993_v12 }
 0xaa3   :  { %v2578_v36 = vsel %vm1221_vm0, %v2570_v44, 0.0 }
 0xaa4   :  { %v2559_v14 = vpop.xlane.xlu1 %2558  ;;  %2579 = vadd.xlane.f32.xlu1 %v2578_v36 }
 0xaa5   :  { %v2563_v49 = vmul.f32 %v2559_v14, %v6530_v42 }
 0xaa7   :  { %v6999_v7 = vsub.f32 %v2544_v39, %v2563_v49 }
 0xaa9   :  { %v2571_v34 = vmul.f32 %v6999_v7, %v6999_v7 }
 0xaab   :  { %v2581_v18 = vsel %vm1221_vm0, %v2571_v34, 0.0 }
 0xaac   :  { %2582 = vadd.xlane.f32.xlu0 %v2581_v18 }
 0xaef   :  { %v2574_v24 = vpop.xlane.xlu0 %2573 }
 0xaf0   :  { %v2584_v62 = vmul.f32 %v2574_v24, %v6530_v42 }
 0xaf2   :  { %v2588_v57 = vadd.f32 1e-05, %v2584_v62 }
 0xaf4   :  { %5227 = vrsqrt.f32 %v2588_v57  ;;  %vm2598_vm9 = vweird.f32 %v2588_v57 }
 0xaf7   :  { %v2577_v26 = vpop.xlane.xlu2 %2576 }
 0xaf8   :  { %v2585_v33 = vmul.f32 %v2577_v26, %v6530_v42 }
 0xafa   :  { %v5228_v16 = vpop.eup %5227  ;;  %v2589_v51 = vadd.f32 1e-05, %v2585_v33 }
 0xafb   :  { %v2593_v22 = vmul.f32 %v5228_v16, %v2588_v57  ;;  %vm2599_vm8 = vweird.f32 %v5228_v16 }
 0xafc   :  { %5229 = vrsqrt.f32 %v2589_v51  ;;  %vm2600_vm10 = vmor %vm2598_vm9, %vm2599_vm8  ;;  %vm2608_vm12 = vweird.f32 %v2589_v51 }
 0xafd   :  { %v2594_v3 = vmul.f32 %v5228_v16, %v2593_v22 }
 0xaff   :  { %v2595_v32 = vmul.f32 0.5, %v2594_v3 }
 0xb01   :  { %v2596_v25 = vsub.f32 1.5, %v2595_v32 }
 0xb02   :  { %v5230_v30 = vpop.eup %5229 }
 0xb03   :  { %v2597_v52 = vmul.f32 %v5228_v16, %v2596_v25  ;;  %v2603_v61 = vmul.f32 %v5230_v30, %v2589_v51  ;;  %vm2609_vm11 = vweird.f32 %v5230_v30 }
 0xb04   :  { %vm2610_vm13 = vmor %vm2608_vm12, %vm2609_vm11 }
 0xb05   :  { %v2601_v29 = vsel %vm2600_vm10, %v5228_v16, %v2597_v52  ;;  %v2604_v13 = vmul.f32 %v5230_v30, %v2603_v61 }
 0xb06   :  { %v2632_v37 = vmul.f32 %v2601_v29, %v2564_v56 }
 0xb07   :  { %v2605_v0 = vmul.f32 0.5, %v2604_v13 }
 0xb08   :  { %v2639_v11 = vmul.f32 %v5113_v60, %v2632_v37 }
 0xb09   :  { %v2606_v5 = vsub.f32 1.5, %v2605_v0 }
 0xb0a   :  { %v2646_v27 = vadd.f32 %v5114_v45, %v2639_v11  ;;  %v2761_v11 = vld [vmem:[%s7818_s16 + $0x18] sm:$0xff] }
 0xb0b   :  { %v2607_v10 = vmul.f32 %v5230_v30, %v2606_v5  ;;  %2786 = vmatpush.msra.mxu2 %v2761_v11  ;;  %v2760_v5 = vld [vmem:[%s7818_s16 + $0x10] sm:$0xff] }
 0xb0c   :  { %v7009_v4 = vadd.f32 %v2646_v27, %v6871_v54  ;;  %v2759_v27 = vld [vmem:[%s7818_s16 + $0x8] sm:$0xff] }
 0xb0d   :  { %v2611_v40 = vsel %vm2610_vm13, %v5230_v30, %v2607_v10  ;;  %2787 = vmatpush.msra.mxu2 %v2760_v5  ;;  %v2758_v10 = vld [vmem:[%s7818_s16] sm:$0xff]  ;;  %s7845_s16 = sld [smem:[#allocation48_spill]] }
 0xb0e   :  { %v2656_v17 = vsel %vm1221_vm0, %v7009_v4, 0.0  ;;  %v2633_v48 = vmul.f32 %v2611_v40, %v2565_v8 }
 0xb0f   :  { %2657 = vadd.xlane.f32.xlu2 %v2656_v17  ;;  %2788 = vmatpush.msra.mxu2 %v2759_v27 }
 0xb10   :  { %v2640_v59 = vmul.f32 %v5113_v60, %v2633_v48 }
 0xb11   :  { %2789 = vmatpush.msra.mxu2 %v2758_v10 }
 0xb12   :  { %v2647_v9 = vadd.f32 %v5114_v45, %v2640_v59 }
 0xb14   :  { %v7014_v1 = vadd.f32 %v2647_v9, %v6879_v53 }
 0xb16   :  { %v2659_v46 = vsel %vm1221_vm0, %v7014_v1, 0.0 }
 0xb17   :  { %v2580_v50 = vpop.xlane.xlu1 %2579  ;;  %2660 = vadd.xlane.f32.xlu1 %v2659_v46 }
 0xb18   :  { %v2586_v31 = vmul.f32 %v2580_v50, %v6530_v42 }
 0xb1a   :  { %v2590_v54 = vadd.f32 1e-05, %v2586_v31 }
 0xb1c   :  { %5231 = vrsqrt.f32 %v2590_v54  ;;  %vm2618_vm5 = vweird.f32 %v2590_v54 }
 0xb1f   :  { %v2583_v58 = vpop.xlane.xlu0 %2582 }
 0xb20   :  { %v2587_v21 = vmul.f32 %v2583_v58, %v6530_v42 }
 0xb22   :  { %v5232_v39 = vpop.eup %5231  ;;  %v2591_v23 = vadd.f32 1e-05, %v2587_v21 }
 0xb23   :  { %v2613_v20 = vmul.f32 %v5232_v39, %v2590_v54  ;;  %vm2619_vm3 = vweird.f32 %v5232_v39 }
 0xb24   :  { %5233 = vrsqrt.f32 %v2591_v23  ;;  %vm2620_vm6 = vmor %vm2618_vm5, %vm2619_vm3  ;;  %vm2628_vm8 = vweird.f32 %v2591_v23 }
 0xb25   :  { %v2614_v43 = vmul.f32 %v5232_v39, %v2613_v20 }
 0xb27   :  { %v2615_v56 = vmul.f32 0.5, %v2614_v43  ;;  %v5115_v43 = vld [vmem:[%s7819_s15] ss:$0 sm:$0xff] }
 0xb29   :  { %v2616_v53 = vsub.f32 1.5, %v2615_v56 }
 0xb2a   :  { %v5234_v63 = vpop.eup %5233 }
 0xb2b   :  { %v2617_v41 = vmul.f32 %v5232_v39, %v2616_v53  ;;  %v2623_v35 = vmul.f32 %v5234_v63, %v2591_v23  ;;  %vm2629_vm7 = vweird.f32 %v5234_v63 }
 0xb2c   :  { %vm2630_vm9 = vmor %vm2628_vm8, %vm2629_vm7 }
 0xb2d   :  { %v2621_v19 = vsel %vm2620_vm6, %v5232_v39, %v2617_v41  ;;  %v2624_v8 = vmul.f32 %v5234_v63, %v2623_v35  ;;  %v5116_v41 = vld [vmem:[%s7820_s18] ss:$0 sm:$0xff]  ;;  %s4741_s18 = sshll.u32 %s5802_s6, 4  ;;  %s4742_s18 = int_to_ptr.hbm [resolvable:$true] %s4741_s18 }
 0xb2e   :  { %v2634_v2 = vmul.f32 %v2621_v19, %v6993_v12 }
 0xb2f   :  { %v2625_v38 = vmul.f32 0.5, %v2624_v8 }
 0xb30   :  { %v2641_v6 = vmul.f32 %v5113_v60, %v2634_v2 }
 0xb31   :  { %v2626_v15 = vsub.f32 1.5, %v2625_v38 }
 0xb32   :  { %v2648_v44 = vadd.f32 %v5114_v45, %v2641_v6 }
 0xb33   :  { %v2627_v36 = vmul.f32 %v5234_v63, %v2626_v15 }
 0xb34   :  { %v7022_v14 = vadd.f32 %v2648_v44, %v6887_v55 }
 0xb35   :  { %v2631_v49 = vsel %vm2630_vm9, %v5234_v63, %v2627_v36 }
 0xb36   :  { %v2662_v34 = vsel %vm1221_vm0, %v7022_v14, 0.0  ;;  %v2635_v18 = vmul.f32 %v2631_v49, %v6999_v7 }
 0xb37   :  { %2663 = vadd.xlane.f32.xlu0 %v2662_v34 }
 0xb38   :  { %v2642_v24 = vmul.f32 %v5113_v60, %v2635_v18 }
 0xb3a   :  { %v2649_v12 = vadd.f32 %v5114_v45, %v2642_v24 }
 0xb3c   :  { %v7028_v62 = vadd.f32 %v2649_v12, %v6895_v28 }
 0xb3e   :  { %v2665_v57 = vsel %vm1221_vm0, %v7028_v62, 0.0 }
 0xb3f   :  { %2666 = vadd.xlane.f32.xlu2 %v2665_v57 }
 0xb82   :  { %v2658_v26 = vpop.xlane.xlu2 %2657 }
 0xb83   :  { %v2668_v55 = vmul.f32 %v2658_v26, %v6530_v42 }
 0xb85   :  { %v2672_v33 = vsub.f32 %v7009_v4, %v2668_v55 }
 0xb87   :  { %v2676_v16 = vmul.f32 %v2672_v33, %v2672_v33 }
 0xb89   :  { %v2680_v51 = vsel %vm1221_vm0, %v2676_v16, 0.0 }
 0xb8a   :  { %v2661_v22 = vpop.xlane.xlu1 %2660  ;;  %2681 = vadd.xlane.f32.xlu1 %v2680_v51 }
 0xb8b   :  { %v2669_v7 = vmul.f32 %v2661_v22, %v6530_v42 }
 0xb8d   :  { %v2673_v3 = vsub.f32 %v7014_v1, %v2669_v7 }
 0xb8f   :  { %v2677_v28 = vmul.f32 %v2673_v3, %v2673_v3 }
 0xb91   :  { %v2683_v32 = vsel %vm1221_vm0, %v2677_v28, 0.0 }
 0xb92   :  { %2684 = vadd.xlane.f32.xlu0 %v2683_v32 }
 0xbaa   :  { %v2664_v25 = vpop.xlane.xlu0 %2663 }
 0xbab   :  { %v2670_v30 = vmul.f32 %v2664_v25, %v6530_v42 }
 0xbad   :  { %v7040_v52 = vsub.f32 %v7022_v14, %v2670_v30 }
 0xbaf   :  { %v2678_v61 = vmul.f32 %v7040_v52, %v7040_v52 }
 0xbb1   :  { %v2686_v60 = vsel %vm1221_vm0, %v2678_v61, 0.0 }
 0xbb2   :  { %2687 = vadd.xlane.f32.xlu2 %v2686_v60  ;;  %v2667_v29 = vpop.xlane.xlu2 %2666 }
 0xbb3   :  { %v2671_v13 = vmul.f32 %v2667_v29, %v6530_v42 }
 0xbb5   :  { %v7047_v37 = vsub.f32 %v7028_v62, %v2671_v13 }
 0xbb7   :  { %v2679_v45 = vmul.f32 %v7047_v37, %v7047_v37 }
 0xbb9   :  { %v2689_v0 = vsel %vm1221_vm0, %v2679_v45, 0.0 }
 0xbba   :  { %2690 = vadd.xlane.f32.xlu1 %v2689_v0 }
 0xbfd   :  { %v2682_v40 = vpop.xlane.xlu1 %2681 }
 0xbfe   :  { %v2692_v17 = vmul.f32 %v2682_v40, %v6530_v42 }
 0xc00   :  { %v2696_v48 = vadd.f32 1e-05, %v2692_v17 }
 0xc02   :  { %5235 = vrsqrt.f32 %v2696_v48  ;;  %vm2706_vm11 = vweird.f32 %v2696_v48 }
 0xc05   :  { %v2685_v59 = vpop.xlane.xlu0 %2684 }
 0xc06   :  { %v2693_v9 = vmul.f32 %v2685_v59, %v6530_v42 }
 0xc08   :  { %v5236_v46 = vpop.eup %5235  ;;  %v2697_v50 = vadd.f32 1e-05, %v2693_v9 }
 0xc09   :  { %v2701_v31 = vmul.f32 %v5236_v46, %v2696_v48  ;;  %vm2707_vm10 = vweird.f32 %v5236_v46 }
 0xc0a   :  { %5237 = vrsqrt.f32 %v2697_v50  ;;  %vm2708_vm12 = vmor %vm2706_vm11, %vm2707_vm10  ;;  %vm2716_vm3 = vweird.f32 %v2697_v50 }
 0xc0b   :  { %v2702_v54 = vmul.f32 %v5236_v46, %v2701_v31 }
 0xc0d   :  { %v2703_v58 = vmul.f32 0.5, %v2702_v54 }
 0xc0f   :  { %v2704_v21 = vsub.f32 1.5, %v2703_v58 }
 0xc10   :  { %v5238_v39 = vpop.eup %5237 }
 0xc11   :  { %v2705_v23 = vmul.f32 %v5236_v46, %v2704_v21  ;;  %v2711_v20 = vmul.f32 %v5238_v39, %v2697_v50  ;;  %vm2717_vm13 = vweird.f32 %v5238_v39 }
 0xc12   :  { %vm2718_vm5 = vmor %vm2716_vm3, %vm2717_vm13 }
 0xc13   :  { %v2709_v56 = vsel %vm2708_vm12, %v5236_v46, %v2705_v23  ;;  %v2712_v53 = vmul.f32 %v5238_v39, %v2711_v20 }
 0xc14   :  { %v2740_v63 = vmul.f32 %v2709_v56, %v2672_v33 }
 0xc15   :  { %v2713_v35 = vmul.f32 0.5, %v2712_v53 }
 0xc16   :  { %v2747_v19 = vmul.f32 %v5115_v43, %v2740_v63 }
 0xc17   :  { %v2714_v8 = vsub.f32 1.5, %v2713_v35 }
 0xc18   :  { %v2754_v2 = vadd.f32 %v5116_v41, %v2747_v19 }
 0xc19   :  { %v2715_v38 = vmul.f32 %v5238_v39, %v2714_v8 }
 0xc1a   :  { %4863 = vmatmul.msk.f32.vlgmr.msra.gmra.mxu2 %vm1221_vm0, %v2754_v2 }
 0xc1b   :  { %v2719_v6 = vsel %vm2718_vm5, %v5238_v39, %v2715_v38 }
 0xc1c   :  { %v2741_v15 = vmul.f32 %v2719_v6, %v2673_v3 }
 0xc1e   :  { %v2748_v44 = vmul.f32 %v5115_v43, %v2741_v15 }
 0xc20   :  { %v2755_v36 = vadd.f32 %v5116_v41, %v2748_v44 }
 0xc22   :  { %4864 = vmatmul.msk.f32.gmra.mxu2 %vm1221_vm0, %v2755_v36 }
 0xc25   :  { %v2688_v49 = vpop.xlane.xlu2 %2687 }
 0xc26   :  { %v2694_v34 = vmul.f32 %v2688_v49, %v6530_v42 }
 0xc28   :  { %v2698_v18 = vadd.f32 1e-05, %v2694_v34 }
 0xc2a   :  { %5239 = vrsqrt.f32 %v2698_v18  ;;  %vm2726_vm7 = vweird.f32 %v2698_v18 }
 0xc2d   :  { %v2691_v24 = vpop.xlane.xlu1 %2690 }
 0xc2e   :  { %v2695_v12 = vmul.f32 %v2691_v24, %v6530_v42 }
 0xc30   :  { %v5240_v57 = vpop.eup %5239  ;;  %v2699_v26 = vadd.f32 1e-05, %v2695_v12 }
 0xc31   :  { %v2721_v55 = vmul.f32 %v5240_v57, %v2698_v18  ;;  %vm2727_vm6 = vweird.f32 %v5240_v57 }
 0xc32   :  { %5241 = vrsqrt.f32 %v2699_v26  ;;  %vm2728_vm8 = vmor %vm2726_vm7, %vm2727_vm6  ;;  %vm2736_vm10 = vweird.f32 %v2699_v26 }
 0xc33   :  { %v2722_v33 = vmul.f32 %v5240_v57, %v2721_v55 }
 0xc35   :  { %v2723_v16 = vmul.f32 0.5, %v2722_v33 }
 0xc37   :  { %v2724_v51 = vsub.f32 1.5, %v2723_v16 }
 0xc38   :  { %v5242_v22 = vpop.eup %5241 }
 0xc39   :  { %v2725_v7 = vmul.f32 %v5240_v57, %v2724_v51  ;;  %v2731_v3 = vmul.f32 %v5242_v22, %v2699_v26  ;;  %vm2737_vm9 = vweird.f32 %v5242_v22 }
 0xc3a   :  { %vm2738_vm11 = vmor %vm2736_vm10, %vm2737_vm9 }
 0xc3b   :  { %v2729_v28 = vsel %vm2728_vm8, %v5240_v57, %v2725_v7  ;;  %v2732_v32 = vmul.f32 %v5242_v22, %v2731_v3 }
 0xc3c   :  { %v2742_v25 = vmul.f32 %v2729_v28, %v7040_v52 }
 0xc3d   :  { %v2733_v30 = vmul.f32 0.5, %v2732_v32 }
 0xc3e   :  { %v2749_v61 = vmul.f32 %v5115_v43, %v2742_v25 }
 0xc3f   :  { %v2734_v60 = vsub.f32 1.5, %v2733_v30 }
 0xc40   :  { %v2756_v29 = vadd.f32 %v5116_v41, %v2749_v61 }
 0xc41   :  { %v2735_v13 = vmul.f32 %v5242_v22, %v2734_v60 }
 0xc42   :  { %4865 = vmatmul.msk.f32.gmra.mxu2 %vm1221_vm0, %v2756_v29 }
 0xc43   :  { %v2739_v45 = vsel %vm2738_vm11, %v5242_v22, %v2735_v13 }
 0xc44   :  { %v2743_v0 = vmul.f32 %v2739_v45, %v7047_v37 }
 0xc46   :  { %v2750_v11 = vmul.f32 %v5115_v43, %v2743_v0 }
 0xc48   :  { %v2757_v5 = vadd.f32 %v5116_v41, %v2750_v11 }
 0xc4a   :  { %4866 = vmatmul.msk.f32.gmra.mxu2 %vm1221_vm0, %v2757_v5 }
 0xc9d   :  { %v2791_v27 = vpop.f32.mrf.mxu2 }
 0xc9e   :  { %2805 = vrot.lane.b32.xlu2 %v2791_v27, %s5524_s5  ;;  %2995 = vrot.lane.b32.xlu1 %v2791_v27, %s5526_s17 }
 0xca5   :  { %v2794_v52 = vpop.f32.mrf.mxu2 }
 0xca6   :  { %2997 = vrot.lane.b32.xlu2 %v2794_v52, %s5526_s17  ;;  %2807 = vrot.lane.b32.xlu0 %v2794_v52, %s5524_s5  ;;  %v7101_v40 = vpack.i.bf16 %v2791_v27, %v2794_v52 }
 0xcae   :  { %2999 = vrot.lane.b32.xlu0 %v2791_v27, %s5525_s9 }
 0xcb6   :  { %3001 = vrot.lane.b32.xlu0 %v2794_v52, %s5525_s9 }
 0xcbe   :  { %3195 = vrot.lane.b32.xlu0 %v2791_v27, %s5528_s25 }
 0xcc5   :  { %v2797_v37 = vpop.f32.mrf.mxu2 }
 0xcc6   :  { %2842 = vrot.lane.b32.xlu2 %v2797_v37, %s5524_s5 }
 0xccd   :  { %v7076_v10 = vpop.f32.mrf.mxu2 }
 0xcce   :  { %3038 = vrot.lane.b32.xlu2 %v2797_v37, %s5525_s9  ;;  %3040 = vrot.lane.b32.xlu0 %v7076_v10, %s5525_s9  ;;  %v7114_v17 = vpack.i.bf16 %v2797_v37, %v7076_v10  ;;  %s7829_s9 = sld [smem:[#allocation35_spill]] }
 0xccf   :  { %2844 = vrot.lane.b32.xlu1 %v7076_v10, %s5524_s5  ;;  %s7828_s5 = sld [smem:[#allocation34_spill]] }
 0xcd6   :  { %3191 = vrot.lane.b32.xlu2 %v2791_v27, %s5527_s21  ;;  %3393 = vrot.lane.b32.xlu0 %v2794_v52, %s5529_s29 }
 0xcd7   :  { %3197 = vrot.lane.b32.xlu1 %v2794_v52, %s5528_s25 }
 0xcde   :  { %3236 = vrot.lane.b32.xlu2 %v7076_v10, %s5528_s25  ;;  %3036 = vrot.lane.b32.xlu0 %v7076_v10, %s5526_s17 }
 0xcdf   :  { %3034 = vrot.lane.b32.xlu1 %v2797_v37, %s5526_s17  ;;  %s7830_s17 = sld [smem:[#allocation36_spill]] }
 0xce6   :  { %3391 = vrot.lane.b32.xlu2 %v2791_v27, %s5529_s29  ;;  %3230 = vrot.lane.b32.xlu0 %v2797_v37, %s5527_s21 }
 0xce7   :  { %3193 = vrot.lane.b32.xlu1 %v2794_v52, %s5527_s21 }
 0xcee   :  { %3232 = vrot.lane.b32.xlu2 %v7076_v10, %s5527_s21  ;;  %3389 = vrot.lane.b32.xlu0 %v2794_v52, %s5531_s8  ;;  %s5539_s21 = smov 64  }
 0xcef   :  { %3234 = vrot.lane.b32.xlu1 %v2797_v37, %s5528_s25  ;;  %s5540_s25 = smov 32  }
 0xcf6   :  { %3430 = vrot.lane.b32.xlu2 %v2797_v37, %s5529_s29  ;;  %3426 = vrot.lane.b32.xlu0 %v2797_v37, %s5531_s8 }
 0xcf7   :  { %3387 = vrot.lane.b32.xlu1 %v2791_v27, %s5531_s8 }
 0xcf8   :  { %v2806_v48 = vpop.permute.xlu2 %2805 }
 0xcfe   :  { %5060 = vrot.lane.b32.xlu2 %v7101_v40, %s5530_s3  ;;  %5070 = vrot.lane.b32.xlu0 %v7101_v40, %s5532_s12 }
 0xcff   :  { %3432 = vrot.lane.b32.xlu1 %v7076_v10, %s5529_s29  ;;  %s7831_s29 = sld [smem:[#allocation39_spill]] }
 0xd00   :  { %v2998_v59 = vpop.permute.xlu2 %2997 }
 0xd06   :  { %5065 = vrot.lane.b32.xlu2 %v7101_v40, %s5533_s2 }
 0xd07   :  { %3428 = vrot.lane.b32.xlu1 %v7076_v10, %s5531_s8  ;;  %s7833_s8 = sld [smem:[#allocation38_spill]] }
 0xd0f   :  { %5075 = vrot.lane.b32.xlu1 %v7114_v17, %s5530_s3 }
 0xd10   :  { %v2996_v58 = vpop.permute.xlu1 %2995 }
 0xd17   :  { %5080 = vrot.lane.b32.xlu1 %v7114_v17, %s5533_s2  ;;  %s7835_s2 = sld [smem:[#allocation43_spill]] }
 0xd18   :  { %v2808_v9 = vpop.permute.xlu0 %2807 }
 0xd19   :  { %4867 = vmatpush.xpose.msk.msrb.mxu3 %vm1382_vm14, %v2808_v9 }
 0xd1d   :  { %4868 = vmatpush.xpose.msk.msrb.mxu3 %vm1382_vm14, %v2806_v48 }
 0xd20   :  { %v3000_v46 = vpop.permute.xlu0 %2999  ;;  %4869 = vmatmul.msk.f32.vlgmr.msrb.gmra.mxu3 %vm1382_vm14, %v2791_v27  ;;  %v2843_v50 = vpop.permute.xlu2 %2842 }
 0xd28   :  { %v3002_v31 = vpop.permute.xlu0 %3001  ;;  %4870 = vmatmul.msk.f32.gmra.mxu3 %vm1382_vm14, %v2794_v52  ;;  %v3039_v54 = vpop.permute.xlu2 %3038 }
 0xd29   :  { %4879 = vmatpush.xpose.msk.msrb.mxu2 %vm1382_vm14, %v3002_v31 }
 0xd2d   :  { %4880 = vmatpush.xpose.msk.msrb.mxu2 %vm1382_vm14, %v3000_v46 }
 0xd30   :  { %4881 = vmatmul.msk.f32.vlgmr.msrb.gmra.mxu2 %vm1382_vm14, %v2996_v58  ;;  %v3192_v21 = vpop.permute.xlu2 %3191  ;;  %v3196_v23 = vpop.permute.xlu0 %3195 }
 0xd38   :  { %4882 = vmatmul.msk.f32.gmra.mxu2 %vm1382_vm14, %v2998_v59  ;;  %v3237_v39 = vpop.permute.xlu2 %3236 }
 0xd40   :  { %v3392_v20 = vpop.permute.xlu2 %3391  ;;  %v3041_v56 = vpop.permute.xlu0 %3040 }
 0xd41   :  { %v2845_v43 = vpop.permute.xlu1 %2844 }
 0xd42   :  { %4871 = vmatpush.xpose.msk.msra.mxu3 %vm1382_vm14, %v2845_v43 }
 0xd46   :  { %4872 = vmatpush.xpose.msk.msra.mxu3 %vm1382_vm14, %v2843_v50 }
 0xd48   :  { %v3233_v53 = vpop.permute.xlu2 %3232  ;;  %v3394_v41 = vpop.permute.xlu0 %3393 }
 0xd49   :  { %v3198_v63 = vpop.permute.xlu1 %3197  ;;  %4873 = vmatmul.msk.f32.vlgmr.msra.gmra.mxu3 %vm1382_vm14, %v2797_v37 }
 0xd4a   :  { %4883 = vmatpush.xpose.msk.msrb.mxu3 %vm1382_vm14, %v3041_v56  ;;  %4891 = vmatpush.xpose.msk.msra.mxu2 %vm1382_vm14, %v3198_v63 }
 0xd4e   :  { %4884 = vmatpush.xpose.msk.msrb.mxu3 %vm1382_vm14, %v3039_v54  ;;  %4892 = vmatpush.xpose.msk.msra.mxu2 %vm1382_vm14, %v3196_v23 }
 0xd50   :  { %v3431_v35 = vpop.permute.xlu2 %3430  ;;  %v3037_v6 = vpop.permute.xlu0 %3036 }
 0xd51   :  { %v3035_v19 = vpop.permute.xlu1 %3034  ;;  %4874 = vmatmul.msk.f32.gmra.mxu3 %vm1382_vm14, %v7076_v10  ;;  %4893 = vmatmul.msk.f32.vlgmr.msra.gmra.mxu2 %vm1382_vm14, %v3192_v21 }
 0xd52   :  { %4895 = vmatpush.xpose.msk.msra.mxu3 %vm1382_vm14, %v3237_v39  ;;  %4903 = vmatpush.xpose.msk.msrb.mxu2 %vm1382_vm14, %v3394_v41 }
 0xd56   :  { %4904 = vmatpush.xpose.msk.msrb.mxu2 %vm1382_vm14, %v3392_v20 }
 0xd58   :  { %v5061_v8 = vpop.permute.xlu2 %5060  ;;  %v3231_v18 = vpop.permute.xlu0 %3230 }
 0xd59   :  { %v3194_v2 = vpop.permute.xlu1 %3193  ;;  %4885 = vmatmul.msk.f32.vlgmr.msrb.gmra.mxu3 %vm1382_vm14, %v3035_v19  ;;  %v5062_v38 = vunpack.i.l.bf16 %v5061_v8  ;;  %v5063_v15 = vunpack.i.h.bf16 %v5061_v8 }
 0xd5a   :  { %4894 = vmatmul.msk.f32.gmra.mxu2 %vm1382_vm14, %v3194_v2 }
 0xd5b   :  { %2951 = vmatpush.msra.mxu0 %v5062_v38 }
 0xd5d   :  { %2952 = vmatpush.msra.mxu0 %v5063_v15 }
 0xd60   :  { %v5066_v44 = vpop.permute.xlu2 %5065  ;;  %v3390_v12 = vpop.permute.xlu0 %3389 }
 0xd61   :  { %v3235_v36 = vpop.permute.xlu1 %3234  ;;  %4886 = vmatmul.msk.f32.gmra.mxu3 %vm1382_vm14, %v3037_v6  ;;  %v5067_v49 = vunpack.i.l.bf16 %v5066_v44  ;;  %v5068_v34 = vunpack.i.h.bf16 %v5066_v44 }
 0xd62   :  { %4896 = vmatpush.xpose.msk.msra.mxu3 %vm1382_vm14, %v3235_v36 }
 0xd63   :  { %3147 = vmatpush.msrb.mxu0 %v5067_v49 }
 0xd65   :  { %3148 = vmatpush.msrb.mxu0 %v5068_v34 }
 0xd68   :  { %v3427_v26 = vpop.permute.xlu0 %3426 }
 0xd69   :  { %v3388_v24 = vpop.permute.xlu1 %3387  ;;  %4897 = vmatmul.msk.f32.vlgmr.msra.gmra.mxu3 %vm1382_vm14, %v3231_v18 }
 0xd6a   :  { %4905 = vmatmul.msk.f32.vlgmr.msrb.gmra.mxu2 %vm1382_vm14, %v3388_v24 }
 0xd71   :  { %v3433_v57 = vpop.permute.xlu1 %3432  ;;  %4898 = vmatmul.msk.f32.gmra.mxu3 %vm1382_vm14, %v3233_v53 }
 0xd72   :  { %4906 = vmatmul.msk.f32.gmra.mxu2 %vm1382_vm14, %v3390_v12  ;;  %4907 = vmatpush.xpose.msk.msrb.mxu3 %vm1382_vm14, %v3433_v57 }
 0xd76   :  { %4908 = vmatpush.xpose.msk.msrb.mxu3 %vm1382_vm14, %v3431_v35 }
 0xd79   :  { %v3429_v55 = vpop.permute.xlu1 %3428  ;;  %4909 = vmatmul.msk.f32.vlgmr.msrb.gmra.mxu3 %vm1382_vm14, %v3427_v26  ;;  %v7217_v26 = vpop.permute.xlu0 %5070 }
 0xd81   :  { %v5076_v33 = vpop.permute.xlu1 %5075  ;;  %4910 = vmatmul.msk.f32.gmra.mxu3 %vm1382_vm14, %v3429_v55 }
 0xd82   :  { %v5077_v16 = vunpack.i.l.bf16 %v5076_v33  ;;  %v5078_v51 = vunpack.i.h.bf16 %v5076_v33 }
 0xd84   :  { %2986 = vmatpush.msra.mxu1 %v5077_v16 }
 0xd86   :  { %2987 = vmatpush.msra.mxu1 %v5078_v51 }
 0xd89   :  { %v5081_v22 = vpop.permute.xlu1 %5080 }
 0xd8a   :  { %v5082_v7 = vunpack.i.l.bf16 %v5081_v22  ;;  %v5083_v3 = vunpack.i.h.bf16 %v5081_v22 }
 0xd8c   :  { %3182 = vmatpush.msrb.mxu1 %v5082_v7 }
 0xd8e   :  { %3183 = vmatpush.msrb.mxu1 %v5083_v3 }
 0xda3   :  { %v2834_v28 = vpop.f32.mrf.mxu3 }
 0xda4   :  { %v7153_v32 = vmul.f32 0.25, %v2834_v28 }
 0xda6   :  { %v2881_v25 = vsel %vm1455_vm15, %v7153_v32, -inf }
 0xda7   :  { %2882 = vmax.xlane.f32.xlu2 %v2881_v25 }
 0xdab   :  { %v2837_v30 = vpop.f32.mrf.mxu3 }
 0xdac   :  { %v7157_v61 = vmul.f32 0.25, %v2837_v30 }
 0xdae   :  { %v2884_v60 = vsel %vm1455_vm15, %v7157_v61, -inf }
 0xdaf   :  { %2885 = vmax.xlane.f32.xlu0 %v2884_v60 }
 0xdb3   :  { %v3028_v29 = vpop.f32.mrf.mxu2 }
 0xdb4   :  { %v7161_v13 = vmul.f32 0.25, %v3028_v29 }
 0xdb6   :  { %v3077_v45 = vsel %vm1455_vm15, %v7161_v13, -inf }
 0xdb7   :  { %3078 = vmax.xlane.f32.xlu2 %v3077_v45 }
 0xdbb   :  { %v3031_v0 = vpop.f32.mrf.mxu2 }
 0xdbc   :  { %v7165_v11 = vmul.f32 0.25, %v3031_v0 }
 0xdbe   :  { %v3080_v5 = vsel %vm1455_vm15, %v7165_v11, -inf }
 0xdbf   :  { %3081 = vmax.xlane.f32.xlu1 %v3080_v5 }
 0xdcc   :  { %v2871_v27 = vpop.f32.mrf.mxu3 }
 0xdcd   :  { %v7169_v52 = vmul.f32 0.25, %v2871_v27 }
 0xdcf   :  { %v2887_v37 = vsel %vm1455_vm15, %v7169_v52, -inf }
 0xdd0   :  { %2888 = vmax.xlane.f32.xlu1 %v2887_v37 }
 0xdd4   :  { %v2874_v10 = vpop.f32.mrf.mxu3  ;;  %v3224_v48 = vpop.f32.mrf.mxu2 }
 0xdd5   :  { %v7173_v59 = vmul.f32 0.25, %v3224_v48  ;;  %v7177_v46 = vmul.f32 0.25, %v2874_v10 }
 0xdd7   :  { %v3273_v9 = vsel %vm1455_vm15, %v7173_v59, -inf  ;;  %v2890_v58 = vsel %vm1455_vm15, %v7177_v46, -inf }
 0xdd8   :  { %3274 = vmax.xlane.f32.xlu0 %v3273_v9 }
 0xddc   :  { %v3067_v50 = vpop.f32.mrf.mxu3 }
 0xddd   :  { %v3227_v31 = vpop.f32.mrf.mxu2  ;;  %v7185_v39 = vmul.f32 0.25, %v3067_v50 }
 0xdde   :  { %v7179_v54 = vmul.f32 0.25, %v3227_v31 }
 0xddf   :  { %v3083_v20 = vsel %vm1455_vm15, %v7185_v39, -inf }
 0xde0   :  { %2891 = vmax.xlane.f32.xlu0 %v2890_v58  ;;  %v3276_v21 = vsel %vm1455_vm15, %v7179_v54, -inf }
 0xde1   :  { %3277 = vmax.xlane.f32.xlu2 %v3276_v21 }
 0xde4   :  { %v3070_v23 = vpop.f32.mrf.mxu3 }
 0xde5   :  { %v7205_v44 = vmul.f32 0.25, %v3070_v23 }
 0xde7   :  { %v3086_v49 = vsel %vm1455_vm15, %v7205_v44, -inf }
 0xde9   :  { %3084 = vmax.xlane.f32.xlu2 %v3083_v20 }
 0xdec   :  { %v3263_v43 = vpop.f32.mrf.mxu3 }
 0xded   :  { %v7189_v56 = vmul.f32 0.25, %v3263_v43  ;;  %v3420_v53 = vpop.f32.mrf.mxu2 }
 0xdee   :  { %v7191_v63 = vmul.f32 0.25, %v3420_v53 }
 0xdef   :  { %v3279_v41 = vsel %vm1455_vm15, %v7189_v56, -inf }
 0xdf0   :  { %3280 = vmax.xlane.f32.xlu0 %v3279_v41  ;;  %v3469_v35 = vsel %vm1455_vm15, %v7191_v63, -inf }
 0xdf1   :  { %3470 = vmax.xlane.f32.xlu1 %v3469_v35 }
 0xdf4   :  { %v3266_v19 = vpop.f32.mrf.mxu3 }
 0xdf5   :  { %v7197_v8 = vmul.f32 0.25, %v3266_v19  ;;  %v3423_v2 = vpop.f32.mrf.mxu2 }
 0xdf6   :  { %v7199_v38 = vmul.f32 0.25, %v3423_v2 }
 0xdf7   :  { %v3282_v6 = vsel %vm1455_vm15, %v7197_v8, -inf }
 0xdf8   :  { %3283 = vmax.xlane.f32.xlu0 %v3282_v6  ;;  %v3472_v15 = vsel %vm1455_vm15, %v7199_v38, -inf }
 0xdf9   :  { %3473 = vmax.xlane.f32.xlu1 %v3472_v15 }
 0xdfc   :  { %v3459_v36 = vpop.f32.mrf.mxu3 }
 0xdfd   :  { %v7209_v34 = vmul.f32 0.25, %v3459_v36 }
 0xdff   :  { %v3475_v57 = vsel %vm1455_vm15, %v7209_v34, -inf }
 0xe01   :  { %3087 = vmax.xlane.f32.xlu1 %v3086_v49 }
 0xe04   :  { %v3462_v18 = vpop.f32.mrf.mxu3 }
 0xe05   :  { %v7211_v24 = vmul.f32 0.25, %v3462_v18 }
 0xe07   :  { %v3478_v12 = vsel %vm1455_vm15, %v7211_v24, -inf }
 0xe08   :  { %3479 = vmax.xlane.f32.xlu0 %v3478_v12 }
 0xe09   :  { %3476 = vmax.xlane.f32.xlu1 %v3475_v57 }
 0xe1a   :  { %v2883_v55 = vpop.xlane.xlu2 %2882 }
 0xe1b   :  { %v2893_v33 = vsub.f32 %v7153_v32, %v2883_v55 }
 0xe1d   :  { %v2897_v16 = vmul.f32 1.442695, %v2893_v33 }
 0xe1f   :  { %5243 = vpow2.f32 %v2897_v16 }
 0xe22   :  { %v2886_v51 = vpop.xlane.xlu0 %2885 }
 0xe23   :  { %v2894_v22 = vsub.f32 %v7157_v61, %v2886_v51 }
 0xe25   :  { %v7221_v7 = vpop.eup %5243  ;;  %v2899_v3 = vmul.f32 1.442695, %v2894_v22 }
 0xe26   :  { %v2905_v28 = vsel %vm1455_vm15, %v7221_v7, 0.0 }
 0xe27   :  { %5245 = vpow2.f32 %v2899_v3  ;;  %2906 = vadd.xlane.f32.xlu2 %v2905_v28 }
 0xe2a   :  { %v3079_v25 = vpop.xlane.xlu2 %3078 }
 0xe2b   :  { %v3089_v30 = vsub.f32 %v7161_v13, %v3079_v25 }
 0xe2d   :  { %v7226_v60 = vpop.eup %5245  ;;  %v3093_v29 = vmul.f32 1.442695, %v3089_v30 }
 0xe2e   :  { %v2908_v32 = vsel %vm1455_vm15, %v7226_v60, 0.0 }
 0xe2f   :  { %5247 = vpow2.f32 %v3093_v29  ;;  %2909 = vadd.xlane.f32.xlu0 %v2908_v32 }
 0xe32   :  { %v3082_v61 = vpop.xlane.xlu1 %3081 }
 0xe33   :  { %v3090_v45 = vsub.f32 %v7165_v11, %v3082_v61 }
 0xe35   :  { %v7231_v0 = vpop.eup %5247  ;;  %v3095_v5 = vmul.f32 1.442695, %v3090_v45 }
 0xe36   :  { %v3101_v27 = vsel %vm1455_vm15, %v7231_v0, 0.0 }
 0xe37   :  { %5249 = vpow2.f32 %v3095_v5  ;;  %3102 = vadd.xlane.f32.xlu1 %v3101_v27 }
 0xe3d   :  { %v7235_v13 = vpop.eup %5249 }
 0xe3e   :  { %v3104_v37 = vsel %vm1455_vm15, %v7235_v13, 0.0 }
 0xe3f   :  { %3105 = vadd.xlane.f32.xlu2 %v3104_v37 }
 0xe43   :  { %v2889_v10 = vpop.xlane.xlu1 %2888 }
 0xe44   :  { %v2895_v11 = vsub.f32 %v7169_v52, %v2889_v10 }
 0xe46   :  { %v2901_v31 = vmul.f32 1.442695, %v2895_v11 }
 0xe4b   :  { %v3275_v48 = vpop.xlane.xlu0 %3274 }
 0xe4c   :  { %v3285_v9 = vsub.f32 %v7173_v59, %v3275_v48 }
 0xe4e   :  { %v3289_v50 = vmul.f32 1.442695, %v3285_v9 }
 0xe50   :  { %5251 = vpow2.f32 %v3289_v50 }
 0xe51   :  { %5253 = vpow2.f32 %v2901_v31 }
 0xe53   :  { %v2892_v59 = vpop.xlane.xlu0 %2891 }
 0xe54   :  { %v3278_v58 = vpop.xlane.xlu2 %3277  ;;  %v2896_v52 = vsub.f32 %v7177_v46, %v2892_v59 }
 0xe55   :  { %v3286_v23 = vsub.f32 %v7179_v54, %v3278_v58 }
 0xe56   :  { %v7241_v21 = vpop.eup %5251  ;;  %v2903_v35 = vmul.f32 1.442695, %v2896_v52 }
 0xe57   :  { %v3297_v20 = vsel %vm1455_vm15, %v7241_v21, 0.0  ;;  %5085 = vrot.lane.b32.xlu2 %v7114_v17, %s5532_s12  ;;  %v3291_v43 = vmul.f32 1.442695, %v3286_v23  ;;  %v7248_v53 = vpop.eup %5253  ;;  %v5072_v23 = vunpack.i.l.bf16 %v7217_v26  ;;  %s7834_s12 = sld [smem:[#allocation40_spill]] }
 0xe58   :  { %3298 = vadd.xlane.f32.xlu0 %v3297_v20  ;;  %v2911_v41 = vsel %vm1455_vm15, %v7248_v53, 0.0  ;;  %v5073_v20 = vunpack.i.h.bf16 %v7217_v26 }
 0xe59   :  { %5255 = vpow2.f32 %v3291_v43 }
 0xe5a   :  { %5257 = vpow2.f32 %v2903_v35 }
 0xe5c   :  { %v3085_v54 = vpop.xlane.xlu2 %3084 }
 0xe5d   :  { %v3091_v15 = vsub.f32 %v7185_v39, %v3085_v54 }
 0xe5f   :  { %v7253_v2 = vpop.eup %5255  ;;  %v3097_v49 = vmul.f32 1.442695, %v3091_v15 }
 0xe60   :  { %2912 = vadd.xlane.f32.xlu0 %v2911_v41  ;;  %v3300_v36 = vsel %vm1455_vm15, %v7253_v2, 0.0  ;;  %v7258_v18 = vpop.eup %5257 }
 0xe61   :  { %5259 = vpow2.f32 %v3097_v49  ;;  %v2914_v33 = vsel %vm1455_vm15, %v7258_v18, 0.0 }
 0xe63   :  { %v3281_v19 = vpop.xlane.xlu0 %3280 }
 0xe64   :  { %v3471_v6 = vpop.xlane.xlu1 %3470  ;;  %v3287_v28 = vsub.f32 %v7189_v56, %v3281_v19 }
 0xe65   :  { %v3481_v57 = vsub.f32 %v7191_v63, %v3471_v6 }
 0xe67   :  { %v3485_v16 = vmul.f32 1.442695, %v3481_v57  ;;  %v7264_v51 = vpop.eup %5259 }
 0xe68   :  { %3301 = vadd.xlane.f32.xlu0 %v3300_v36  ;;  %v3107_v63 = vsel %vm1455_vm15, %v7264_v51, 0.0 }
 0xe69   :  { %5261 = vpow2.f32 %v3485_v16 }
 0xe6b   :  { %v3284_v46 = vpop.xlane.xlu0 %3283 }
 0xe6c   :  { %v3474_v12 = vpop.xlane.xlu1 %3473  ;;  %v3288_v55 = vsub.f32 %v7197_v8, %v3284_v46  ;;  %v3293_v8 = vmul.f32 1.442695, %v3287_v28 }
 0xe6d   :  { %v3482_v32 = vsub.f32 %v7199_v38, %v3474_v12 }
 0xe6e   :  { %v3295_v39 = vmul.f32 1.442695, %v3288_v55 }
 0xe6f   :  { %v7270_v30 = vpop.eup %5261  ;;  %v3487_v5 = vmul.f32 1.442695, %v3482_v32 }
 0xe70   :  { %2915 = vadd.xlane.f32.xlu0 %v2914_v33  ;;  %5263 = vpow2.f32 %v3295_v39 }
 0xe74   :  { %v3088_v22 = vpop.xlane.xlu1 %3087 }
 0xe75   :  { %v3092_v3 = vsub.f32 %v7205_v44, %v3088_v22  ;;  %v3493_v44 = vsel %vm1455_vm15, %v7270_v30, 0.0 }
 0xe76   :  { %v7272_v29 = vpop.eup %5263 }
 0xe77   :  { %v3099_v25 = vmul.f32 1.442695, %v3092_v3  ;;  %v3306_v56 = vsel %vm1455_vm15, %v7272_v29, 0.0 }
 0xe78   :  { %3108 = vadd.xlane.f32.xlu0 %v3107_v63 }
 0xe79   :  { %5265 = vpow2.f32 %v3099_v25 }
 0xe7a   :  { %5267 = vpow2.f32 %v3293_v8 }
 0xe7b   :  { %5269 = vpow2.f32 %v3487_v5  ;;  %v3480_v48 = vpop.xlane.xlu0 %3479 }
 0xe7c   :  { %v3477_v50 = vpop.xlane.xlu1 %3476  ;;  %v3484_v59 = vsub.f32 %v7211_v24, %v3480_v48 }
 0xe7d   :  { %v3483_v41 = vsub.f32 %v7209_v34, %v3477_v50 }
 0xe7f   :  { %v7275_v61 = vpop.eup %5265  ;;  %v3489_v26 = vmul.f32 1.442695, %v3483_v41 }
 0xe80   :  { %3307 = vadd.xlane.f32.xlu0 %v3306_v56  ;;  %3494 = vadd.xlane.f32.xlu2 %v3493_v44  ;;  %v3110_v45 = vsel %vm1455_vm15, %v7275_v61, 0.0  ;;  %v7283_v27 = vpop.eup %5267 }
 0xe81   :  { %3111 = vadd.xlane.f32.xlu1 %v3110_v45  ;;  %v3303_v38 = vsel %vm1455_vm15, %v7283_v27, 0.0  ;;  %v7287_v37 = vpop.eup %5269 }
 0xe82   :  { %v3496_v10 = vsel %vm1455_vm15, %v7287_v37, 0.0 }
 0xe88   :  { %3304 = vadd.xlane.f32.xlu2 %v3303_v38 }
 0xe90   :  { %3497 = vadd.xlane.f32.xlu2 %v3496_v10 }
 0xe94   :  { %5095 = vrot.lane.b32.xlu0 %v7114_v17, %s5534_s10 }
 0xe9a   :  { %5090 = vrot.lane.b32.xlu1 %v7101_v40, %s5534_s10  ;;  %v2907_v9 = vpop.xlane.xlu2 %2906  ;;  %s7836_s10 = sld [smem:[#allocation41_spill]] }
 0xe9b   :  { %5271 = vrcp.f32 %v2907_v9 }
 0xea1   :  { %v5272_v11 = vpop.eup %5271 }
 0xea2   :  { %v2921_v31 = vmul.f32 %v5272_v11, %v7221_v7  ;;  %v2910_v58 = vpop.xlane.xlu0 %2909  ;;  %v3491_v7 = vmul.f32 1.442695, %v3484_v59 }
 0xea3   :  { %5273 = vrcp.f32 %v2910_v58 }
 0xea4   :  { %4875 = vmatmul.msk.f32.vlgmr.msra.gmra.mxu0 %vm1455_vm15, %v2921_v31 }
 0xea5   :  { %3343 = vmatpush.msra.mxu0 %v5072_v23 }
 0xea7   :  { %3344 = vmatpush.msra.mxu0 %v5073_v20 }
 0xea9   :  { %v5274_v17 = vpop.eup %5273 }
 0xeaa   :  { %v3103_v43 = vpop.xlane.xlu1 %3102  ;;  %v2922_v40 = vmul.f32 %v5274_v17, %v7226_v60 }
 0xeab   :  { %5275 = vrcp.f32 %v3103_v43 }
 0xeac   :  { %4876 = vmatmul.msk.f32.gmra.mxu0 %vm1455_vm15, %v2922_v40 }
 0xeb1   :  { %v5276_v52 = vpop.eup %5275 }
 0xeb2   :  { %v3117_v35 = vmul.f32 %v5276_v52, %v7231_v0  ;;  %v3106_v54 = vpop.xlane.xlu2 %3105 }
 0xeb3   :  { %5277 = vrcp.f32 %v3106_v54 }
 0xeb4   :  { %5279 = vpow2.f32 %v3491_v7  ;;  %4887 = vmatmul.msk.f32.vlgmr.msrb.gmra.mxu0 %vm1455_vm15, %v3117_v35 }
 0xeb5   :  { %5281 = vpow2.f32 %v3489_v26 }
 0xeb9   :  { %v5278_v19 = vpop.eup %5277 }
 0xeba   :  { %v7305_v6 = vpop.eup %5279  ;;  %v3118_v24 = vmul.f32 %v5278_v19, %v7235_v13  ;;  %v5086_v13 = vpop.permute.xlu2 %5085 }
 0xebb   :  { %v3502_v60 = vsel %vm1455_vm15, %v7305_v6, 0.0  ;;  %v7311_v34 = vpop.eup %5281  ;;  %v5087_v33 = vunpack.i.l.bf16 %v5086_v13  ;;  %v5088_v16 = vunpack.i.h.bf16 %v5086_v13 }
 0xebc   :  { %4888 = vmatmul.msk.f32.gmra.mxu0 %vm1455_vm15, %v3118_v24  ;;  %v3499_v0 = vsel %vm1455_vm15, %v7311_v34, 0.0 }
 0xebe   :  { %3503 = vadd.xlane.f32.xlu0 %v3502_v60 }
 0xec4   :  { %3500 = vadd.xlane.f32.xlu1 %v3499_v0 }
 0xecb   :  { %v3299_v15 = vpop.xlane.xlu0 %3298 }
 0xecc   :  { %5283 = vrcp.f32 %v3299_v15 }
 0xed2   :  { %v5284_v36 = vpop.eup %5283 }
 0xed3   :  { %v3313_v49 = vmul.f32 %v5284_v36, %v7241_v21  ;;  %v2913_v46 = vpop.xlane.xlu0 %2912 }
 0xed4   :  { %5285 = vrcp.f32 %v2913_v46 }
 0xed5   :  { %4899 = vmatmul.msk.f32.vlgmr.msra.gmra.mxu0 %vm1455_vm15, %v3313_v49 }
 0xeda   :  { %v5286_v12 = vpop.eup %5285 }
 0xedb   :  { %v2923_v57 = vmul.f32 %v5286_v12, %v7248_v53  ;;  %v3302_v55 = vpop.xlane.xlu0 %3301 }
 0xedc   :  { %5287 = vrcp.f32 %v3302_v55 }
 0xedd   :  { %4877 = vmatmul.msk.f32.vlgmr.msra.gmra.mxu1 %vm1455_vm15, %v2923_v57 }
 0xede   :  { %3378 = vmatpush.msra.mxu1 %v5087_v33 }
 0xee0   :  { %3379 = vmatpush.msra.mxu1 %v5088_v16 }
 0xee2   :  { %v5288_v39 = vpop.eup %5287 }
 0xee3   :  { %v2916_v22 = vpop.xlane.xlu0 %2915  ;;  %v3314_v21 = vmul.f32 %v5288_v39, %v7253_v2 }
 0xee4   :  { %5289 = vrcp.f32 %v2916_v22 }
 0xee5   :  { %4900 = vmatmul.msk.f32.gmra.mxu0 %vm1455_vm15, %v3314_v21 }
 0xeea   :  { %v5290_v3 = vpop.eup %5289 }
 0xeeb   :  { %v3109_v28 = vpop.xlane.xlu0 %3108  ;;  %v2924_v25 = vmul.f32 %v5290_v3, %v7258_v18 }
 0xeec   :  { %5291 = vrcp.f32 %v3109_v28 }
 0xeed   :  { %4878 = vmatmul.msk.f32.gmra.mxu1 %vm1455_vm15, %v2924_v25 }
 0xef2   :  { %v5292_v53 = vpop.eup %5291 }
 0xef3   :  { %v3119_v63 = vmul.f32 %v5292_v53, %v7264_v51  ;;  %v3495_v8 = vpop.xlane.xlu2 %3494  ;;  %v3308_v45 = vpop.xlane.xlu0 %3307 }
 0xef4   :  { %v3112_v32 = vpop.xlane.xlu1 %3111 }
 0xef5   :  { %5293 = vrcp.f32 %v3112_v32  ;;  %4889 = vmatmul.msk.f32.vlgmr.msrb.gmra.mxu1 %vm1455_vm15, %v3119_v63 }
 0xefb   :  { %v5294_v56 = vpop.eup %5293  ;;  %v3305_v2 = vpop.xlane.xlu2 %3304 }
 0xefc   :  { %5295 = vrcp.f32 %v3305_v2  ;;  %v3120_v44 = vmul.f32 %v5294_v56, %v7275_v61 }
 0xefd   :  { %5297 = vrcp.f32 %v3308_v45 }
 0xefe   :  { %4890 = vmatmul.msk.f32.gmra.mxu1 %vm1455_vm15, %v3120_v44  ;;  %5299 = vrcp.f32 %v3495_v8 }
 0xf02   :  { %v5296_v18 = vpop.eup %5295 }
 0xf03   :  { %v3315_v5 = vmul.f32 %v5296_v18, %v7283_v27  ;;  %v5298_v10 = vpop.eup %5297  ;;  %v3498_v9 = vpop.xlane.xlu2 %3497 }
 0xf04   :  { %v3316_v61 = vmul.f32 %v5298_v10, %v7272_v29  ;;  %v5300_v50 = vpop.eup %5299  ;;  %5301 = vrcp.f32 %v3498_v9 }
 0xf05   :  { %v3509_v27 = vmul.f32 %v5300_v50, %v7270_v30 }
 0xf06   :  { %v5096_v38 = vpop.permute.xlu0 %5095  ;;  %4901 = vmatmul.msk.f32.vlgmr.msra.gmra.mxu1 %vm1455_vm15, %v3315_v5 }
 0xf07   :  { %v5097_v51 = vunpack.i.l.bf16 %v5096_v38  ;;  %v5098_v48 = vunpack.i.h.bf16 %v5096_v38 }
 0xf09   :  { %3574 = vmatpush.msrb.mxu1 %v5097_v51 }
 0xf0a   :  { %v5302_v23 = vpop.eup %5301 }
 0xf0b   :  { %3575 = vmatpush.msrb.mxu1 %v5098_v48  ;;  %v3510_v20 = vmul.f32 %v5302_v23, %v7287_v37 }
 0xf0c   :  { %v5091_v11 = vpop.permute.xlu1 %5090 }
 0xf0d   :  { %v5092_v31 = vunpack.i.l.bf16 %v5091_v11  ;;  %v5093_v58 = vunpack.i.h.bf16 %v5091_v11 }
 0xf0e   :  { %4902 = vmatmul.msk.f32.gmra.mxu1 %vm1455_vm15, %v3316_v61 }
 0xf0f   :  { %3539 = vmatpush.msrb.mxu0 %v5092_v31 }
 0xf11   :  { %3540 = vmatpush.msrb.mxu0 %v5093_v58 }
 0xf12   :  { %4911 = vmatmul.msk.f32.vlgmr.msrb.gmra.mxu0 %vm1455_vm15, %v3509_v27 }
 0xf1a   :  { %4912 = vmatmul.msk.f32.gmra.mxu0 %vm1455_vm15, %v3510_v20 }
 0xf21   :  { %v2954_v17 = vpop.f32.mrf.mxu0 }
 0xf29   :  { %v2957_v43 = vpop.f32.mrf.mxu0 }
 0xf31   :  { %v3150_v29 = vpop.f32.mrf.mxu0  ;;  %v3504_v7 = vpop.xlane.xlu0 %3503 }
 0xf32   :  { %3587 = vrot.lane.b32.xlu2 %v3150_v29, %s5535_s7 }
 0xf37   :  { %v3501_v40 = vpop.xlane.xlu1 %3500 }
 0xf38   :  { %5303 = vrcp.f32 %v3501_v40 }
 0xf39   :  { %v3153_v59 = vpop.f32.mrf.mxu0  ;;  %5305 = vrcp.f32 %v3504_v7 }
 0xf3a   :  { %3589 = vrot.lane.b32.xlu0 %v3153_v59, %s5535_s7 }
 0xf3e   :  { %v5304_v30 = vpop.eup %5303 }
 0xf3f   :  { %v3511_v52 = vmul.f32 %v5304_v30, %v7311_v34  ;;  %v5306_v37 = vpop.eup %5305 }
 0xf40   :  { %v3512_v41 = vmul.f32 %v5306_v37, %v7305_v6 }
 0xf41   :  { %4913 = vmatmul.msk.f32.vlgmr.msrb.gmra.mxu1 %vm1455_vm15, %v3511_v52 }
 0xf49   :  { %4914 = vmatmul.msk.f32.gmra.mxu1 %vm1455_vm15, %v3512_v41 }
 0xf52   :  { %v3346_v35 = vpop.f32.mrf.mxu0 }
 0xf53   :  { %3603 = vrot.lane.b32.xlu1 %v3346_v35, %s5536_s11 }
 0xf5a   :  { %v2989_v54 = vpop.f32.mrf.mxu1 }
 0xf62   :  { %v3349_v26 = vpop.f32.mrf.mxu0 }
 0xf63   :  { %3605 = vrot.lane.b32.xlu1 %v3349_v26, %s5536_s11  ;;  %v3754_v26 = vld [vmem:[%s7821_s22 + $0x18] sm:$0xff] }
 0xf64   :  { %3783 = vmatpush.msra.mxu2 %v3754_v26 }
 0xf6a   :  { %v2992_v19 = vpop.f32.mrf.mxu1 }
 0xf72   :  { %v3185_v24 = vpop.f32.mrf.mxu1 }
 0xf73   :  { %3591 = vrot.lane.b32.xlu1 %v3185_v24, %s5535_s7  ;;  %v3752_v24 = vld [vmem:[%s7821_s22 + $0x8] sm:$0xff] }
 0xf7b   :  { %v3188_v60 = vpop.f32.mrf.mxu1 }
 0xf7c   :  { %3593 = vrot.lane.b32.xlu1 %v3188_v60, %s5535_s7  ;;  %v3751_v60 = vld [vmem:[%s7821_s22] sm:$0xff]  ;;  %s7837_s7 = sld [smem:[#allocation42_spill]] }
 0xf83   :  { %v3381_v0 = vpop.f32.mrf.mxu1 }
 0xf8b   :  { %v3384_v15 = vpop.f32.mrf.mxu1 }
 0xf8c   :  { %v3588_v46 = vpop.permute.xlu2 %3587 }
 0xf8d   :  { %v3631_v12 = vsel %vm2206_vm1, %v2954_v17, %v3588_v46 }
 0xf8f   :  { %v3542_v34 = vpop.f32.mrf.mxu0 }
 0xf90   :  { %3619 = vrot.lane.b32.xlu2 %v3542_v34, %s5537_s13 }
 0xf97   :  { %v3545_v6 = vpop.f32.mrf.mxu0 }
 0xf98   :  { %3621 = vrot.lane.b32.xlu2 %v3545_v6, %s5537_s13 }
 0xfa0   :  { %3607 = vrot.lane.b32.xlu2 %v3381_v0, %s5536_s11 }
 0xfa8   :  { %3609 = vrot.lane.b32.xlu2 %v3384_v15, %s5536_s11  ;;  %s7838_s11 = sld [smem:[#allocation44_spill]] }
 0xfac   :  { %v3590_v39 = vpop.permute.xlu0 %3589 }
 0xfad   :  { %v3632_v3 = vsel %vm2206_vm1, %v2957_v43, %v3590_v39 }
 0xfbe   :  { %v3577_v36 = vpop.f32.mrf.mxu1 }
 0xfbf   :  { %3623 = vrot.lane.b32.xlu0 %v3577_v36, %s5537_s13 }
 0xfc5   :  { %v3604_v13 = vpop.permute.xlu1 %3603 }
 0xfc6   :  { %v3580_v49 = vpop.f32.mrf.mxu1  ;;  %v3635_v57 = vsel %vm1455_vm15, %v3631_v12, %v3604_v13 }
 0xfc7   :  { %3625 = vrot.lane.b32.xlu0 %v3580_v49, %s5537_s13  ;;  %s7839_s13 = sld [smem:[#allocation49_spill]] }
 0xfd5   :  { %v3606_v21 = vpop.permute.xlu1 %3605 }
 0xfd6   :  { %v3636_v28 = vsel %vm1455_vm15, %v3632_v3, %v3606_v21  ;;  %v5117_v21 = vld [vmem:[%s7822_s26] ss:$0 sm:$0xff] }
 0xfe5   :  { %v3592_v8 = vpop.permute.xlu1 %3591 }
 0xfe6   :  { %v3633_v56 = vsel %vm2206_vm1, %v2989_v54, %v3592_v8 }
 0xfea   :  { %v3620_v55 = vpop.permute.xlu2 %3619 }
 0xfeb   :  { %v3639_v33 = vsel %vm2215_vm2, %v3635_v57, %v3620_v55 }
 0xfec   :  { %v7355_v16 = vadd.f32 %v3639_v33, %v7009_v4 }
 0xfee   :  { %v3649_v22 = vsel %vm1221_vm0, %v7355_v16, 0.0  ;;  %v3594_v5 = vpop.permute.xlu1 %3593 }
 0xfef   :  { %3650 = vadd.xlane.f32.xlu1 %v3649_v22  ;;  %v3634_v51 = vsel %vm2206_vm1, %v2992_v19, %v3594_v5  ;;  %v3753_v19 = vld [vmem:[%s7821_s22 + $0x10] sm:$0xff]  ;;  %s5449_s22 = sshra.s32 %s4742_s18, 4  ;;  %s5450_s22 = int_to_ptr.hbm [resolvable:$true] %s5449_s22 }
 0xff0   :  { %3784 = vmatpush.msra.mxu2 %v3753_v19  ;;  %s5451_s26 = scalar_lea.hbm %s5450_s22, 2  ;;  %p5454_p7 = scmp.lt.s32.totalorder %s5450_s22, %s5802_s6 }
 0xff1   :  { %p5452_p6 = scmp.ne.s32.totalorder %s5450_s22, %s5451_s26 }
 0xff2   :  { %v3622_v25 = vpop.permute.xlu2 %3621  ;;  %3785 = vmatpush.msra.mxu2 %v3752_v24  ;;  %v5119_v24 = vld [vmem:[%s7824_s23] ss:$0 sm:$0xff] }
 0xff3   :  { %v3640_v53 = vsel %vm2215_vm2, %v3636_v28, %v3622_v25  ;;  %v5118_v25 = vld [vmem:[%s7823_s4] ss:$0 sm:$0xff]  ;;  %s5453_s4 = scalar_lea.hbm %s5802_s6, 2 }
 0xff4   :  { %v7363_v63 = vadd.f32 %v3640_v53, %v7014_v1  ;;  %3786 = vmatpush.msra.mxu2 %v3751_v60  ;;  %p5455_p8 = scmp.lt.s32.totalorder %s5453_s4, %s5451_s26 }
 0xff6   :  { %v3652_v4 = vsel %vm1221_vm0, %v7363_v63, 0.0  ;;  %p5456_p9 = por %p5455_p8, %p5454_p7 }
 0xff7   :  { %3653 = vadd.xlane.f32.xlu2 %v3652_v4 }
 0xff8   :  { %p5457_p10 = pnand %p5456_p9, %p5452_p6 }
 0xffa   :  { %v3608_v32 = vpop.permute.xlu2 %3607 }
 0xffb   :  { %v3637_v2 = vsel %vm1455_vm15, %v3633_v56, %v3608_v32 }
0x1002   :  { %v3610_v38 = vpop.permute.xlu2 %3609 }
0x1003   :  { %v3638_v10 = vsel %vm1455_vm15, %v3634_v51, %v3610_v38 }
0x1031   :  { %v3624_v44 = vpop.permute.xlu0 %3623 }
0x1032   :  { %v3641_v45 = vsel %vm2215_vm2, %v3637_v2, %v3624_v44 }
0x1033   :  { %v7371_v18 = vadd.f32 %v3641_v45, %v7022_v14 }
0x1035   :  { %v3655_v1 = vsel %vm1221_vm0, %v7371_v18, 0.0 }
0x1036   :  { %3656 = vadd.xlane.f32.xlu0 %v3655_v1 }
0x1039   :  { %v3626_v48 = vpop.permute.xlu0 %3625 }
0x103a   :  { %v3642_v9 = vsel %vm2215_vm2, %v3638_v10, %v3626_v48 }
0x103b   :  { %v7379_v11 = vadd.f32 %v3642_v9, %v7028_v62 }
0x103d   :  { %v3658_v14 = vsel %vm1221_vm0, %v7379_v11, 0.0 }
0x103e   :  { %3659 = vadd.xlane.f32.xlu2 %v3658_v14 }
0x1062   :  { %v3651_v61 = vpop.xlane.xlu1 %3650 }
0x1063   :  { %v3661_v50 = vmul.f32 %v3651_v61, %v6530_v42 }
0x1065   :  { %v3665_v31 = vsub.f32 %v7355_v16, %v3661_v50 }
0x1067   :  { %v3669_v58 = vmul.f32 %v3665_v31, %v3665_v31 }
0x1069   :  { %v3673_v27 = vsel %vm1221_vm0, %v3669_v58, 0.0 }
0x106a   :  { %3674 = vadd.xlane.f32.xlu1 %v3673_v27  ;;  %v3654_v23 = vpop.xlane.xlu2 %3653 }
0x106b   :  { %v3662_v20 = vmul.f32 %v3654_v23, %v6530_v42 }
0x106d   :  { %v3666_v17 = vsub.f32 %v7363_v63, %v3662_v20 }
0x106f   :  { %v3670_v62 = vmul.f32 %v3666_v17, %v3666_v17 }
0x1071   :  { %v3676_v43 = vsel %vm1221_vm0, %v3670_v62, 0.0 }
0x1072   :  { %3677 = vadd.xlane.f32.xlu2 %v3676_v43 }
0x10a9   :  { %v3657_v29 = vpop.xlane.xlu0 %3656 }
0x10aa   :  { %v3663_v40 = vmul.f32 %v3657_v29, %v6530_v42 }
0x10ac   :  { %v7391_v59 = vsub.f32 %v7371_v18, %v3663_v40 }
0x10ae   :  { %v3671_v7 = vmul.f32 %v7391_v59, %v7391_v59 }
0x10b0   :  { %v3679_v30 = vsel %vm1221_vm0, %v3671_v7, 0.0 }
0x10b1   :  { %3680 = vadd.xlane.f32.xlu0 %v3679_v30  ;;  %v3660_v52 = vpop.xlane.xlu2 %3659 }
0x10b2   :  { %v3664_v37 = vmul.f32 %v3660_v52, %v6530_v42 }
0x10b4   :  { %v7398_v41 = vsub.f32 %v7379_v11, %v3664_v37 }
0x10b6   :  { %v3672_v35 = vmul.f32 %v7398_v41, %v7398_v41 }
0x10b8   :  { %v3682_v54 = vsel %vm1221_vm0, %v3672_v35, 0.0 }
0x10b9   :  { %3683 = vadd.xlane.f32.xlu1 %v3682_v54 }
0x10dd   :  { %v3675_v34 = vpop.xlane.xlu1 %3674 }
0x10de   :  { %v3685_v6 = vmul.f32 %v3675_v34, %v6530_v42 }
0x10e0   :  { %v3689_v0 = vadd.f32 1e-05, %v3685_v6 }
0x10e2   :  { %5307 = vrsqrt.f32 %v3689_v0  ;;  %vm3699_vm15 = vweird.f32 %v3689_v0 }
0x10e5   :  { %v3678_v15 = vpop.xlane.xlu2 %3677 }
0x10e6   :  { %v3686_v36 = vmul.f32 %v3678_v15, %v6530_v42 }
0x10e8   :  { %v5308_v49 = vpop.eup %5307  ;;  %v3690_v46 = vadd.f32 1e-05, %v3686_v36 }
0x10e9   :  { %v3694_v13 = vmul.f32 %v5308_v49, %v3689_v0  ;;  %vm3700_vm14 = vweird.f32 %v5308_v49 }
0x10ea   :  { %5309 = vrsqrt.f32 %v3690_v46  ;;  %vm3701_vm1 = vmor %vm3699_vm15, %vm3700_vm14  ;;  %vm3709_vm12 = vweird.f32 %v3690_v46 }
0x10eb   :  { %v3695_v12 = vmul.f32 %v5308_v49, %v3694_v13 }
0x10ed   :  { %v3696_v57 = vmul.f32 0.5, %v3695_v12 }
0x10ef   :  { %v3697_v55 = vsub.f32 1.5, %v3696_v57 }
0x10f0   :  { %v5310_v33 = vpop.eup %5309 }
0x10f1   :  { %v3698_v39 = vmul.f32 %v5308_v49, %v3697_v55  ;;  %v3704_v22 = vmul.f32 %v5310_v33, %v3690_v46  ;;  %vm3710_vm2 = vweird.f32 %v5310_v33 }
0x10f2   :  { %vm3711_vm13 = vmor %vm3709_vm12, %vm3710_vm2 }
0x10f3   :  { %v3702_v3 = vsel %vm3701_vm1, %v5308_v49, %v3698_v39  ;;  %v3705_v28 = vmul.f32 %v5310_v33, %v3704_v22 }
0x10f4   :  { %v3733_v53 = vmul.f32 %v3702_v3, %v3665_v31 }
0x10f5   :  { %v3706_v4 = vmul.f32 0.5, %v3705_v28 }
0x10f6   :  { %v3740_v8 = vmul.f32 %v5117_v21, %v3733_v53 }
0x10f7   :  { %v3707_v32 = vsub.f32 1.5, %v3706_v4 }
0x10f8   :  { %v3747_v56 = vadd.f32 %v5118_v25, %v3740_v8 }
0x10f9   :  { %v3708_v2 = vmul.f32 %v5310_v33, %v3707_v32 }
0x10fa   :  { %4915 = vmatmul.msk.f32.vlgmr.msra.gmra.mxu2 %vm1221_vm0, %v3747_v56 }
0x10fb   :  { %v3712_v44 = vsel %vm3711_vm13, %v5310_v33, %v3708_v2 }
0x10fc   :  { %v3734_v45 = vmul.f32 %v3712_v44, %v3666_v17 }
0x10fe   :  { %v3741_v5 = vmul.f32 %v5117_v21, %v3734_v45 }
0x1100   :  { %v3748_v1 = vadd.f32 %v5118_v25, %v3741_v5 }
0x1102   :  { %4916 = vmatmul.msk.f32.gmra.mxu2 %vm1221_vm0, %v3748_v1 }
0x1124   :  { %v3681_v38 = vpop.xlane.xlu0 %3680 }
0x1125   :  { %v3687_v51 = vmul.f32 %v3681_v38, %v6530_v42 }
0x1127   :  { %v3691_v10 = vadd.f32 1e-05, %v3687_v51  ;;  %v3915_v51 = vld [vmem:[%s7825_s1 + $0x38] sm:$0xff] }
0x1128   :  { %3940 = vmatpush.msra.mxu3 %v3915_v51 }
0x1129   :  { %5311 = vrsqrt.f32 %v3691_v10  ;;  %vm3719_vm5 = vweird.f32 %v3691_v10 }
0x112c   :  { %v3684_v48 = vpop.xlane.xlu1 %3683 }
0x112d   :  { %v3688_v9 = vmul.f32 %v3684_v48, %v6530_v42  ;;  %v3913_v48 = vld [vmem:[%s7825_s1 + $0x28] sm:$0xff] }
0x112f   :  { %v5312_v14 = vpop.eup %5311  ;;  %v3692_v61 = vadd.f32 1e-05, %v3688_v9  ;;  %v3912_v9 = vld [vmem:[%s7825_s1 + $0x20] sm:$0xff] }
0x1130   :  { %v3714_v50 = vmul.f32 %v5312_v14, %v3691_v10  ;;  %vm3720_vm3 = vweird.f32 %v5312_v14  ;;  %v3914_v10 = vld [vmem:[%s7825_s1 + $0x30] sm:$0xff] }
0x1131   :  { %5313 = vrsqrt.f32 %v3692_v61  ;;  %vm3721_vm6 = vmor %vm3719_vm5, %vm3720_vm3  ;;  %vm3729_vm8 = vweird.f32 %v3692_v61  ;;  %3941 = vmatpush.msra.mxu3 %v3914_v10 }
0x1132   :  { %v3715_v31 = vmul.f32 %v5312_v14, %v3714_v50  ;;  %v3909_v50 = vld [vmem:[%s7825_s1 + $0x8] sm:$0xff] }
0x1133   :  { %3942 = vmatpush.msra.mxu3 %v3913_v48 }
0x1134   :  { %v3716_v58 = vmul.f32 0.5, %v3715_v31  ;;  %v3908_v31 = vld [vmem:[%s7825_s1] sm:$0xff] }
0x1135   :  { %3943 = vmatpush.msra.mxu3 %v3912_v9 }
0x1136   :  { %v3717_v27 = vsub.f32 1.5, %v3716_v58 }
0x1137   :  { %v5314_v23 = vpop.eup %5313 }
0x1138   :  { %v3718_v20 = vmul.f32 %v5312_v14, %v3717_v27  ;;  %v3724_v17 = vmul.f32 %v5314_v23, %v3692_v61  ;;  %vm3730_vm7 = vweird.f32 %v5314_v23  ;;  %v3910_v61 = vld [vmem:[%s7825_s1 + $0x10] sm:$0xff] }
0x1139   :  { %vm3731_vm9 = vmor %vm3729_vm8, %vm3730_vm7 }
0x113a   :  { %v3722_v62 = vsel %vm3721_vm6, %v5312_v14, %v3718_v20  ;;  %v3725_v43 = vmul.f32 %v5314_v23, %v3724_v17  ;;  %v3911_v14 = vld [vmem:[%s7825_s1 + $0x18] sm:$0xff] }
0x113b   :  { %v3735_v29 = vmul.f32 %v3722_v62, %v7391_v59  ;;  %3944 = vmatpush.msra.mxu3 %v3911_v14 }
0x113c   :  { %v3726_v40 = vmul.f32 0.5, %v3725_v43 }
0x113d   :  { %v3742_v7 = vmul.f32 %v5117_v21, %v3735_v29  ;;  %3945 = vmatpush.msra.mxu3 %v3910_v61 }
0x113e   :  { %v3727_v30 = vsub.f32 1.5, %v3726_v40 }
0x113f   :  { %v3749_v52 = vadd.f32 %v5118_v25, %v3742_v7  ;;  %3946 = vmatpush.msra.mxu3 %v3909_v50 }
0x1140   :  { %v3728_v37 = vmul.f32 %v5314_v23, %v3727_v30 }
0x1141   :  { %4917 = vmatmul.msk.f32.gmra.mxu2 %vm1221_vm0, %v3749_v52  ;;  %3947 = vmatpush.msra.mxu3 %v3908_v31 }
0x1142   :  { %v3732_v35 = vsel %vm3731_vm9, %v5314_v23, %v3728_v37 }
0x1143   :  { %v3736_v54 = vmul.f32 %v3732_v35, %v7398_v41 }
0x1145   :  { %v3743_v26 = vmul.f32 %v5117_v21, %v3736_v54  ;;  %v5120_v54 = vld [vmem:[%s7826_s0] ss:$0 sm:$0xff] }
0x1147   :  { %v3750_v19 = vadd.f32 %v5118_v25, %v3743_v26 }
0x1149   :  { %4918 = vmatmul.msk.f32.gmra.mxu2 %vm1221_vm0, %v3750_v19 }
0x117d   :  { %v3788_v60 = vpop.f32.mrf.mxu2 }
0x117e   :  { %v3789_v59 = vadd.f32 %v5119_v24, %v3788_v60 }
0x1180   :  { %v3802_v34 = vsel %vm2379_vm4, %v3789_v59, 0.0 }
0x1181   :  { %3803 = vadd.xlane.f32.xlu2 %v3802_v34 }
0x1185   :  { %v3791_v6 = vpop.f32.mrf.mxu2 }
0x1186   :  { %v3792_v0 = vadd.f32 %v5119_v24, %v3791_v6 }
0x1188   :  { %v3805_v15 = vsel %vm2379_vm4, %v3792_v0, 0.0 }
0x1189   :  { %3806 = vadd.xlane.f32.xlu0 %v3805_v15 }
0x11c4   :  { %v3794_v36 = vpop.f32.mrf.mxu2 }
0x11c5   :  { %v3795_v49 = vadd.f32 %v5119_v24, %v3794_v36 }
0x11c7   :  { %v3808_v46 = vsel %vm2379_vm4, %v3795_v49, 0.0 }
0x11c8   :  { %3809 = vadd.xlane.f32.xlu1 %v3808_v46 }
0x11cc   :  { %v3797_v41 = vpop.f32.mrf.mxu2 }
0x11cd   :  { %v3798_v13 = vadd.f32 %v5119_v24, %v3797_v41  ;;  %v5121_v24 = vld [vmem:[%s7827_s28] ss:$0 sm:$0xff] }
0x11cf   :  { %v3811_v12 = vsel %vm2379_vm4, %v3798_v13, 0.0 }
0x11d0   :  { %3812 = vadd.xlane.f32.xlu2 %v3811_v12 }
0x11f4   :  { %v3804_v57 = vpop.xlane.xlu2 %3803 }
0x11f5   :  { %v3814_v55 = vmul.f32 %v3804_v57, %v6940_v47 }
0x11f7   :  { %v3818_v33 = vsub.f32 %v3789_v59, %v3814_v55 }
0x11f9   :  { %v3822_v39 = vmul.f32 %v3818_v33, %v3818_v33 }
0x11fb   :  { %v3826_v22 = vsel %vm2379_vm4, %v3822_v39, 0.0 }
0x11fc   :  { %v3807_v21 = vpop.xlane.xlu0 %3806  ;;  %3827 = vadd.xlane.f32.xlu0 %v3826_v22 }
0x11fd   :  { %v3815_v3 = vmul.f32 %v3807_v21, %v6940_v47 }
0x11ff   :  { %v7427_v28 = vsub.f32 %v3792_v0, %v3815_v3 }
0x1201   :  { %v3823_v25 = vmul.f32 %v7427_v28, %v7427_v28 }
0x1203   :  { %v3829_v53 = vsel %vm2379_vm4, %v3823_v25, 0.0 }
0x1204   :  { %3830 = vadd.xlane.f32.xlu1 %v3829_v53 }
0x123b   :  { %v3810_v4 = vpop.xlane.xlu1 %3809 }
0x123c   :  { %v3816_v8 = vmul.f32 %v3810_v4, %v6940_v47 }
0x123e   :  { %v7433_v32 = vsub.f32 %v3795_v49, %v3816_v8 }
0x1240   :  { %v3824_v56 = vmul.f32 %v7433_v32, %v7433_v32 }
0x1242   :  { %v3832_v2 = vsel %vm2379_vm4, %v3824_v56, 0.0 }
0x1243   :  { %3833 = vadd.xlane.f32.xlu2 %v3832_v2  ;;  %v3813_v44 = vpop.xlane.xlu2 %3812 }
0x1244   :  { %v3817_v45 = vmul.f32 %v3813_v44, %v6940_v47 }
0x1246   :  { %v7439_v5 = vsub.f32 %v3798_v13, %v3817_v45 }
0x1248   :  { %v3825_v1 = vmul.f32 %v7439_v5, %v7439_v5 }
0x124a   :  { %v3835_v38 = vsel %vm2379_vm4, %v3825_v1, 0.0 }
0x124b   :  { %3836 = vadd.xlane.f32.xlu0 %v3835_v38 }
0x126f   :  { %v3828_v58 = vpop.xlane.xlu0 %3827 }
0x1270   :  { %v3838_v27 = vmul.f32 %v3828_v58, %v6940_v47 }
0x1272   :  { %v3842_v23 = vadd.f32 1e-05, %v3838_v27 }
0x1274   :  { %5315 = vrsqrt.f32 %v3842_v23  ;;  %vm3852_vm11 = vweird.f32 %v3842_v23 }
0x1277   :  { %v3831_v20 = vpop.xlane.xlu1 %3830 }
0x1278   :  { %v3839_v17 = vmul.f32 %v3831_v20, %v6940_v47 }
0x127a   :  { %v5316_v62 = vpop.eup %5315  ;;  %v3843_v43 = vadd.f32 1e-05, %v3839_v17 }
0x127b   :  { %v3847_v29 = vmul.f32 %v5316_v62, %v3842_v23  ;;  %vm3853_vm10 = vweird.f32 %v5316_v62 }
0x127c   :  { %5317 = vrsqrt.f32 %v3843_v43  ;;  %vm3854_vm14 = vmor %vm3852_vm11, %vm3853_vm10  ;;  %vm3862_vm1 = vweird.f32 %v3843_v43 }
0x127d   :  { %v3848_v40 = vmul.f32 %v5316_v62, %v3847_v29 }
0x127f   :  { %v3849_v7 = vmul.f32 0.5, %v3848_v40 }
0x1281   :  { %v3850_v30 = vsub.f32 1.5, %v3849_v7 }
0x1282   :  { %v5318_v52 = vpop.eup %5317 }
0x1283   :  { %v3851_v37 = vmul.f32 %v5316_v62, %v3850_v30  ;;  %v3857_v35 = vmul.f32 %v5318_v52, %v3843_v43  ;;  %vm3863_vm15 = vweird.f32 %v5318_v52 }
0x1284   :  { %vm3864_vm2 = vmor %vm3862_vm1, %vm3863_vm15  ;;  %vm4074_vm1 = vcmask 253952  }
0x1285   :  { %v3855_v26 = vsel %vm3854_vm14, %v5316_v62, %v3851_v37  ;;  %v3858_v19 = vmul.f32 %v5318_v52, %v3857_v35 }
0x1286   :  { %v3886_v60 = vmul.f32 %v3855_v26, %v3818_v33 }
0x1287   :  { %v3859_v59 = vmul.f32 0.5, %v3858_v19 }
0x1288   :  { %v3893_v34 = vmul.f32 %v5120_v54, %v3886_v60 }
0x1289   :  { %v3860_v6 = vsub.f32 1.5, %v3859_v59 }
0x128a   :  { %v3900_v0 = vadd.f32 %v5121_v24, %v3893_v34 }
0x128b   :  { %v3861_v15 = vmul.f32 %v5318_v52, %v3860_v6 }
0x128c   :  { %v3904_v36 = vmax.f32 %v3900_v0, 0.0 }
0x128d   :  { %v3865_v49 = vsel %vm3864_vm2, %v5318_v52, %v3861_v15 }
0x128e   :  { %v3887_v46 = vmul.f32 %v3865_v49, %v7427_v28  ;;  %4919 = vmatmul.msk.f32.vlgmr.msra.gmra.mxu3 %vm2379_vm4, %v3904_v36 }
0x1290   :  { %v3894_v41 = vmul.f32 %v5120_v54, %v3887_v46 }
0x1292   :  { %v3901_v13 = vadd.f32 %v5121_v24, %v3894_v41 }
0x1294   :  { %v3905_v12 = vmax.f32 %v3901_v13, 0.0 }
0x1296   :  { %4920 = vmatmul.msk.f32.gmra.mxu3 %vm2379_vm4, %v3905_v12 }
0x12b6   :  { %v3834_v57 = vpop.xlane.xlu2 %3833 }
0x12b7   :  { %v3840_v55 = vmul.f32 %v3834_v57, %v6940_v47 }
0x12b9   :  { %v3844_v33 = vadd.f32 1e-05, %v3840_v55 }
0x12bb   :  { %5319 = vrsqrt.f32 %v3844_v33  ;;  %vm3872_vm13 = vweird.f32 %v3844_v33 }
0x12be   :  { %v3837_v39 = vpop.xlane.xlu0 %3836 }
0x12bf   :  { %v3841_v22 = vmul.f32 %v3837_v39, %v6940_v47 }
0x12c1   :  { %v5320_v21 = vpop.eup %5319  ;;  %v3845_v3 = vadd.f32 1e-05, %v3841_v22 }
0x12c2   :  { %v3867_v25 = vmul.f32 %v5320_v21, %v3844_v33  ;;  %vm3873_vm12 = vweird.f32 %v5320_v21 }
0x12c3   :  { %5321 = vrsqrt.f32 %v3845_v3  ;;  %vm3874_vm3 = vmor %vm3872_vm13, %vm3873_vm12  ;;  %vm3882_vm6 = vweird.f32 %v3845_v3 }
0x12c4   :  { %v3868_v28 = vmul.f32 %v5320_v21, %v3867_v25 }
0x12c6   :  { %v3869_v53 = vmul.f32 0.5, %v3868_v28 }
0x12c8   :  { %v3870_v4 = vsub.f32 1.5, %v3869_v53 }
0x12c9   :  { %v5322_v8 = vpop.eup %5321 }
0x12ca   :  { %v3871_v56 = vmul.f32 %v5320_v21, %v3870_v4  ;;  %v3877_v2 = vmul.f32 %v5322_v8, %v3845_v3  ;;  %vm3883_vm5 = vweird.f32 %v5322_v8 }
0x12cb   :  { %vm3884_vm7 = vmor %vm3882_vm6, %vm3883_vm5 }
0x12cc   :  { %v3875_v44 = vsel %vm3874_vm3, %v5320_v21, %v3871_v56  ;;  %v3878_v45 = vmul.f32 %v5322_v8, %v3877_v2 }
0x12cd   :  { %v3888_v1 = vmul.f32 %v3875_v44, %v7433_v32  ;;  %v5122_v32 = vld [vmem:[%s7828_s5] ss:$0 sm:$0xff] }
0x12ce   :  { %v3879_v38 = vmul.f32 0.5, %v3878_v45 }
0x12cf   :  { %v3895_v51 = vmul.f32 %v5120_v54, %v3888_v1 }
0x12d0   :  { %v3880_v10 = vsub.f32 1.5, %v3879_v38  ;;  %v7489_v38 = vld [vmem:[%s7829_s9] ss:$0 sm:$0xff] }
0x12d1   :  { %v3902_v48 = vadd.f32 %v5121_v24, %v3895_v51 }
0x12d2   :  { %v3881_v9 = vmul.f32 %v5322_v8, %v3880_v10 }
0x12d3   :  { %v3906_v14 = vmax.f32 %v3902_v48, 0.0  ;;  %v7492_v48 = vld [vmem:[%s7830_s17] ss:$0 sm:$0xff] }
0x12d4   :  { %v3885_v61 = vsel %vm3884_vm7, %v5322_v8, %v3881_v9  ;;  %vm4081_vm7 = vcmask 516352  }
0x12d5   :  { %v3889_v50 = vmul.f32 %v3885_v61, %v7439_v5  ;;  %4921 = vmatmul.msk.f32.gmra.mxu3 %vm2379_vm4, %v3906_v14 }
0x12d7   :  { %v3896_v31 = vmul.f32 %v5120_v54, %v3889_v50 }
0x12d9   :  { %v3903_v58 = vadd.f32 %v5121_v24, %v3896_v31 }
0x12db   :  { %v3907_v27 = vmax.f32 %v3903_v58, 0.0 }
0x12dd   :  { %4922 = vmatmul.msk.f32.gmra.mxu3 %vm2379_vm4, %v3907_v27 }
0x1311   :  { %v3949_v23 = vpop.f32.mrf.mxu3 }
0x1312   :  { %v3950_v20 = vadd.f32 %v5122_v32, %v3949_v23 }
0x1314   :  { %v3963_v17 = vsel %vm1221_vm0, %v3950_v20, 0.0 }
0x1315   :  { %3964 = vadd.xlane.f32.xlu1 %v3963_v17 }
0x1319   :  { %v3952_v62 = vpop.f32.mrf.mxu3 }
0x131a   :  { %v3953_v43 = vadd.f32 %v5122_v32, %v3952_v62 }
0x131c   :  { %v3966_v29 = vsel %vm1221_vm0, %v3953_v43, 0.0 }
0x131d   :  { %3967 = vadd.xlane.f32.xlu2 %v3966_v29 }
0x1358   :  { %v3955_v40 = vpop.f32.mrf.mxu3 }
0x1359   :  { %v3956_v5 = vadd.f32 %v5122_v32, %v3955_v40 }
0x135b   :  { %v3969_v7 = vsel %vm1221_vm0, %v3956_v5, 0.0 }
0x135c   :  { %3970 = vadd.xlane.f32.xlu0 %v3969_v7 }
0x1360   :  { %v3958_v30 = vpop.f32.mrf.mxu3 }
0x1361   :  { %v3959_v52 = vadd.f32 %v5122_v32, %v3958_v30 }
0x1363   :  { %v3972_v37 = vsel %vm1221_vm0, %v3959_v52, 0.0 }
0x1364   :  { %3973 = vadd.xlane.f32.xlu1 %v3972_v37 }
0x1388   :  { %v3965_v35 = vpop.xlane.xlu1 %3964 }
0x1389   :  { %v3975_v54 = vmul.f32 %v3965_v35, %v6530_v42 }
0x138b   :  { %v3979_v26 = vsub.f32 %v3950_v20, %v3975_v54 }
0x138d   :  { %v3983_v19 = vmul.f32 %v3979_v26, %v3979_v26 }
0x138f   :  { %v3987_v24 = vsel %vm1221_vm0, %v3983_v19, 0.0 }
0x1390   :  { %3988 = vadd.xlane.f32.xlu2 %v3987_v24  ;;  %v3968_v60 = vpop.xlane.xlu2 %3967 }
0x1391   :  { %v3976_v59 = vmul.f32 %v3968_v60, %v6530_v42 }
0x1393   :  { %v3980_v34 = vsub.f32 %v3953_v43, %v3976_v59 }
0x1395   :  { %v3984_v6 = vmul.f32 %v3980_v34, %v3980_v34 }
0x1397   :  { %v3990_v0 = vsel %vm1221_vm0, %v3984_v6, 0.0 }
0x1398   :  { %3991 = vadd.xlane.f32.xlu0 %v3990_v0 }
0x13cf   :  { %v3971_v15 = vpop.xlane.xlu0 %3970 }
0x13d0   :  { %v3977_v36 = vmul.f32 %v3971_v15, %v6530_v42 }
0x13d2   :  { %v7475_v49 = vsub.f32 %v3956_v5, %v3977_v36 }
0x13d4   :  { %v3985_v46 = vmul.f32 %v7475_v49, %v7475_v49 }
0x13d6   :  { %v3993_v41 = vsel %vm1221_vm0, %v3985_v46, 0.0 }
0x13d7   :  { %v3974_v13 = vpop.xlane.xlu1 %3973  ;;  %3994 = vadd.xlane.f32.xlu1 %v3993_v41 }
0x13d8   :  { %v3978_v12 = vmul.f32 %v3974_v13, %v6530_v42 }
0x13da   :  { %v7481_v57 = vsub.f32 %v3959_v52, %v3978_v12 }
0x13dc   :  { %v3986_v55 = vmul.f32 %v7481_v57, %v7481_v57 }
0x13de   :  { %v3996_v33 = vsel %vm1221_vm0, %v3986_v55, 0.0 }
0x13df   :  { %3997 = vadd.xlane.f32.xlu2 %v3996_v33 }
0x1403   :  { %v3989_v39 = vpop.xlane.xlu2 %3988 }
0x1404   :  { %v3999_v22 = vmul.f32 %v3989_v39, %v6530_v42 }
0x1406   :  { %v4003_v21 = vadd.f32 1e-05, %v3999_v22 }
0x1408   :  { %5323 = vrsqrt.f32 %v4003_v21  ;;  %vm4013_vm9 = vweird.f32 %v4003_v21 }
0x140b   :  { %v3992_v3 = vpop.xlane.xlu0 %3991 }
0x140c   :  { %v4000_v25 = vmul.f32 %v3992_v3, %v6530_v42 }
0x140e   :  { %v5324_v28 = vpop.eup %5323  ;;  %v4004_v53 = vadd.f32 1e-05, %v4000_v25 }
0x140f   :  { %v4008_v4 = vmul.f32 %v5324_v28, %v4003_v21  ;;  %vm4014_vm8 = vweird.f32 %v5324_v28 }
0x1410   :  { %5325 = vrsqrt.f32 %v4004_v53  ;;  %vm4015_vm10 = vmor %vm4013_vm9, %vm4014_vm8  ;;  %vm4023_vm14 = vweird.f32 %v4004_v53  ;;  %vm4088_vm8 = vcmask 778752   ;;  %vm4095_vm9 = vcmask 1041152  }
0x1411   :  { %v4009_v8 = vmul.f32 %v5324_v28, %v4008_v4 }
0x1413   :  { %v4010_v56 = vmul.f32 0.5, %v4009_v8 }
0x1415   :  { %v4011_v2 = vsub.f32 1.5, %v4010_v56 }
0x1416   :  { %v5326_v44 = vpop.eup %5325 }
0x1417   :  { %v4012_v45 = vmul.f32 %v5324_v28, %v4011_v2  ;;  %v4018_v1 = vmul.f32 %v5326_v44, %v4004_v53  ;;  %vm4024_vm11 = vweird.f32 %v5326_v44 }
0x1418   :  { %vm4025_vm15 = vmor %vm4023_vm14, %vm4024_vm11  ;;  %vm4323_vm14 = vcmask 1045508  }
0x1419   :  { %v4016_v51 = vsel %vm4015_vm10, %v5324_v28, %v4012_v45  ;;  %v4019_v10 = vmul.f32 %v5326_v44, %v4018_v1  ;;  %vm4250_vm10 = vcmask 1041408  }
0x141a   :  { %v4047_v9 = vmul.f32 %v4016_v51, %v3979_v26 }
0x141b   :  { %v4020_v14 = vmul.f32 0.5, %v4019_v10 }
0x141c   :  { %v4054_v61 = vmul.f32 %v7489_v38, %v4047_v9 }
0x141d   :  { %v4021_v50 = vsub.f32 1.5, %v4020_v14 }
0x141e   :  { %v4061_v31 = vadd.f32 %v7492_v48, %v4054_v61 }
0x141f   :  { %v4022_v58 = vmul.f32 %v5326_v44, %v4021_v50 }
0x1420   :  { %v4065_v27 = vadd.f32 %v4061_v31, %v7355_v16 }
0x1421   :  { %v4026_v32 = vsel %vm4025_vm15, %v5326_v44, %v4022_v58 }
0x1422   :  { %4069 = vst.msk [vmem:[#allocation2] sm:$0xff] %vm1221_vm0, %v4065_v27  ;;  %v4048_v23 = vmul.f32 %v4026_v32, %v3980_v34 }
0x1424   :  { %v4055_v20 = vmul.f32 %v7489_v38, %v4048_v23 }
0x1426   :  { %v4062_v17 = vadd.f32 %v7492_v48, %v4055_v20 }
0x1428   :  { %v4066_v62 = vadd.f32 %v4062_v17, %v7363_v63 }
0x1429   :  { %v4105_v43 = vld [vmem:[#allocation2 + $0x6] sm:$0x1]  ;;  %v4099_v29 = vld [vmem:[#allocation2 + $0x5] sm:$0x1]  ;;  %v4076_v40 = vld [vmem:[#allocation2 + $0x1] sm:$0x1] }
0x142a   :  { %4070 = vst.msk [vmem:[#allocation2 + $0x8] sm:$0xff] %vm1221_vm0, %v4066_v62  ;;  %4107 = vrot.lane.b32.xlu2 %v4105_v43, %s5539_s21  ;;  %4101 = vrot.lane.b32.xlu1 %v4099_v29, %s5540_s25  ;;  %v4097_v16 = vld [vmem:[#allocation2 + $0x4] sm:$0x1]  ;;  %v4073_v5 = vld [vmem:[#allocation2] sm:$0x1] }
0x142b   :  { %4078 = vrot.lane.b32.xlu0 %v4076_v40, %s5540_s25  ;;  %4098 = vst.msk [vmem:[#allocation3 + $0x2] sm:$0x1] %vm4074_vm1, %v4097_v16  ;;  %v4090_v7 = vld [vmem:[#allocation2 + $0x3] sm:$0x1]  ;;  %v4083_v30 = vld [vmem:[#allocation2 + $0x2] sm:$0x1] }
0x142c   :  { %4075 = vst.msk [vmem:[#allocation3] sm:$0x1] %vm4074_vm1, %v4073_v5  ;;  %v4111_v26 = vld [vmem:[#allocation2 + $0x7] sm:$0x1] }
0x1431   :  { %v4119_v63 = vld [vmem:[#allocation2 + $0x9] sm:$0x1]  ;;  %v4117_v52 = vld [vmem:[#allocation2 + $0x8] sm:$0x1]  ;;  %v4137_v37 = vld [vmem:[#allocation2 + $0xc] sm:$0x1] }
0x1432   :  { %4121 = vrot.lane.b32.xlu2 %v4119_v63, %s5540_s25  ;;  %4092 = vrot.lane.b32.xlu1 %v4090_v7, %s5530_s3  ;;  %4118 = vst.msk [vmem:[#allocation3 + $0x4] sm:$0x1] %vm4074_vm1, %v4117_v52  ;;  %v4131_v35 = vld [vmem:[#allocation2 + $0xb] sm:$0x1]  ;;  %v4125_v54 = vld [vmem:[#allocation2 + $0xa] sm:$0x1] }
0x1433   :  { %4085 = vrot.lane.b32.xlu0 %v4083_v30, %s5539_s21  ;;  %4138 = vst.msk [vmem:[#allocation3 + $0x6] sm:$0x1] %vm4074_vm1, %v4137_v37  ;;  %v4151_v19 = vld [vmem:[#allocation2 + $0xf] sm:$0x1]  ;;  %v4139_v24 = vld [vmem:[#allocation2 + $0xd] sm:$0x1] }
0x1434   :  { %v4145_v59 = vld [vmem:[#allocation2 + $0xe] sm:$0x1] }
0x143a   :  { %4133 = vrot.lane.b32.xlu2 %v4131_v35, %s5530_s3  ;;  %4127 = vrot.lane.b32.xlu1 %v4125_v54, %s5539_s21 }
0x143b   :  { %4113 = vrot.lane.b32.xlu0 %v4111_v26, %s5530_s3 }
0x1442   :  { %4153 = vrot.lane.b32.xlu1 %v4151_v19, %s5530_s3 }
0x1443   :  { %4141 = vrot.lane.b32.xlu0 %v4139_v24, %s5540_s25 }
0x144a   :  { %v3995_v60 = vpop.xlane.xlu1 %3994 }
0x144b   :  { %v4001_v34 = vmul.f32 %v3995_v60, %v6530_v42  ;;  %4147 = vrot.lane.b32.xlu0 %v4145_v59, %s5539_s21 }
0x144d   :  { %v4005_v6 = vadd.f32 1e-05, %v4001_v34 }
0x144f   :  { %5327 = vrsqrt.f32 %v4005_v6  ;;  %vm4033_vm12 = vweird.f32 %v4005_v6 }
0x1452   :  { %v3998_v0 = vpop.xlane.xlu2 %3997 }
0x1453   :  { %v4002_v15 = vmul.f32 %v3998_v0, %v6530_v42 }
0x1455   :  { %v5328_v36 = vpop.eup %5327  ;;  %v4006_v46 = vadd.f32 1e-05, %v4002_v15 }
0x1456   :  { %v4028_v41 = vmul.f32 %v5328_v36, %v4005_v6  ;;  %vm4034_vm2 = vweird.f32 %v5328_v36 }
0x1457   :  { %5329 = vrsqrt.f32 %v4006_v46  ;;  %vm4035_vm13 = vmor %vm4033_vm12, %vm4034_vm2  ;;  %vm4043_vm5 = vweird.f32 %v4006_v46  ;;  %vm4325_vm2 = vcmask 1043456  }
0x1458   :  { %v4029_v13 = vmul.f32 %v5328_v36, %v4028_v41 }
0x145a   :  { %v4030_v12 = vmul.f32 0.5, %v4029_v13 }
0x145c   :  { %v4031_v55 = vsub.f32 1.5, %v4030_v12 }
0x145d   :  { %v5330_v33 = vpop.eup %5329 }
0x145e   :  { %v4032_v39 = vmul.f32 %v5328_v36, %v4031_v55  ;;  %v4038_v22 = vmul.f32 %v5330_v33, %v4006_v46  ;;  %vm4044_vm3 = vweird.f32 %v5330_v33 }
0x145f   :  { %vm4045_vm6 = vmor %vm4043_vm5, %vm4044_vm3 }
0x1460   :  { %v4036_v21 = vsel %vm4035_vm13, %v5328_v36, %v4032_v39  ;;  %v4039_v3 = vmul.f32 %v5330_v33, %v4038_v22  ;;  %vm4502_vm13 = vcmask 517120  }
0x1461   :  { %v4049_v25 = vmul.f32 %v4036_v21, %v7475_v49 }
0x1462   :  { %v4040_v28 = vmul.f32 0.5, %v4039_v3 }
0x1463   :  { %v4056_v53 = vmul.f32 %v7489_v38, %v4049_v25 }
0x1464   :  { %v4041_v4 = vsub.f32 1.5, %v4040_v28 }
0x1465   :  { %v4063_v8 = vadd.f32 %v7492_v48, %v4056_v53  ;;  %v5541_v53 = vmov 512.0  }
0x1466   :  { %v4042_v56 = vmul.f32 %v5330_v33, %v4041_v4  ;;  %5331 = vrcp.f32 %v5541_v53  ;;  %v4380_v53 = vld [vmem:[%s7831_s29 + $0x130] sm:$0xff] }
0x1467   :  { %v4067_v2 = vadd.f32 %v4063_v8, %v7371_v18 }
0x1468   :  { %v4046_v44 = vsel %vm4045_vm6, %v5330_v33, %v4042_v56 }
0x1469   :  { %4071 = vst.msk [vmem:[#allocation2 + $0x10] sm:$0xff] %vm1221_vm0, %v4067_v2  ;;  %v4050_v45 = vmul.f32 %v4046_v44, %v7481_v57 }
0x146b   :  { %v4057_v1 = vmul.f32 %v7489_v38, %v4050_v45  ;;  %v5542_v45 = vmov 269488144  }
0x146c   :  { %v5332_v4 = vpop.eup %5331 }
0x146d   :  { %v4064_v49 = vadd.f32 %v7492_v48, %v4057_v1  ;;  %v4261_v8 = vmul.f32 512.0, %v5332_v4  ;;  %vm4265_vm11 = vweird.f32 %v5332_v4  ;;  %v7574_v1 = vunpack.c.l.s4 %v5542_v45  ;;  %v4363_v45 = vld [vmem:[%s7831_s29 + $0xa8] sm:$0xff] }
0x146f   :  { %v4068_v51 = vadd.f32 %v4064_v49, %v7379_v11  ;;  %v4262_v56 = vsub.f32 1.0, %v4261_v8  ;;  %v4364_v8 = vld [vmem:[%s7831_s29 + $0xb0] sm:$0xff] }
0x1470   :  { %v4165_v10 = vld [vmem:[#allocation2 + $0x12] sm:$0x1]  ;;  %v4159_v9 = vld [vmem:[#allocation2 + $0x11] sm:$0x1]  ;;  %v4179_v14 = vld [vmem:[#allocation2 + $0x15] sm:$0x1] }
0x1471   :  { %4072 = vst.msk [vmem:[#allocation2 + $0x18] sm:$0xff] %vm1221_vm0, %v4068_v51  ;;  %4167 = vrot.lane.b32.xlu2 %v4165_v10, %s5539_s21  ;;  %4161 = vrot.lane.b32.xlu1 %v4159_v9, %s5540_s25  ;;  %v4157_v18 = vld [vmem:[#allocation2 + $0x10] sm:$0x1]  ;;  %v4177_v61 = vld [vmem:[#allocation2 + $0x14] sm:$0x1]  ;;  %v4263_v2 = vmul.f32 %v5332_v4, %v4262_v56  ;;  %v4271_v51 = vunpack.c.0.s8 %v7574_v1  ;;  %v4396_v56 = vld [vmem:[%s7831_s29 + $0x1b0] sm:$0xff] }
0x1472   :  { %4181 = vrot.lane.b32.xlu0 %v4179_v14, %s5540_s25  ;;  %4158 = vst.msk [vmem:[#allocation3 + $0x1] sm:$0x1] %vm4074_vm1, %v4157_v18  ;;  %v4185_v57 = vld [vmem:[#allocation2 + $0x16] sm:$0x1]  ;;  %v4171_v11 = vld [vmem:[#allocation2 + $0x13] sm:$0x1] }
0x1473   :  { %4178 = vst.msk [vmem:[#allocation3 + $0x3] sm:$0x1] %vm4074_vm1, %v4177_v61  ;;  %v4191_v20 = vld [vmem:[#allocation2 + $0x17] sm:$0x1]  ;;  %v4264_v44 = vadd.f32 %v5332_v4, %v4263_v2  ;;  %v4379_v2 = vld [vmem:[%s7831_s29 + $0x128] sm:$0xff] }
0x1475   :  { %v7576_v49 = vsel %vm4265_vm11, %v5332_v4, %v4264_v44  ;;  %v4348_v4 = vld [vmem:[%s7831_s29 + $0x30] sm:$0xff]  ;;  %v4347_v44 = vld [vmem:[%s7831_s29 + $0x28] sm:$0xff] }
0x1478   :  { %v4199_v38 = vld [vmem:[#allocation2 + $0x19] sm:$0x1]  ;;  %v4197_v48 = vld [vmem:[#allocation2 + $0x18] sm:$0x1]  ;;  %v4217_v50 = vld [vmem:[#allocation2 + $0x1c] sm:$0x1] }
0x1479   :  { %4187 = vrot.lane.b32.xlu1 %v4185_v57, %s5539_s21  ;;  %4201 = vrot.lane.b32.xlu2 %v4199_v38, %s5540_s25  ;;  %4198 = vst.msk [vmem:[#allocation3 + $0x5] sm:$0x1] %vm4074_vm1, %v4197_v48  ;;  %v4219_v31 = vld [vmem:[#allocation2 + $0x1d] sm:$0x1]  ;;  %v4225_v58 = vld [vmem:[#allocation2 + $0x1e] sm:$0x1] }
0x147a   :  { %4173 = vrot.lane.b32.xlu0 %v4171_v11, %s5530_s3  ;;  %4218 = vst.msk [vmem:[#allocation3 + $0x7] sm:$0x1] %vm4074_vm1, %v4217_v50  ;;  %v4205_v27 = vld [vmem:[#allocation2 + $0x1a] sm:$0x1]  ;;  %v4211_v23 = vld [vmem:[#allocation2 + $0x1b] sm:$0x1] }
0x147b   :  { %v4231_v17 = vld [vmem:[#allocation2 + $0x1f] sm:$0x1] }
0x1481   :  { %4221 = vrot.lane.b32.xlu1 %v4219_v31, %s5540_s25  ;;  %4227 = vrot.lane.b32.xlu2 %v4225_v58, %s5539_s21 }
0x1482   :  { %4207 = vrot.lane.b32.xlu0 %v4205_v27, %s5539_s21 }
0x1484   :  { %v4108_v32 = vpop.permute.xlu2 %4107 }
0x1489   :  { %4213 = vrot.lane.b32.xlu1 %v4211_v23, %s5530_s3  ;;  %4193 = vrot.lane.b32.xlu2 %v4191_v20, %s5530_s3 }
0x148a   :  { %4233 = vrot.lane.b32.xlu0 %v4231_v17, %s5530_s3  ;;  %v4389_v17 = vld [vmem:[%s7831_s29 + $0x178] sm:$0xff]  ;;  %s7832_s3 = sld [smem:[#allocation37_spill]] }
0x148b   :  { %4460 = vmatpush.msrb.mxu2 %v4389_v17  ;;  %v4375_v17 = vld [vmem:[%s7831_s29 + $0x108] sm:$0xff] }
0x148c   :  { %v4122_v62 = vpop.permute.xlu2 %4121 }
0x148d   :  { %4124 = vst.msk [vmem:[#allocation3 + $0x4] sm:$0x1] %vm4081_vm7, %v4122_v62  ;;  %v4357_v62 = vld [vmem:[%s7831_s29 + $0x78] sm:$0xff] }
0x148e   :  { %4420 = vmatpush.msra.mxu0 %v4357_v62  ;;  %v4343_v62 = vld [vmem:[%s7831_s29 + $0x8] sm:$0xff] }
0x1494   :  { %v4134_v63 = vpop.permute.xlu2 %4133 }
0x149c   :  { %v4102_v43 = vpop.permute.xlu1 %4101 }
0x149d   :  { %4104 = vst.msk [vmem:[#allocation3 + $0x2] sm:$0x1] %vm4081_vm7, %v4102_v43  ;;  %v4079_v29 = vpop.permute.xlu0 %4078  ;;  %v4373_v43 = vld [vmem:[%s7831_s29 + $0xf8] sm:$0xff] }
0x149e   :  { %4082 = vst.msk [vmem:[#allocation3] sm:$0x1] %vm4081_vm7, %v4079_v29  ;;  %v4405_v29 = vld [vmem:[%s7831_s29 + $0x1f8] sm:$0xff]  ;;  %4440 = vmatpush.msra.mxu1 %v4373_v43  ;;  %v4359_v43 = vld [vmem:[%s7831_s29 + $0x88] sm:$0xff] }
0x149f   :  { %4110 = vst.msk [vmem:[#allocation3 + $0x2] sm:$0x1] %vm4088_vm8, %v4108_v32  ;;  %4480 = vmatpush.msrb.mxu3 %v4405_v29  ;;  %v4391_v29 = vld [vmem:[%s7831_s29 + $0x188] sm:$0xff] }
0x14a4   :  { %v4093_v40 = vpop.permute.xlu1 %4092 }
0x14a5   :  { %v4086_v16 = vpop.permute.xlu0 %4085 }
0x14a6   :  { %4089 = vst.msk [vmem:[#allocation3] sm:$0x1] %vm4088_vm8, %v4086_v16  ;;  %v4356_v16 = vld [vmem:[%s7831_s29 + $0x70] sm:$0xff] }
0x14a7   :  { %4096 = vst.msk [vmem:[#allocation3] sm:$0x1] %vm4095_vm9, %v4093_v40  ;;  %v4388_v40 = vld [vmem:[%s7831_s29 + $0x170] sm:$0xff]  ;;  %4421 = vmatpush.msra.mxu0 %v4356_v16  ;;  %v4374_v16 = vld [vmem:[%s7831_s29 + $0x100] sm:$0xff] }
0x14a8   :  { %4461 = vmatpush.msrb.mxu2 %v4388_v40 }
0x14ac   :  { %v4128_v5 = vpop.permute.xlu1 %4127 }
0x14ad   :  { %4130 = vst.msk [vmem:[#allocation3 + $0x4] sm:$0x1] %vm4088_vm8, %v4128_v5  ;;  %v4114_v7 = vpop.permute.xlu0 %4113  ;;  %v4372_v5 = vld [vmem:[%s7831_s29 + $0xf0] sm:$0xff] }
0x14ae   :  { %4136 = vst.msk [vmem:[#allocation3 + $0x4] sm:$0x1] %vm4095_vm9, %v4134_v63  ;;  %v4404_v63 = vld [vmem:[%s7831_s29 + $0x1f0] sm:$0xff]  ;;  %4441 = vmatpush.msra.mxu1 %v4372_v5  ;;  %v4342_v5 = vld [vmem:[%s7831_s29] sm:$0xff] }
0x14af   :  { %4116 = vst.msk [vmem:[#allocation3 + $0x2] sm:$0x1] %vm4095_vm9, %v4114_v7  ;;  %4481 = vmatpush.msrb.mxu3 %v4404_v63  ;;  %v4387_v7 = vld [vmem:[%s7831_s29 + $0x168] sm:$0xff]  ;;  %v4390_v63 = vld [vmem:[%s7831_s29 + $0x180] sm:$0xff] }
0x14b0   :  { %4462 = vmatpush.msrb.mxu2 %v4387_v7  ;;  %v4238_v7 = vld [vmem:[%s7832_s3] sm:$0xf] }
0x14b4   :  { %v4154_v37 = vpop.permute.xlu1 %4153 }
0x14b5   :  { %v4142_v30 = vpop.permute.xlu0 %4141 }
0x14b6   :  { %4144 = vst.msk [vmem:[#allocation3 + $0x6] sm:$0x1] %vm4081_vm7, %v4142_v30  ;;  %v4355_v30 = vld [vmem:[%s7831_s29 + $0x68] sm:$0xff] }
0x14b7   :  { %4422 = vmatpush.msra.mxu0 %v4355_v30 }
0x14bd   :  { %v4148_v52 = vpop.permute.xlu0 %4147 }
0x14be   :  { %4150 = vst.msk [vmem:[#allocation3 + $0x6] sm:$0x1] %vm4088_vm8, %v4148_v52  ;;  %v4371_v52 = vld [vmem:[%s7831_s29 + $0xe8] sm:$0xff] }
0x14bf   :  { %4156 = vst.msk [vmem:[#allocation3 + $0x6] sm:$0x1] %vm4095_vm9, %v4154_v37  ;;  %v4403_v37 = vld [vmem:[%s7831_s29 + $0x1e8] sm:$0xff]  ;;  %4442 = vmatpush.msra.mxu1 %v4371_v52  ;;  %v4239_v52 = vld [vmem:[%s7833_s8] sm:$0xf] }
0x14c0   :  { %4482 = vmatpush.msrb.mxu3 %v4403_v37 }
0x14cb   :  { %v4168_v35 = vpop.permute.xlu2 %4167 }
0x14d3   :  { %v4202_v54 = vpop.permute.xlu2 %4201 }
0x14d4   :  { %4204 = vst.msk [vmem:[#allocation3 + $0x5] sm:$0x1] %vm4081_vm7, %v4202_v54  ;;  %v4354_v54 = vld [vmem:[%s7831_s29 + $0x60] sm:$0xff] }
0x14d5   :  { %4423 = vmatpush.msra.mxu0 %v4354_v54  ;;  %v4317_v54 = vperm.slane %v4238_v7, 2 }
0x14db   :  { %v4228_v26 = vpop.permute.xlu2 %4227 }
0x14e3   :  { %v4162_v19 = vpop.permute.xlu1 %4161  ;;  %v4194_v59 = vpop.permute.xlu2 %4193 }
0x14e4   :  { %4164 = vst.msk [vmem:[#allocation3 + $0x1] sm:$0x1] %vm4081_vm7, %v4162_v19  ;;  %v4182_v24 = vpop.permute.xlu0 %4181  ;;  %v4402_v19 = vld [vmem:[%s7831_s29 + $0x1e0] sm:$0xff] }
0x14e5   :  { %4170 = vst.msk [vmem:[#allocation3 + $0x1] sm:$0x1] %vm4088_vm8, %v4168_v35  ;;  %v4386_v35 = vld [vmem:[%s7831_s29 + $0x160] sm:$0xff]  ;;  %4483 = vmatpush.msrb.mxu3 %v4402_v19 }
0x14e6   :  { %4184 = vst.msk [vmem:[#allocation3 + $0x3] sm:$0x1] %vm4081_vm7, %v4182_v24  ;;  %4463 = vmatpush.msrb.mxu2 %v4386_v35  ;;  %v4385_v24 = vld [vmem:[%s7831_s29 + $0x158] sm:$0xff]  ;;  %v4316_v35 = vperm.slane %v4238_v7, 1 }
0x14e8   :  { %4464 = vmatpush.msrb.mxu2 %v4385_v24  ;;  %v4331_v24 = vperm.slane %v4239_v52, 1 }
0x14eb   :  { %v4188_v60 = vpop.permute.xlu1 %4187 }
0x14ec   :  { %4190 = vst.msk [vmem:[#allocation3 + $0x3] sm:$0x1] %vm4088_vm8, %v4188_v60  ;;  %v4174_v34 = vpop.permute.xlu0 %4173  ;;  %v4353_v60 = vld [vmem:[%s7831_s29 + $0x58] sm:$0xff] }
0x14ed   :  { %4196 = vst.msk [vmem:[#allocation3 + $0x3] sm:$0x1] %vm4095_vm9, %v4194_v59  ;;  %v4369_v59 = vld [vmem:[%s7831_s29 + $0xd8] sm:$0xff]  ;;  %4424 = vmatpush.msra.mxu0 %v4353_v60  ;;  %v4332_v60 = vperm.slane %v4239_v52, 2 }
0x14ee   :  { %4176 = vst.msk [vmem:[#allocation3 + $0x1] sm:$0x1] %vm4095_vm9, %v4174_v34  ;;  %v4401_v34 = vld [vmem:[%s7831_s29 + $0x1d8] sm:$0xff] }
0x14ef   :  { %4484 = vmatpush.msrb.mxu3 %v4401_v34 }
0x14f3   :  { %v4222_v6 = vpop.permute.xlu1 %4221 }
0x14f4   :  { %4224 = vst.msk [vmem:[#allocation3 + $0x7] sm:$0x1] %vm4081_vm7, %v4222_v6  ;;  %v4208_v0 = vpop.permute.xlu0 %4207  ;;  %v4384_v6 = vld [vmem:[%s7831_s29 + $0x150] sm:$0xff]  ;;  %vm4571_vm7 = vcmask 254976  }
0x14f5   :  { %4230 = vst.msk [vmem:[#allocation3 + $0x7] sm:$0x1] %vm4088_vm8, %v4228_v26  ;;  %v4370_v26 = vld [vmem:[%s7831_s29 + $0xe0] sm:$0xff]  ;;  %4465 = vmatpush.msrb.mxu2 %v4384_v6  ;;  %v4315_v6 = vperm.slane %v4238_v7, 0 }
0x14f6   :  { %4210 = vst.msk [vmem:[#allocation3 + $0x5] sm:$0x1] %vm4088_vm8, %v4208_v0  ;;  %4443 = vmatpush.msra.mxu1 %v4370_v26  ;;  %v4352_v0 = vld [vmem:[%s7831_s29 + $0x50] sm:$0xff]  ;;  %v4318_v26 = vperm.slane %v4238_v7, 3 }
0x14f7   :  { %4425 = vmatpush.msra.mxu0 %v4352_v0  ;;  %v4319_v0 = vrot.slane %v4316_v35, 6 }
0x14f8   :  { %4444 = vmatpush.msra.mxu1 %v4369_v59  ;;  %v4333_v59 = vperm.slane %v4239_v52, 3 }
0x14fb   :  { %v4214_v15 = vpop.permute.xlu1 %4213 }
0x14fc   :  { %4216 = vst.msk [vmem:[#allocation3 + $0x5] sm:$0x1] %vm4095_vm9, %v4214_v15  ;;  %v4234_v36 = vpop.permute.xlu0 %4233  ;;  %v4368_v15 = vld [vmem:[%s7831_s29 + $0xd0] sm:$0xff] }
0x14fd   :  { %4236 = vst.msk [vmem:[#allocation3 + $0x7] sm:$0x1] %vm4095_vm9, %v4234_v36  ;;  %v4400_v36 = vld [vmem:[%s7831_s29 + $0x1d0] sm:$0xff]  ;;  %4445 = vmatpush.msra.mxu1 %v4368_v15  ;;  %v4320_v15 = vrot.slane %v4317_v54, 4 }
0x14fe   :  { %4485 = vmatpush.msrb.mxu3 %v4400_v36  ;;  %v4321_v36 = vrot.slane %v4318_v26, 2 }
0x1504   :  { %v4237_v46 = vld [vmem:[#allocation3] sm:$0xff] }
0x1505   :  { %4241 = vst [vmem:[#allocation1] ss:$4 sm:$0xff] %v4237_v46 }
0x150c   :  { %v4242_v41 = vld.sshfl [vmem:[#allocation1] sm:$0xff pattern:$0x73625140]  ;;  %v4243_v13 = vld.sshfl [vmem:[#allocation1 + $0x8] sm:$0xff pattern:$0x73625140] }
0x150d   :  { %v4244_v12 = vld.sshfl [vmem:[#allocation1 + $0x10] sm:$0xff pattern:$0x73625140]  ;;  %v4251_v55 = vsel %vm4250_vm10, %v4242_v41, 0.0  ;;  %v4252_v33 = vsel %vm4250_vm10, %v4243_v13, 0.0  ;;  %v4351_v41 = vld [vmem:[%s7831_s29 + $0x48] sm:$0xff] }
0x150e   :  { %v4245_v39 = vld.sshfl [vmem:[#allocation1 + $0x18] sm:$0xff pattern:$0x73625140]  ;;  %v4253_v22 = vadd.f32 %v4252_v33, %v4251_v55  ;;  %v4254_v21 = vsel %vm4250_vm10, %v4244_v12, 0.0  ;;  %v4367_v13 = vld [vmem:[%s7831_s29 + $0xc8] sm:$0xff]  ;;  %4426 = vmatpush.msra.mxu0 %v4351_v41  ;;  %v4382_v55 = vld [vmem:[%s7831_s29 + $0x140] sm:$0xff] }
0x150f   :  { %v4256_v25 = vsel %vm4250_vm10, %v4245_v39, 0.0  ;;  %v4399_v12 = vld [vmem:[%s7831_s29 + $0x1c8] sm:$0xff]  ;;  %4446 = vmatpush.msra.mxu1 %v4367_v13  ;;  %v4350_v33 = vld [vmem:[%s7831_s29 + $0x40] sm:$0xff]  ;;  %v4330_v41 = vperm.slane %v4239_v52, 0  ;;  %v4334_v13 = vrot.slane %v4331_v24, 6 }
0x1510   :  { %v4255_v3 = vadd.f32 %v4254_v21, %v4253_v22  ;;  %4486 = vmatpush.msrb.mxu3 %v4399_v12  ;;  %v4366_v39 = vld [vmem:[%s7831_s29 + $0xc0] sm:$0xff]  ;;  %4427 = vmatpush.msra.mxu0 %v4350_v33  ;;  %v4381_v21 = vld [vmem:[%s7831_s29 + $0x138] sm:$0xff]  ;;  %v4335_v12 = vrot.slane %v4332_v60, 4 }
0x1511   :  { %v4398_v22 = vld [vmem:[%s7831_s29 + $0x1c0] sm:$0xff]  ;;  %4447 = vmatpush.msra.mxu1 %v4366_v39  ;;  %v4322_v39 = vsel %vm4250_vm10, %v4315_v6, %v4319_v0 }
0x1512   :  { %v4257_v28 = vadd.f32 %v4256_v25, %v4255_v3  ;;  %4487 = vmatpush.msrb.mxu3 %v4398_v22  ;;  %v4349_v3 = vld [vmem:[%s7831_s29 + $0x38] sm:$0xff]  ;;  %v4324_v22 = vsel %vm4323_vm14, %v4320_v15, %v4321_v36  ;;  %v5127_v60 = vld [vmem:[%s7837_s7] ss:$0 sm:$0xff] }
0x1513   :  { %v4365_v25 = vld [vmem:[%s7831_s29 + $0xb8] sm:$0xff]  ;;  %4428 = vmatpush.msra.mxu0 %v4349_v3  ;;  %v4337_v3 = vsel %vm4250_vm10, %v4330_v41, %v4334_v13  ;;  %v5128_v0 = vld [vmem:[%s7838_s11] ss:$0 sm:$0xff] }
0x1514   :  { %4258 = vadd.xlane.f32.xlu2 %v4257_v28  ;;  %v4397_v28 = vld [vmem:[%s7831_s29 + $0x1b8] sm:$0xff]  ;;  %4448 = vmatpush.msra.mxu1 %v4365_v25 }
0x1515   :  { %4488 = vmatpush.msrb.mxu3 %v4397_v28  ;;  %4429 = vmatpush.msra.mxu0 %v4348_v4 }
0x1516   :  { %4449 = vmatpush.msra.mxu1 %v4364_v8 }
0x1517   :  { %4489 = vmatpush.msrb.mxu3 %v4396_v56  ;;  %4430 = vmatpush.msra.mxu0 %v4347_v44 }
0x1518   :  { %4450 = vmatpush.msra.mxu1 %v4363_v45 }
0x1587   :  { %v4259_v10 = vpop.xlane.xlu2 %4258 }
0x1588   :  { %v4267_v9 = vmul.f32 %v7576_v49, %v4259_v10  ;;  %v4395_v10 = vld [vmem:[%s7831_s29 + $0x1a8] sm:$0xff] }
0x1589   :  { %4490 = vmatpush.msrb.mxu3 %v4395_v10 }
0x158a   :  { %v4272_v14 = vperm.slane %v4267_v9, %v4271_v51  ;;  %v4378_v9 = vld [vmem:[%s7831_s29 + $0x120] sm:$0xff] }
0x158c   :  { %v7582_v18 = vsub.f32 %v4237_v46, %v4272_v14  ;;  %v4383_v46 = vld [vmem:[%s7831_s29 + $0x148] sm:$0xff]  ;;  %v4346_v14 = vld [vmem:[%s7831_s29 + $0x20] sm:$0xff] }
0x158d   :  { %4466 = vmatpush.msrb.mxu2 %v4383_v46  ;;  %4431 = vmatpush.msra.mxu0 %v4346_v14  ;;  %v5125_v14 = vld [vmem:[%s7834_s12] ss:$0 sm:$0xff] }
0x158e   :  { %v4275_v61 = vmul.f32 %v7582_v18, %v7582_v18 }
0x158f   :  { %4467 = vmatpush.msrb.mxu2 %v4382_v55  ;;  %v4336_v55 = vrot.slane %v4333_v59, 2 }
0x1590   :  { %4277 = vst [vmem:[#allocation1] ss:$4 sm:$0xff] %v4275_v61  ;;  %v4362_v61 = vld [vmem:[%s7831_s29 + $0xa0] sm:$0xff] }
0x1591   :  { %4468 = vmatpush.msrb.mxu2 %v4381_v21  ;;  %4451 = vmatpush.msra.mxu1 %v4362_v61  ;;  %v4338_v25 = vsel %vm4323_vm14, %v4335_v12, %v4336_v55 }
0x1592   :  { %v4339_v8 = vsel %vm4325_vm2, %v4337_v3, %v4338_v25  ;;  %v4607_v3 = vld [vmem:[%s7839_s13] sm:$0xff] }
0x1593   :  { %4469 = vmatpush.msrb.mxu2 %v4380_v53  ;;  %v4326_v53 = vsel %vm4325_vm2, %v4322_v39, %v4324_v22  ;;  %v4610_v39 = vld [vmem:[%s7839_s13 + $0x18] sm:$0xff]  ;;  %v4609_v22 = vld [vmem:[%s7839_s13 + $0x10] sm:$0xff]  ;;  %v4603_v25 = vld [vmem:[%s7840_s14] sm:$0x3] }
0x1595   :  { %4470 = vmatpush.msrb.mxu2 %v4379_v2 }
0x1597   :  { %v4278_v57 = vld.sshfl [vmem:[#allocation1] sm:$0xff pattern:$0x73625140]  ;;  %v4279_v38 = vld.sshfl [vmem:[#allocation1 + $0x8] sm:$0xff pattern:$0x73625140]  ;;  %4471 = vmatpush.msrb.mxu2 %v4378_v9 }
0x1598   :  { %v4280_v11 = vld.sshfl [vmem:[#allocation1 + $0x10] sm:$0xff pattern:$0x73625140]  ;;  %v4286_v48 = vsel %vm4250_vm10, %v4278_v57, 0.0  ;;  %v4287_v50 = vsel %vm4250_vm10, %v4279_v38, 0.0  ;;  %v4394_v57 = vld [vmem:[%s7831_s29 + $0x1a0] sm:$0xff] }
0x1599   :  { %v4281_v31 = vld.sshfl [vmem:[#allocation1 + $0x18] sm:$0xff pattern:$0x73625140]  ;;  %v4288_v58 = vadd.f32 %v4287_v50, %v4286_v48  ;;  %v4289_v27 = vsel %vm4250_vm10, %v4280_v11, 0.0  ;;  %4491 = vmatpush.msrb.mxu3 %v4394_v57 }
0x159a   :  { %v4291_v23 = vsel %vm4250_vm10, %v4281_v31, 0.0  ;;  %v4377_v38 = vld [vmem:[%s7831_s29 + $0x118] sm:$0xff] }
0x159b   :  { %v4290_v32 = vadd.f32 %v4289_v27, %v4288_v58  ;;  %v4345_v11 = vld [vmem:[%s7831_s29 + $0x18] sm:$0xff]  ;;  %4472 = vmatpush.msrb.mxu2 %v4377_v38  ;;  %v4376_v58 = vld [vmem:[%s7831_s29 + $0x110] sm:$0xff] }
0x159c   :  { %v4361_v48 = vld [vmem:[%s7831_s29 + $0x98] sm:$0xff]  ;;  %4432 = vmatpush.msra.mxu0 %v4345_v11  ;;  %v4344_v27 = vld [vmem:[%s7831_s29 + $0x10] sm:$0xff] }
0x159d   :  { %v4292_v20 = vadd.f32 %v4291_v23, %v4290_v32  ;;  %v4393_v31 = vld [vmem:[%s7831_s29 + $0x198] sm:$0xff]  ;;  %4452 = vmatpush.msra.mxu1 %v4361_v48  ;;  %v4360_v23 = vld [vmem:[%s7831_s29 + $0x90] sm:$0xff]  ;;  %4473 = vmatpush.msrb.mxu2 %v4376_v58 }
0x159e   :  { %4492 = vmatpush.msrb.mxu3 %v4393_v31  ;;  %4433 = vmatpush.msra.mxu0 %v4344_v27 }
0x159f   :  { %4293 = vadd.xlane.f32.xlu1 %v4292_v20  ;;  %v4392_v20 = vld [vmem:[%s7831_s29 + $0x190] sm:$0xff]  ;;  %4453 = vmatpush.msra.mxu1 %v4360_v23 }
0x15a0   :  { %4493 = vmatpush.msrb.mxu3 %v4392_v20  ;;  %4474 = vmatpush.msrb.mxu2 %v4375_v17  ;;  %v4541_v20 = vld [vmem:[%s7835_s2 + $0x38] sm:$0xff]  ;;  %v4540_v17 = vld [vmem:[%s7835_s2 + $0x30] sm:$0xff] }
0x15a1   :  { %4434 = vmatpush.msra.mxu0 %v4343_v62  ;;  %4454 = vmatpush.msra.mxu1 %v4359_v43  ;;  %v4539_v62 = vld [vmem:[%s7835_s2 + $0x28] sm:$0xff]  ;;  %v4538_v43 = vld [vmem:[%s7835_s2 + $0x20] sm:$0xff] }
0x15a2   :  { %4494 = vmatpush.msrb.mxu3 %v4391_v29  ;;  %4475 = vmatpush.msrb.mxu2 %v4374_v16  ;;  %v4537_v29 = vld [vmem:[%s7835_s2 + $0x18] sm:$0xff]  ;;  %v4535_v16 = vld [vmem:[%s7835_s2 + $0x8] sm:$0xff] }
0x15a3   :  { %4435 = vmatpush.msra.mxu0 %v4342_v5  ;;  %v4534_v5 = vld [vmem:[%s7835_s2] sm:$0xff] }
0x15a4   :  { %4495 = vmatpush.msrb.mxu3 %v4390_v63 }
0x15a5   :  { %4557 = vmatpush.msrb.mxu0 %v4541_v20 }
0x15a7   :  { %4558 = vmatpush.msrb.mxu0 %v4540_v17 }
0x15a9   :  { %4559 = vmatpush.msrb.mxu0 %v4539_v62 }
0x15ab   :  { %4560 = vmatpush.msrb.mxu0 %v4538_v43 }
0x15ad   :  { %4561 = vmatpush.msrb.mxu0 %v4537_v29 }
0x1612   :  { %v4294_v50 = vpop.xlane.xlu1 %4293 }
0x1613   :  { %v4295_v32 = vmul.f32 %v4294_v50, %v7576_v49  ;;  %v4358_v49 = vld [vmem:[%s7831_s29 + $0x80] sm:$0xff] }
0x1614   :  { %4455 = vmatpush.msra.mxu1 %v4358_v49 }
0x1615   :  { %v4296_v40 = vadd.f32 1e-05, %v4295_v32 }
0x1616   :  { %4630 = vmatpush.msrb.mxu1 %v4610_v39 }
0x1617   :  { %5333 = vrsqrt.f32 %v4296_v40  ;;  %vm4303_vm1 = vweird.f32 %v4296_v40 }
0x1618   :  { %4631 = vmatpush.msrb.mxu1 %v4609_v22  ;;  %v5132_v22 = vld [vmem:[#allocation7] ss:$0 sm:$0xff] }
0x161d   :  { %v5334_v30 = vpop.eup %5333 }
0x161e   :  { %v4298_v37 = vmul.f32 %v5334_v30, %v4296_v40  ;;  %vm4304_vm15 = vweird.f32 %v5334_v30  ;;  %v4536_v40 = vld [vmem:[%s7835_s2 + $0x10] sm:$0xff] }
0x161f   :  { %vm4305_vm12 = vmor %vm4303_vm1, %vm4304_vm15  ;;  %4562 = vmatpush.msrb.mxu0 %v4536_v40  ;;  %vm4732_vm15 = vcmask 33792  }
0x1620   :  { %v4299_v19 = vmul.f32 %v5334_v30, %v4298_v37 }
0x1621   :  { %4563 = vmatpush.msrb.mxu0 %v4535_v16 }
0x1622   :  { %v4300_v34 = vmul.f32 0.5, %v4299_v19  ;;  %v5126_v19 = vld [vmem:[%s7836_s10] ss:$0 sm:$0xff] }
0x1623   :  { %4564 = vmatpush.msrb.mxu0 %v4534_v5 }
0x1624   :  { %v4301_v46 = vsub.f32 1.5, %v4300_v34 }
0x1626   :  { %v4302_v33 = vmul.f32 %v5334_v30, %v4301_v46 }
0x1628   :  { %v4306_v21 = vsel %vm4305_vm12, %v5334_v30, %v4302_v33 }
0x1629   :  { %v4311_v28 = vperm.slane %v4306_v21, %v4271_v51  ;;  %v4608_v21 = vld [vmem:[%s7839_s13 + $0x8] sm:$0xff] }
0x162a   :  { %4632 = vmatpush.msrb.mxu1 %v4608_v21 }
0x162b   :  { %v4313_v4 = vmul.f32 %v4311_v28, %v7582_v18  ;;  %v4604_v28 = vld [vmem:[%s7841_s19] sm:$0x3] }
0x162c   :  { %4633 = vmatpush.msrb.mxu1 %v4607_v3  ;;  %v5133_v3 = vld [vmem:[#allocation9] ss:$0 sm:$0xff] }
0x162d   :  { %v4328_v56 = vmul.f32 %v4326_v53, %v4313_v4  ;;  %v5543_v4 = vmov 1  }
0x162e   :  { %5100 = vset.pattern.permute.xlu1 %v5543_v4 }
0x162f   :  { %v4341_v2 = vadd.f32 %v4339_v8, %v4328_v56  ;;  %v5544_v8 = vmov 0  }
0x1630   :  { %5101 = vset.pattern.permute.xlu0 %v5544_v8  ;;  %5099 = vset.pattern.permute.xlu2 %v5544_v8 }
0x1631   :  { %4411 = vst [vmem:[#allocation1] ss:$4 sm:$0xff] %v4341_v2 }
0x1638   :  { %v4412_v44 = vld.sshfl [vmem:[#allocation1] sm:$0xff pattern:$0x73625140]  ;;  %v4413_v45 = vld.sshfl [vmem:[#allocation1 + $0x8] sm:$0xff pattern:$0x73625140] }
0x1639   :  { %4436 = vmatmul.f32.vlgmr.msra.gmra.mxu0 %v4412_v44  ;;  %4456 = vmatmul.f32.vlgmr.msra.gmra.mxu1 %v4413_v45  ;;  %v4414_v10 = vld.sshfl [vmem:[#allocation1 + $0x10] sm:$0xff pattern:$0x73625140]  ;;  %v4415_v9 = vld.sshfl [vmem:[#allocation1 + $0x18] sm:$0xff pattern:$0x73625140] }
0x163a   :  { %4476 = vmatmul.f32.vlgmr.msrb.gmra.mxu2 %v4414_v10  ;;  %4496 = vmatmul.f32.vlgmr.msrb.gmra.mxu3 %v4415_v9 }
0x16b6   :  { %v4437_v61 = vpop.f32.mrf.mxu0  ;;  %v4457_v51 = vpop.f32.mrf.mxu1 }
0x16b7   :  { %v4438_v1 = vadd.f32 %v5125_v14, %v4437_v61 }
0x16b9   :  { %v4458_v57 = vadd.f32 %v4457_v51, %v4438_v1  ;;  %v5129_v1 = vld [vmem:[%s7842_s24] ss:$0 sm:$0xff] }
0x16bd   :  { %v4477_v18 = vpop.f32.mrf.mxu2  ;;  %v4497_v11 = vpop.f32.mrf.mxu3 }
0x16be   :  { %v4478_v38 = vadd.f32 %v4477_v18, %v4458_v57  ;;  %v5130_v57 = vld [vmem:[%s7843_s30] ss:$0 sm:$0xff] }
0x16c0   :  { %v4498_v48 = vadd.f32 %v4497_v11, %v4478_v38 }
0x16c2   :  { %v4503_v50 = vsel %vm4502_vm13, %v4498_v48, 0.0 }
0x16c3   :  { %4504 = vadd.xlane.f32.xlu0 %v4503_v50 }
0x1736   :  { %v4505_v31 = vpop.xlane.xlu0 %4504 }
0x1737   :  { %v4506_v58 = vmul.f32 %v4505_v31, %v6940_v47  ;;  %v4605_v31 = vld [vmem:[%s7844_s20] sm:$0x3] }
0x1739   :  { %v4507_v27 = vsub.f32 %v4498_v48, %v4506_v58  ;;  %v4606_v58 = vld [vmem:[%s7845_s16] sm:$0x3] }
0x173a   :  { %v4658_v17 = vperm.slane %v4606_v58, 0  ;;  %v4665_v5 = vperm.slane %v4606_v58, 1 }
0x173b   :  { %v4508_v32 = vmul.f32 %v4507_v27, %v4507_v27 }
0x173d   :  { %v4509_v23 = vsel %vm4502_vm13, %v4508_v32, 0.0  ;;  %v5131_v32 = vld [vmem:[#allocation4] ss:$0 sm:$0xff] }
0x173e   :  { %4510 = vadd.xlane.f32.xlu2 %v4509_v23  ;;  %v4650_v23 = vperm.slane %v4605_v31, 1 }
0x1756   :  { %4640 = vperm.xlu2 %5099, %v4603_v25  }
0x175e   :  { %5102 = vset.pattern.permute.xlu2 %v5543_v4 }
0x175f   :  { %4662 = vperm.xlu2 %5102, %v4604_v28  }
0x17b1   :  { %v4511_v49 = vpop.xlane.xlu2 %4510 }
0x17b2   :  { %v4512_v63 = vmul.f32 %v4511_v49, %v6940_v47 }
0x17b4   :  { %v4513_v7 = vadd.f32 1e-05, %v4512_v63 }
0x17b6   :  { %5335 = vrsqrt.f32 %v4513_v7  ;;  %vm4520_vm5 = vweird.f32 %v4513_v7 }
0x17b9   :  { %v4641_v50 = vpop.permute.xlu2 %4640 }
0x17bc   :  { %v5336_v30 = vpop.eup %5335 }
0x17bd   :  { %v4515_v52 = vmul.f32 %v5336_v30, %v4513_v7  ;;  %vm4521_vm3 = vweird.f32 %v5336_v30 }
0x17be   :  { %vm4522_vm6 = vmor %vm4520_vm5, %vm4521_vm3 }
0x17bf   :  { %v4516_v37 = vmul.f32 %v5336_v30, %v4515_v52 }
0x17c1   :  { %v4517_v35 = vmul.f32 0.5, %v4516_v37  ;;  %v4663_v49 = vpop.permute.xlu2 %4662 }
0x17c2   :  { %v4666_v52 = vmul.f32 %v4665_v5, %v4663_v49 }
0x17c3   :  { %v4518_v54 = vsub.f32 1.5, %v4517_v35 }
0x17c5   :  { %v4519_v26 = vmul.f32 %v5336_v30, %v4518_v54 }
0x17c7   :  { %v4523_v24 = vsel %vm4522_vm6, %v5336_v30, %v4519_v26 }
0x17c8   :  { %v4524_v59 = vmul.f32 %v4523_v24, %v4507_v27  ;;  %v4643_v27 = vperm.slane %v4605_v31, 0 }
0x17ca   :  { %v4528_v34 = vmul.f32 %v5126_v19, %v4524_v59  ;;  %v4644_v29 = vmul.f32 %v4643_v27, %v4641_v50 }
0x17cc   :  { %v4532_v6 = vadd.f32 %v5127_v60, %v4528_v34  ;;  %v4704_v34 = vld [vmem:[%s5792_s27 + $0x18] sm:$0xff] }
0x17cd   :  { %4724 = vmatpush.msra.mxu2 %v4704_v34 }
0x17ce   :  { %v4533_v47 = vmax.f32 %v4532_v6, 0.0  ;;  %v4703_v6 = vld [vmem:[%s5792_s27 + $0x10] sm:$0xff] }
0x17cf   :  { %4725 = vmatpush.msra.mxu2 %v4703_v6 }
0x17d0   :  { %4923 = vmatmul.msk.f32.vlgmr.msrb.gmra.mxu0 %vm2379_vm4, %v4533_v47  ;;  %v4702_v47 = vld [vmem:[%s5792_s27 + $0x8] sm:$0xff] }
0x17d1   :  { %4726 = vmatpush.msra.mxu2 %v4702_v47 }
0x184d   :  { %v4566_v15 = vpop.f32.mrf.mxu0 }
0x184e   :  { %v4567_v36 = vadd.f32 %v5128_v0, %v4566_v15  ;;  %v4701_v0 = vld [vmem:[%s5792_s27] sm:$0xff]  ;;  %s5545_s27 = smov [#allocation12]  }
0x184f   :  { %4727 = vmatpush.msra.mxu2 %v4701_v0  ;;  %s4739_s15 = sshll.u32 %s5545_s27, 4  ;;  %s4740_s15 = int_to_ptr.vmem [resolvable:$true] %s4739_s15 }
0x1850   :  { %v4572_v46 = vsel %vm4571_vm7, %v4567_v36, 0.0 }
0x1851   :  { %4573 = vadd.xlane.f32.xlu1 %v4572_v46 }
0x186a   :  { %4647 = vperm.xlu1 %5100, %v4603_v25  }
0x18c4   :  { %v4574_v41 = vpop.xlane.xlu1 %4573 }
0x18c5   :  { %v4575_v13 = vmul.f32 %v4574_v41, %v6530_v42 }
0x18c7   :  { %v4576_v12 = vsub.f32 %v4567_v36, %v4575_v13 }
0x18c9   :  { %v4577_v55 = vmul.f32 %v4576_v12, %v4576_v12 }
0x18cb   :  { %v4578_v33 = vsel %vm4571_vm7, %v4577_v55, 0.0 }
0x18cc   :  { %4579 = vadd.xlane.f32.xlu0 %v4578_v33 }
0x18dc   :  { %v4648_v20 = vpop.permute.xlu1 %4647 }
0x18dd   :  { %v4651_v16 = vmul.f32 %v4650_v23, %v4648_v20 }
0x18e0   :  { %4655 = vperm.xlu0 %5101, %v4604_v28  }
0x18e8   :  { %5103 = vset.pattern.permute.xlu0 %v5543_v4 }
0x193f   :  { %v4580_v53 = vpop.xlane.xlu0 %4579 }
0x1940   :  { %v4581_v56 = vmul.f32 %v4580_v53, %v6530_v42 }
0x1942   :  { %v4582_v2 = vadd.f32 1e-05, %v4581_v56 }
0x1944   :  { %5337 = vrsqrt.f32 %v4582_v2  ;;  %vm4589_vm8 = vweird.f32 %v4582_v2 }
0x194a   :  { %v5338_v44 = vpop.eup %5337 }
0x194b   :  { %v4584_v45 = vmul.f32 %v5338_v44, %v4582_v2  ;;  %vm4590_vm4 = vweird.f32 %v5338_v44 }
0x194c   :  { %vm4591_vm9 = vmor %vm4589_vm8, %vm4590_vm4 }
0x194d   :  { %v4585_v10 = vmul.f32 %v5338_v44, %v4584_v45 }
0x194f   :  { %v4586_v9 = vmul.f32 0.5, %v4585_v10 }
0x1951   :  { %v4587_v14 = vsub.f32 1.5, %v4586_v9 }
0x1952   :  { %v4656_v43 = vpop.permute.xlu0 %4655 }
0x1953   :  { %v4588_v61 = vmul.f32 %v5338_v44, %v4587_v14  ;;  %v4659_v7 = vmul.f32 %v4658_v17, %v4656_v43 }
0x1955   :  { %v4592_v51 = vsel %vm4591_vm9, %v5338_v44, %v4588_v61 }
0x1956   :  { %v4593_v18 = vmul.f32 %v4592_v51, %v4576_v12 }
0x1958   :  { %v4597_v38 = vmul.f32 %v5129_v1, %v4593_v18 }
0x195a   :  { %v4601_v11 = vadd.f32 %v5130_v57, %v4597_v38 }
0x195c   :  { %v4602_v48 = vmax.f32 %v4601_v11, 0.0 }
0x195e   :  { %4924 = vmatmul.msk.f32.vlgmr.msrb.gmra.mxu1 %vm1221_vm0, %v4602_v48 }
0x19db   :  { %v4635_v62 = vpop.f32.mrf.mxu1 }
0x19dc   :  { %v4636_v40 = vadd.f32 %v5131_v32, %v4635_v62 }
0x19de   :  { %v4645_v63 = vadd.f32 %v4644_v29, %v4636_v40 }
0x19e0   :  { %v4652_v30 = vadd.f32 %v4651_v16, %v4645_v63 }
0x19e2   :  { %v4660_v37 = vadd.f32 %v4659_v7, %v4652_v30 }
0x19e4   :  { %v4667_v35 = vadd.f32 %v4666_v52, %v4660_v37 }
0x19e6   :  { %v4670_v54 = vsel %vm4571_vm7, %v4667_v35, 0.0 }
0x19e7   :  { %4671 = vadd.xlane.f32.xlu1 %v4670_v54 }
0x1a5a   :  { %v4672_v26 = vpop.xlane.xlu1 %4671 }
0x1a5b   :  { %v4673_v19 = vmul.f32 %v4672_v26, %v6530_v42 }
0x1a5d   :  { %v4674_v24 = vsub.f32 %v4667_v35, %v4673_v19 }
0x1a5f   :  { %v4675_v60 = vmul.f32 %v4674_v24, %v4674_v24 }
0x1a61   :  { %v4676_v59 = vsel %vm4571_vm7, %v4675_v60, 0.0 }
0x1a62   :  { %4677 = vadd.xlane.f32.xlu2 %v4676_v59 }
0x1ad5   :  { %v4678_v15 = vpop.xlane.xlu2 %4677 }
0x1ad6   :  { %v4679_v36 = vmul.f32 %v4678_v15, %v6530_v42  ;;  %v5134_v42 = vld [vmem:[#allocation10] ss:$0 sm:$0xff] }
0x1ad8   :  { %v4680_v46 = vadd.f32 1e-05, %v4679_v36 }
0x1ada   :  { %5339 = vrsqrt.f32 %v4680_v46  ;;  %vm4687_vm11 = vweird.f32 %v4680_v46 }
0x1ae0   :  { %v5340_v41 = vpop.eup %5339 }
0x1ae1   :  { %v4682_v13 = vmul.f32 %v5340_v41, %v4680_v46  ;;  %vm4688_vm10 = vweird.f32 %v5340_v41 }
0x1ae2   :  { %vm4689_vm14 = vmor %vm4687_vm11, %vm4688_vm10 }
0x1ae3   :  { %v4683_v12 = vmul.f32 %v5340_v41, %v4682_v13 }
0x1ae5   :  { %v4684_v55 = vmul.f32 0.5, %v4683_v12 }
0x1ae7   :  { %v4685_v33 = vsub.f32 1.5, %v4684_v55 }
0x1ae9   :  { %v4686_v39 = vmul.f32 %v5340_v41, %v4685_v33 }
0x1aeb   :  { %v4690_v21 = vsel %vm4689_vm14, %v5340_v41, %v4686_v39 }
0x1aec   :  { %v4691_v25 = vmul.f32 %v4690_v21, %v4674_v24 }
0x1aee   :  { %v4695_v28 = vmul.f32 %v5132_v22, %v4691_v25 }
0x1af0   :  { %v4699_v53 = vadd.f32 %v5133_v3, %v4695_v28 }
0x1af2   :  { %v4700_v4 = vmax.f32 %v4699_v53, 0.0 }
0x1af4   :  { %4925 = vmatmul.msk.f32.vlgmr.msra.gmra.mxu2 %vm1221_vm0, %v4700_v4 }
0x1b77   :  { %v4729_v8 = vpop.f32.mrf.mxu2 }
0x1b78   :  { %v4730_v56 = vadd.f32 %v5134_v42, %v4729_v8 }
0x1b7a   :  { %4733 = vst.msk [vmem:[#allocation12] sm:$0x3] %vm4732_vm15, %v4730_v56 }
0x1b7b   :  { %5460 = shalt.err (!%p5457_p10)
}
0x1b7c   :  { %4744 = dma.vmem_to_hbm [thread:$0]  %s4740_s15, 32, %s4742_s18, [#allocation6]  }
0x1b7d   :  { %5467 = dma.done.wait [#allocation6], 32  }
0x1b7e   :  { %5468 = vsyncadd [#allocation6], 4294967264 }
0x1b7f   :  { %4749 = vsyncpa [#allocation5], 1 }
0x1b80   :  { %4750 = vsyncpa [#allocation8], 1 }
0x1b81   :  { %4751 = vsyncpa [#allocation11], 1 }
0x1b82   :  { %4752 = vsyncpa [#allocation6], 1 }

</bundles_post_ra>
